<compile_context>
chip_gen: v5e
topology: v5e:2x2
jax: 0.10.0
libtpu: 0.0.40
codegen_flags: <defaults>
</compile_context>

<pallas_src>
import functools

import jax
import jax.numpy as jnp
from jax.experimental import pallas as pl
from jax.experimental.pallas import tpu as pltpu

_VMEM_LIMIT = 32 * 1024 * 1024   # fits every generation (v7x physical = 64 MiB)
_CONV1_KPAD = 32                 # 5*5*1  = 25  -> 32  (aligned weight rows)
_CONV2_KPAD = 512                # 5*5*16 = 400 -> 512 (lane-aligned contraction)


# ---------------------------------------------------------------------------
# Kernel 1/2: conv (im2col matmul) + MetadataNorm + ReLU, fully fused
# ---------------------------------------------------------------------------
def _conv_mdn_relu_kernel(p_ref, w_ref, b_ref, mdn_ref, o_ref, *, n_batch):
    """o[n] = relu( sum_m mdn[n,m] * (p[m] @ w + b) )  for one hw tile.

    p_ref:   (N, hw_tile, K)     VMEM (f32 conv1 / bf16 conv2)
    w_ref:   (K, Cout)           VMEM (same dtype as p)
    b_ref:   (1, Cout)           VMEM f32
    mdn_ref: (N, N)              SMEM f32 -- MDN batch-mixing matrix (I - R)
    o_ref:   (N, hw_tile, Cout)  VMEM bf16
    """
    # Per-sample matmul, f32 accumulation; batch is tiny and static -> unroll.
    accs = [
        jnp.dot(p_ref[n], w_ref[...], preferred_element_type=jnp.float32)
        + b_ref[...]
        for n in range(n_batch)
    ]
    # MetadataNorm == left-multiply the batch dimension by the (N, N) mixing
    # matrix; scalars come from SMEM, slabs are whole leading-dim slices.
    for n in range(n_batch):
        y = mdn_ref[n, 0] * accs[0]
        for m in range(1, n_batch):
            y = y + mdn_ref[n, m] * accs[m]
        o_ref[n] = jnp.maximum(y, 0.0).astype(o_ref.dtype)


def conv_mdn_relu(patches, w, b, mdn_mat, *, hw_tile, out_dtype):
    """patches: (N, HW, K); w: (K, Cout); b: (Cout,); mdn_mat: (N, N)."""
    N, HW, K = patches.shape
    cout = w.shape[1]
    assert w.shape[0] == K
    # hw tiling must keep sublane alignment (bf16 packs 16 rows / vreg) and
    # every tile must contain all batch slabs for the fused MDN epilogue.
    assert HW % hw_tile == 0 and hw_tile % 16 == 0
    grid = (HW // hw_tile,)
    kern = functools.partial(_conv_mdn_relu_kernel, n_batch=N)
    return pl.pallas_call(
        kern,
        out_shape=jax.ShapeDtypeStruct((N, HW, cout), out_dtype),
        grid_spec=pltpu.PrefetchScalarGridSpec(
            num_scalar_prefetch=0,
            grid=grid,
            in_specs=[
                pl.BlockSpec((N, hw_tile, K), lambda i: (0, i, 0)),
                pl.BlockSpec((K, cout), lambda i: (0, 0)),
                pl.BlockSpec((1, cout), lambda i: (0, 0)),
                # Tiny (N, N) mixing matrix lives in SMEM -> cheap scalar reads.
                pl.BlockSpec(memory_space=pltpu.MemorySpace.SMEM),
            ],
            out_specs=pl.BlockSpec((N, hw_tile, cout), lambda i: (0, i, 0)),
        ),
        compiler_params=pltpu.CompilerParams(
            dimension_semantics=("parallel",),      # shardable on v7x megacore
            vmem_limit_bytes=_VMEM_LIMIT),
    )(patches, w, b.reshape(1, cout), mdn_mat)


# ---------------------------------------------------------------------------
# Kernel 3: fc1 + MetadataNorm3 + ReLU + fc2 + sigmoid (single step, no acc)
# ---------------------------------------------------------------------------
def _fc_head_kernel(x_ref, w1_ref, b1_ref, mdn_ref, w2_ref, b2_ref,
                    fc_ref, out_ref):
    # fc1: bf16 x bf16 -> f32 accumulate.
    h = jnp.dot(x_ref[...], w1_ref[...],
                preferred_element_type=jnp.float32) + b1_ref[...]
    # MetadataNorm3 as the (N, N) batch-mixing matmul.
    fc = jnp.dot(mdn_ref[...], h, preferred_element_type=jnp.float32)
    fc_ref[...] = fc.astype(fc_ref.dtype)
    # ReLU + fc2 + sigmoid.
    z = jnp.dot(jnp.maximum(fc, 0.0), w2_ref[...],
                preferred_element_type=jnp.float32) + b2_ref[...]
    out_ref[...] = (1.0 / (1.0 + jnp.exp(-z))).astype(out_ref.dtype)


def fc_mdn_head(x, w1, b1, mdn_mat, w2, b2):
    """x: (N, 18432) bf16 NHWC-flattened; w1: (18432, 84) bf16; w2: (84, 1)."""
    M, K = x.shape
    f1 = w1.shape[1]
    f2 = w2.shape[1]
    fc, out = pl.pallas_call(
        _fc_head_kernel,
        out_shape=(jax.ShapeDtypeStruct((M, f1), jnp.float32),
                   jax.ShapeDtypeStruct((M, f2), jnp.float32)),
        grid_spec=pltpu.PrefetchScalarGridSpec(
            num_scalar_prefetch=0,
            grid=(1,),
            in_specs=[
                pl.BlockSpec((M, K), lambda i: (0, 0)),
                pl.BlockSpec((K, f1), lambda i: (0, 0)),    # bf16 w1, 3.1 MB
                pl.BlockSpec((1, f1), lambda i: (0, 0)),
                pl.BlockSpec((M, M), lambda i: (0, 0)),     # mdn_mat (N, N)
                pl.BlockSpec((f1, f2), lambda i: (0, 0)),
                pl.BlockSpec((1, f2), lambda i: (0, 0)),
            ],
            out_specs=[
                pl.BlockSpec((M, f1), lambda i: (0, 0)),
                pl.BlockSpec((M, f2), lambda i: (0, 0)),
            ],
        ),
        compiler_params=pltpu.CompilerParams(
            dimension_semantics=("arbitrary",),
            vmem_limit_bytes=_VMEM_LIMIT),
    )(x, w1, b1.reshape(1, f1), mdn_mat, w2, b2.reshape(1, f2))
    return out, fc


# ---------------------------------------------------------------------------
# Plain-JAX glue: NHWC im2col (with K padding), weight layout prep, forward
# ---------------------------------------------------------------------------
def im2col_nhwc(x, kh, kw, k_pad):
    """x: (N, H, W, C) NHWC, valid conv, stride 1.
    Returns (patches, Ho, Wo); patches (N, Ho*Wo, k_pad) with column order
    (kh, kw, cin) -- matching transpose(w, (2,3,1,0)).reshape(kh*kw*C, Cout) --
    zero-padded to k_pad columns (weights get matching zero rows)."""
    N, H, W, C = x.shape
    Ho, Wo = H - kh + 1, W - kw + 1
    K = kh * kw * C
    slabs = [x[:, i:i + Ho, j:j + Wo, :] for i in range(kh) for j in range(kw)]
    p = jnp.concatenate(slabs, axis=-1)                 # (N, Ho, Wo, K)
    if k_pad > K:
        p = jnp.pad(p, ((0, 0), (0, 0), (0, 0), (0, k_pad - K)))
    return p.reshape(N, Ho * Wo, k_pad), Ho, Wo


def conv_params(key, cin, cout, k):
    fan_in = cin * k * k
    bound = 1.0 / float(fan_in) ** 0.5
    k1, k2 = jax.random.split(key)
    w = jax.random.uniform(k1, (cout, cin, k, k), jnp.float32, -bound, bound)
    b = jax.random.uniform(k2, (cout,), jnp.float32, -bound, bound)
    return w, b


def linear_params(key, fin, fout):
    bound = 1.0 / float(fin) ** 0.5
    k1, k2 = jax.random.split(key)
    w = jax.random.uniform(k1, (fout, fin), jnp.float32, -bound, bound)
    b = jax.random.uniform(k2, (fout,), jnp.float32, -bound, bound)
    return w, b


def prepare_params(p):
    """One-time layout/dtype prep (done at init, NOT per forward step):
    conv weights -> (K, Cout) matmul layout (kh, kw, cin) row order, zero-padded
    to the aligned K; conv2/fc1 weights cast to bf16; fc1 columns permuted from
    NCHW-flatten order to our NHWC-flatten order."""
    q = {}
    w1c = jnp.transpose(p["conv1_w"], (2, 3, 1, 0)).reshape(25, 16)
    q["conv1_w"] = jnp.pad(w1c, ((0, _CONV1_KPAD - 25), (0, 0)))    # (32, 16) f32
    q["conv1_b"] = p["conv1_b"]
    w2c = jnp.transpose(p["conv2_w"], (2, 3, 1, 0)).reshape(400, 32)
    q["conv2_w"] = jnp.pad(
        w2c, ((0, _CONV2_KPAD - 400), (0, 0))).astype(jnp.bfloat16)  # (512, 32)
    q["conv2_b"] = p["conv2_b"]
    w1 = p["fc1_w"].reshape(84, 32, 24, 24)                   # (out, c, h, w)
    w1 = jnp.transpose(w1, (0, 2, 3, 1)).reshape(84, 18432)   # (out, h*w*c)
    q["fc1_w"] = w1.T.astype(jnp.bfloat16)                    # (18432, 84) bf16
    q["fc1_b"] = p["fc1_b"]
    q["fc2_w"] = p["fc2_w"].T                                 # (84, 1) f32
    q["fc2_b"] = p["fc2_b"]
    return q


def mdn_conv_forward(x, params, cfs, kmat, *, dataset_size):
    """x: (N, 1, 32, 32) NCHW.  Returns (sigmoid(fc2(...)), fc)."""
    N = x.shape[0]
    assert kmat.shape == (cfs.shape[1], cfs.shape[1])

    # MetadataNorm (training path) folded to a batch-mixing matrix:
    #   y = x - cfs[:, 1:] @ (kernel @ cfs^T @ x * dataset_size/N)[1:]
    #     = (I - (dataset_size/N) * cfs @ kmat0 @ cfs^T) @ x,
    # kmat0 = kernel with row 0 zeroed.  NOTE: this relies on cfs column 0
    # being the intercept column (asserted on the concrete data in __main__).
    scale = jnp.float32(dataset_size) / jnp.float32(N)
    kmat0 = kmat.at[0, :].set(0.0)
    mdn_mat = (jnp.eye(N, dtype=jnp.float32)
               - scale * (cfs @ kmat0 @ cfs.T)).astype(jnp.float32)

    # NCHW -> NHWC is a pure reshape here (Cin == 1).
    x_nhwc = x.reshape(N, 32, 32, 1)

    # conv1 + MDN1 + ReLU : (N,32,32,1) -> (N, 784, 16) bf16, single block.
    p1, h1, w1o = im2col_nhwc(x_nhwc, 5, 5, k_pad=_CONV1_KPAD)
    a1 = conv_mdn_relu(p1, params["conv1_w"], params["conv1_b"], mdn_mat,
                       hw_tile=h1 * w1o, out_dtype=jnp.bfloat16)
    a1 = a1.reshape(N, h1, w1o, 16)                     # free row-major reshape

    # conv2 + MDN2 + ReLU : bf16 patches (N, 576, 512) -> (N, 576, 32) bf16,
    # 4-step hw-tiled "parallel" pipeline.
    p2, h2, w2o = im2col_nhwc(a1, 5, 5, k_pad=_CONV2_KPAD)
    a2 = conv_mdn_relu(p2, params["conv2_w"], params["conv2_b"], mdn_mat,
                       hw_tile=144, out_dtype=jnp.bfloat16)

    # fc1 + MDN3 + ReLU + fc2 + sigmoid (fused head); features stay NHWC-order
    # (fc1_w columns were permuted to match in prepare_params); the reshape is
    # a free row-major bitcast in HBM.
    feat = a2.reshape(N, 18432)                          # (N, 18432) bf16
    out, fc = fc_mdn_head(feat, params["fc1_w"], params["fc1_b"], mdn_mat,
                          params["fc2_w"], params["fc2_b"])
    return out, fc


# ---------------------------------------------------------------------------
# Pure-XLA reference (PyTorch NCHW path, f32 HIGHEST) for a correctness check
# ---------------------------------------------------------------------------
def reference_forward(x, p, cfs, kmat, dataset_size):
    N = x.shape[0]
    scale = dataset_size / N
    hi = jax.lax.Precision.HIGHEST

    def mdn(xf):
        beta = kmat @ (cfs.T @ xf) * scale
        return xf - cfs[:, 1:] @ beta[1:]

    y = jax.lax.conv_general_dilated(
        x, p["conv1_w"], (1, 1), "VALID",
        dimension_numbers=("NCHW", "OIHW", "NCHW"), precision=hi)
    y = y + p["conv1_b"].reshape(1, -1, 1, 1)
    y = jnp.maximum(mdn(y.reshape(N, -1)).reshape(y.shape), 0.0)
    y = jax.lax.conv_general_dilated(
        y, p["conv2_w"], (1, 1), "VALID",
        dimension_numbers=("NCHW", "OIHW", "NCHW"), precision=hi)
    y = y + p["conv2_b"].reshape(1, -1, 1, 1)
    y = jnp.maximum(mdn(y.reshape(N, -1)).reshape(y.shape), 0.0)
    y = y.reshape(N, -1)                                # NCHW flatten (18432)
    y = jnp.dot(y, p["fc1_w"].T, precision=hi) + p["fc1_b"]
    fc = mdn(y)
    out = jax.nn.sigmoid(
        jnp.dot(jnp.maximum(fc, 0.0), p["fc2_w"].T, precision=hi) + p["fc2_b"])
    return out, fc


if __name__ == "__main__":
    N = 2               # batch_size
    C = 3               # confounder columns (intercept + 2)
    dataset_size = 8

    key = jax.random.PRNGKey(0)
    keys = jax.random.split(key, 8)

    x = jax.random.normal(keys[0], (N, 1, 32, 32), jnp.float32)

    # Confounder design matrix over the "dataset"; first column = intercept.
    X_full = jnp.concatenate(
        [jnp.ones((dataset_size, 1), jnp.float32),
         jax.random.normal(keys[1], (dataset_size, C - 1), jnp.float32)],
        axis=1)
    kmat = jnp.linalg.inv(X_full.T @ X_full)   # precomputed MDN kernel (C, C)
    cfs = X_full[:N]                           # batch confounders (N, C)
    # The MDN folding (kmat row-0 zeroing) assumes cfs column 0 is the
    # intercept -- assert on the concrete data.
    assert bool(jnp.allclose(cfs[:, 0], 1.0))

    raw = {}
    raw["conv1_w"], raw["conv1_b"] = conv_params(keys[2], 1, 16, 5)
    raw["conv2_w"], raw["conv2_b"] = conv_params(keys[3], 16, 32, 5)
    raw["fc1_w"], raw["fc1_b"] = linear_params(keys[4], 18432, 84)
    raw["fc2_w"], raw["fc2_b"] = linear_params(keys[5], 84, 1)
    params = prepare_params(raw)               # one-time layout/dtype prep

    fwd = jax.jit(functools.partial(mdn_conv_forward,
                                    dataset_size=dataset_size))
    out, fc = fwd(x, params, cfs, kmat)
    jax.block_until_ready((out, fc))

    assert out.shape == (N, 1) and out.dtype == jnp.float32
    assert fc.shape == (N, 84) and fc.dtype == jnp.float32
    assert bool(jnp.all(jnp.isfinite(out))) and bool(jnp.all(jnp.isfinite(fc)))
    assert bool(jnp.all((out >= 0.0) & (out <= 1.0)))

    # Cross-check against an independent plain-XLA NCHW f32 implementation.
    # Tolerances account for bf16 operand quantization (~2^-9 relative) through
    # the K=400 / K=18432 contractions (f32 accumulation) and the O(1)-entry
    # MDN batch-mixing: observed/expected error is ~1-2% relative on fc.
    ref_out, ref_fc = reference_forward(x, raw, cfs, kmat, dataset_size)
    assert bool(jnp.allclose(fc, ref_fc, atol=2e-2, rtol=5e-2))
    assert bool(jnp.allclose(out, ref_out, atol=1e-2, rtol=5e-2))
    rel_err = jnp.linalg.norm(fc - ref_fc) / jnp.linalg.norm(ref_fc)
    assert bool(rel_err < 5e-2)

    print("KERNEL_OK")
</pallas_src>

<mosaic_0001>
module attributes {stable_mosaic.version = 11 : i64} {
  func.func @_conv_mdn_relu_kernel(%arg0: i32, %arg1: memref<2x784x32xf32, #tpu.memory_space<vmem>>, %arg2: memref<32x16xf32, #tpu.memory_space<vmem>>, %arg3: memref<1x16xf32, #tpu.memory_space<vmem>>, %arg4: memref<2x2xf32, #tpu.memory_space<smem>>, %arg5: memref<2x784x16xbf16, #tpu.memory_space<vmem>>) attributes {dimension_semantics = [#tpu.dimension_semantics<parallel>], iteration_bounds = array<i64: 1>, scalar_prefetch = 0 : i64, scratch_operands = 0 : i64, tpu.core_type = #tpu.core_type<tc>, window_params = [{transform_indices = @transform_0, window_bounds = array<i64: 2, 784, 32>}, {pipeline_mode = #tpu.pipeline_mode<synchronous>, transform_indices = @transform_1, window_bounds = array<i64: 32, 16>}, {pipeline_mode = #tpu.pipeline_mode<synchronous>, transform_indices = @transform_2, window_bounds = array<i64: 1, 16>}, {transform_indices = @transform_3, window_bounds = array<i64: 2, 2>}, {transform_indices = @transform_4, window_bounds = array<i64: 2, 784, 16>}]} {
    %c0 = arith.constant 0 : index
    %c0_0 = arith.constant 0 : index
    %c0_1 = arith.constant 0 : index
    %0 = vector.load %arg1[%c0, %c0_0, %c0_1] : memref<2x784x32xf32, #tpu.memory_space<vmem>>, vector<1x784x32xf32>
    %1 = vector.shape_cast %0 : vector<1x784x32xf32> to vector<784x32xf32>
    %c0_2 = arith.constant 0 : index
    %c0_3 = arith.constant 0 : index
    %2 = vector.load %arg2[%c0_2, %c0_3] : memref<32x16xf32, #tpu.memory_space<vmem>>, vector<32x16xf32>
    %cst = arith.constant dense<0.000000e+00> : vector<784x16xf32>
    %3 = tpu.matmul %1, %2, %cst {dimension_numbers = #tpu.dot_dimension_numbers<[1], [0], [0], [1], [0, 0, 1, 1], [], []>} : vector<784x32xf32>, vector<32x16xf32>, vector<784x16xf32> -> vector<784x16xf32>
    %c0_4 = arith.constant 0 : index
    %c0_5 = arith.constant 0 : index
    %4 = vector.load %arg3[%c0_4, %c0_5] : memref<1x16xf32, #tpu.memory_space<vmem>>, vector<1x16xf32>
    %5 = vector.broadcast %4 : vector<1x16xf32> to vector<784x16xf32>
    %6 = arith.addf %3, %5 : vector<784x16xf32>
    %c1 = arith.constant 1 : index
    %c0_6 = arith.constant 0 : index
    %c0_7 = arith.constant 0 : index
    %7 = vector.load %arg1[%c1, %c0_6, %c0_7] : memref<2x784x32xf32, #tpu.memory_space<vmem>>, vector<1x784x32xf32>
    %8 = vector.shape_cast %7 : vector<1x784x32xf32> to vector<784x32xf32>
    %c0_8 = arith.constant 0 : index
    %c0_9 = arith.constant 0 : index
    %9 = vector.load %arg2[%c0_8, %c0_9] : memref<32x16xf32, #tpu.memory_space<vmem>>, vector<32x16xf32>
    %cst_10 = arith.constant dense<0.000000e+00> : vector<784x16xf32>
    %10 = tpu.matmul %8, %9, %cst_10 {dimension_numbers = #tpu.dot_dimension_numbers<[1], [0], [0], [1], [0, 0, 1, 1], [], []>} : vector<784x32xf32>, vector<32x16xf32>, vector<784x16xf32> -> vector<784x16xf32>
    %c0_11 = arith.constant 0 : index
    %c0_12 = arith.constant 0 : index
    %11 = vector.load %arg3[%c0_11, %c0_12] : memref<1x16xf32, #tpu.memory_space<vmem>>, vector<1x16xf32>
    %12 = vector.broadcast %11 : vector<1x16xf32> to vector<784x16xf32>
    %13 = arith.addf %10, %12 : vector<784x16xf32>
    %c0_13 = arith.constant 0 : index
    %c0_14 = arith.constant 0 : index
    %14 = memref.load %arg4[%c0_13, %c0_14] : memref<2x2xf32, #tpu.memory_space<smem>>
    %15 = vector.broadcast %14 : f32 to vector<784x16xf32>
    %16 = arith.mulf %15, %6 : vector<784x16xf32>
    %c0_15 = arith.constant 0 : index
    %c1_16 = arith.constant 1 : index
    %17 = memref.load %arg4[%c0_15, %c1_16] : memref<2x2xf32, #tpu.memory_space<smem>>
    %18 = vector.broadcast %17 : f32 to vector<784x16xf32>
    %19 = arith.mulf %18, %13 : vector<784x16xf32>
    %20 = arith.addf %16, %19 : vector<784x16xf32>
    %cst_17 = arith.constant 0.000000e+00 : f32
    %21 = vector.broadcast %cst_17 : f32 to vector<784x16xf32>
    %22 = arith.maximumf %20, %21 : vector<784x16xf32>
    %23 = arith.truncf %22 : vector<784x16xf32> to vector<784x16xbf16>
    %c0_18 = arith.constant 0 : index
    %c0_19 = arith.constant 0 : index
    %c0_20 = arith.constant 0 : index
    %24 = vector.load %arg5[%c0_18, %c0_19, %c0_20] : memref<2x784x16xbf16, #tpu.memory_space<vmem>>, vector<1x784x16xbf16>
    %25 = vector.shape_cast %24 : vector<1x784x16xbf16> to vector<784x16xbf16>
    %26 = vector.shape_cast %23 : vector<784x16xbf16> to vector<1x784x16xbf16>
    tpu.vector_store %arg5[%c0_18, %c0_19, %c0_20], %26 {strides = array<i32>} : memref<2x784x16xbf16, #tpu.memory_space<vmem>>, vector<1x784x16xbf16>,
    %c1_21 = arith.constant 1 : index
    %c0_22 = arith.constant 0 : index
    %27 = memref.load %arg4[%c1_21, %c0_22] : memref<2x2xf32, #tpu.memory_space<smem>>
    %28 = vector.broadcast %27 : f32 to vector<784x16xf32>
    %29 = arith.mulf %28, %6 : vector<784x16xf32>
    %c1_23 = arith.constant 1 : index
    %c1_24 = arith.constant 1 : index
    %30 = memref.load %arg4[%c1_23, %c1_24] : memref<2x2xf32, #tpu.memory_space<smem>>
    %31 = vector.broadcast %30 : f32 to vector<784x16xf32>
    %32 = arith.mulf %31, %13 : vector<784x16xf32>
    %33 = arith.addf %29, %32 : vector<784x16xf32>
    %cst_25 = arith.constant 0.000000e+00 : f32
    %34 = vector.broadcast %cst_25 : f32 to vector<784x16xf32>
    %35 = arith.maximumf %33, %34 : vector<784x16xf32>
    %36 = arith.truncf %35 : vector<784x16xf32> to vector<784x16xbf16>
    %c1_26 = arith.constant 1 : index
    %c0_27 = arith.constant 0 : index
    %c0_28 = arith.constant 0 : index
    %37 = vector.load %arg5[%c1_26, %c0_27, %c0_28] : memref<2x784x16xbf16, #tpu.memory_space<vmem>>, vector<1x784x16xbf16>
    %38 = vector.shape_cast %37 : vector<1x784x16xbf16> to vector<784x16xbf16>
    %39 = vector.shape_cast %36 : vector<784x16xbf16> to vector<1x784x16xbf16>
    tpu.vector_store %arg5[%c1_26, %c0_27, %c0_28], %39 {strides = array<i32>} : memref<2x784x16xbf16, #tpu.memory_space<vmem>>, vector<1x784x16xbf16>,
    return
  }
  func.func @transform_0(%arg0: i32) -> (i32, i32, i32) {
    %c0_i32 = arith.constant 0 : i32
    %c0_i32_0 = arith.constant 0 : i32
    %c0_i32_1 = arith.constant 0 : i32
    return %c0_i32, %arg0, %c0_i32_0 : i32, i32, i32
  }
  func.func @transform_1(%arg0: i32) -> (i32, i32) {
    %c0_i32 = arith.constant 0 : i32
    %c0_i32_0 = arith.constant 0 : i32
    %c0_i32_1 = arith.constant 0 : i32
    return %c0_i32, %c0_i32_0 : i32, i32
  }
  func.func @transform_2(%arg0: i32) -> (i32, i32) {
    %c0_i32 = arith.constant 0 : i32
    %c0_i32_0 = arith.constant 0 : i32
    %c0_i32_1 = arith.constant 0 : i32
    return %c0_i32, %c0_i32_0 : i32, i32
  }
  func.func @transform_3(%arg0: i32) -> (i32, i32) {
    %c0_i32 = arith.constant 0 : i32
    %c0_i32_0 = arith.constant 0 : i32
    %c0_i32_1 = arith.constant 0 : i32
    return %c0_i32, %c0_i32_0 : i32, i32
  }
  func.func @transform_4(%arg0: i32) -> (i32, i32, i32) {
    %c0_i32 = arith.constant 0 : i32
    %c0_i32_0 = arith.constant 0 : i32
    %c0_i32_1 = arith.constant 0 : i32
    return %c0_i32, %arg0, %c0_i32_0 : i32, i32, i32
  }
}

module attributes {stable_mosaic.version = 11 : i64} {
  func.func @_conv_mdn_relu_kernel(%arg0: i32, %arg1: memref<2x144x512xbf16, #tpu.memory_space<vmem>>, %arg2: memref<512x32xbf16, #tpu.memory_space<vmem>>, %arg3: memref<1x32xf32, #tpu.memory_space<vmem>>, %arg4: memref<2x2xf32, #tpu.memory_space<smem>>, %arg5: memref<2x144x32xbf16, #tpu.memory_space<vmem>>) attributes {dimension_semantics = [#tpu.dimension_semantics<parallel>], iteration_bounds = array<i64: 4>, scalar_prefetch = 0 : i64, scratch_operands = 0 : i64, tpu.core_type = #tpu.core_type<tc>, window_params = [{transform_indices = @transform_0, window_bounds = array<i64: 2, 144, 512>}, {pipeline_mode = #tpu.pipeline_mode<synchronous>, transform_indices = @transform_1, window_bounds = array<i64: 512, 32>}, {pipeline_mode = #tpu.pipeline_mode<synchronous>, transform_indices = @transform_2, window_bounds = array<i64: 1, 32>}, {transform_indices = @transform_3, window_bounds = array<i64: 2, 2>}, {transform_indices = @transform_4, window_bounds = array<i64: 2, 144, 32>}]} {
    %c0 = arith.constant 0 : index
    %c0_0 = arith.constant 0 : index
    %c0_1 = arith.constant 0 : index
    %0 = vector.load %arg1[%c0, %c0_0, %c0_1] : memref<2x144x512xbf16, #tpu.memory_space<vmem>>, vector<1x144x512xbf16>
    %1 = vector.shape_cast %0 : vector<1x144x512xbf16> to vector<144x512xbf16>
    %c0_2 = arith.constant 0 : index
    %c0_3 = arith.constant 0 : index
    %2 = vector.load %arg2[%c0_2, %c0_3] : memref<512x32xbf16, #tpu.memory_space<vmem>>, vector<512x32xbf16>
    %cst = arith.constant dense<0.000000e+00> : vector<144x32xf32>
    %3 = tpu.matmul %1, %2, %cst {dimension_numbers = #tpu.dot_dimension_numbers<[1], [0], [0], [1], [0, 0, 1, 1], [], []>} : vector<144x512xbf16>, vector<512x32xbf16>, vector<144x32xf32> -> vector<144x32xf32>
    %c0_4 = arith.constant 0 : index
    %c0_5 = arith.constant 0 : index
    %4 = vector.load %arg3[%c0_4, %c0_5] : memref<1x32xf32, #tpu.memory_space<vmem>>, vector<1x32xf32>
    %5 = vector.broadcast %4 : vector<1x32xf32> to vector<144x32xf32>
    %6 = arith.addf %3, %5 : vector<144x32xf32>
    %c1 = arith.constant 1 : index
    %c0_6 = arith.constant 0 : index
    %c0_7 = arith.constant 0 : index
    %7 = vector.load %arg1[%c1, %c0_6, %c0_7] : memref<2x144x512xbf16, #tpu.memory_space<vmem>>, vector<1x144x512xbf16>
    %8 = vector.shape_cast %7 : vector<1x144x512xbf16> to vector<144x512xbf16>
    %c0_8 = arith.constant 0 : index
    %c0_9 = arith.constant 0 : index
    %9 = vector.load %arg2[%c0_8, %c0_9] : memref<512x32xbf16, #tpu.memory_space<vmem>>, vector<512x32xbf16>
    %cst_10 = arith.constant dense<0.000000e+00> : vector<144x32xf32>
    %10 = tpu.matmul %8, %9, %cst_10 {dimension_numbers = #tpu.dot_dimension_numbers<[1], [0], [0], [1], [0, 0, 1, 1], [], []>} : vector<144x512xbf16>, vector<512x32xbf16>, vector<144x32xf32> -> vector<144x32xf32>
    %c0_11 = arith.constant 0 : index
    %c0_12 = arith.constant 0 : index
    %11 = vector.load %arg3[%c0_11, %c0_12] : memref<1x32xf32, #tpu.memory_space<vmem>>, vector<1x32xf32>
    %12 = vector.broadcast %11 : vector<1x32xf32> to vector<144x32xf32>
    %13 = arith.addf %10, %12 : vector<144x32xf32>
    %c0_13 = arith.constant 0 : index
    %c0_14 = arith.constant 0 : index
    %14 = memref.load %arg4[%c0_13, %c0_14] : memref<2x2xf32, #tpu.memory_space<smem>>
    %15 = vector.broadcast %14 : f32 to vector<144x32xf32>
    %16 = arith.mulf %15, %6 : vector<144x32xf32>
    %c0_15 = arith.constant 0 : index
    %c1_16 = arith.constant 1 : index
    %17 = memref.load %arg4[%c0_15, %c1_16] : memref<2x2xf32, #tpu.memory_space<smem>>
    %18 = vector.broadcast %17 : f32 to vector<144x32xf32>
    %19 = arith.mulf %18, %13 : vector<144x32xf32>
    %20 = arith.addf %16, %19 : vector<144x32xf32>
    %cst_17 = arith.constant 0.000000e+00 : f32
    %21 = vector.broadcast %cst_17 : f32 to vector<144x32xf32>
    %22 = arith.maximumf %20, %21 : vector<144x32xf32>
    %23 = arith.truncf %22 : vector<144x32xf32> to vector<144x32xbf16>
    %c0_18 = arith.constant 0 : index
    %c0_19 = arith.constant 0 : index
    %c0_20 = arith.constant 0 : index
    %24 = vector.load %arg5[%c0_18, %c0_19, %c0_20] : memref<2x144x32xbf16, #tpu.memory_space<vmem>>, vector<1x144x32xbf16>
    %25 = vector.shape_cast %24 : vector<1x144x32xbf16> to vector<144x32xbf16>
    %26 = vector.shape_cast %23 : vector<144x32xbf16> to vector<1x144x32xbf16>
    tpu.vector_store %arg5[%c0_18, %c0_19, %c0_20], %26 {strides = array<i32>} : memref<2x144x32xbf16, #tpu.memory_space<vmem>>, vector<1x144x32xbf16>,
    %c1_21 = arith.constant 1 : index
    %c0_22 = arith.constant 0 : index
    %27 = memref.load %arg4[%c1_21, %c0_22] : memref<2x2xf32, #tpu.memory_space<smem>>
    %28 = vector.broadcast %27 : f32 to vector<144x32xf32>
    %29 = arith.mulf %28, %6 : vector<144x32xf32>
    %c1_23 = arith.constant 1 : index
    %c1_24 = arith.constant 1 : index
    %30 = memref.load %arg4[%c1_23, %c1_24] : memref<2x2xf32, #tpu.memory_space<smem>>
    %31 = vector.broadcast %30 : f32 to vector<144x32xf32>
    %32 = arith.mulf %31, %13 : vector<144x32xf32>
    %33 = arith.addf %29, %32 : vector<144x32xf32>
    %cst_25 = arith.constant 0.000000e+00 : f32
    %34 = vector.broadcast %cst_25 : f32 to vector<144x32xf32>
    %35 = arith.maximumf %33, %34 : vector<144x32xf32>
    %36 = arith.truncf %35 : vector<144x32xf32> to vector<144x32xbf16>
    %c1_26 = arith.constant 1 : index
    %c0_27 = arith.constant 0 : index
    %c0_28 = arith.constant 0 : index
    %37 = vector.load %arg5[%c1_26, %c0_27, %c0_28] : memref<2x144x32xbf16, #tpu.memory_space<vmem>>, vector<1x144x32xbf16>
    %38 = vector.shape_cast %37 : vector<1x144x32xbf16> to vector<144x32xbf16>
    %39 = vector.shape_cast %36 : vector<144x32xbf16> to vector<1x144x32xbf16>
    tpu.vector_store %arg5[%c1_26, %c0_27, %c0_28], %39 {strides = array<i32>} : memref<2x144x32xbf16, #tpu.memory_space<vmem>>, vector<1x144x32xbf16>,
    return
  }
  func.func @transform_0(%arg0: i32) -> (i32, i32, i32) {
    %c0_i32 = arith.constant 0 : i32
    %c0_i32_0 = arith.constant 0 : i32
    %c0_i32_1 = arith.constant 0 : i32
    return %c0_i32, %arg0, %c0_i32_0 : i32, i32, i32
  }
  func.func @transform_1(%arg0: i32) -> (i32, i32) {
    %c0_i32 = arith.constant 0 : i32
    %c0_i32_0 = arith.constant 0 : i32
    %c0_i32_1 = arith.constant 0 : i32
    return %c0_i32, %c0_i32_0 : i32, i32
  }
  func.func @transform_2(%arg0: i32) -> (i32, i32) {
    %c0_i32 = arith.constant 0 : i32
    %c0_i32_0 = arith.constant 0 : i32
    %c0_i32_1 = arith.constant 0 : i32
    return %c0_i32, %c0_i32_0 : i32, i32
  }
  func.func @transform_3(%arg0: i32) -> (i32, i32) {
    %c0_i32 = arith.constant 0 : i32
    %c0_i32_0 = arith.constant 0 : i32
    %c0_i32_1 = arith.constant 0 : i32
    return %c0_i32, %c0_i32_0 : i32, i32
  }
  func.func @transform_4(%arg0: i32) -> (i32, i32, i32) {
    %c0_i32 = arith.constant 0 : i32
    %c0_i32_0 = arith.constant 0 : i32
    %c0_i32_1 = arith.constant 0 : i32
    return %c0_i32, %arg0, %c0_i32_0 : i32, i32, i32
  }
}

module attributes {stable_mosaic.version = 11 : i64} {
  func.func @_fc_head_kernel(%arg0: i32, %arg1: memref<2x18432xbf16, #tpu.memory_space<vmem>>, %arg2: memref<18432x84xbf16, #tpu.memory_space<vmem>>, %arg3: memref<1x84xf32, #tpu.memory_space<vmem>>, %arg4: memref<2x2xf32, #tpu.memory_space<vmem>>, %arg5: memref<84x1xf32, #tpu.memory_space<vmem>>, %arg6: memref<1x1xf32, #tpu.memory_space<vmem>>, %arg7: memref<2x84xf32, #tpu.memory_space<vmem>>, %arg8: memref<2x1xf32, #tpu.memory_space<vmem>>) attributes {dimension_semantics = [#tpu.dimension_semantics<arbitrary>], iteration_bounds = array<i64: 1>, scalar_prefetch = 0 : i64, scratch_operands = 0 : i64, tpu.core_type = #tpu.core_type<tc>, window_params = [{pipeline_mode = #tpu.pipeline_mode<synchronous>, transform_indices = @transform_0, window_bounds = array<i64: 2, 18432>}, {pipeline_mode = #tpu.pipeline_mode<synchronous>, transform_indices = @transform_1, window_bounds = array<i64: 18432, 84>}, {pipeline_mode = #tpu.pipeline_mode<synchronous>, transform_indices = @transform_2, window_bounds = array<i64: 1, 84>}, {pipeline_mode = #tpu.pipeline_mode<synchronous>, transform_indices = @transform_3, window_bounds = array<i64: 2, 2>}, {pipeline_mode = #tpu.pipeline_mode<synchronous>, transform_indices = @transform_4, window_bounds = array<i64: 84, 1>}, {pipeline_mode = #tpu.pipeline_mode<synchronous>, transform_indices = @transform_5, window_bounds = array<i64: 1, 1>}, {pipeline_mode = #tpu.pipeline_mode<synchronous>, transform_indices = @transform_6, window_bounds = array<i64: 2, 84>}, {pipeline_mode = #tpu.pipeline_mode<synchronous>, transform_indices = @transform_7, window_bounds = array<i64: 2, 1>}]} {
    %c0 = arith.constant 0 : index
    %c0_0 = arith.constant 0 : index
    %0 = vector.load %arg1[%c0, %c0_0] : memref<2x18432xbf16, #tpu.memory_space<vmem>>, vector<2x18432xbf16>
    %c0_1 = arith.constant 0 : index
    %c0_2 = arith.constant 0 : index
    %1 = vector.load %arg2[%c0_1, %c0_2] : memref<18432x84xbf16, #tpu.memory_space<vmem>>, vector<18432x84xbf16>
    %cst = arith.constant dense<0.000000e+00> : vector<2x84xf32>
    %2 = tpu.matmul %0, %1, %cst {dimension_numbers = #tpu.dot_dimension_numbers<[1], [0], [0], [1], [0, 0, 1, 1], [], []>} : vector<2x18432xbf16>, vector<18432x84xbf16>, vector<2x84xf32> -> vector<2x84xf32>
    %c0_3 = arith.constant 0 : index
    %c0_4 = arith.constant 0 : index
    %3 = vector.load %arg3[%c0_3, %c0_4] : memref<1x84xf32, #tpu.memory_space<vmem>>, vector<1x84xf32>
    %4 = vector.broadcast %3 : vector<1x84xf32> to vector<2x84xf32>
    %5 = arith.addf %2, %4 : vector<2x84xf32>
    %c0_5 = arith.constant 0 : index
    %c0_6 = arith.constant 0 : index
    %6 = vector.load %arg4[%c0_5, %c0_6] : memref<2x2xf32, #tpu.memory_space<vmem>>, vector<2x2xf32>
    %cst_7 = arith.constant dense<0.000000e+00> : vector<2x84xf32>
    %7 = tpu.matmul %6, %5, %cst_7 {dimension_numbers = #tpu.dot_dimension_numbers<[1], [0], [0], [1], [0, 0, 1, 1], [], []>} : vector<2x2xf32>, vector<2x84xf32>, vector<2x84xf32> -> vector<2x84xf32>
    %c0_8 = arith.constant 0 : index
    %c0_9 = arith.constant 0 : index
    %8 = vector.load %arg7[%c0_8, %c0_9] : memref<2x84xf32, #tpu.memory_space<vmem>>, vector<2x84xf32>
    tpu.vector_store %arg7[%c0_8, %c0_9], %7 {strides = array<i32>} : memref<2x84xf32, #tpu.memory_space<vmem>>, vector<2x84xf32>,
    %cst_10 = arith.constant 0.000000e+00 : f32
    %9 = vector.broadcast %cst_10 : f32 to vector<2x84xf32>
    %10 = arith.maximumf %7, %9 : vector<2x84xf32>
    %c0_11 = arith.constant 0 : index
    %c0_12 = arith.constant 0 : index
    %11 = vector.load %arg5[%c0_11, %c0_12] : memref<84x1xf32, #tpu.memory_space<vmem>>, vector<84x1xf32>
    %cst_13 = arith.constant dense<0.000000e+00> : vector<2x1xf32>
    %12 = tpu.matmul %10, %11, %cst_13 {dimension_numbers = #tpu.dot_dimension_numbers<[1], [0], [0], [1], [0, 0, 1, 1], [], []>} : vector<2x84xf32>, vector<84x1xf32>, vector<2x1xf32> -> vector<2x1xf32>
    %c0_14 = arith.constant 0 : index
    %c0_15 = arith.constant 0 : index
    %13 = vector.load %arg6[%c0_14, %c0_15] : memref<1x1xf32, #tpu.memory_space<vmem>>, vector<1x1xf32>
    %14 = vector.broadcast %13 : vector<1x1xf32> to vector<2x1xf32>
    %15 = arith.addf %12, %14 : vector<2x1xf32>
    %cst_16 = arith.constant 0.000000e+00 : f32
    %16 = vector.broadcast %cst_16 : f32 to vector<2x1xf32>
    %17 = arith.subf %16, %15 : vector<2x1xf32>
    %18 = math.exp %17 : vector<2x1xf32>
    %cst_17 = arith.constant 1.000000e+00 : f32
    %19 = vector.broadcast %cst_17 : f32 to vector<2x1xf32>
    %20 = arith.addf %19, %18 : vector<2x1xf32>
    %cst_18 = arith.constant 1.000000e+00 : f32
    %21 = vector.broadcast %cst_18 : f32 to vector<2x1xf32>
    %22 = arith.divf %21, %20 : vector<2x1xf32>
    %c0_19 = arith.constant 0 : index
    %c0_20 = arith.constant 0 : index
    %23 = vector.load %arg8[%c0_19, %c0_20] : memref<2x1xf32, #tpu.memory_space<vmem>>, vector<2x1xf32>
    tpu.vector_store %arg8[%c0_19, %c0_20], %22 {strides = array<i32>} : memref<2x1xf32, #tpu.memory_space<vmem>>, vector<2x1xf32>,
    return
  }
  func.func @transform_0(%arg0: i32) -> (i32, i32) {
    %c0_i32 = arith.constant 0 : i32
    %c0_i32_0 = arith.constant 0 : i32
    %c0_i32_1 = arith.constant 0 : i32
    return %c0_i32, %c0_i32_0 : i32, i32
  }
  func.func @transform_1(%arg0: i32) -> (i32, i32) {
    %c0_i32 = arith.constant 0 : i32
    %c0_i32_0 = arith.constant 0 : i32
    %c0_i32_1 = arith.constant 0 : i32
    return %c0_i32, %c0_i32_0 : i32, i32
  }
  func.func @transform_2(%arg0: i32) -> (i32, i32) {
    %c0_i32 = arith.constant 0 : i32
    %c0_i32_0 = arith.constant 0 : i32
    %c0_i32_1 = arith.constant 0 : i32
    return %c0_i32, %c0_i32_0 : i32, i32
  }
  func.func @transform_3(%arg0: i32) -> (i32, i32) {
    %c0_i32 = arith.constant 0 : i32
    %c0_i32_0 = arith.constant 0 : i32
    %c0_i32_1 = arith.constant 0 : i32
    return %c0_i32, %c0_i32_0 : i32, i32
  }
  func.func @transform_4(%arg0: i32) -> (i32, i32) {
    %c0_i32 = arith.constant 0 : i32
    %c0_i32_0 = arith.constant 0 : i32
    %c0_i32_1 = arith.constant 0 : i32
    return %c0_i32, %c0_i32_0 : i32, i32
  }
  func.func @transform_5(%arg0: i32) -> (i32, i32) {
    %c0_i32 = arith.constant 0 : i32
    %c0_i32_0 = arith.constant 0 : i32
    %c0_i32_1 = arith.constant 0 : i32
    return %c0_i32, %c0_i32_0 : i32, i32
  }
  func.func @transform_6(%arg0: i32) -> (i32, i32) {
    %c0_i32 = arith.constant 0 : i32
    %c0_i32_0 = arith.constant 0 : i32
    %c0_i32_1 = arith.constant 0 : i32
    return %c0_i32, %c0_i32_0 : i32, i32
  }
  func.func @transform_7(%arg0: i32) -> (i32, i32) {
    %c0_i32 = arith.constant 0 : i32
    %c0_i32_0 = arith.constant 0 : i32
    %c0_i32_1 = arith.constant 0 : i32
    return %c0_i32, %c0_i32_0 : i32, i32
  }
}

</mosaic_0001>

<bundles_post_ra>
// kernel: mdn_conv_forward.3
= control target key start
LH: loop header
LB: loop body
LE: loop exit
PB: predicated region body
PF: predicated region fallthrough
CT: control target
= control target key end

     0   :  { %9 = vsyncpa [#allocation3], 0  ;;  %s3059_s18 = smov [#allocation2]   ;;  %s5284_s0 = inlined_call_operand.vmem [shape: f32[2,784,32], index: 0, kind: input, shape index: {}]   ;;  %s5285_s1 = inlined_call_operand.vmem [shape: f32[32,16], index: 1, kind: input, shape index: {}]   ;;  %s5286_s2 = inlined_call_operand.vmem [shape: f32[1,16], index: 2, kind: input, shape index: {}]   ;;  %s5287_s3 = inlined_call_operand.vmem [shape: f32[2,2], index: 3, kind: input, shape index: {}]   ;;  %s5288_s4 = inlined_call_operand.vmem [shape: bf16[2,784,16], index: 4, kind: output, shape index: {}]  }
   0x1   :  { %s21_s17 = sshll.u32 %s5287_s3, 4  ;;  %s22_s17 = int_to_ptr.vmem [resolvable:$true] %s21_s17 }
   0x2   :  { %24 = dma.vmem_to_smem %s22_s17, 32, %s3059_s18, [#allocation3]  }
   0x3   :  { %3057 = dma.done.wait [#allocation3], 32  }
   0x4   :  { %3058 = vsyncadd [#allocation3], 4294967264 }
   0x5   :  { %29 = sfence }
   0x6   :  { %v131_v0 = vld [vmem:[%s5285_s1 + $0x18] sm:$0xff]  ;;  %v130_v1 = vld [vmem:[%s5285_s1 + $0x10] sm:$0xff]  ;;  %v129_v2 = vld [vmem:[%s5285_s1 + $0x8] sm:$0xff]  ;;  %vm136_vm0 = vcmask 261120   ;;  %s1446_s7 = sld [smem:[#allocation2]]  ;;  %vm1940_vm1 = vcmask 125952  }
   0x7   :  { %3032 = vmatpush.msra.mxu2 %v131_v0  ;;  %3036 = vmatpush.msra.mxu3 %v131_v0  ;;  %v128_v3 = vld [vmem:[%s5285_s1] sm:$0xff]  ;;  %v79_v4 = vld [vmem:[%s5284_s0 + $0x188] sm:$0xff]  ;;  %v2784_v5 = vld [vmem:[%s5284_s0 + $0x498] sm:$0xff]  ;;  %s2932_s12 = sld [smem:[#allocation2 + $0x80]] }
   0x8   :  { %443 = vmatpush.msra.mxu0 %v131_v0  ;;  %1147 = vmatpush.msra.mxu1 %v131_v0  ;;  %v30_v6 = vld [vmem:[%s5284_s0] sm:$0xff]  ;;  %v2735_v7 = vld [vmem:[%s5284_s0 + $0x310] sm:$0xff]  ;;  %v31_v10 = vld [vmem:[%s5284_s0 + $0x8] sm:$0xff]  ;;  %s2931_s13 = sld [smem:[#allocation2 + $0x1]] }
   0x9   :  { %3033 = vmatpush.msra.mxu2 %v130_v1  ;;  %3037 = vmatpush.msra.mxu3 %v130_v1  ;;  %v80_v8 = vld [vmem:[%s5284_s0 + $0x190] sm:$0xff]  ;;  %v2785_v9 = vld [vmem:[%s5284_s0 + $0x4a0] sm:$0xff]  ;;  %v2736_v11 = vld [vmem:[%s5284_s0 + $0x318] sm:$0xff]  ;;  %s2933_s18 = sld [smem:[#allocation2 + $0x81]] }
   0xa   :  { %444 = vmatpush.msra.mxu0 %v130_v1  ;;  %1148 = vmatpush.msra.mxu1 %v130_v1  ;;  %v81_v12 = vld [vmem:[%s5284_s0 + $0x198] sm:$0xff]  ;;  %v2786_v13 = vld [vmem:[%s5284_s0 + $0x4a8] sm:$0xff]  ;;  %v32_v14 = vld [vmem:[%s5284_s0 + $0x10] sm:$0xff] }
   0xb   :  { %3034 = vmatpush.msra.mxu2 %v129_v2  ;;  %3038 = vmatpush.msra.mxu3 %v129_v2  ;;  %v2737_v15 = vld [vmem:[%s5284_s0 + $0x320] sm:$0xff]  ;;  %v2787_v17 = vld [vmem:[%s5284_s0 + $0x4b0] sm:$0xff]  ;;  %v33_v18 = vld [vmem:[%s5284_s0 + $0x18] sm:$0xff] }
   0xc   :  { %445 = vmatpush.msra.mxu0 %v129_v2  ;;  %1149 = vmatpush.msra.mxu1 %v129_v2  ;;  %v82_v16 = vld [vmem:[%s5284_s0 + $0x1a0] sm:$0xff]  ;;  %v2738_v19 = vld [vmem:[%s5284_s0 + $0x328] sm:$0xff]  ;;  %v2788_v21 = vld [vmem:[%s5284_s0 + $0x4b8] sm:$0xff] }
   0xd   :  { %3035 = vmatpush.msra.mxu2 %v128_v3  ;;  %3039 = vmatpush.msra.mxu3 %v128_v3  ;;  %v83_v20 = vld [vmem:[%s5284_s0 + $0x1a8] sm:$0xff]  ;;  %v34_v22 = vld [vmem:[%s5284_s0 + $0x20] sm:$0xff]  ;;  %v2739_v23 = vld [vmem:[%s5284_s0 + $0x330] sm:$0xff] }
   0xe   :  { %2686 = vmatmul.msk.f32.vlgmr.msra.gmra.mxu2 %vm136_vm0, %v79_v4  ;;  %2882 = vmatmul.msk.f32.vlgmr.msra.gmra.mxu3 %vm136_vm0, %v2784_v5  ;;  %v84_v24 = vld [vmem:[%s5284_s0 + $0x1b0] sm:$0xff]  ;;  %v2789_v25 = vld [vmem:[%s5284_s0 + $0x4c0] sm:$0xff]  ;;  %v35_v26 = vld [vmem:[%s5284_s0 + $0x28] sm:$0xff] }
   0xf   :  { %446 = vmatpush.msra.mxu0 %v128_v3  ;;  %1150 = vmatpush.msra.mxu1 %v128_v3  ;;  %v2740_v27 = vld [vmem:[%s5284_s0 + $0x338] sm:$0xff]  ;;  %v2790_v29 = vld [vmem:[%s5284_s0 + $0x4c8] sm:$0xff]  ;;  %v36_v30 = vld [vmem:[%s5284_s0 + $0x30] sm:$0xff] }
  0x10   :  { %2637 = vmatmul.msk.f32.vlgmr.msra.gmra.mxu0 %vm136_vm0, %v30_v6  ;;  %2833 = vmatmul.msk.f32.vlgmr.msra.gmra.mxu1 %vm136_vm0, %v2735_v7  ;;  %v85_v28 = vld [vmem:[%s5284_s0 + $0x1b8] sm:$0xff]  ;;  %v2741_v31 = vld [vmem:[%s5284_s0 + $0x340] sm:$0xff]  ;;  %v2791_v33 = vld [vmem:[%s5284_s0 + $0x4d0] sm:$0xff]  ;;  %v3367_v7 = vstv %s1446_s7 }
  0x11   :  { %v86_v32 = vld [vmem:[%s5284_s0 + $0x1c0] sm:$0xff]  ;;  %v37_v34 = vld [vmem:[%s5284_s0 + $0x38] sm:$0xff]  ;;  %v2742_v35 = vld [vmem:[%s5284_s0 + $0x348] sm:$0xff] }
  0x12   :  { %v87_v36 = vld [vmem:[%s5284_s0 + $0x1c8] sm:$0xff]  ;;  %v2792_v37 = vld [vmem:[%s5284_s0 + $0x4d8] sm:$0xff]  ;;  %v38_v38 = vld [vmem:[%s5284_s0 + $0x40] sm:$0xff] }
  0x13   :  { %v2743_v39 = vld [vmem:[%s5284_s0 + $0x350] sm:$0xff]  ;;  %v2793_v41 = vld [vmem:[%s5284_s0 + $0x4e0] sm:$0xff]  ;;  %v39_v42 = vld [vmem:[%s5284_s0 + $0x48] sm:$0xff] }
  0x14   :  { %v88_v40 = vld [vmem:[%s5284_s0 + $0x1d0] sm:$0xff]  ;;  %v2744_v43 = vld [vmem:[%s5284_s0 + $0x358] sm:$0xff]  ;;  %v2794_v45 = vld [vmem:[%s5284_s0 + $0x4e8] sm:$0xff] }
  0x15   :  { %v89_v44 = vld [vmem:[%s5284_s0 + $0x1d8] sm:$0xff]  ;;  %v40_v46 = vld [vmem:[%s5284_s0 + $0x50] sm:$0xff]  ;;  %v2745_v47 = vld [vmem:[%s5284_s0 + $0x360] sm:$0xff] }
  0x16   :  { %2687 = vmatmul.msk.f32.gmra.mxu2 %vm136_vm0, %v80_v8  ;;  %2883 = vmatmul.msk.f32.gmra.mxu3 %vm136_vm0, %v2785_v9  ;;  %v90_v48 = vld [vmem:[%s5284_s0 + $0x1e0] sm:$0xff]  ;;  %v2795_v49 = vld [vmem:[%s5284_s0 + $0x4f0] sm:$0xff]  ;;  %v41_v50 = vld [vmem:[%s5284_s0 + $0x58] sm:$0xff]  ;;  %v3369_v9 = vstv %s2932_s12 }
  0x17   :  { %v2746_v51 = vld [vmem:[%s5284_s0 + $0x368] sm:$0xff]  ;;  %v2796_v53 = vld [vmem:[%s5284_s0 + $0x4f8] sm:$0xff]  ;;  %v42_v54 = vld [vmem:[%s5284_s0 + $0x60] sm:$0xff] }
  0x18   :  { %2638 = vmatmul.msk.f32.gmra.mxu0 %vm136_vm0, %v31_v10  ;;  %2834 = vmatmul.msk.f32.gmra.mxu1 %vm136_vm0, %v2736_v11  ;;  %v91_v52 = vld [vmem:[%s5284_s0 + $0x1e8] sm:$0xff]  ;;  %v2747_v55 = vld [vmem:[%s5284_s0 + $0x370] sm:$0xff]  ;;  %v2797_v57 = vld [vmem:[%s5284_s0 + $0x500] sm:$0xff]  ;;  %v3371_v11 = vstv %s2931_s13 }
  0x19   :  { %v92_v56 = vld [vmem:[%s5284_s0 + $0x1f0] sm:$0xff]  ;;  %v43_v58 = vld [vmem:[%s5284_s0 + $0x68] sm:$0xff]  ;;  %v2748_v59 = vld [vmem:[%s5284_s0 + $0x378] sm:$0xff] }
  0x1a   :  { %v93_v60 = vld [vmem:[%s5284_s0 + $0x1f8] sm:$0xff]  ;;  %v2798_v61 = vld [vmem:[%s5284_s0 + $0x508] sm:$0xff]  ;;  %v44_v62 = vld [vmem:[%s5284_s0 + $0x70] sm:$0xff] }
  0x1b   :  { %v2749_v63 = vld [vmem:[%s5284_s0 + $0x380] sm:$0xff]  ;;  %v2799_v1 = vld [vmem:[%s5284_s0 + $0x510] sm:$0xff]  ;;  %v45_v2 = vld [vmem:[%s5284_s0 + $0x78] sm:$0xff] }
  0x1c   :  { %v94_v0 = vld [vmem:[%s5284_s0 + $0x200] sm:$0xff]  ;;  %v2750_v3 = vld [vmem:[%s5284_s0 + $0x388] sm:$0xff]  ;;  %v2800_v6 = vld [vmem:[%s5284_s0 + $0x518] sm:$0xff] }
  0x1d   :  { %v3359_v4 = vld [vmem:[%s5286_s2] ss:$0 sm:$0xff]  ;;  %v95_v5 = vld [vmem:[%s5284_s0 + $0x208] sm:$0xff] }
  0x1e   :  { %2688 = vmatmul.msk.f32.gmra.mxu2 %vm136_vm0, %v81_v12  ;;  %2884 = vmatmul.msk.f32.gmra.mxu3 %vm136_vm0, %v2786_v13  ;;  %v3373_v12 = vstv %s2933_s18  ;;  %v46_v13 = vld [vmem:[%s5284_s0 + $0x80] sm:$0xff] }
  0x20   :  { %2639 = vmatmul.msk.f32.gmra.mxu0 %vm136_vm0, %v32_v14  ;;  %2835 = vmatmul.msk.f32.gmra.mxu1 %vm136_vm0, %v2737_v15 }
  0x26   :  { %2689 = vmatmul.msk.f32.gmra.mxu2 %vm136_vm0, %v82_v16  ;;  %2885 = vmatmul.msk.f32.gmra.mxu3 %vm136_vm0, %v2787_v17  ;;  %v2751_v16 = vld [vmem:[%s5284_s0 + $0x390] sm:$0xff] }
  0x28   :  { %2640 = vmatmul.msk.f32.gmra.mxu0 %vm136_vm0, %v33_v18  ;;  %2836 = vmatmul.msk.f32.gmra.mxu1 %vm136_vm0, %v2738_v19 }
  0x2e   :  { %2690 = vmatmul.msk.f32.gmra.mxu2 %vm136_vm0, %v83_v20  ;;  %2886 = vmatmul.msk.f32.gmra.mxu3 %vm136_vm0, %v2788_v21 }
  0x30   :  { %2641 = vmatmul.msk.f32.gmra.mxu0 %vm136_vm0, %v34_v22  ;;  %2837 = vmatmul.msk.f32.gmra.mxu1 %vm136_vm0, %v2739_v23 }
  0x36   :  { %2691 = vmatmul.msk.f32.gmra.mxu2 %vm136_vm0, %v84_v24  ;;  %2887 = vmatmul.msk.f32.gmra.mxu3 %vm136_vm0, %v2789_v25 }
  0x38   :  { %2642 = vmatmul.msk.f32.gmra.mxu0 %vm136_vm0, %v35_v26  ;;  %2838 = vmatmul.msk.f32.gmra.mxu1 %vm136_vm0, %v2740_v27  ;;  %v96_v27 = vld [vmem:[%s5284_s0 + $0x210] sm:$0xff] }
  0x3e   :  { %2692 = vmatmul.msk.f32.gmra.mxu2 %vm136_vm0, %v85_v28  ;;  %2888 = vmatmul.msk.f32.gmra.mxu3 %vm136_vm0, %v2790_v29  ;;  %v2801_v28 = vld [vmem:[%s5284_s0 + $0x520] sm:$0xff] }
  0x40   :  { %2643 = vmatmul.msk.f32.gmra.mxu0 %vm136_vm0, %v36_v30  ;;  %2839 = vmatmul.msk.f32.gmra.mxu1 %vm136_vm0, %v2741_v31 }
  0x46   :  { %2693 = vmatmul.msk.f32.gmra.mxu2 %vm136_vm0, %v86_v32  ;;  %2889 = vmatmul.msk.f32.gmra.mxu3 %vm136_vm0, %v2791_v33 }
  0x48   :  { %2644 = vmatmul.msk.f32.gmra.mxu0 %vm136_vm0, %v37_v34  ;;  %2840 = vmatmul.msk.f32.gmra.mxu1 %vm136_vm0, %v2742_v35 }
  0x4e   :  { %2694 = vmatmul.msk.f32.gmra.mxu2 %vm136_vm0, %v87_v36  ;;  %2890 = vmatmul.msk.f32.gmra.mxu3 %vm136_vm0, %v2792_v37  ;;  %v47_v37 = vld [vmem:[%s5284_s0 + $0x88] sm:$0xff] }
  0x50   :  { %2645 = vmatmul.msk.f32.gmra.mxu0 %vm136_vm0, %v38_v38  ;;  %2841 = vmatmul.msk.f32.gmra.mxu1 %vm136_vm0, %v2743_v39 }
  0x56   :  { %2695 = vmatmul.msk.f32.gmra.mxu2 %vm136_vm0, %v88_v40  ;;  %2891 = vmatmul.msk.f32.gmra.mxu3 %vm136_vm0, %v2793_v41  ;;  %v2752_v41 = vld [vmem:[%s5284_s0 + $0x398] sm:$0xff] }
  0x58   :  { %2646 = vmatmul.msk.f32.gmra.mxu0 %vm136_vm0, %v39_v42  ;;  %2842 = vmatmul.msk.f32.gmra.mxu1 %vm136_vm0, %v2744_v43 }
  0x5e   :  { %2696 = vmatmul.msk.f32.gmra.mxu2 %vm136_vm0, %v89_v44  ;;  %2892 = vmatmul.msk.f32.gmra.mxu3 %vm136_vm0, %v2794_v45 }
  0x60   :  { %2647 = vmatmul.msk.f32.gmra.mxu0 %vm136_vm0, %v40_v46  ;;  %2843 = vmatmul.msk.f32.gmra.mxu1 %vm136_vm0, %v2745_v47 }
  0x66   :  { %2697 = vmatmul.msk.f32.gmra.mxu2 %vm136_vm0, %v90_v48  ;;  %2893 = vmatmul.msk.f32.gmra.mxu3 %vm136_vm0, %v2795_v49 }
  0x68   :  { %2648 = vmatmul.msk.f32.gmra.mxu0 %vm136_vm0, %v41_v50  ;;  %2844 = vmatmul.msk.f32.gmra.mxu1 %vm136_vm0, %v2746_v51 }
  0x6e   :  { %2698 = vmatmul.msk.f32.gmra.mxu2 %vm136_vm0, %v91_v52  ;;  %2894 = vmatmul.msk.f32.gmra.mxu3 %vm136_vm0, %v2796_v53 }
  0x70   :  { %2649 = vmatmul.msk.f32.gmra.mxu0 %vm136_vm0, %v42_v54  ;;  %2845 = vmatmul.msk.f32.gmra.mxu1 %vm136_vm0, %v2747_v55 }
  0x76   :  { %2699 = vmatmul.msk.f32.gmra.mxu2 %vm136_vm0, %v92_v56  ;;  %2895 = vmatmul.msk.f32.gmra.mxu3 %vm136_vm0, %v2797_v57 }
  0x78   :  { %2650 = vmatmul.msk.f32.gmra.mxu0 %vm136_vm0, %v43_v58  ;;  %2846 = vmatmul.msk.f32.gmra.mxu1 %vm136_vm0, %v2748_v59  ;;  %v97_v59 = vld [vmem:[%s5284_s0 + $0x218] sm:$0xff] }
  0x7e   :  { %2700 = vmatmul.msk.f32.gmra.mxu2 %vm136_vm0, %v93_v60  ;;  %2896 = vmatmul.msk.f32.gmra.mxu3 %vm136_vm0, %v2798_v61  ;;  %v2802_v60 = vld [vmem:[%s5284_s0 + $0x528] sm:$0xff] }
  0x80   :  { %2651 = vmatmul.msk.f32.gmra.mxu0 %vm136_vm0, %v44_v62  ;;  %2847 = vmatmul.msk.f32.gmra.mxu1 %vm136_vm0, %v2749_v63 }
  0x86   :  { %2701 = vmatmul.msk.f32.gmra.mxu2 %vm136_vm0, %v94_v0  ;;  %2897 = vmatmul.msk.f32.gmra.mxu3 %vm136_vm0, %v2799_v1 }
  0x88   :  { %2652 = vmatmul.msk.f32.gmra.mxu0 %vm136_vm0, %v45_v2  ;;  %2848 = vmatmul.msk.f32.gmra.mxu1 %vm136_vm0, %v2750_v3 }
  0x8d   :  { %v448_v8 = vpop.f32.mrf.mxu0  ;;  %v1152_v10 = vpop.f32.mrf.mxu1 }
  0x8e   :  { %2702 = vmatmul.msk.f32.gmra.mxu2 %vm136_vm0, %v95_v5  ;;  %2898 = vmatmul.msk.f32.gmra.mxu3 %vm136_vm0, %v2800_v6  ;;  %v449_v14 = vadd.f32 %v3359_v4, %v448_v8  ;;  %v1153_v15 = vadd.f32 %v3359_v4, %v1152_v10  ;;  %v48_v6 = vld [vmem:[%s5284_s0 + $0x90] sm:$0xff] }
  0x90   :  { %v1448_v17 = vmul.f32 %v3367_v7, %v449_v14  ;;  %v2041_v18 = vmul.f32 %v3369_v9, %v449_v14  ;;  %v1548_v19 = vmul.f32 %v3371_v11, %v1153_v15  ;;  %v2141_v20 = vmul.f32 %v3373_v12, %v1153_v15  ;;  %2653 = vmatmul.msk.f32.gmra.mxu0 %vm136_vm0, %v46_v13  ;;  %v2753_v14 = vld [vmem:[%s5284_s0 + $0x3a0] sm:$0xff] }
  0x91   :  { %v595_v21 = vpop.f32.mrf.mxu2  ;;  %v1299_v22 = vpop.f32.mrf.mxu3  ;;  %2849 = vmatmul.msk.f32.gmra.mxu1 %vm136_vm0, %v2751_v16 }
  0x92   :  { %v596_v23 = vadd.f32 %v3359_v4, %v595_v21  ;;  %v1646_v24 = vadd.f32 %v1548_v19, %v1448_v17  ;;  %v2239_v25 = vadd.f32 %v2141_v20, %v2041_v18  ;;  %v1300_v26 = vadd.f32 %v3359_v4, %v1299_v22 }
  0x94   :  { %v1497_v29 = vmul.f32 %v3367_v7, %v596_v23  ;;  %v2090_v30 = vmul.f32 %v3369_v9, %v596_v23  ;;  %v1744_v31 = vmax.f32 %v1646_v24, 0.0  ;;  %v2337_v32 = vmax.f32 %v2239_v25, 0.0 }
  0x95   :  { %v1597_v33 = vmul.f32 %v3371_v11, %v1300_v26  ;;  %v2190_v34 = vmul.f32 %v3373_v12, %v1300_v26  ;;  %v451_v35 = vpop.f32.mrf.mxu0  ;;  %v1155_v36 = vpop.f32.mrf.mxu1 }
  0x96   :  { %v1842_v38 = vpack.c.bf16 %v1744_v31, %v1744_v31  ;;  %v2435_v39 = vpack.c.bf16 %v2337_v32, %v2337_v32  ;;  %2703 = vmatmul.msk.f32.gmra.mxu2 %vm136_vm0, %v96_v27  ;;  %2899 = vmatmul.msk.f32.gmra.mxu3 %vm136_vm0, %v2801_v28  ;;  %v452_v40 = vadd.f32 %v3359_v4, %v451_v35  ;;  %v98_v32 = vld [vmem:[%s5284_s0 + $0x220] sm:$0xff] }
  0x97   :  { %v1695_v42 = vadd.f32 %v1597_v33, %v1497_v29  ;;  %v2288_v43 = vadd.f32 %v2190_v34, %v2090_v30  ;;  %v1156_v44 = vadd.f32 %v3359_v4, %v1155_v36  ;;  %v2803_v33 = vld [vmem:[%s5284_s0 + $0x530] sm:$0xff] }
  0x98   :  { %1941 = vst.msk [vmem:[%s5288_s4] sm:$0xf] %vm1940_vm1, %v1842_v38  ;;  %v1449_v45 = vmul.f32 %v3367_v7, %v452_v40  ;;  %v2042_v46 = vmul.f32 %v3369_v9, %v452_v40  ;;  %2654 = vmatmul.msk.f32.gmra.mxu0 %vm136_vm0, %v47_v37 }
  0x99   :  { %2934 = vst.msk [vmem:[%s5288_s4 + $0x188] sm:$0xf] %vm1940_vm1, %v2435_v39  ;;  %v1793_v47 = vmax.f32 %v1695_v42, 0.0  ;;  %v2386_v48 = vmax.f32 %v2288_v43, 0.0  ;;  %v598_v49 = vpop.f32.mrf.mxu2  ;;  %v1549_v50 = vmul.f32 %v3371_v11, %v1156_v44  ;;  %v2142_v51 = vmul.f32 %v3373_v12, %v1156_v44  ;;  %v1302_v52 = vpop.f32.mrf.mxu3  ;;  %2850 = vmatmul.msk.f32.gmra.mxu1 %vm136_vm0, %v2752_v41  ;;  %v49_v42 = vld [vmem:[%s5284_s0 + $0x98] sm:$0xff] }
  0x9a   :  { %v599_v53 = vadd.f32 %v3359_v4, %v598_v49  ;;  %v1303_v54 = vadd.f32 %v3359_v4, %v1302_v52 }
  0x9b   :  { %v1891_v55 = vpack.c.bf16 %v1793_v47, %v1793_v47  ;;  %v2484_v56 = vpack.c.bf16 %v2386_v48, %v2386_v48  ;;  %v1647_v57 = vadd.f32 %v1549_v50, %v1449_v45  ;;  %v2240_v58 = vadd.f32 %v2142_v51, %v2042_v46  ;;  %v2754_v46 = vld [vmem:[%s5284_s0 + $0x3a8] sm:$0xff] }
  0x9c   :  { %v1498_v61 = vmul.f32 %v3367_v7, %v599_v53  ;;  %v2091_v62 = vmul.f32 %v3369_v9, %v599_v53  ;;  %v1598_v63 = vmul.f32 %v3371_v11, %v1303_v54  ;;  %v2191_v0 = vmul.f32 %v3373_v12, %v1303_v54 }
  0x9d   :  { %1990 = vst.msk [vmem:[%s5288_s4 + $0xc4] sm:$0xf] %vm1940_vm1, %v1891_v55  ;;  %v1745_v1 = vmax.f32 %v1647_v57, 0.0  ;;  %v2338_v2 = vmax.f32 %v2240_v58, 0.0  ;;  %v454_v3 = vpop.f32.mrf.mxu0  ;;  %v1158_v5 = vpop.f32.mrf.mxu1 }
  0x9e   :  { %2983 = vst.msk [vmem:[%s5288_s4 + $0x24c] sm:$0xf] %vm1940_vm1, %v2484_v56  ;;  %v1696_v8 = vadd.f32 %v1598_v63, %v1498_v61  ;;  %v2289_v10 = vadd.f32 %v2191_v0, %v2091_v62  ;;  %2704 = vmatmul.msk.f32.gmra.mxu2 %vm136_vm0, %v97_v59  ;;  %2900 = vmatmul.msk.f32.gmra.mxu3 %vm136_vm0, %v2802_v60  ;;  %v99_v0 = vld [vmem:[%s5284_s0 + $0x228] sm:$0xff] }
  0x9f   :  { %v455_v13 = vadd.f32 %v3359_v4, %v454_v3  ;;  %v1843_v15 = vpack.c.bf16 %v1745_v1, %v1745_v1  ;;  %v2436_v16 = vpack.c.bf16 %v2338_v2, %v2338_v2  ;;  %v1159_v17 = vadd.f32 %v3359_v4, %v1158_v5  ;;  %v2804_v1 = vld [vmem:[%s5284_s0 + $0x538] sm:$0xff] }
  0xa0   :  { %v1794_v18 = vmax.f32 %v1696_v8, 0.0  ;;  %v2387_v19 = vmax.f32 %v2289_v10, 0.0  ;;  %2655 = vmatmul.msk.f32.gmra.mxu0 %vm136_vm0, %v48_v6 }
  0xa1   :  { %v1450_v20 = vmul.f32 %v3367_v7, %v455_v13  ;;  %v2043_v21 = vmul.f32 %v3369_v9, %v455_v13  ;;  %1942 = vst.msk [vmem:[%s5288_s4 + $0x4] sm:$0xf] %vm1940_vm1, %v1843_v15  ;;  %v601_v22 = vpop.f32.mrf.mxu2  ;;  %v1550_v23 = vmul.f32 %v3371_v11, %v1159_v17  ;;  %v2143_v24 = vmul.f32 %v3373_v12, %v1159_v17  ;;  %v1305_v25 = vpop.f32.mrf.mxu3  ;;  %v50_v15 = vld [vmem:[%s5284_s0 + $0xa0] sm:$0xff] }
  0xa2   :  { %2851 = vmatmul.msk.f32.gmra.mxu1 %vm136_vm0, %v2753_v14  ;;  %2935 = vst.msk [vmem:[%s5288_s4 + $0x18c] sm:$0xf] %vm1940_vm1, %v2436_v16  ;;  %v1892_v26 = vpack.c.bf16 %v1794_v18, %v1794_v18  ;;  %v2485_v27 = vpack.c.bf16 %v2387_v19, %v2387_v19  ;;  %v602_v28 = vadd.f32 %v3359_v4, %v601_v22  ;;  %v2755_v19 = vld [vmem:[%s5284_s0 + $0x3b0] sm:$0xff] }
  0xa3   :  { %v1306_v29 = vadd.f32 %v3359_v4, %v1305_v25  ;;  %v1648_v30 = vadd.f32 %v1550_v23, %v1450_v20  ;;  %v2241_v31 = vadd.f32 %v2143_v24, %v2043_v21 }
  0xa4   :  { %1991 = vst.msk [vmem:[%s5288_s4 + $0xc8] sm:$0xf] %vm1940_vm1, %v1892_v26  ;;  %v1499_v34 = vmul.f32 %v3367_v7, %v602_v28  ;;  %v2092_v35 = vmul.f32 %v3369_v9, %v602_v28 }
  0xa5   :  { %v1599_v36 = vmul.f32 %v3371_v11, %v1306_v29  ;;  %v2192_v37 = vmul.f32 %v3373_v12, %v1306_v29  ;;  %2984 = vst.msk [vmem:[%s5288_s4 + $0x250] sm:$0xf] %vm1940_vm1, %v2485_v27  ;;  %v1746_v38 = vmax.f32 %v1648_v30, 0.0  ;;  %v2339_v39 = vmax.f32 %v2241_v31, 0.0  ;;  %v457_v40 = vpop.f32.mrf.mxu0  ;;  %v1161_v41 = vpop.f32.mrf.mxu1 }
  0xa6   :  { %2705 = vmatmul.msk.f32.gmra.mxu2 %vm136_vm0, %v98_v32  ;;  %2901 = vmatmul.msk.f32.gmra.mxu3 %vm136_vm0, %v2803_v33  ;;  %v458_v45 = vadd.f32 %v3359_v4, %v457_v40  ;;  %v1162_v49 = vadd.f32 %v3359_v4, %v1161_v41 }
  0xa7   :  { %v1697_v43 = vadd.f32 %v1599_v36, %v1499_v34  ;;  %v2290_v44 = vadd.f32 %v2192_v37, %v2092_v35  ;;  %v1844_v47 = vpack.c.bf16 %v1746_v38, %v1746_v38  ;;  %v2437_v48 = vpack.c.bf16 %v2339_v39, %v2339_v39  ;;  %v100_v37 = vld [vmem:[%s5284_s0 + $0x230] sm:$0xff]  ;;  %v2805_v38 = vld [vmem:[%s5284_s0 + $0x540] sm:$0xff] }
  0xa8   :  { %v1451_v52 = vmul.f32 %v3367_v7, %v458_v45  ;;  %v2044_v53 = vmul.f32 %v3369_v9, %v458_v45  ;;  %2656 = vmatmul.msk.f32.gmra.mxu0 %vm136_vm0, %v49_v42  ;;  %v1551_v55 = vmul.f32 %v3371_v11, %v1162_v49  ;;  %v2144_v56 = vmul.f32 %v3373_v12, %v1162_v49 }
  0xa9   :  { %v1795_v50 = vmax.f32 %v1697_v43, 0.0  ;;  %v2388_v51 = vmax.f32 %v2290_v44, 0.0  ;;  %1943 = vst.msk [vmem:[%s5288_s4 + $0x8] sm:$0xf] %vm1940_vm1, %v1844_v47  ;;  %v604_v54 = vpop.f32.mrf.mxu2  ;;  %v1308_v57 = vpop.f32.mrf.mxu3  ;;  %v51_v47 = vld [vmem:[%s5284_s0 + $0xa8] sm:$0xff] }
  0xaa   :  { %2852 = vmatmul.msk.f32.gmra.mxu1 %vm136_vm0, %v2754_v46  ;;  %2936 = vst.msk [vmem:[%s5288_s4 + $0x190] sm:$0xf] %vm1940_vm1, %v2437_v48  ;;  %v605_v60 = vadd.f32 %v3359_v4, %v604_v54  ;;  %v1309_v61 = vadd.f32 %v3359_v4, %v1308_v57  ;;  %v1649_v62 = vadd.f32 %v1551_v55, %v1451_v52 }
  0xab   :  { %v1893_v58 = vpack.c.bf16 %v1795_v50, %v1795_v50  ;;  %v2486_v59 = vpack.c.bf16 %v2388_v51, %v2388_v51  ;;  %v2242_v63 = vadd.f32 %v2144_v56, %v2044_v53  ;;  %v2756_v51 = vld [vmem:[%s5284_s0 + $0x3b8] sm:$0xff] }
  0xac   :  { %v1500_v2 = vmul.f32 %v3367_v7, %v605_v60  ;;  %v2093_v3 = vmul.f32 %v3369_v9, %v605_v60  ;;  %v1600_v5 = vmul.f32 %v3371_v11, %v1309_v61  ;;  %v2193_v6 = vmul.f32 %v3373_v12, %v1309_v61 }
  0xad   :  { %1992 = vst.msk [vmem:[%s5288_s4 + $0xcc] sm:$0xf] %vm1940_vm1, %v1893_v58  ;;  %v1747_v8 = vmax.f32 %v1649_v62, 0.0  ;;  %v2340_v10 = vmax.f32 %v2242_v63, 0.0  ;;  %v460_v13 = vpop.f32.mrf.mxu0  ;;  %v1164_v14 = vpop.f32.mrf.mxu1 }
  0xae   :  { %2985 = vst.msk [vmem:[%s5288_s4 + $0x254] sm:$0xf] %vm1940_vm1, %v2486_v59  ;;  %v1698_v16 = vadd.f32 %v1600_v5, %v1500_v2  ;;  %v2291_v17 = vadd.f32 %v2193_v6, %v2093_v3  ;;  %2706 = vmatmul.msk.f32.gmra.mxu2 %vm136_vm0, %v99_v0  ;;  %2902 = vmatmul.msk.f32.gmra.mxu3 %vm136_vm0, %v2804_v1  ;;  %v101_v6 = vld [vmem:[%s5284_s0 + $0x238] sm:$0xff] }
  0xaf   :  { %v461_v18 = vadd.f32 %v3359_v4, %v460_v13  ;;  %v1845_v20 = vpack.c.bf16 %v1747_v8, %v1747_v8  ;;  %v2438_v21 = vpack.c.bf16 %v2340_v10, %v2340_v10  ;;  %v1165_v22 = vadd.f32 %v3359_v4, %v1164_v14  ;;  %v2806_v8 = vld [vmem:[%s5284_s0 + $0x548] sm:$0xff] }
  0xb0   :  { %v1796_v23 = vmax.f32 %v1698_v16, 0.0  ;;  %v2389_v24 = vmax.f32 %v2291_v17, 0.0  ;;  %2657 = vmatmul.msk.f32.gmra.mxu0 %vm136_vm0, %v50_v15 }
  0xb1   :  { %v1452_v25 = vmul.f32 %v3367_v7, %v461_v18  ;;  %v2045_v26 = vmul.f32 %v3369_v9, %v461_v18  ;;  %1944 = vst.msk [vmem:[%s5288_s4 + $0xc] sm:$0xf] %vm1940_vm1, %v1845_v20  ;;  %v607_v27 = vpop.f32.mrf.mxu2  ;;  %v1552_v28 = vmul.f32 %v3371_v11, %v1165_v22  ;;  %v2145_v29 = vmul.f32 %v3373_v12, %v1165_v22  ;;  %v1311_v30 = vpop.f32.mrf.mxu3  ;;  %v52_v20 = vld [vmem:[%s5284_s0 + $0xb0] sm:$0xff] }
  0xb2   :  { %2853 = vmatmul.msk.f32.gmra.mxu1 %vm136_vm0, %v2755_v19  ;;  %2937 = vst.msk [vmem:[%s5288_s4 + $0x194] sm:$0xf] %vm1940_vm1, %v2438_v21  ;;  %v1894_v31 = vpack.c.bf16 %v1796_v23, %v1796_v23  ;;  %v2487_v32 = vpack.c.bf16 %v2389_v24, %v2389_v24  ;;  %v608_v33 = vadd.f32 %v3359_v4, %v607_v27  ;;  %v2757_v24 = vld [vmem:[%s5284_s0 + $0x3c0] sm:$0xff] }
  0xb3   :  { %v1312_v34 = vadd.f32 %v3359_v4, %v1311_v30  ;;  %v1650_v35 = vadd.f32 %v1552_v28, %v1452_v25  ;;  %v2243_v36 = vadd.f32 %v2145_v29, %v2045_v26 }
  0xb4   :  { %1993 = vst.msk [vmem:[%s5288_s4 + $0xd0] sm:$0xf] %vm1940_vm1, %v1894_v31  ;;  %v1501_v39 = vmul.f32 %v3367_v7, %v608_v33  ;;  %v2094_v40 = vmul.f32 %v3369_v9, %v608_v33 }
  0xb5   :  { %v1601_v41 = vmul.f32 %v3371_v11, %v1312_v34  ;;  %v2194_v42 = vmul.f32 %v3373_v12, %v1312_v34  ;;  %2986 = vst.msk [vmem:[%s5288_s4 + $0x258] sm:$0xf] %vm1940_vm1, %v2487_v32  ;;  %v1748_v43 = vmax.f32 %v1650_v35, 0.0  ;;  %v2341_v44 = vmax.f32 %v2243_v36, 0.0  ;;  %v463_v45 = vpop.f32.mrf.mxu0  ;;  %v1167_v46 = vpop.f32.mrf.mxu1 }
  0xb6   :  { %2707 = vmatmul.msk.f32.gmra.mxu2 %vm136_vm0, %v100_v37  ;;  %2903 = vmatmul.msk.f32.gmra.mxu3 %vm136_vm0, %v2805_v38  ;;  %v464_v50 = vadd.f32 %v3359_v4, %v463_v45  ;;  %v1168_v54 = vadd.f32 %v3359_v4, %v1167_v46 }
  0xb7   :  { %v1699_v48 = vadd.f32 %v1601_v41, %v1501_v39  ;;  %v2292_v49 = vadd.f32 %v2194_v42, %v2094_v40  ;;  %v1846_v52 = vpack.c.bf16 %v1748_v43, %v1748_v43  ;;  %v2439_v53 = vpack.c.bf16 %v2341_v44, %v2341_v44  ;;  %v102_v42 = vld [vmem:[%s5284_s0 + $0x240] sm:$0xff]  ;;  %v2807_v43 = vld [vmem:[%s5284_s0 + $0x550] sm:$0xff] }
  0xb8   :  { %v1453_v57 = vmul.f32 %v3367_v7, %v464_v50  ;;  %v2046_v58 = vmul.f32 %v3369_v9, %v464_v50  ;;  %2658 = vmatmul.msk.f32.gmra.mxu0 %vm136_vm0, %v51_v47  ;;  %v1553_v60 = vmul.f32 %v3371_v11, %v1168_v54  ;;  %v2146_v61 = vmul.f32 %v3373_v12, %v1168_v54 }
  0xb9   :  { %v1797_v55 = vmax.f32 %v1699_v48, 0.0  ;;  %v2390_v56 = vmax.f32 %v2292_v49, 0.0  ;;  %1945 = vst.msk [vmem:[%s5288_s4 + $0x10] sm:$0xf] %vm1940_vm1, %v1846_v52  ;;  %v610_v59 = vpop.f32.mrf.mxu2  ;;  %v1314_v62 = vpop.f32.mrf.mxu3  ;;  %v53_v52 = vld [vmem:[%s5284_s0 + $0xb8] sm:$0xff] }
  0xba   :  { %2854 = vmatmul.msk.f32.gmra.mxu1 %vm136_vm0, %v2756_v51  ;;  %2938 = vst.msk [vmem:[%s5288_s4 + $0x198] sm:$0xf] %vm1940_vm1, %v2439_v53  ;;  %v611_v1 = vadd.f32 %v3359_v4, %v610_v59  ;;  %v1315_v2 = vadd.f32 %v3359_v4, %v1314_v62  ;;  %v1651_v3 = vadd.f32 %v1553_v60, %v1453_v57 }
  0xbb   :  { %v1895_v63 = vpack.c.bf16 %v1797_v55, %v1797_v55  ;;  %v2488_v0 = vpack.c.bf16 %v2390_v56, %v2390_v56  ;;  %v2244_v5 = vadd.f32 %v2146_v61, %v2046_v58  ;;  %v2758_v56 = vld [vmem:[%s5284_s0 + $0x3c8] sm:$0xff] }
  0xbc   :  { %v1502_v10 = vmul.f32 %v3367_v7, %v611_v1  ;;  %v2095_v13 = vmul.f32 %v3369_v9, %v611_v1  ;;  %v1602_v14 = vmul.f32 %v3371_v11, %v1315_v2  ;;  %v2195_v15 = vmul.f32 %v3373_v12, %v1315_v2 }
  0xbd   :  { %1994 = vst.msk [vmem:[%s5288_s4 + $0xd4] sm:$0xf] %vm1940_vm1, %v1895_v63  ;;  %v1749_v16 = vmax.f32 %v1651_v3, 0.0  ;;  %v2342_v17 = vmax.f32 %v2244_v5, 0.0  ;;  %v466_v18 = vpop.f32.mrf.mxu0  ;;  %v1170_v19 = vpop.f32.mrf.mxu1 }
  0xbe   :  { %2987 = vst.msk [vmem:[%s5288_s4 + $0x25c] sm:$0xf] %vm1940_vm1, %v2488_v0  ;;  %v1700_v21 = vadd.f32 %v1602_v14, %v1502_v10  ;;  %v2293_v22 = vadd.f32 %v2195_v15, %v2095_v13  ;;  %2708 = vmatmul.msk.f32.gmra.mxu2 %vm136_vm0, %v101_v6  ;;  %2904 = vmatmul.msk.f32.gmra.mxu3 %vm136_vm0, %v2806_v8  ;;  %v103_v15 = vld [vmem:[%s5284_s0 + $0x248] sm:$0xff] }
  0xbf   :  { %v467_v23 = vadd.f32 %v3359_v4, %v466_v18  ;;  %v1847_v25 = vpack.c.bf16 %v1749_v16, %v1749_v16  ;;  %v2440_v26 = vpack.c.bf16 %v2342_v17, %v2342_v17  ;;  %v1171_v27 = vadd.f32 %v3359_v4, %v1170_v19  ;;  %v2808_v16 = vld [vmem:[%s5284_s0 + $0x558] sm:$0xff] }
  0xc0   :  { %v1798_v28 = vmax.f32 %v1700_v21, 0.0  ;;  %v2391_v29 = vmax.f32 %v2293_v22, 0.0  ;;  %2659 = vmatmul.msk.f32.gmra.mxu0 %vm136_vm0, %v52_v20 }
  0xc1   :  { %v1454_v30 = vmul.f32 %v3367_v7, %v467_v23  ;;  %v2047_v31 = vmul.f32 %v3369_v9, %v467_v23  ;;  %1946 = vst.msk [vmem:[%s5288_s4 + $0x14] sm:$0xf] %vm1940_vm1, %v1847_v25  ;;  %v613_v32 = vpop.f32.mrf.mxu2  ;;  %v1554_v33 = vmul.f32 %v3371_v11, %v1171_v27  ;;  %v2147_v34 = vmul.f32 %v3373_v12, %v1171_v27  ;;  %v1317_v35 = vpop.f32.mrf.mxu3  ;;  %v54_v25 = vld [vmem:[%s5284_s0 + $0xc0] sm:$0xff] }
  0xc2   :  { %2855 = vmatmul.msk.f32.gmra.mxu1 %vm136_vm0, %v2757_v24  ;;  %2939 = vst.msk [vmem:[%s5288_s4 + $0x19c] sm:$0xf] %vm1940_vm1, %v2440_v26  ;;  %v1896_v36 = vpack.c.bf16 %v1798_v28, %v1798_v28  ;;  %v2489_v37 = vpack.c.bf16 %v2391_v29, %v2391_v29  ;;  %v614_v38 = vadd.f32 %v3359_v4, %v613_v32  ;;  %v2759_v29 = vld [vmem:[%s5284_s0 + $0x3d0] sm:$0xff] }
  0xc3   :  { %v1318_v39 = vadd.f32 %v3359_v4, %v1317_v35  ;;  %v1652_v40 = vadd.f32 %v1554_v33, %v1454_v30  ;;  %v2245_v41 = vadd.f32 %v2147_v34, %v2047_v31 }
  0xc4   :  { %1995 = vst.msk [vmem:[%s5288_s4 + $0xd8] sm:$0xf] %vm1940_vm1, %v1896_v36  ;;  %v1503_v44 = vmul.f32 %v3367_v7, %v614_v38  ;;  %v2096_v45 = vmul.f32 %v3369_v9, %v614_v38 }
  0xc5   :  { %v1603_v46 = vmul.f32 %v3371_v11, %v1318_v39  ;;  %v2196_v47 = vmul.f32 %v3373_v12, %v1318_v39  ;;  %2988 = vst.msk [vmem:[%s5288_s4 + $0x260] sm:$0xf] %vm1940_vm1, %v2489_v37  ;;  %v1750_v48 = vmax.f32 %v1652_v40, 0.0  ;;  %v2343_v49 = vmax.f32 %v2245_v41, 0.0  ;;  %v469_v50 = vpop.f32.mrf.mxu0  ;;  %v1173_v51 = vpop.f32.mrf.mxu1 }
  0xc6   :  { %2709 = vmatmul.msk.f32.gmra.mxu2 %vm136_vm0, %v102_v42  ;;  %2905 = vmatmul.msk.f32.gmra.mxu3 %vm136_vm0, %v2807_v43  ;;  %v470_v55 = vadd.f32 %v3359_v4, %v469_v50  ;;  %v1174_v59 = vadd.f32 %v3359_v4, %v1173_v51 }
  0xc7   :  { %v1701_v53 = vadd.f32 %v1603_v46, %v1503_v44  ;;  %v2294_v54 = vadd.f32 %v2196_v47, %v2096_v45  ;;  %v1848_v57 = vpack.c.bf16 %v1750_v48, %v1750_v48  ;;  %v2441_v58 = vpack.c.bf16 %v2343_v49, %v2343_v49  ;;  %v104_v47 = vld [vmem:[%s5284_s0 + $0x250] sm:$0xff]  ;;  %v2809_v48 = vld [vmem:[%s5284_s0 + $0x560] sm:$0xff] }
  0xc8   :  { %v1455_v62 = vmul.f32 %v3367_v7, %v470_v55  ;;  %v2048_v63 = vmul.f32 %v3369_v9, %v470_v55  ;;  %2660 = vmatmul.msk.f32.gmra.mxu0 %vm136_vm0, %v53_v52  ;;  %v1555_v1 = vmul.f32 %v3371_v11, %v1174_v59  ;;  %v2148_v2 = vmul.f32 %v3373_v12, %v1174_v59 }
  0xc9   :  { %v1799_v60 = vmax.f32 %v1701_v53, 0.0  ;;  %v2392_v61 = vmax.f32 %v2294_v54, 0.0  ;;  %1947 = vst.msk [vmem:[%s5288_s4 + $0x18] sm:$0xf] %vm1940_vm1, %v1848_v57  ;;  %v616_v0 = vpop.f32.mrf.mxu2  ;;  %v1320_v3 = vpop.f32.mrf.mxu3  ;;  %v55_v57 = vld [vmem:[%s5284_s0 + $0xc8] sm:$0xff] }
  0xca   :  { %2856 = vmatmul.msk.f32.gmra.mxu1 %vm136_vm0, %v2758_v56  ;;  %2940 = vst.msk [vmem:[%s5288_s4 + $0x1a0] sm:$0xf] %vm1940_vm1, %v2441_v58  ;;  %v617_v8 = vadd.f32 %v3359_v4, %v616_v0  ;;  %v1321_v10 = vadd.f32 %v3359_v4, %v1320_v3  ;;  %v1653_v13 = vadd.f32 %v1555_v1, %v1455_v62 }
  0xcb   :  { %v1897_v5 = vpack.c.bf16 %v1799_v60, %v1799_v60  ;;  %v2490_v6 = vpack.c.bf16 %v2392_v61, %v2392_v61  ;;  %v2246_v14 = vadd.f32 %v2148_v2, %v2048_v63  ;;  %v2760_v61 = vld [vmem:[%s5284_s0 + $0x3d8] sm:$0xff] }
  0xcc   :  { %v1504_v17 = vmul.f32 %v3367_v7, %v617_v8  ;;  %v2097_v18 = vmul.f32 %v3369_v9, %v617_v8  ;;  %v1604_v19 = vmul.f32 %v3371_v11, %v1321_v10  ;;  %v2197_v20 = vmul.f32 %v3373_v12, %v1321_v10 }
  0xcd   :  { %1996 = vst.msk [vmem:[%s5288_s4 + $0xdc] sm:$0xf] %vm1940_vm1, %v1897_v5  ;;  %v1751_v21 = vmax.f32 %v1653_v13, 0.0  ;;  %v2344_v22 = vmax.f32 %v2246_v14, 0.0  ;;  %v472_v23 = vpop.f32.mrf.mxu0  ;;  %v1176_v24 = vpop.f32.mrf.mxu1 }
  0xce   :  { %2989 = vst.msk [vmem:[%s5288_s4 + $0x264] sm:$0xf] %vm1940_vm1, %v2490_v6  ;;  %v1702_v26 = vadd.f32 %v1604_v19, %v1504_v17  ;;  %v2295_v27 = vadd.f32 %v2197_v20, %v2097_v18  ;;  %2710 = vmatmul.msk.f32.gmra.mxu2 %vm136_vm0, %v103_v15  ;;  %2906 = vmatmul.msk.f32.gmra.mxu3 %vm136_vm0, %v2808_v16  ;;  %v105_v20 = vld [vmem:[%s5284_s0 + $0x258] sm:$0xff] }
  0xcf   :  { %v473_v28 = vadd.f32 %v3359_v4, %v472_v23  ;;  %v1849_v30 = vpack.c.bf16 %v1751_v21, %v1751_v21  ;;  %v2442_v31 = vpack.c.bf16 %v2344_v22, %v2344_v22  ;;  %v1177_v32 = vadd.f32 %v3359_v4, %v1176_v24  ;;  %v2810_v21 = vld [vmem:[%s5284_s0 + $0x568] sm:$0xff] }
  0xd0   :  { %v1800_v33 = vmax.f32 %v1702_v26, 0.0  ;;  %v2393_v34 = vmax.f32 %v2295_v27, 0.0  ;;  %2661 = vmatmul.msk.f32.gmra.mxu0 %vm136_vm0, %v54_v25 }
  0xd1   :  { %v1456_v35 = vmul.f32 %v3367_v7, %v473_v28  ;;  %v2049_v36 = vmul.f32 %v3369_v9, %v473_v28  ;;  %1948 = vst.msk [vmem:[%s5288_s4 + $0x1c] sm:$0xf] %vm1940_vm1, %v1849_v30  ;;  %v619_v37 = vpop.f32.mrf.mxu2  ;;  %v1556_v38 = vmul.f32 %v3371_v11, %v1177_v32  ;;  %v2149_v39 = vmul.f32 %v3373_v12, %v1177_v32  ;;  %v1323_v40 = vpop.f32.mrf.mxu3  ;;  %v56_v30 = vld [vmem:[%s5284_s0 + $0xd0] sm:$0xff] }
  0xd2   :  { %2857 = vmatmul.msk.f32.gmra.mxu1 %vm136_vm0, %v2759_v29  ;;  %2941 = vst.msk [vmem:[%s5288_s4 + $0x1a4] sm:$0xf] %vm1940_vm1, %v2442_v31  ;;  %v1898_v41 = vpack.c.bf16 %v1800_v33, %v1800_v33  ;;  %v2491_v42 = vpack.c.bf16 %v2393_v34, %v2393_v34  ;;  %v620_v43 = vadd.f32 %v3359_v4, %v619_v37  ;;  %v2761_v34 = vld [vmem:[%s5284_s0 + $0x3e0] sm:$0xff] }
  0xd3   :  { %v1324_v44 = vadd.f32 %v3359_v4, %v1323_v40  ;;  %v1654_v45 = vadd.f32 %v1556_v38, %v1456_v35  ;;  %v2247_v46 = vadd.f32 %v2149_v39, %v2049_v36 }
  0xd4   :  { %1997 = vst.msk [vmem:[%s5288_s4 + $0xe0] sm:$0xf] %vm1940_vm1, %v1898_v41  ;;  %v1505_v49 = vmul.f32 %v3367_v7, %v620_v43  ;;  %v2098_v50 = vmul.f32 %v3369_v9, %v620_v43 }
  0xd5   :  { %v1605_v51 = vmul.f32 %v3371_v11, %v1324_v44  ;;  %v2198_v52 = vmul.f32 %v3373_v12, %v1324_v44  ;;  %2990 = vst.msk [vmem:[%s5288_s4 + $0x268] sm:$0xf] %vm1940_vm1, %v2491_v42  ;;  %v1752_v53 = vmax.f32 %v1654_v45, 0.0  ;;  %v2345_v54 = vmax.f32 %v2247_v46, 0.0  ;;  %v475_v55 = vpop.f32.mrf.mxu0  ;;  %v1179_v56 = vpop.f32.mrf.mxu1 }
  0xd6   :  { %2711 = vmatmul.msk.f32.gmra.mxu2 %vm136_vm0, %v104_v47  ;;  %2907 = vmatmul.msk.f32.gmra.mxu3 %vm136_vm0, %v2809_v48  ;;  %v476_v60 = vadd.f32 %v3359_v4, %v475_v55  ;;  %v1180_v0 = vadd.f32 %v3359_v4, %v1179_v56 }
  0xd7   :  { %v1703_v58 = vadd.f32 %v1605_v51, %v1505_v49  ;;  %v2296_v59 = vadd.f32 %v2198_v52, %v2098_v50  ;;  %v1850_v62 = vpack.c.bf16 %v1752_v53, %v1752_v53  ;;  %v2443_v63 = vpack.c.bf16 %v2345_v54, %v2345_v54  ;;  %v106_v52 = vld [vmem:[%s5284_s0 + $0x260] sm:$0xff]  ;;  %v2811_v53 = vld [vmem:[%s5284_s0 + $0x570] sm:$0xff] }
  0xd8   :  { %v1457_v3 = vmul.f32 %v3367_v7, %v476_v60  ;;  %v2050_v5 = vmul.f32 %v3369_v9, %v476_v60  ;;  %2662 = vmatmul.msk.f32.gmra.mxu0 %vm136_vm0, %v55_v57  ;;  %v1557_v8 = vmul.f32 %v3371_v11, %v1180_v0  ;;  %v2150_v10 = vmul.f32 %v3373_v12, %v1180_v0 }
  0xd9   :  { %v1801_v1 = vmax.f32 %v1703_v58, 0.0  ;;  %v2394_v2 = vmax.f32 %v2296_v59, 0.0  ;;  %1949 = vst.msk [vmem:[%s5288_s4 + $0x20] sm:$0xf] %vm1940_vm1, %v1850_v62  ;;  %v622_v6 = vpop.f32.mrf.mxu2  ;;  %v1326_v13 = vpop.f32.mrf.mxu3  ;;  %v57_v62 = vld [vmem:[%s5284_s0 + $0xd8] sm:$0xff] }
  0xda   :  { %2858 = vmatmul.msk.f32.gmra.mxu1 %vm136_vm0, %v2760_v61  ;;  %2942 = vst.msk [vmem:[%s5288_s4 + $0x1a8] sm:$0xf] %vm1940_vm1, %v2443_v63  ;;  %v623_v16 = vadd.f32 %v3359_v4, %v622_v6  ;;  %v1327_v17 = vadd.f32 %v3359_v4, %v1326_v13  ;;  %v1655_v18 = vadd.f32 %v1557_v8, %v1457_v3 }
  0xdb   :  { %v1899_v14 = vpack.c.bf16 %v1801_v1, %v1801_v1  ;;  %v2492_v15 = vpack.c.bf16 %v2394_v2, %v2394_v2  ;;  %v2248_v19 = vadd.f32 %v2150_v10, %v2050_v5  ;;  %v2762_v2 = vld [vmem:[%s5284_s0 + $0x3e8] sm:$0xff] }
  0xdc   :  { %v1506_v22 = vmul.f32 %v3367_v7, %v623_v16  ;;  %v2099_v23 = vmul.f32 %v3369_v9, %v623_v16  ;;  %v1606_v24 = vmul.f32 %v3371_v11, %v1327_v17  ;;  %v2199_v25 = vmul.f32 %v3373_v12, %v1327_v17 }
  0xdd   :  { %1998 = vst.msk [vmem:[%s5288_s4 + $0xe4] sm:$0xf] %vm1940_vm1, %v1899_v14  ;;  %v1753_v26 = vmax.f32 %v1655_v18, 0.0  ;;  %v2346_v27 = vmax.f32 %v2248_v19, 0.0  ;;  %v478_v28 = vpop.f32.mrf.mxu0  ;;  %v1182_v29 = vpop.f32.mrf.mxu1 }
  0xde   :  { %2991 = vst.msk [vmem:[%s5288_s4 + $0x26c] sm:$0xf] %vm1940_vm1, %v2492_v15  ;;  %v1704_v31 = vadd.f32 %v1606_v24, %v1506_v22  ;;  %v2297_v32 = vadd.f32 %v2199_v25, %v2099_v23  ;;  %2712 = vmatmul.msk.f32.gmra.mxu2 %vm136_vm0, %v105_v20  ;;  %2908 = vmatmul.msk.f32.gmra.mxu3 %vm136_vm0, %v2810_v21  ;;  %v107_v25 = vld [vmem:[%s5284_s0 + $0x268] sm:$0xff] }
  0xdf   :  { %v479_v33 = vadd.f32 %v3359_v4, %v478_v28  ;;  %v1851_v35 = vpack.c.bf16 %v1753_v26, %v1753_v26  ;;  %v2444_v36 = vpack.c.bf16 %v2346_v27, %v2346_v27  ;;  %v1183_v37 = vadd.f32 %v3359_v4, %v1182_v29  ;;  %v2812_v26 = vld [vmem:[%s5284_s0 + $0x578] sm:$0xff] }
  0xe0   :  { %v1802_v38 = vmax.f32 %v1704_v31, 0.0  ;;  %v2395_v39 = vmax.f32 %v2297_v32, 0.0  ;;  %2663 = vmatmul.msk.f32.gmra.mxu0 %vm136_vm0, %v56_v30 }
  0xe1   :  { %v1458_v40 = vmul.f32 %v3367_v7, %v479_v33  ;;  %v2051_v41 = vmul.f32 %v3369_v9, %v479_v33  ;;  %1950 = vst.msk [vmem:[%s5288_s4 + $0x24] sm:$0xf] %vm1940_vm1, %v1851_v35  ;;  %v625_v42 = vpop.f32.mrf.mxu2  ;;  %v1558_v43 = vmul.f32 %v3371_v11, %v1183_v37  ;;  %v2151_v44 = vmul.f32 %v3373_v12, %v1183_v37  ;;  %v1329_v45 = vpop.f32.mrf.mxu3  ;;  %v58_v35 = vld [vmem:[%s5284_s0 + $0xe0] sm:$0xff] }
  0xe2   :  { %2859 = vmatmul.msk.f32.gmra.mxu1 %vm136_vm0, %v2761_v34  ;;  %2943 = vst.msk [vmem:[%s5288_s4 + $0x1ac] sm:$0xf] %vm1940_vm1, %v2444_v36  ;;  %v1900_v46 = vpack.c.bf16 %v1802_v38, %v1802_v38  ;;  %v2493_v47 = vpack.c.bf16 %v2395_v39, %v2395_v39  ;;  %v626_v48 = vadd.f32 %v3359_v4, %v625_v42  ;;  %v2763_v39 = vld [vmem:[%s5284_s0 + $0x3f0] sm:$0xff] }
  0xe3   :  { %v1330_v49 = vadd.f32 %v3359_v4, %v1329_v45  ;;  %v1656_v50 = vadd.f32 %v1558_v43, %v1458_v40  ;;  %v2249_v51 = vadd.f32 %v2151_v44, %v2051_v41 }
  0xe4   :  { %1999 = vst.msk [vmem:[%s5288_s4 + $0xe8] sm:$0xf] %vm1940_vm1, %v1900_v46  ;;  %v1507_v54 = vmul.f32 %v3367_v7, %v626_v48  ;;  %v2100_v55 = vmul.f32 %v3369_v9, %v626_v48 }
  0xe5   :  { %v1607_v56 = vmul.f32 %v3371_v11, %v1330_v49  ;;  %v2200_v57 = vmul.f32 %v3373_v12, %v1330_v49  ;;  %2992 = vst.msk [vmem:[%s5288_s4 + $0x270] sm:$0xf] %vm1940_vm1, %v2493_v47  ;;  %v1754_v58 = vmax.f32 %v1656_v50, 0.0  ;;  %v2347_v59 = vmax.f32 %v2249_v51, 0.0  ;;  %v481_v60 = vpop.f32.mrf.mxu0  ;;  %v1185_v61 = vpop.f32.mrf.mxu1 }
  0xe6   :  { %2713 = vmatmul.msk.f32.gmra.mxu2 %vm136_vm0, %v106_v52  ;;  %2909 = vmatmul.msk.f32.gmra.mxu3 %vm136_vm0, %v2811_v53  ;;  %v482_v1 = vadd.f32 %v3359_v4, %v481_v60  ;;  %v1186_v6 = vadd.f32 %v3359_v4, %v1185_v61 }
  0xe7   :  { %v1705_v63 = vadd.f32 %v1607_v56, %v1507_v54  ;;  %v2298_v0 = vadd.f32 %v2200_v57, %v2100_v55  ;;  %v1852_v3 = vpack.c.bf16 %v1754_v58, %v1754_v58  ;;  %v2445_v5 = vpack.c.bf16 %v2347_v59, %v2347_v59  ;;  %v108_v57 = vld [vmem:[%s5284_s0 + $0x270] sm:$0xff]  ;;  %v2813_v58 = vld [vmem:[%s5284_s0 + $0x580] sm:$0xff] }
  0xe8   :  { %v1459_v13 = vmul.f32 %v3367_v7, %v482_v1  ;;  %v2052_v14 = vmul.f32 %v3369_v9, %v482_v1  ;;  %2664 = vmatmul.msk.f32.gmra.mxu0 %vm136_vm0, %v57_v62  ;;  %v1559_v16 = vmul.f32 %v3371_v11, %v1186_v6  ;;  %v2152_v17 = vmul.f32 %v3373_v12, %v1186_v6  ;;  %v3939_v6 = vld [vmem:[%s5286_s2] ss:$0 sm:$0xff] }
  0xe9   :  { %v1803_v8 = vmax.f32 %v1705_v63, 0.0  ;;  %v2396_v10 = vmax.f32 %v2298_v0, 0.0  ;;  %1951 = vst.msk [vmem:[%s5288_s4 + $0x28] sm:$0xf] %vm1940_vm1, %v1852_v3  ;;  %v628_v15 = vpop.f32.mrf.mxu2  ;;  %v1332_v18 = vpop.f32.mrf.mxu3 }
  0xea   :  { %2860 = vmatmul.msk.f32.gmra.mxu1 %vm136_vm0, %v2762_v2  ;;  %2944 = vst.msk [vmem:[%s5288_s4 + $0x1b0] sm:$0xf] %vm1940_vm1, %v2445_v5  ;;  %v629_v21 = vadd.f32 %v3359_v4, %v628_v15  ;;  %v1333_v22 = vadd.f32 %v3359_v4, %v1332_v18  ;;  %v1657_v23 = vadd.f32 %v1559_v16, %v1459_v13  ;;  %v59_v2 = vld [vmem:[%s5284_s0 + $0xe8] sm:$0xff] }
  0xeb   :  { %v1901_v19 = vpack.c.bf16 %v1803_v8, %v1803_v8  ;;  %v2494_v20 = vpack.c.bf16 %v2396_v10, %v2396_v10  ;;  %v2250_v24 = vadd.f32 %v2152_v17, %v2052_v14  ;;  %v2764_v10 = vld [vmem:[%s5284_s0 + $0x3f8] sm:$0xff] }
  0xec   :  { %v1508_v27 = vmul.f32 %v3367_v7, %v629_v21  ;;  %v2101_v28 = vmul.f32 %v3369_v9, %v629_v21  ;;  %v1608_v29 = vmul.f32 %v3371_v11, %v1333_v22  ;;  %v2201_v30 = vmul.f32 %v3373_v12, %v1333_v22 }
  0xed   :  { %2000 = vst.msk [vmem:[%s5288_s4 + $0xec] sm:$0xf] %vm1940_vm1, %v1901_v19  ;;  %v1755_v31 = vmax.f32 %v1657_v23, 0.0  ;;  %v2348_v32 = vmax.f32 %v2250_v24, 0.0  ;;  %v484_v33 = vpop.f32.mrf.mxu0  ;;  %v1188_v34 = vpop.f32.mrf.mxu1 }
  0xee   :  { %2993 = vst.msk [vmem:[%s5288_s4 + $0x274] sm:$0xf] %vm1940_vm1, %v2494_v20  ;;  %v1706_v36 = vadd.f32 %v1608_v29, %v1508_v27  ;;  %v2299_v37 = vadd.f32 %v2201_v30, %v2101_v28  ;;  %2714 = vmatmul.msk.f32.gmra.mxu2 %vm136_vm0, %v107_v25  ;;  %2910 = vmatmul.msk.f32.gmra.mxu3 %vm136_vm0, %v2812_v26  ;;  %v109_v30 = vld [vmem:[%s5284_s0 + $0x278] sm:$0xff] }
  0xef   :  { %v485_v38 = vadd.f32 %v3359_v4, %v484_v33  ;;  %v1853_v40 = vpack.c.bf16 %v1755_v31, %v1755_v31  ;;  %v2446_v41 = vpack.c.bf16 %v2348_v32, %v2348_v32  ;;  %v1189_v42 = vadd.f32 %v3359_v4, %v1188_v34  ;;  %v2814_v31 = vld [vmem:[%s5284_s0 + $0x588] sm:$0xff] }
  0xf0   :  { %v1804_v43 = vmax.f32 %v1706_v36, 0.0  ;;  %v2397_v44 = vmax.f32 %v2299_v37, 0.0  ;;  %2665 = vmatmul.msk.f32.gmra.mxu0 %vm136_vm0, %v58_v35 }
  0xf1   :  { %v1460_v45 = vmul.f32 %v3367_v7, %v485_v38  ;;  %v2053_v46 = vmul.f32 %v3369_v9, %v485_v38  ;;  %1952 = vst.msk [vmem:[%s5288_s4 + $0x2c] sm:$0xf] %vm1940_vm1, %v1853_v40  ;;  %v631_v47 = vpop.f32.mrf.mxu2  ;;  %v1560_v48 = vmul.f32 %v3371_v11, %v1189_v42  ;;  %v2153_v49 = vmul.f32 %v3373_v12, %v1189_v42  ;;  %v1335_v50 = vpop.f32.mrf.mxu3  ;;  %v60_v40 = vld [vmem:[%s5284_s0 + $0xf0] sm:$0xff] }
  0xf2   :  { %2861 = vmatmul.msk.f32.gmra.mxu1 %vm136_vm0, %v2763_v39  ;;  %2945 = vst.msk [vmem:[%s5288_s4 + $0x1b4] sm:$0xf] %vm1940_vm1, %v2446_v41  ;;  %v1902_v51 = vpack.c.bf16 %v1804_v43, %v1804_v43  ;;  %v2495_v52 = vpack.c.bf16 %v2397_v44, %v2397_v44  ;;  %v632_v53 = vadd.f32 %v3359_v4, %v631_v47  ;;  %v2765_v44 = vld [vmem:[%s5284_s0 + $0x400] sm:$0xff] }
  0xf3   :  { %v1336_v54 = vadd.f32 %v3359_v4, %v1335_v50  ;;  %v1658_v55 = vadd.f32 %v1560_v48, %v1460_v45  ;;  %v2251_v56 = vadd.f32 %v2153_v49, %v2053_v46 }
  0xf4   :  { %2001 = vst.msk [vmem:[%s5288_s4 + $0xf0] sm:$0xf] %vm1940_vm1, %v1902_v51  ;;  %v1509_v59 = vmul.f32 %v3367_v7, %v632_v53  ;;  %v2102_v60 = vmul.f32 %v3369_v9, %v632_v53 }
  0xf5   :  { %v1609_v4 = vmul.f32 %v3371_v11, %v1336_v54  ;;  %v2202_v61 = vmul.f32 %v3373_v12, %v1336_v54  ;;  %2994 = vst.msk [vmem:[%s5288_s4 + $0x278] sm:$0xf] %vm1940_vm1, %v2495_v52  ;;  %v1756_v62 = vmax.f32 %v1658_v55, 0.0  ;;  %v2349_v63 = vmax.f32 %v2251_v56, 0.0  ;;  %v487_v0 = vpop.f32.mrf.mxu0  ;;  %v1191_v1 = vpop.f32.mrf.mxu1 }
  0xf6   :  { %2715 = vmatmul.msk.f32.gmra.mxu2 %vm136_vm0, %v108_v57  ;;  %2911 = vmatmul.msk.f32.gmra.mxu3 %vm136_vm0, %v2813_v58  ;;  %v488_v8 = vadd.f32 %v3939_v6, %v487_v0  ;;  %v1192_v15 = vadd.f32 %v3939_v6, %v1191_v1 }
  0xf7   :  { %v1707_v3 = vadd.f32 %v1609_v4, %v1509_v59  ;;  %v2300_v5 = vadd.f32 %v2202_v61, %v2102_v60  ;;  %v1854_v13 = vpack.c.bf16 %v1756_v62, %v1756_v62  ;;  %v2447_v14 = vpack.c.bf16 %v2349_v63, %v2349_v63  ;;  %v110_v61 = vld [vmem:[%s5284_s0 + $0x280] sm:$0xff]  ;;  %v2815_v62 = vld [vmem:[%s5284_s0 + $0x590] sm:$0xff] }
  0xf8   :  { %v1461_v18 = vmul.f32 %v3367_v7, %v488_v8  ;;  %v2054_v19 = vmul.f32 %v3369_v9, %v488_v8  ;;  %2666 = vmatmul.msk.f32.gmra.mxu0 %vm136_vm0, %v59_v2  ;;  %v1561_v21 = vmul.f32 %v3371_v11, %v1192_v15  ;;  %v2154_v22 = vmul.f32 %v3373_v12, %v1192_v15 }
  0xf9   :  { %v1805_v16 = vmax.f32 %v1707_v3, 0.0  ;;  %v2398_v17 = vmax.f32 %v2300_v5, 0.0  ;;  %1953 = vst.msk [vmem:[%s5288_s4 + $0x30] sm:$0xf] %vm1940_vm1, %v1854_v13  ;;  %v634_v20 = vpop.f32.mrf.mxu2  ;;  %v1338_v23 = vpop.f32.mrf.mxu3  ;;  %v61_v13 = vld [vmem:[%s5284_s0 + $0xf8] sm:$0xff] }
  0xfa   :  { %2862 = vmatmul.msk.f32.gmra.mxu1 %vm136_vm0, %v2764_v10  ;;  %2946 = vst.msk [vmem:[%s5288_s4 + $0x1b8] sm:$0xf] %vm1940_vm1, %v2447_v14  ;;  %v635_v26 = vadd.f32 %v3939_v6, %v634_v20  ;;  %v1339_v27 = vadd.f32 %v3939_v6, %v1338_v23  ;;  %v1659_v28 = vadd.f32 %v1561_v21, %v1461_v18 }
  0xfb   :  { %v1903_v24 = vpack.c.bf16 %v1805_v16, %v1805_v16  ;;  %v2496_v25 = vpack.c.bf16 %v2398_v17, %v2398_v17  ;;  %v2252_v29 = vadd.f32 %v2154_v22, %v2054_v19  ;;  %v2766_v17 = vld [vmem:[%s5284_s0 + $0x408] sm:$0xff] }
  0xfc   :  { %v1510_v32 = vmul.f32 %v3367_v7, %v635_v26  ;;  %v2103_v33 = vmul.f32 %v3369_v9, %v635_v26  ;;  %v1610_v34 = vmul.f32 %v3371_v11, %v1339_v27  ;;  %v2203_v35 = vmul.f32 %v3373_v12, %v1339_v27 }
  0xfd   :  { %2002 = vst.msk [vmem:[%s5288_s4 + $0xf4] sm:$0xf] %vm1940_vm1, %v1903_v24  ;;  %v1757_v36 = vmax.f32 %v1659_v28, 0.0  ;;  %v2350_v37 = vmax.f32 %v2252_v29, 0.0  ;;  %v490_v38 = vpop.f32.mrf.mxu0  ;;  %v1194_v39 = vpop.f32.mrf.mxu1 }
  0xfe   :  { %2995 = vst.msk [vmem:[%s5288_s4 + $0x27c] sm:$0xf] %vm1940_vm1, %v2496_v25  ;;  %v1708_v41 = vadd.f32 %v1610_v34, %v1510_v32  ;;  %v2301_v42 = vadd.f32 %v2203_v35, %v2103_v33  ;;  %2716 = vmatmul.msk.f32.gmra.mxu2 %vm136_vm0, %v109_v30  ;;  %2912 = vmatmul.msk.f32.gmra.mxu3 %vm136_vm0, %v2814_v31  ;;  %v111_v35 = vld [vmem:[%s5284_s0 + $0x288] sm:$0xff] }
  0xff   :  { %v491_v43 = vadd.f32 %v3939_v6, %v490_v38  ;;  %v1855_v45 = vpack.c.bf16 %v1757_v36, %v1757_v36  ;;  %v2448_v46 = vpack.c.bf16 %v2350_v37, %v2350_v37  ;;  %v1195_v47 = vadd.f32 %v3939_v6, %v1194_v39  ;;  %v2816_v36 = vld [vmem:[%s5284_s0 + $0x598] sm:$0xff] }
 0x100   :  { %v1806_v48 = vmax.f32 %v1708_v41, 0.0  ;;  %v2399_v49 = vmax.f32 %v2301_v42, 0.0  ;;  %2667 = vmatmul.msk.f32.gmra.mxu0 %vm136_vm0, %v60_v40 }
 0x101   :  { %v1462_v50 = vmul.f32 %v3367_v7, %v491_v43  ;;  %v2055_v51 = vmul.f32 %v3369_v9, %v491_v43  ;;  %1954 = vst.msk [vmem:[%s5288_s4 + $0x34] sm:$0xf] %vm1940_vm1, %v1855_v45  ;;  %v637_v52 = vpop.f32.mrf.mxu2  ;;  %v1562_v53 = vmul.f32 %v3371_v11, %v1195_v47  ;;  %v2155_v54 = vmul.f32 %v3373_v12, %v1195_v47  ;;  %v1341_v55 = vpop.f32.mrf.mxu3 }
 0x102   :  { %2863 = vmatmul.msk.f32.gmra.mxu1 %vm136_vm0, %v2765_v44  ;;  %2947 = vst.msk [vmem:[%s5288_s4 + $0x1bc] sm:$0xf] %vm1940_vm1, %v2448_v46  ;;  %v1904_v56 = vpack.c.bf16 %v1806_v48, %v1806_v48  ;;  %v2497_v57 = vpack.c.bf16 %v2399_v49, %v2399_v49  ;;  %v638_v58 = vadd.f32 %v3939_v6, %v637_v52  ;;  %v62_v44 = vld [vmem:[%s5284_s0 + $0x100] sm:$0xff]  ;;  %v2767_v49 = vld [vmem:[%s5284_s0 + $0x410] sm:$0xff] }
 0x103   :  { %v1342_v59 = vadd.f32 %v3939_v6, %v1341_v55  ;;  %v1660_v60 = vadd.f32 %v1562_v53, %v1462_v50  ;;  %v2253_v4 = vadd.f32 %v2155_v54, %v2055_v51 }
 0x104   :  { %2003 = vst.msk [vmem:[%s5288_s4 + $0xf8] sm:$0xf] %vm1940_vm1, %v1904_v56  ;;  %v1511_v63 = vmul.f32 %v3367_v7, %v638_v58  ;;  %v2104_v0 = vmul.f32 %v3369_v9, %v638_v58 }
 0x105   :  { %v1611_v1 = vmul.f32 %v3371_v11, %v1342_v59  ;;  %v2204_v2 = vmul.f32 %v3373_v12, %v1342_v59  ;;  %2996 = vst.msk [vmem:[%s5288_s4 + $0x280] sm:$0xf] %vm1940_vm1, %v2497_v57  ;;  %v1758_v3 = vmax.f32 %v1660_v60, 0.0  ;;  %v2351_v5 = vmax.f32 %v2253_v4, 0.0  ;;  %v493_v8 = vpop.f32.mrf.mxu0  ;;  %v1197_v10 = vpop.f32.mrf.mxu1 }
 0x106   :  { %2717 = vmatmul.msk.f32.gmra.mxu2 %vm136_vm0, %v110_v61  ;;  %2913 = vmatmul.msk.f32.gmra.mxu3 %vm136_vm0, %v2815_v62  ;;  %v494_v16 = vadd.f32 %v3939_v6, %v493_v8  ;;  %v1198_v20 = vadd.f32 %v3939_v6, %v1197_v10 }
 0x107   :  { %v1709_v14 = vadd.f32 %v1611_v1, %v1511_v63  ;;  %v2302_v15 = vadd.f32 %v2204_v2, %v2104_v0  ;;  %v1856_v18 = vpack.c.bf16 %v1758_v3, %v1758_v3  ;;  %v2449_v19 = vpack.c.bf16 %v2351_v5, %v2351_v5  ;;  %v112_v2 = vld [vmem:[%s5284_s0 + $0x290] sm:$0xff]  ;;  %v2817_v3 = vld [vmem:[%s5284_s0 + $0x5a0] sm:$0xff] }
 0x108   :  { %v1463_v23 = vmul.f32 %v3367_v7, %v494_v16  ;;  %v2056_v24 = vmul.f32 %v3369_v9, %v494_v16  ;;  %2668 = vmatmul.msk.f32.gmra.mxu0 %vm136_vm0, %v61_v13  ;;  %v1563_v26 = vmul.f32 %v3371_v11, %v1198_v20  ;;  %v2156_v27 = vmul.f32 %v3373_v12, %v1198_v20 }
 0x109   :  { %v1807_v21 = vmax.f32 %v1709_v14, 0.0  ;;  %v2400_v22 = vmax.f32 %v2302_v15, 0.0  ;;  %1955 = vst.msk [vmem:[%s5288_s4 + $0x38] sm:$0xf] %vm1940_vm1, %v1856_v18  ;;  %v640_v25 = vpop.f32.mrf.mxu2  ;;  %v1344_v28 = vpop.f32.mrf.mxu3 }
 0x10a   :  { %2864 = vmatmul.msk.f32.gmra.mxu1 %vm136_vm0, %v2766_v17  ;;  %2948 = vst.msk [vmem:[%s5288_s4 + $0x1c0] sm:$0xf] %vm1940_vm1, %v2449_v19  ;;  %v641_v31 = vadd.f32 %v3939_v6, %v640_v25  ;;  %v1345_v32 = vadd.f32 %v3939_v6, %v1344_v28  ;;  %v1661_v33 = vadd.f32 %v1563_v26, %v1463_v23  ;;  %v63_v17 = vld [vmem:[%s5284_s0 + $0x108] sm:$0xff] }
 0x10b   :  { %v1905_v29 = vpack.c.bf16 %v1807_v21, %v1807_v21  ;;  %v2498_v30 = vpack.c.bf16 %v2400_v22, %v2400_v22  ;;  %v2254_v34 = vadd.f32 %v2156_v27, %v2056_v24  ;;  %v2768_v22 = vld [vmem:[%s5284_s0 + $0x418] sm:$0xff] }
 0x10c   :  { %v1512_v37 = vmul.f32 %v3367_v7, %v641_v31  ;;  %v2105_v38 = vmul.f32 %v3369_v9, %v641_v31  ;;  %v1612_v39 = vmul.f32 %v3371_v11, %v1345_v32  ;;  %v2205_v40 = vmul.f32 %v3373_v12, %v1345_v32 }
 0x10d   :  { %2004 = vst.msk [vmem:[%s5288_s4 + $0xfc] sm:$0xf] %vm1940_vm1, %v1905_v29  ;;  %v1759_v41 = vmax.f32 %v1661_v33, 0.0  ;;  %v2352_v42 = vmax.f32 %v2254_v34, 0.0  ;;  %v496_v43 = vpop.f32.mrf.mxu0 }
 0x10e   :  { %2997 = vst.msk [vmem:[%s5288_s4 + $0x284] sm:$0xf] %vm1940_vm1, %v2498_v30  ;;  %v1710_v45 = vadd.f32 %v1612_v39, %v1512_v37  ;;  %v2303_v46 = vadd.f32 %v2205_v40, %v2105_v38  ;;  %2718 = vmatmul.msk.f32.gmra.mxu2 %vm136_vm0, %v111_v35  ;;  %2914 = vmatmul.msk.f32.gmra.mxu3 %vm136_vm0, %v2816_v36  ;;  %v1200_v48 = vpop.f32.mrf.mxu1  ;;  %v113_v40 = vld [vmem:[%s5284_s0 + $0x298] sm:$0xff] }
 0x10f   :  { %v497_v47 = vadd.f32 %v3939_v6, %v496_v43  ;;  %v1857_v50 = vpack.c.bf16 %v1759_v41, %v1759_v41  ;;  %v2450_v51 = vpack.c.bf16 %v2352_v42, %v2352_v42  ;;  %v1201_v52 = vadd.f32 %v3939_v6, %v1200_v48  ;;  %v2818_v41 = vld [vmem:[%s5284_s0 + $0x5a8] sm:$0xff] }
 0x110   :  { %v1808_v53 = vmax.f32 %v1710_v45, 0.0  ;;  %v2401_v54 = vmax.f32 %v2303_v46, 0.0  ;;  %2669 = vmatmul.msk.f32.gmra.mxu0 %vm136_vm0, %v62_v44 }
 0x111   :  { %v1464_v55 = vmul.f32 %v3367_v7, %v497_v47  ;;  %v2057_v56 = vmul.f32 %v3369_v9, %v497_v47  ;;  %1956 = vst.msk [vmem:[%s5288_s4 + $0x3c] sm:$0xf] %vm1940_vm1, %v1857_v50  ;;  %v643_v57 = vpop.f32.mrf.mxu2  ;;  %v1564_v58 = vmul.f32 %v3371_v11, %v1201_v52  ;;  %v2157_v59 = vmul.f32 %v3373_v12, %v1201_v52  ;;  %v1347_v60 = vpop.f32.mrf.mxu3 }
 0x112   :  { %2865 = vmatmul.msk.f32.gmra.mxu1 %vm136_vm0, %v2767_v49  ;;  %2949 = vst.msk [vmem:[%s5288_s4 + $0x1c4] sm:$0xf] %vm1940_vm1, %v2450_v51  ;;  %v1906_v4 = vpack.c.bf16 %v1808_v53, %v1808_v53  ;;  %v2499_v61 = vpack.c.bf16 %v2401_v54, %v2401_v54  ;;  %v644_v62 = vadd.f32 %v3939_v6, %v643_v57  ;;  %v64_v49 = vld [vmem:[%s5284_s0 + $0x110] sm:$0xff]  ;;  %v2769_v54 = vld [vmem:[%s5284_s0 + $0x420] sm:$0xff] }
 0x113   :  { %v1348_v63 = vadd.f32 %v3939_v6, %v1347_v60  ;;  %v1662_v0 = vadd.f32 %v1564_v58, %v1464_v55  ;;  %v2255_v1 = vadd.f32 %v2157_v59, %v2057_v56 }
 0x114   :  { %2005 = vst.msk [vmem:[%s5288_s4 + $0x100] sm:$0xf] %vm1940_vm1, %v1906_v4  ;;  %v1513_v5 = vmul.f32 %v3367_v7, %v644_v62  ;;  %v2106_v8 = vmul.f32 %v3369_v9, %v644_v62 }
 0x115   :  { %v1613_v10 = vmul.f32 %v3371_v11, %v1348_v63  ;;  %v2206_v13 = vmul.f32 %v3373_v12, %v1348_v63  ;;  %2998 = vst.msk [vmem:[%s5288_s4 + $0x288] sm:$0xf] %vm1940_vm1, %v2499_v61  ;;  %v1760_v14 = vmax.f32 %v1662_v0, 0.0  ;;  %v2353_v15 = vmax.f32 %v2255_v1, 0.0  ;;  %v499_v16 = vpop.f32.mrf.mxu0 }
 0x116   :  { %2719 = vmatmul.msk.f32.gmra.mxu2 %vm136_vm0, %v112_v2  ;;  %2915 = vmatmul.msk.f32.gmra.mxu3 %vm136_vm0, %v2817_v3  ;;  %v500_v20 = vadd.f32 %v3939_v6, %v499_v16  ;;  %v1203_v21 = vpop.f32.mrf.mxu1 }
 0x117   :  { %v1711_v18 = vadd.f32 %v1613_v10, %v1513_v5  ;;  %v2304_v19 = vadd.f32 %v2206_v13, %v2106_v8  ;;  %v1858_v23 = vpack.c.bf16 %v1760_v14, %v1760_v14  ;;  %v2451_v24 = vpack.c.bf16 %v2353_v15, %v2353_v15  ;;  %v114_v13 = vld [vmem:[%s5284_s0 + $0x2a0] sm:$0xff]  ;;  %v2819_v14 = vld [vmem:[%s5284_s0 + $0x5b0] sm:$0xff] }
 0x118   :  { %v1204_v25 = vadd.f32 %v3939_v6, %v1203_v21  ;;  %v1465_v28 = vmul.f32 %v3367_v7, %v500_v20  ;;  %v2058_v29 = vmul.f32 %v3369_v9, %v500_v20  ;;  %2670 = vmatmul.msk.f32.gmra.mxu0 %vm136_vm0, %v63_v17 }
 0x119   :  { %v1809_v26 = vmax.f32 %v1711_v18, 0.0  ;;  %v2402_v27 = vmax.f32 %v2304_v19, 0.0  ;;  %1957 = vst.msk [vmem:[%s5288_s4 + $0x40] sm:$0xf] %vm1940_vm1, %v1858_v23  ;;  %v646_v30 = vpop.f32.mrf.mxu2  ;;  %v1350_v33 = vpop.f32.mrf.mxu3 }
 0x11a   :  { %v1565_v31 = vmul.f32 %v3371_v11, %v1204_v25  ;;  %v2158_v32 = vmul.f32 %v3373_v12, %v1204_v25  ;;  %2866 = vmatmul.msk.f32.gmra.mxu1 %vm136_vm0, %v2768_v22  ;;  %2950 = vst.msk [vmem:[%s5288_s4 + $0x1c8] sm:$0xf] %vm1940_vm1, %v2451_v24  ;;  %v647_v36 = vadd.f32 %v3939_v6, %v646_v30  ;;  %v65_v22 = vld [vmem:[%s5284_s0 + $0x118] sm:$0xff] }
 0x11b   :  { %v1907_v34 = vpack.c.bf16 %v1809_v26, %v1809_v26  ;;  %v2500_v35 = vpack.c.bf16 %v2402_v27, %v2402_v27  ;;  %v1351_v37 = vadd.f32 %v3939_v6, %v1350_v33  ;;  %v2770_v27 = vld [vmem:[%s5284_s0 + $0x428] sm:$0xff] }
 0x11c   :  { %v1663_v38 = vadd.f32 %v1565_v31, %v1465_v28  ;;  %v2256_v39 = vadd.f32 %v2158_v32, %v2058_v29  ;;  %v1514_v42 = vmul.f32 %v3367_v7, %v647_v36  ;;  %v2107_v43 = vmul.f32 %v3369_v9, %v647_v36 }
 0x11d   :  { %2006 = vst.msk [vmem:[%s5288_s4 + $0x104] sm:$0xf] %vm1940_vm1, %v1907_v34  ;;  %v1614_v44 = vmul.f32 %v3371_v11, %v1351_v37  ;;  %v2207_v45 = vmul.f32 %v3373_v12, %v1351_v37  ;;  %v502_v48 = vpop.f32.mrf.mxu0 }
 0x11e   :  { %2999 = vst.msk [vmem:[%s5288_s4 + $0x28c] sm:$0xf] %vm1940_vm1, %v2500_v35  ;;  %v1761_v46 = vmax.f32 %v1663_v38, 0.0  ;;  %v2354_v47 = vmax.f32 %v2256_v39, 0.0  ;;  %2720 = vmatmul.msk.f32.gmra.mxu2 %vm136_vm0, %v113_v40  ;;  %2916 = vmatmul.msk.f32.gmra.mxu3 %vm136_vm0, %v2818_v41  ;;  %v503_v52 = vadd.f32 %v3939_v6, %v502_v48 }
 0x11f   :  { %v1712_v50 = vadd.f32 %v1614_v44, %v1514_v42  ;;  %v2305_v51 = vadd.f32 %v2207_v45, %v2107_v43  ;;  %v1206_v53 = vpop.f32.mrf.mxu1  ;;  %v115_v45 = vld [vmem:[%s5284_s0 + $0x2a8] sm:$0xff] }
 0x120   :  { %v1859_v55 = vpack.c.bf16 %v1761_v46, %v1761_v46  ;;  %v2452_v56 = vpack.c.bf16 %v2354_v47, %v2354_v47  ;;  %v1207_v57 = vadd.f32 %v3939_v6, %v1206_v53  ;;  %v1466_v60 = vmul.f32 %v3367_v7, %v503_v52  ;;  %2671 = vmatmul.msk.f32.gmra.mxu0 %vm136_vm0, %v64_v49  ;;  %v2820_v46 = vld [vmem:[%s5284_s0 + $0x5b8] sm:$0xff] }
 0x121   :  { %v1810_v58 = vmax.f32 %v1712_v50, 0.0  ;;  %v2403_v59 = vmax.f32 %v2305_v51, 0.0  ;;  %v2059_v4 = vmul.f32 %v3369_v9, %v503_v52  ;;  %v649_v61 = vpop.f32.mrf.mxu2  ;;  %v1353_v0 = vpop.f32.mrf.mxu3 }
 0x122   :  { %1958 = vst.msk [vmem:[%s5288_s4 + $0x44] sm:$0xf] %vm1940_vm1, %v1859_v55  ;;  %v1566_v62 = vmul.f32 %v3371_v11, %v1207_v57  ;;  %v2159_v63 = vmul.f32 %v3373_v12, %v1207_v57  ;;  %2867 = vmatmul.msk.f32.gmra.mxu1 %vm136_vm0, %v2769_v54  ;;  %v650_v3 = vadd.f32 %v3939_v6, %v649_v61  ;;  %v66_v54 = vld [vmem:[%s5284_s0 + $0x120] sm:$0xff] }
 0x123   :  { %2951 = vst.msk [vmem:[%s5288_s4 + $0x1cc] sm:$0xf] %vm1940_vm1, %v2452_v56  ;;  %v1908_v1 = vpack.c.bf16 %v1810_v58, %v1810_v58  ;;  %v2501_v2 = vpack.c.bf16 %v2403_v59, %v2403_v59  ;;  %v1354_v5 = vadd.f32 %v3939_v6, %v1353_v0  ;;  %v2771_v59 = vld [vmem:[%s5284_s0 + $0x430] sm:$0xff] }
 0x124   :  { %v1664_v8 = vadd.f32 %v1566_v62, %v1466_v60  ;;  %v2257_v10 = vadd.f32 %v2159_v63, %v2059_v4  ;;  %v1515_v15 = vmul.f32 %v3367_v7, %v650_v3  ;;  %v2108_v16 = vmul.f32 %v3369_v9, %v650_v3 }
 0x125   :  { %2007 = vst.msk [vmem:[%s5288_s4 + $0x108] sm:$0xf] %vm1940_vm1, %v1908_v1  ;;  %v1615_v17 = vmul.f32 %v3371_v11, %v1354_v5  ;;  %v2208_v18 = vmul.f32 %v3373_v12, %v1354_v5  ;;  %v505_v21 = vpop.f32.mrf.mxu0 }
 0x126   :  { %3000 = vst.msk [vmem:[%s5288_s4 + $0x290] sm:$0xf] %vm1940_vm1, %v2501_v2  ;;  %v1762_v19 = vmax.f32 %v1664_v8, 0.0  ;;  %v2355_v20 = vmax.f32 %v2257_v10, 0.0  ;;  %2721 = vmatmul.msk.f32.gmra.mxu2 %vm136_vm0, %v114_v13  ;;  %2917 = vmatmul.msk.f32.gmra.mxu3 %vm136_vm0, %v2819_v14  ;;  %v506_v25 = vadd.f32 %v3939_v6, %v505_v21 }
 0x127   :  { %v1713_v23 = vadd.f32 %v1615_v17, %v1515_v15  ;;  %v2306_v24 = vadd.f32 %v2208_v18, %v2108_v16  ;;  %v1209_v26 = vpop.f32.mrf.mxu1  ;;  %v116_v18 = vld [vmem:[%s5284_s0 + $0x2b0] sm:$0xff] }
 0x128   :  { %v1860_v28 = vpack.c.bf16 %v1762_v19, %v1762_v19  ;;  %v2453_v29 = vpack.c.bf16 %v2355_v20, %v2355_v20  ;;  %v1210_v30 = vadd.f32 %v3939_v6, %v1209_v26  ;;  %v1467_v33 = vmul.f32 %v3367_v7, %v506_v25  ;;  %2672 = vmatmul.msk.f32.gmra.mxu0 %vm136_vm0, %v65_v22  ;;  %v2821_v19 = vld [vmem:[%s5284_s0 + $0x5c0] sm:$0xff] }
 0x129   :  { %v1811_v31 = vmax.f32 %v1713_v23, 0.0  ;;  %v2404_v32 = vmax.f32 %v2306_v24, 0.0  ;;  %v2060_v34 = vmul.f32 %v3369_v9, %v506_v25  ;;  %v652_v35 = vpop.f32.mrf.mxu2  ;;  %v1356_v38 = vpop.f32.mrf.mxu3 }
 0x12a   :  { %1959 = vst.msk [vmem:[%s5288_s4 + $0x48] sm:$0xf] %vm1940_vm1, %v1860_v28  ;;  %v1567_v36 = vmul.f32 %v3371_v11, %v1210_v30  ;;  %v2160_v37 = vmul.f32 %v3373_v12, %v1210_v30  ;;  %2868 = vmatmul.msk.f32.gmra.mxu1 %vm136_vm0, %v2770_v27  ;;  %v653_v41 = vadd.f32 %v3939_v6, %v652_v35  ;;  %v67_v27 = vld [vmem:[%s5284_s0 + $0x128] sm:$0xff] }
 0x12b   :  { %2952 = vst.msk [vmem:[%s5288_s4 + $0x1d0] sm:$0xf] %vm1940_vm1, %v2453_v29  ;;  %v1909_v39 = vpack.c.bf16 %v1811_v31, %v1811_v31  ;;  %v2502_v40 = vpack.c.bf16 %v2404_v32, %v2404_v32  ;;  %v1357_v42 = vadd.f32 %v3939_v6, %v1356_v38  ;;  %v2772_v32 = vld [vmem:[%s5284_s0 + $0x438] sm:$0xff] }
 0x12c   :  { %v1665_v43 = vadd.f32 %v1567_v36, %v1467_v33  ;;  %v2258_v44 = vadd.f32 %v2160_v37, %v2060_v34  ;;  %v1516_v47 = vmul.f32 %v3367_v7, %v653_v41  ;;  %v2109_v48 = vmul.f32 %v3369_v9, %v653_v41 }
 0x12d   :  { %2008 = vst.msk [vmem:[%s5288_s4 + $0x10c] sm:$0xf] %vm1940_vm1, %v1909_v39  ;;  %v1616_v49 = vmul.f32 %v3371_v11, %v1357_v42  ;;  %v2209_v50 = vmul.f32 %v3373_v12, %v1357_v42  ;;  %v508_v53 = vpop.f32.mrf.mxu0 }
 0x12e   :  { %3001 = vst.msk [vmem:[%s5288_s4 + $0x294] sm:$0xf] %vm1940_vm1, %v2502_v40  ;;  %v1763_v51 = vmax.f32 %v1665_v43, 0.0  ;;  %v2356_v52 = vmax.f32 %v2258_v44, 0.0  ;;  %2722 = vmatmul.msk.f32.gmra.mxu2 %vm136_vm0, %v115_v45  ;;  %2918 = vmatmul.msk.f32.gmra.mxu3 %vm136_vm0, %v2820_v46  ;;  %v509_v57 = vadd.f32 %v3939_v6, %v508_v53 }
 0x12f   :  { %v1714_v55 = vadd.f32 %v1616_v49, %v1516_v47  ;;  %v2307_v56 = vadd.f32 %v2209_v50, %v2109_v48  ;;  %v1212_v58 = vpop.f32.mrf.mxu1  ;;  %v117_v50 = vld [vmem:[%s5284_s0 + $0x2b8] sm:$0xff] }
 0x130   :  { %v1861_v60 = vpack.c.bf16 %v1763_v51, %v1763_v51  ;;  %v2454_v4 = vpack.c.bf16 %v2356_v52, %v2356_v52  ;;  %v1213_v61 = vadd.f32 %v3939_v6, %v1212_v58  ;;  %v1468_v0 = vmul.f32 %v3367_v7, %v509_v57  ;;  %2673 = vmatmul.msk.f32.gmra.mxu0 %vm136_vm0, %v66_v54  ;;  %v2822_v51 = vld [vmem:[%s5284_s0 + $0x5c8] sm:$0xff] }
 0x131   :  { %v1812_v62 = vmax.f32 %v1714_v55, 0.0  ;;  %v2405_v63 = vmax.f32 %v2307_v56, 0.0  ;;  %v2061_v1 = vmul.f32 %v3369_v9, %v509_v57  ;;  %v655_v2 = vpop.f32.mrf.mxu2  ;;  %v1359_v8 = vpop.f32.mrf.mxu3 }
 0x132   :  { %1960 = vst.msk [vmem:[%s5288_s4 + $0x4c] sm:$0xf] %vm1940_vm1, %v1861_v60  ;;  %v1568_v3 = vmul.f32 %v3371_v11, %v1213_v61  ;;  %v2161_v5 = vmul.f32 %v3373_v12, %v1213_v61  ;;  %2869 = vmatmul.msk.f32.gmra.mxu1 %vm136_vm0, %v2771_v59  ;;  %v656_v14 = vadd.f32 %v3939_v6, %v655_v2  ;;  %v68_v59 = vld [vmem:[%s5284_s0 + $0x130] sm:$0xff] }
 0x133   :  { %2953 = vst.msk [vmem:[%s5288_s4 + $0x1d4] sm:$0xf] %vm1940_vm1, %v2454_v4  ;;  %v1910_v10 = vpack.c.bf16 %v1812_v62, %v1812_v62  ;;  %v2503_v13 = vpack.c.bf16 %v2405_v63, %v2405_v63  ;;  %v1360_v15 = vadd.f32 %v3939_v6, %v1359_v8  ;;  %v2773_v63 = vld [vmem:[%s5284_s0 + $0x440] sm:$0xff] }
 0x134   :  { %v1666_v16 = vadd.f32 %v1568_v3, %v1468_v0  ;;  %v2259_v17 = vadd.f32 %v2161_v5, %v2061_v1  ;;  %v1517_v20 = vmul.f32 %v3367_v7, %v656_v14  ;;  %v2110_v21 = vmul.f32 %v3369_v9, %v656_v14 }
 0x135   :  { %2009 = vst.msk [vmem:[%s5288_s4 + $0x110] sm:$0xf] %vm1940_vm1, %v1910_v10  ;;  %v1617_v22 = vmul.f32 %v3371_v11, %v1360_v15  ;;  %v2210_v23 = vmul.f32 %v3373_v12, %v1360_v15  ;;  %v511_v26 = vpop.f32.mrf.mxu0 }
 0x136   :  { %3002 = vst.msk [vmem:[%s5288_s4 + $0x298] sm:$0xf] %vm1940_vm1, %v2503_v13  ;;  %v1764_v24 = vmax.f32 %v1666_v16, 0.0  ;;  %v2357_v25 = vmax.f32 %v2259_v17, 0.0  ;;  %2723 = vmatmul.msk.f32.gmra.mxu2 %vm136_vm0, %v116_v18  ;;  %2919 = vmatmul.msk.f32.gmra.mxu3 %vm136_vm0, %v2821_v19  ;;  %v512_v30 = vadd.f32 %v3939_v6, %v511_v26 }
 0x137   :  { %v1715_v28 = vadd.f32 %v1617_v22, %v1517_v20  ;;  %v2308_v29 = vadd.f32 %v2210_v23, %v2110_v21  ;;  %v1215_v31 = vpop.f32.mrf.mxu1  ;;  %v118_v23 = vld [vmem:[%s5284_s0 + $0x2c0] sm:$0xff] }
 0x138   :  { %v1862_v33 = vpack.c.bf16 %v1764_v24, %v1764_v24  ;;  %v2455_v34 = vpack.c.bf16 %v2357_v25, %v2357_v25  ;;  %v1216_v35 = vadd.f32 %v3939_v6, %v1215_v31  ;;  %v1469_v38 = vmul.f32 %v3367_v7, %v512_v30  ;;  %2674 = vmatmul.msk.f32.gmra.mxu0 %vm136_vm0, %v67_v27  ;;  %v2823_v24 = vld [vmem:[%s5284_s0 + $0x5d0] sm:$0xff] }
 0x139   :  { %v1813_v36 = vmax.f32 %v1715_v28, 0.0  ;;  %v2406_v37 = vmax.f32 %v2308_v29, 0.0  ;;  %v2062_v39 = vmul.f32 %v3369_v9, %v512_v30  ;;  %v658_v40 = vpop.f32.mrf.mxu2  ;;  %v1362_v43 = vpop.f32.mrf.mxu3 }
 0x13a   :  { %1961 = vst.msk [vmem:[%s5288_s4 + $0x50] sm:$0xf] %vm1940_vm1, %v1862_v33  ;;  %v1569_v41 = vmul.f32 %v3371_v11, %v1216_v35  ;;  %v2162_v42 = vmul.f32 %v3373_v12, %v1216_v35  ;;  %2870 = vmatmul.msk.f32.gmra.mxu1 %vm136_vm0, %v2772_v32  ;;  %v659_v46 = vadd.f32 %v3939_v6, %v658_v40  ;;  %v69_v32 = vld [vmem:[%s5284_s0 + $0x138] sm:$0xff] }
 0x13b   :  { %2954 = vst.msk [vmem:[%s5288_s4 + $0x1d8] sm:$0xf] %vm1940_vm1, %v2455_v34  ;;  %v1911_v44 = vpack.c.bf16 %v1813_v36, %v1813_v36  ;;  %v2504_v45 = vpack.c.bf16 %v2406_v37, %v2406_v37  ;;  %v1363_v47 = vadd.f32 %v3939_v6, %v1362_v43  ;;  %v2774_v37 = vld [vmem:[%s5284_s0 + $0x448] sm:$0xff] }
 0x13c   :  { %v1667_v48 = vadd.f32 %v1569_v41, %v1469_v38  ;;  %v2260_v49 = vadd.f32 %v2162_v42, %v2062_v39  ;;  %v1518_v52 = vmul.f32 %v3367_v7, %v659_v46  ;;  %v2111_v53 = vmul.f32 %v3369_v9, %v659_v46 }
 0x13d   :  { %2010 = vst.msk [vmem:[%s5288_s4 + $0x114] sm:$0xf] %vm1940_vm1, %v1911_v44  ;;  %v1618_v54 = vmul.f32 %v3371_v11, %v1363_v47  ;;  %v2211_v55 = vmul.f32 %v3373_v12, %v1363_v47  ;;  %v514_v58 = vpop.f32.mrf.mxu0 }
 0x13e   :  { %3003 = vst.msk [vmem:[%s5288_s4 + $0x29c] sm:$0xf] %vm1940_vm1, %v2504_v45  ;;  %v1765_v56 = vmax.f32 %v1667_v48, 0.0  ;;  %v2358_v57 = vmax.f32 %v2260_v49, 0.0  ;;  %2724 = vmatmul.msk.f32.gmra.mxu2 %vm136_vm0, %v117_v50  ;;  %2920 = vmatmul.msk.f32.gmra.mxu3 %vm136_vm0, %v2822_v51  ;;  %v515_v61 = vadd.f32 %v3939_v6, %v514_v58 }
 0x13f   :  { %v1716_v60 = vadd.f32 %v1618_v54, %v1518_v52  ;;  %v2309_v4 = vadd.f32 %v2211_v55, %v2111_v53  ;;  %v1218_v62 = vpop.f32.mrf.mxu1  ;;  %v119_v55 = vld [vmem:[%s5284_s0 + $0x2c8] sm:$0xff] }
 0x140   :  { %v1863_v0 = vpack.c.bf16 %v1765_v56, %v1765_v56  ;;  %v2456_v1 = vpack.c.bf16 %v2358_v57, %v2358_v57  ;;  %v1219_v2 = vadd.f32 %v3939_v6, %v1218_v62  ;;  %v1470_v8 = vmul.f32 %v3367_v7, %v515_v61  ;;  %2675 = vmatmul.msk.f32.gmra.mxu0 %vm136_vm0, %v68_v59  ;;  %v2824_v56 = vld [vmem:[%s5284_s0 + $0x5d8] sm:$0xff] }
 0x141   :  { %v1814_v3 = vmax.f32 %v1716_v60, 0.0  ;;  %v2407_v5 = vmax.f32 %v2309_v4, 0.0  ;;  %v2063_v10 = vmul.f32 %v3369_v9, %v515_v61  ;;  %v661_v13 = vpop.f32.mrf.mxu2  ;;  %v1365_v16 = vpop.f32.mrf.mxu3 }
 0x142   :  { %1962 = vst.msk [vmem:[%s5288_s4 + $0x54] sm:$0xf] %vm1940_vm1, %v1863_v0  ;;  %v1570_v14 = vmul.f32 %v3371_v11, %v1219_v2  ;;  %v2163_v15 = vmul.f32 %v3373_v12, %v1219_v2  ;;  %2871 = vmatmul.msk.f32.gmra.mxu1 %vm136_vm0, %v2773_v63  ;;  %v662_v19 = vadd.f32 %v3939_v6, %v661_v13  ;;  %v70_v63 = vld [vmem:[%s5284_s0 + $0x140] sm:$0xff] }
 0x143   :  { %2955 = vst.msk [vmem:[%s5288_s4 + $0x1dc] sm:$0xf] %vm1940_vm1, %v2456_v1  ;;  %v1912_v17 = vpack.c.bf16 %v1814_v3, %v1814_v3  ;;  %v2505_v18 = vpack.c.bf16 %v2407_v5, %v2407_v5  ;;  %v1366_v20 = vadd.f32 %v3939_v6, %v1365_v16  ;;  %v2775_v5 = vld [vmem:[%s5284_s0 + $0x450] sm:$0xff] }
 0x144   :  { %v1668_v21 = vadd.f32 %v1570_v14, %v1470_v8  ;;  %v2261_v22 = vadd.f32 %v2163_v15, %v2063_v10  ;;  %v1519_v25 = vmul.f32 %v3367_v7, %v662_v19  ;;  %v2112_v26 = vmul.f32 %v3369_v9, %v662_v19 }
 0x145   :  { %2011 = vst.msk [vmem:[%s5288_s4 + $0x118] sm:$0xf] %vm1940_vm1, %v1912_v17  ;;  %v1619_v27 = vmul.f32 %v3371_v11, %v1366_v20  ;;  %v2212_v28 = vmul.f32 %v3373_v12, %v1366_v20  ;;  %v517_v31 = vpop.f32.mrf.mxu0 }
 0x146   :  { %3004 = vst.msk [vmem:[%s5288_s4 + $0x2a0] sm:$0xf] %vm1940_vm1, %v2505_v18  ;;  %v1766_v29 = vmax.f32 %v1668_v21, 0.0  ;;  %v2359_v30 = vmax.f32 %v2261_v22, 0.0  ;;  %2725 = vmatmul.msk.f32.gmra.mxu2 %vm136_vm0, %v118_v23  ;;  %2921 = vmatmul.msk.f32.gmra.mxu3 %vm136_vm0, %v2823_v24  ;;  %v518_v35 = vadd.f32 %v3939_v6, %v517_v31 }
 0x147   :  { %v1717_v33 = vadd.f32 %v1619_v27, %v1519_v25  ;;  %v2310_v34 = vadd.f32 %v2212_v28, %v2112_v26  ;;  %v1221_v36 = vpop.f32.mrf.mxu1  ;;  %v120_v28 = vld [vmem:[%s5284_s0 + $0x2d0] sm:$0xff] }
 0x148   :  { %v1864_v38 = vpack.c.bf16 %v1766_v29, %v1766_v29  ;;  %v2457_v39 = vpack.c.bf16 %v2359_v30, %v2359_v30  ;;  %v1222_v40 = vadd.f32 %v3939_v6, %v1221_v36  ;;  %v1471_v43 = vmul.f32 %v3367_v7, %v518_v35  ;;  %2676 = vmatmul.msk.f32.gmra.mxu0 %vm136_vm0, %v69_v32  ;;  %v2825_v29 = vld [vmem:[%s5284_s0 + $0x5e0] sm:$0xff] }
 0x149   :  { %v1815_v41 = vmax.f32 %v1717_v33, 0.0  ;;  %v2408_v42 = vmax.f32 %v2310_v34, 0.0  ;;  %v2064_v44 = vmul.f32 %v3369_v9, %v518_v35  ;;  %v664_v45 = vpop.f32.mrf.mxu2  ;;  %v1368_v48 = vpop.f32.mrf.mxu3 }
 0x14a   :  { %1963 = vst.msk [vmem:[%s5288_s4 + $0x58] sm:$0xf] %vm1940_vm1, %v1864_v38  ;;  %v1571_v46 = vmul.f32 %v3371_v11, %v1222_v40  ;;  %v2164_v47 = vmul.f32 %v3373_v12, %v1222_v40  ;;  %2872 = vmatmul.msk.f32.gmra.mxu1 %vm136_vm0, %v2774_v37  ;;  %v665_v51 = vadd.f32 %v3939_v6, %v664_v45  ;;  %v71_v37 = vld [vmem:[%s5284_s0 + $0x148] sm:$0xff] }
 0x14b   :  { %2956 = vst.msk [vmem:[%s5288_s4 + $0x1e0] sm:$0xf] %vm1940_vm1, %v2457_v39  ;;  %v1913_v49 = vpack.c.bf16 %v1815_v41, %v1815_v41  ;;  %v2506_v50 = vpack.c.bf16 %v2408_v42, %v2408_v42  ;;  %v1369_v52 = vadd.f32 %v3939_v6, %v1368_v48  ;;  %v2776_v42 = vld [vmem:[%s5284_s0 + $0x458] sm:$0xff] }
 0x14c   :  { %v1669_v53 = vadd.f32 %v1571_v46, %v1471_v43  ;;  %v2262_v54 = vadd.f32 %v2164_v47, %v2064_v44  ;;  %v1520_v57 = vmul.f32 %v3367_v7, %v665_v51  ;;  %v2113_v58 = vmul.f32 %v3369_v9, %v665_v51 }
 0x14d   :  { %2012 = vst.msk [vmem:[%s5288_s4 + $0x11c] sm:$0xf] %vm1940_vm1, %v1913_v49  ;;  %v1620_v59 = vmul.f32 %v3371_v11, %v1369_v52  ;;  %v2213_v60 = vmul.f32 %v3373_v12, %v1369_v52  ;;  %v520_v62 = vpop.f32.mrf.mxu0 }
 0x14e   :  { %3005 = vst.msk [vmem:[%s5288_s4 + $0x2a4] sm:$0xf] %vm1940_vm1, %v2506_v50  ;;  %v1767_v4 = vmax.f32 %v1669_v53, 0.0  ;;  %v2360_v61 = vmax.f32 %v2262_v54, 0.0  ;;  %2726 = vmatmul.msk.f32.gmra.mxu2 %vm136_vm0, %v119_v55  ;;  %2922 = vmatmul.msk.f32.gmra.mxu3 %vm136_vm0, %v2824_v56  ;;  %v521_v2 = vadd.f32 %v3939_v6, %v520_v62 }
 0x14f   :  { %v1718_v0 = vadd.f32 %v1620_v59, %v1520_v57  ;;  %v2311_v1 = vadd.f32 %v2213_v60, %v2113_v58  ;;  %v1224_v3 = vpop.f32.mrf.mxu1  ;;  %v121_v60 = vld [vmem:[%s5284_s0 + $0x2d8] sm:$0xff] }
 0x150   :  { %v1865_v8 = vpack.c.bf16 %v1767_v4, %v1767_v4  ;;  %v2458_v10 = vpack.c.bf16 %v2360_v61, %v2360_v61  ;;  %v1225_v13 = vadd.f32 %v3939_v6, %v1224_v3  ;;  %v1472_v16 = vmul.f32 %v3367_v7, %v521_v2  ;;  %2677 = vmatmul.msk.f32.gmra.mxu0 %vm136_vm0, %v70_v63  ;;  %v2826_v4 = vld [vmem:[%s5284_s0 + $0x5e8] sm:$0xff]  ;;  %v72_v3 = vld [vmem:[%s5284_s0 + $0x150] sm:$0xff] }
 0x151   :  { %v1816_v14 = vmax.f32 %v1718_v0, 0.0  ;;  %v2409_v15 = vmax.f32 %v2311_v1, 0.0  ;;  %v2065_v17 = vmul.f32 %v3369_v9, %v521_v2  ;;  %v667_v18 = vpop.f32.mrf.mxu2  ;;  %v1371_v21 = vpop.f32.mrf.mxu3 }
 0x152   :  { %1964 = vst.msk [vmem:[%s5288_s4 + $0x5c] sm:$0xf] %vm1940_vm1, %v1865_v8  ;;  %v1572_v19 = vmul.f32 %v3371_v11, %v1225_v13  ;;  %v2165_v20 = vmul.f32 %v3373_v12, %v1225_v13  ;;  %2873 = vmatmul.msk.f32.gmra.mxu1 %vm136_vm0, %v2775_v5  ;;  %v668_v24 = vadd.f32 %v3939_v6, %v667_v18 }
 0x153   :  { %2957 = vst.msk [vmem:[%s5288_s4 + $0x1e4] sm:$0xf] %vm1940_vm1, %v2458_v10  ;;  %v1914_v22 = vpack.c.bf16 %v1816_v14, %v1816_v14  ;;  %v2507_v23 = vpack.c.bf16 %v2409_v15, %v2409_v15  ;;  %v1372_v25 = vadd.f32 %v3939_v6, %v1371_v21  ;;  %v4516_v10 = vld [vmem:[%s5286_s2] ss:$0 sm:$0xff] }
 0x154   :  { %v1670_v26 = vadd.f32 %v1572_v19, %v1472_v16  ;;  %v2263_v27 = vadd.f32 %v2165_v20, %v2065_v17  ;;  %v1521_v30 = vmul.f32 %v3367_v7, %v668_v24  ;;  %v2114_v31 = vmul.f32 %v3369_v9, %v668_v24  ;;  %v2777_v15 = vld [vmem:[%s5284_s0 + $0x460] sm:$0xff] }
 0x155   :  { %2013 = vst.msk [vmem:[%s5288_s4 + $0x120] sm:$0xf] %vm1940_vm1, %v1914_v22  ;;  %v1621_v32 = vmul.f32 %v3371_v11, %v1372_v25  ;;  %v2214_v33 = vmul.f32 %v3373_v12, %v1372_v25  ;;  %v523_v36 = vpop.f32.mrf.mxu0 }
 0x156   :  { %3006 = vst.msk [vmem:[%s5288_s4 + $0x2a8] sm:$0xf] %vm1940_vm1, %v2507_v23  ;;  %v1768_v34 = vmax.f32 %v1670_v26, 0.0  ;;  %v2361_v35 = vmax.f32 %v2263_v27, 0.0  ;;  %2727 = vmatmul.msk.f32.gmra.mxu2 %vm136_vm0, %v120_v28  ;;  %2923 = vmatmul.msk.f32.gmra.mxu3 %vm136_vm0, %v2825_v29  ;;  %v524_v40 = vadd.f32 %v3939_v6, %v523_v36 }
 0x157   :  { %v1719_v38 = vadd.f32 %v1621_v32, %v1521_v30  ;;  %v2312_v39 = vadd.f32 %v2214_v33, %v2114_v31  ;;  %v1227_v41 = vpop.f32.mrf.mxu1  ;;  %v122_v33 = vld [vmem:[%s5284_s0 + $0x2e0] sm:$0xff] }
 0x158   :  { %v1866_v43 = vpack.c.bf16 %v1768_v34, %v1768_v34  ;;  %v2459_v44 = vpack.c.bf16 %v2361_v35, %v2361_v35  ;;  %v1228_v45 = vadd.f32 %v3939_v6, %v1227_v41  ;;  %v1473_v48 = vmul.f32 %v3367_v7, %v524_v40  ;;  %2678 = vmatmul.msk.f32.gmra.mxu0 %vm136_vm0, %v71_v37  ;;  %v2827_v34 = vld [vmem:[%s5284_s0 + $0x5f0] sm:$0xff] }
 0x159   :  { %v1817_v46 = vmax.f32 %v1719_v38, 0.0  ;;  %v2410_v47 = vmax.f32 %v2312_v39, 0.0  ;;  %v2066_v49 = vmul.f32 %v3369_v9, %v524_v40  ;;  %v670_v50 = vpop.f32.mrf.mxu2  ;;  %v1374_v53 = vpop.f32.mrf.mxu3 }
 0x15a   :  { %1965 = vst.msk [vmem:[%s5288_s4 + $0x60] sm:$0xf] %vm1940_vm1, %v1866_v43  ;;  %v1573_v51 = vmul.f32 %v3371_v11, %v1228_v45  ;;  %v2166_v52 = vmul.f32 %v3373_v12, %v1228_v45  ;;  %2874 = vmatmul.msk.f32.gmra.mxu1 %vm136_vm0, %v2776_v42  ;;  %v671_v56 = vadd.f32 %v3939_v6, %v670_v50  ;;  %v73_v42 = vld [vmem:[%s5284_s0 + $0x158] sm:$0xff] }
 0x15b   :  { %2958 = vst.msk [vmem:[%s5288_s4 + $0x1e8] sm:$0xf] %vm1940_vm1, %v2459_v44  ;;  %v1915_v54 = vpack.c.bf16 %v1817_v46, %v1817_v46  ;;  %v2508_v55 = vpack.c.bf16 %v2410_v47, %v2410_v47  ;;  %v1375_v57 = vadd.f32 %v3939_v6, %v1374_v53  ;;  %v2778_v47 = vld [vmem:[%s5284_s0 + $0x468] sm:$0xff] }
 0x15c   :  { %v1671_v58 = vadd.f32 %v1573_v51, %v1473_v48  ;;  %v2264_v59 = vadd.f32 %v2166_v52, %v2066_v49  ;;  %v1522_v61 = vmul.f32 %v3367_v7, %v671_v56  ;;  %v2115_v62 = vmul.f32 %v3369_v9, %v671_v56 }
 0x15d   :  { %2014 = vst.msk [vmem:[%s5288_s4 + $0x124] sm:$0xf] %vm1940_vm1, %v1915_v54  ;;  %v1622_v6 = vmul.f32 %v3371_v11, %v1375_v57  ;;  %v2215_v63 = vmul.f32 %v3373_v12, %v1375_v57  ;;  %v526_v2 = vpop.f32.mrf.mxu0 }
 0x15e   :  { %3007 = vst.msk [vmem:[%s5288_s4 + $0x2ac] sm:$0xf] %vm1940_vm1, %v2508_v55  ;;  %v1769_v0 = vmax.f32 %v1671_v58, 0.0  ;;  %v2362_v1 = vmax.f32 %v2264_v59, 0.0  ;;  %2728 = vmatmul.msk.f32.gmra.mxu2 %vm136_vm0, %v121_v60  ;;  %2924 = vmatmul.msk.f32.gmra.mxu3 %vm136_vm0, %v2826_v4  ;;  %v527_v13 = vadd.f32 %v4516_v10, %v526_v2 }
 0x15f   :  { %v1720_v5 = vadd.f32 %v1622_v6, %v1522_v61  ;;  %v2313_v8 = vadd.f32 %v2215_v63, %v2115_v62  ;;  %v1230_v14 = vpop.f32.mrf.mxu1  ;;  %v123_v63 = vld [vmem:[%s5284_s0 + $0x2e8] sm:$0xff] }
 0x160   :  { %v1867_v16 = vpack.c.bf16 %v1769_v0, %v1769_v0  ;;  %v2460_v17 = vpack.c.bf16 %v2362_v1, %v2362_v1  ;;  %v1231_v18 = vadd.f32 %v4516_v10, %v1230_v14  ;;  %v1474_v21 = vmul.f32 %v3367_v7, %v527_v13  ;;  %2679 = vmatmul.msk.f32.gmra.mxu0 %vm136_vm0, %v72_v3  ;;  %v2828_v0 = vld [vmem:[%s5284_s0 + $0x5f8] sm:$0xff] }
 0x161   :  { %v1818_v19 = vmax.f32 %v1720_v5, 0.0  ;;  %v2411_v20 = vmax.f32 %v2313_v8, 0.0  ;;  %v2067_v22 = vmul.f32 %v3369_v9, %v527_v13  ;;  %v673_v23 = vpop.f32.mrf.mxu2  ;;  %v1377_v26 = vpop.f32.mrf.mxu3 }
 0x162   :  { %1966 = vst.msk [vmem:[%s5288_s4 + $0x64] sm:$0xf] %vm1940_vm1, %v1867_v16  ;;  %v1574_v24 = vmul.f32 %v3371_v11, %v1231_v18  ;;  %v2167_v25 = vmul.f32 %v3373_v12, %v1231_v18  ;;  %2875 = vmatmul.msk.f32.gmra.mxu1 %vm136_vm0, %v2777_v15  ;;  %v674_v29 = vadd.f32 %v4516_v10, %v673_v23  ;;  %v74_v15 = vld [vmem:[%s5284_s0 + $0x160] sm:$0xff] }
 0x163   :  { %2959 = vst.msk [vmem:[%s5288_s4 + $0x1ec] sm:$0xf] %vm1940_vm1, %v2460_v17  ;;  %v1916_v27 = vpack.c.bf16 %v1818_v19, %v1818_v19  ;;  %v2509_v28 = vpack.c.bf16 %v2411_v20, %v2411_v20  ;;  %v1378_v30 = vadd.f32 %v4516_v10, %v1377_v26  ;;  %v2779_v20 = vld [vmem:[%s5284_s0 + $0x470] sm:$0xff] }
 0x164   :  { %v1672_v31 = vadd.f32 %v1574_v24, %v1474_v21  ;;  %v2265_v32 = vadd.f32 %v2167_v25, %v2067_v22  ;;  %v1523_v35 = vmul.f32 %v3367_v7, %v674_v29  ;;  %v2116_v36 = vmul.f32 %v3369_v9, %v674_v29 }
 0x165   :  { %2015 = vst.msk [vmem:[%s5288_s4 + $0x128] sm:$0xf] %vm1940_vm1, %v1916_v27  ;;  %v1623_v37 = vmul.f32 %v3371_v11, %v1378_v30  ;;  %v2216_v38 = vmul.f32 %v3373_v12, %v1378_v30  ;;  %v529_v41 = vpop.f32.mrf.mxu0 }
 0x166   :  { %3008 = vst.msk [vmem:[%s5288_s4 + $0x2b0] sm:$0xf] %vm1940_vm1, %v2509_v28  ;;  %v1770_v39 = vmax.f32 %v1672_v31, 0.0  ;;  %v2363_v40 = vmax.f32 %v2265_v32, 0.0  ;;  %2729 = vmatmul.msk.f32.gmra.mxu2 %vm136_vm0, %v122_v33  ;;  %2925 = vmatmul.msk.f32.gmra.mxu3 %vm136_vm0, %v2827_v34  ;;  %v530_v45 = vadd.f32 %v4516_v10, %v529_v41 }
 0x167   :  { %v1721_v43 = vadd.f32 %v1623_v37, %v1523_v35  ;;  %v2314_v44 = vadd.f32 %v2216_v38, %v2116_v36  ;;  %v1233_v46 = vpop.f32.mrf.mxu1  ;;  %v124_v38 = vld [vmem:[%s5284_s0 + $0x2f0] sm:$0xff] }
 0x168   :  { %v1868_v48 = vpack.c.bf16 %v1770_v39, %v1770_v39  ;;  %v2461_v49 = vpack.c.bf16 %v2363_v40, %v2363_v40  ;;  %v1234_v50 = vadd.f32 %v4516_v10, %v1233_v46  ;;  %v1475_v53 = vmul.f32 %v3367_v7, %v530_v45  ;;  %2680 = vmatmul.msk.f32.gmra.mxu0 %vm136_vm0, %v73_v42  ;;  %v2829_v39 = vld [vmem:[%s5284_s0 + $0x600] sm:$0xff] }
 0x169   :  { %v1819_v51 = vmax.f32 %v1721_v43, 0.0  ;;  %v2412_v52 = vmax.f32 %v2314_v44, 0.0  ;;  %v2068_v54 = vmul.f32 %v3369_v9, %v530_v45  ;;  %v676_v55 = vpop.f32.mrf.mxu2  ;;  %v1380_v58 = vpop.f32.mrf.mxu3 }
 0x16a   :  { %1967 = vst.msk [vmem:[%s5288_s4 + $0x68] sm:$0xf] %vm1940_vm1, %v1868_v48  ;;  %v1575_v56 = vmul.f32 %v3371_v11, %v1234_v50  ;;  %v2168_v57 = vmul.f32 %v3373_v12, %v1234_v50  ;;  %2876 = vmatmul.msk.f32.gmra.mxu1 %vm136_vm0, %v2778_v47  ;;  %v677_v4 = vadd.f32 %v4516_v10, %v676_v55  ;;  %v75_v47 = vld [vmem:[%s5284_s0 + $0x168] sm:$0xff] }
 0x16b   :  { %2960 = vst.msk [vmem:[%s5288_s4 + $0x1f0] sm:$0xf] %vm1940_vm1, %v2461_v49  ;;  %v1917_v59 = vpack.c.bf16 %v1819_v51, %v1819_v51  ;;  %v2510_v60 = vpack.c.bf16 %v2412_v52, %v2412_v52  ;;  %v1381_v61 = vadd.f32 %v4516_v10, %v1380_v58  ;;  %v2780_v52 = vld [vmem:[%s5284_s0 + $0x478] sm:$0xff] }
 0x16c   :  { %v1673_v62 = vadd.f32 %v1575_v56, %v1475_v53  ;;  %v2266_v6 = vadd.f32 %v2168_v57, %v2068_v54  ;;  %v1524_v1 = vmul.f32 %v3367_v7, %v677_v4  ;;  %v2117_v2 = vmul.f32 %v3369_v9, %v677_v4 }
 0x16d   :  { %2016 = vst.msk [vmem:[%s5288_s4 + $0x12c] sm:$0xf] %vm1940_vm1, %v1917_v59  ;;  %v1624_v3 = vmul.f32 %v3371_v11, %v1381_v61  ;;  %v2217_v5 = vmul.f32 %v3373_v12, %v1381_v61  ;;  %v532_v14 = vpop.f32.mrf.mxu0 }
 0x16e   :  { %3009 = vst.msk [vmem:[%s5288_s4 + $0x2b4] sm:$0xf] %vm1940_vm1, %v2510_v60  ;;  %v1771_v8 = vmax.f32 %v1673_v62, 0.0  ;;  %v2364_v13 = vmax.f32 %v2266_v6, 0.0  ;;  %2730 = vmatmul.msk.f32.gmra.mxu2 %vm136_vm0, %v123_v63  ;;  %2926 = vmatmul.msk.f32.gmra.mxu3 %vm136_vm0, %v2828_v0  ;;  %v533_v18 = vadd.f32 %v4516_v10, %v532_v14 }
 0x16f   :  { %v1722_v16 = vadd.f32 %v1624_v3, %v1524_v1  ;;  %v2315_v17 = vadd.f32 %v2217_v5, %v2117_v2  ;;  %v1236_v19 = vpop.f32.mrf.mxu1  ;;  %v125_v5 = vld [vmem:[%s5284_s0 + $0x2f8] sm:$0xff] }
 0x170   :  { %v1869_v21 = vpack.c.bf16 %v1771_v8, %v1771_v8  ;;  %v2462_v22 = vpack.c.bf16 %v2364_v13, %v2364_v13  ;;  %v1237_v23 = vadd.f32 %v4516_v10, %v1236_v19  ;;  %v1476_v26 = vmul.f32 %v3367_v7, %v533_v18  ;;  %2681 = vmatmul.msk.f32.gmra.mxu0 %vm136_vm0, %v74_v15  ;;  %v2830_v8 = vld [vmem:[%s5284_s0 + $0x608] sm:$0xff] }
 0x171   :  { %v1820_v24 = vmax.f32 %v1722_v16, 0.0  ;;  %v2413_v25 = vmax.f32 %v2315_v17, 0.0  ;;  %v2069_v27 = vmul.f32 %v3369_v9, %v533_v18  ;;  %v679_v28 = vpop.f32.mrf.mxu2  ;;  %v1383_v31 = vpop.f32.mrf.mxu3 }
 0x172   :  { %1968 = vst.msk [vmem:[%s5288_s4 + $0x6c] sm:$0xf] %vm1940_vm1, %v1869_v21  ;;  %v1576_v29 = vmul.f32 %v3371_v11, %v1237_v23  ;;  %v2169_v30 = vmul.f32 %v3373_v12, %v1237_v23  ;;  %2877 = vmatmul.msk.f32.gmra.mxu1 %vm136_vm0, %v2779_v20  ;;  %v680_v34 = vadd.f32 %v4516_v10, %v679_v28  ;;  %v76_v20 = vld [vmem:[%s5284_s0 + $0x170] sm:$0xff] }
 0x173   :  { %2961 = vst.msk [vmem:[%s5288_s4 + $0x1f4] sm:$0xf] %vm1940_vm1, %v2462_v22  ;;  %v1918_v32 = vpack.c.bf16 %v1820_v24, %v1820_v24  ;;  %v2511_v33 = vpack.c.bf16 %v2413_v25, %v2413_v25  ;;  %v1384_v35 = vadd.f32 %v4516_v10, %v1383_v31  ;;  %v2781_v25 = vld [vmem:[%s5284_s0 + $0x480] sm:$0xff] }
 0x174   :  { %v1674_v36 = vadd.f32 %v1576_v29, %v1476_v26  ;;  %v2267_v37 = vadd.f32 %v2169_v30, %v2069_v27  ;;  %v1525_v40 = vmul.f32 %v3367_v7, %v680_v34  ;;  %v2118_v41 = vmul.f32 %v3369_v9, %v680_v34 }
 0x175   :  { %2017 = vst.msk [vmem:[%s5288_s4 + $0x130] sm:$0xf] %vm1940_vm1, %v1918_v32  ;;  %v1625_v42 = vmul.f32 %v3371_v11, %v1384_v35  ;;  %v2218_v43 = vmul.f32 %v3373_v12, %v1384_v35  ;;  %v535_v46 = vpop.f32.mrf.mxu0 }
 0x176   :  { %3010 = vst.msk [vmem:[%s5288_s4 + $0x2b8] sm:$0xf] %vm1940_vm1, %v2511_v33  ;;  %v1772_v44 = vmax.f32 %v1674_v36, 0.0  ;;  %v2365_v45 = vmax.f32 %v2267_v37, 0.0  ;;  %2731 = vmatmul.msk.f32.gmra.mxu2 %vm136_vm0, %v124_v38  ;;  %2927 = vmatmul.msk.f32.gmra.mxu3 %vm136_vm0, %v2829_v39  ;;  %v536_v50 = vadd.f32 %v4516_v10, %v535_v46 }
 0x177   :  { %v1723_v48 = vadd.f32 %v1625_v42, %v1525_v40  ;;  %v2316_v49 = vadd.f32 %v2218_v43, %v2118_v41  ;;  %v1239_v51 = vpop.f32.mrf.mxu1  ;;  %v126_v43 = vld [vmem:[%s5284_s0 + $0x300] sm:$0xff] }
 0x178   :  { %v1870_v53 = vpack.c.bf16 %v1772_v44, %v1772_v44  ;;  %v2463_v54 = vpack.c.bf16 %v2365_v45, %v2365_v45  ;;  %v1240_v55 = vadd.f32 %v4516_v10, %v1239_v51  ;;  %v1477_v58 = vmul.f32 %v3367_v7, %v536_v50  ;;  %2682 = vmatmul.msk.f32.gmra.mxu0 %vm136_vm0, %v75_v47  ;;  %v2831_v44 = vld [vmem:[%s5284_s0 + $0x610] sm:$0xff] }
 0x179   :  { %v1821_v56 = vmax.f32 %v1723_v48, 0.0  ;;  %v2414_v57 = vmax.f32 %v2316_v49, 0.0  ;;  %v2070_v59 = vmul.f32 %v3369_v9, %v536_v50  ;;  %v682_v60 = vpop.f32.mrf.mxu2  ;;  %v1386_v62 = vpop.f32.mrf.mxu3 }
 0x17a   :  { %1969 = vst.msk [vmem:[%s5288_s4 + $0x70] sm:$0xf] %vm1940_vm1, %v1870_v53  ;;  %v1577_v4 = vmul.f32 %v3371_v11, %v1240_v55  ;;  %v2170_v61 = vmul.f32 %v3373_v12, %v1240_v55  ;;  %2878 = vmatmul.msk.f32.gmra.mxu1 %vm136_vm0, %v2780_v52  ;;  %v683_v0 = vadd.f32 %v4516_v10, %v682_v60  ;;  %v77_v52 = vld [vmem:[%s5284_s0 + $0x178] sm:$0xff] }
 0x17b   :  { %2962 = vst.msk [vmem:[%s5288_s4 + $0x1f8] sm:$0xf] %vm1940_vm1, %v2463_v54  ;;  %v1919_v6 = vpack.c.bf16 %v1821_v56, %v1821_v56  ;;  %v2512_v63 = vpack.c.bf16 %v2414_v57, %v2414_v57  ;;  %v1387_v1 = vadd.f32 %v4516_v10, %v1386_v62  ;;  %v2782_v57 = vld [vmem:[%s5284_s0 + $0x488] sm:$0xff] }
 0x17c   :  { %v1675_v2 = vadd.f32 %v1577_v4, %v1477_v58  ;;  %v2268_v3 = vadd.f32 %v2170_v61, %v2070_v59  ;;  %v1526_v13 = vmul.f32 %v3367_v7, %v683_v0  ;;  %v2119_v14 = vmul.f32 %v3369_v9, %v683_v0 }
 0x17d   :  { %2018 = vst.msk [vmem:[%s5288_s4 + $0x134] sm:$0xf] %vm1940_vm1, %v1919_v6  ;;  %v1626_v15 = vmul.f32 %v3371_v11, %v1387_v1  ;;  %v2219_v16 = vmul.f32 %v3373_v12, %v1387_v1  ;;  %v538_v19 = vpop.f32.mrf.mxu0 }
 0x17e   :  { %3011 = vst.msk [vmem:[%s5288_s4 + $0x2bc] sm:$0xf] %vm1940_vm1, %v2512_v63  ;;  %v1773_v17 = vmax.f32 %v1675_v2, 0.0  ;;  %v2366_v18 = vmax.f32 %v2268_v3, 0.0  ;;  %2732 = vmatmul.msk.f32.gmra.mxu2 %vm136_vm0, %v125_v5  ;;  %2928 = vmatmul.msk.f32.gmra.mxu3 %vm136_vm0, %v2830_v8  ;;  %v539_v23 = vadd.f32 %v4516_v10, %v538_v19 }
 0x17f   :  { %v1724_v21 = vadd.f32 %v1626_v15, %v1526_v13  ;;  %v2317_v22 = vadd.f32 %v2219_v16, %v2119_v14  ;;  %v1242_v24 = vpop.f32.mrf.mxu1  ;;  %v127_v16 = vld [vmem:[%s5284_s0 + $0x308] sm:$0xff] }
 0x180   :  { %v1871_v26 = vpack.c.bf16 %v1773_v17, %v1773_v17  ;;  %v2464_v27 = vpack.c.bf16 %v2366_v18, %v2366_v18  ;;  %v1243_v28 = vadd.f32 %v4516_v10, %v1242_v24  ;;  %v1478_v31 = vmul.f32 %v3367_v7, %v539_v23  ;;  %2683 = vmatmul.msk.f32.gmra.mxu0 %vm136_vm0, %v76_v20  ;;  %v2832_v17 = vld [vmem:[%s5284_s0 + $0x618] sm:$0xff] }
 0x181   :  { %v1822_v29 = vmax.f32 %v1724_v21, 0.0  ;;  %v2415_v30 = vmax.f32 %v2317_v22, 0.0  ;;  %v2071_v32 = vmul.f32 %v3369_v9, %v539_v23  ;;  %v685_v33 = vpop.f32.mrf.mxu2  ;;  %v1389_v36 = vpop.f32.mrf.mxu3 }
 0x182   :  { %1970 = vst.msk [vmem:[%s5288_s4 + $0x74] sm:$0xf] %vm1940_vm1, %v1871_v26  ;;  %v1578_v34 = vmul.f32 %v3371_v11, %v1243_v28  ;;  %v2171_v35 = vmul.f32 %v3373_v12, %v1243_v28  ;;  %2879 = vmatmul.msk.f32.gmra.mxu1 %vm136_vm0, %v2781_v25  ;;  %v686_v39 = vadd.f32 %v4516_v10, %v685_v33  ;;  %v78_v25 = vld [vmem:[%s5284_s0 + $0x180] sm:$0xff] }
 0x183   :  { %2963 = vst.msk [vmem:[%s5288_s4 + $0x1fc] sm:$0xf] %vm1940_vm1, %v2464_v27  ;;  %v1920_v37 = vpack.c.bf16 %v1822_v29, %v1822_v29  ;;  %v2513_v38 = vpack.c.bf16 %v2415_v30, %v2415_v30  ;;  %v1390_v40 = vadd.f32 %v4516_v10, %v1389_v36  ;;  %v2783_v30 = vld [vmem:[%s5284_s0 + $0x490] sm:$0xff] }
 0x184   :  { %v1676_v41 = vadd.f32 %v1578_v34, %v1478_v31  ;;  %v2269_v42 = vadd.f32 %v2171_v35, %v2071_v32  ;;  %v1527_v45 = vmul.f32 %v3367_v7, %v686_v39  ;;  %v2120_v46 = vmul.f32 %v3369_v9, %v686_v39 }
 0x185   :  { %2019 = vst.msk [vmem:[%s5288_s4 + $0x138] sm:$0xf] %vm1940_vm1, %v1920_v37  ;;  %v1627_v47 = vmul.f32 %v3371_v11, %v1390_v40  ;;  %v2220_v48 = vmul.f32 %v3373_v12, %v1390_v40  ;;  %v541_v51 = vpop.f32.mrf.mxu0 }
 0x186   :  { %3012 = vst.msk [vmem:[%s5288_s4 + $0x2c0] sm:$0xf] %vm1940_vm1, %v2513_v38  ;;  %v1774_v49 = vmax.f32 %v1676_v41, 0.0  ;;  %v2367_v50 = vmax.f32 %v2269_v42, 0.0  ;;  %2733 = vmatmul.msk.f32.gmra.mxu2 %vm136_vm0, %v126_v43  ;;  %2929 = vmatmul.msk.f32.gmra.mxu3 %vm136_vm0, %v2831_v44  ;;  %v542_v55 = vadd.f32 %v4516_v10, %v541_v51 }
 0x187   :  { %v1725_v53 = vadd.f32 %v1627_v47, %v1527_v45  ;;  %v2318_v54 = vadd.f32 %v2220_v48, %v2120_v46  ;;  %v1245_v56 = vpop.f32.mrf.mxu1 }
 0x188   :  { %v1872_v58 = vpack.c.bf16 %v1774_v49, %v1774_v49  ;;  %v2465_v59 = vpack.c.bf16 %v2367_v50, %v2367_v50  ;;  %v1246_v60 = vadd.f32 %v4516_v10, %v1245_v56  ;;  %v1479_v62 = vmul.f32 %v3367_v7, %v542_v55  ;;  %2684 = vmatmul.msk.f32.gmra.mxu0 %vm136_vm0, %v77_v52 }
 0x189   :  { %v1823_v4 = vmax.f32 %v1725_v53, 0.0  ;;  %v2416_v61 = vmax.f32 %v2318_v54, 0.0  ;;  %v2072_v6 = vmul.f32 %v3369_v9, %v542_v55  ;;  %v688_v63 = vpop.f32.mrf.mxu2  ;;  %v1392_v2 = vpop.f32.mrf.mxu3 }
 0x18a   :  { %1971 = vst.msk [vmem:[%s5288_s4 + $0x78] sm:$0xf] %vm1940_vm1, %v1872_v58  ;;  %v1579_v0 = vmul.f32 %v3371_v11, %v1246_v60  ;;  %v2172_v1 = vmul.f32 %v3373_v12, %v1246_v60  ;;  %2880 = vmatmul.msk.f32.gmra.mxu1 %vm136_vm0, %v2782_v57  ;;  %v689_v8 = vadd.f32 %v4516_v10, %v688_v63 }
 0x18b   :  { %2964 = vst.msk [vmem:[%s5288_s4 + $0x200] sm:$0xf] %vm1940_vm1, %v2465_v59  ;;  %v1921_v3 = vpack.c.bf16 %v1823_v4, %v1823_v4  ;;  %v2514_v5 = vpack.c.bf16 %v2416_v61, %v2416_v61  ;;  %v1393_v13 = vadd.f32 %v4516_v10, %v1392_v2 }
 0x18c   :  { %v1677_v14 = vadd.f32 %v1579_v0, %v1479_v62  ;;  %v2270_v15 = vadd.f32 %v2172_v1, %v2072_v6  ;;  %v1528_v18 = vmul.f32 %v3367_v7, %v689_v8  ;;  %v2121_v19 = vmul.f32 %v3369_v9, %v689_v8 }
 0x18d   :  { %2020 = vst.msk [vmem:[%s5288_s4 + $0x13c] sm:$0xf] %vm1940_vm1, %v1921_v3  ;;  %v1628_v20 = vmul.f32 %v3371_v11, %v1393_v13  ;;  %v2221_v21 = vmul.f32 %v3373_v12, %v1393_v13  ;;  %v544_v24 = vpop.f32.mrf.mxu0 }
 0x18e   :  { %3013 = vst.msk [vmem:[%s5288_s4 + $0x2c4] sm:$0xf] %vm1940_vm1, %v2514_v5  ;;  %v1775_v22 = vmax.f32 %v1677_v14, 0.0  ;;  %v2368_v23 = vmax.f32 %v2270_v15, 0.0  ;;  %2734 = vmatmul.msk.f32.gmra.mxu2 %vm136_vm0, %v127_v16  ;;  %2930 = vmatmul.msk.f32.gmra.mxu3 %vm136_vm0, %v2832_v17  ;;  %v545_v28 = vadd.f32 %v4516_v10, %v544_v24 }
 0x18f   :  { %v1726_v26 = vadd.f32 %v1628_v20, %v1528_v18  ;;  %v2319_v27 = vadd.f32 %v2221_v21, %v2121_v19  ;;  %v1248_v29 = vpop.f32.mrf.mxu1 }
 0x190   :  { %v1873_v31 = vpack.c.bf16 %v1775_v22, %v1775_v22  ;;  %v2466_v32 = vpack.c.bf16 %v2368_v23, %v2368_v23  ;;  %v1249_v33 = vadd.f32 %v4516_v10, %v1248_v29  ;;  %v1480_v36 = vmul.f32 %v3367_v7, %v545_v28  ;;  %2685 = vmatmul.msk.f32.gmra.mxu0 %vm136_vm0, %v78_v25 }
 0x191   :  { %v1824_v34 = vmax.f32 %v1726_v26, 0.0  ;;  %v2417_v35 = vmax.f32 %v2319_v27, 0.0  ;;  %v2073_v37 = vmul.f32 %v3369_v9, %v545_v28  ;;  %v691_v38 = vpop.f32.mrf.mxu2  ;;  %v1395_v41 = vpop.f32.mrf.mxu3 }
 0x192   :  { %1972 = vst.msk [vmem:[%s5288_s4 + $0x7c] sm:$0xf] %vm1940_vm1, %v1873_v31  ;;  %v1580_v39 = vmul.f32 %v3371_v11, %v1249_v33  ;;  %v2173_v40 = vmul.f32 %v3373_v12, %v1249_v33  ;;  %2881 = vmatmul.msk.f32.gmra.mxu1 %vm136_vm0, %v2783_v30  ;;  %v692_v44 = vadd.f32 %v4516_v10, %v691_v38 }
 0x193   :  { %2965 = vst.msk [vmem:[%s5288_s4 + $0x204] sm:$0xf] %vm1940_vm1, %v2466_v32  ;;  %v1922_v42 = vpack.c.bf16 %v1824_v34, %v1824_v34  ;;  %v2515_v43 = vpack.c.bf16 %v2417_v35, %v2417_v35  ;;  %v1396_v45 = vadd.f32 %v4516_v10, %v1395_v41 }
 0x194   :  { %v1678_v46 = vadd.f32 %v1580_v39, %v1480_v36  ;;  %v2271_v47 = vadd.f32 %v2173_v40, %v2073_v37  ;;  %v1529_v48 = vmul.f32 %v3367_v7, %v692_v44  ;;  %v2122_v49 = vmul.f32 %v3369_v9, %v692_v44 }
 0x195   :  { %2021 = vst.msk [vmem:[%s5288_s4 + $0x140] sm:$0xf] %vm1940_vm1, %v1922_v42  ;;  %v1629_v50 = vmul.f32 %v3371_v11, %v1396_v45  ;;  %v2222_v51 = vmul.f32 %v3373_v12, %v1396_v45  ;;  %v547_v54 = vpop.f32.mrf.mxu0 }
 0x196   :  { %3014 = vst.msk [vmem:[%s5288_s4 + $0x2c8] sm:$0xf] %vm1940_vm1, %v2515_v43  ;;  %v1776_v52 = vmax.f32 %v1678_v46, 0.0  ;;  %v2369_v53 = vmax.f32 %v2271_v47, 0.0  ;;  %v548_v57 = vadd.f32 %v4516_v10, %v547_v54 }
 0x197   :  { %v1727_v55 = vadd.f32 %v1629_v50, %v1529_v48  ;;  %v2320_v56 = vadd.f32 %v2222_v51, %v2122_v49  ;;  %v1251_v58 = vpop.f32.mrf.mxu1 }
 0x198   :  { %v1874_v59 = vpack.c.bf16 %v1776_v52, %v1776_v52  ;;  %v2467_v60 = vpack.c.bf16 %v2369_v53, %v2369_v53  ;;  %v1252_v4 = vadd.f32 %v4516_v10, %v1251_v58  ;;  %v1481_v6 = vmul.f32 %v3367_v7, %v548_v57 }
 0x199   :  { %v1825_v61 = vmax.f32 %v1727_v55, 0.0  ;;  %v2418_v62 = vmax.f32 %v2320_v56, 0.0  ;;  %v2074_v63 = vmul.f32 %v3369_v9, %v548_v57  ;;  %v694_v0 = vpop.f32.mrf.mxu2  ;;  %v1398_v3 = vpop.f32.mrf.mxu3 }
 0x19a   :  { %1973 = vst.msk [vmem:[%s5288_s4 + $0x80] sm:$0xf] %vm1940_vm1, %v1874_v59  ;;  %v1581_v1 = vmul.f32 %v3371_v11, %v1252_v4  ;;  %v2174_v2 = vmul.f32 %v3373_v12, %v1252_v4  ;;  %v695_v13 = vadd.f32 %v4516_v10, %v694_v0  ;;  %v1399_v14 = vadd.f32 %v4516_v10, %v1398_v3 }
 0x19b   :  { %2966 = vst.msk [vmem:[%s5288_s4 + $0x208] sm:$0xf] %vm1940_vm1, %v2467_v60  ;;  %v1923_v5 = vpack.c.bf16 %v1825_v61, %v1825_v61  ;;  %v2516_v8 = vpack.c.bf16 %v2418_v62, %v2418_v62 }
 0x19c   :  { %v1679_v15 = vadd.f32 %v1581_v1, %v1481_v6  ;;  %v2272_v16 = vadd.f32 %v2174_v2, %v2074_v63  ;;  %v1530_v17 = vmul.f32 %v3367_v7, %v695_v13  ;;  %v2123_v18 = vmul.f32 %v3369_v9, %v695_v13 }
 0x19d   :  { %2022 = vst.msk [vmem:[%s5288_s4 + $0x144] sm:$0xf] %vm1940_vm1, %v1923_v5  ;;  %v1630_v19 = vmul.f32 %v3371_v11, %v1399_v14  ;;  %v2223_v20 = vmul.f32 %v3373_v12, %v1399_v14  ;;  %v550_v23 = vpop.f32.mrf.mxu0 }
 0x19e   :  { %3015 = vst.msk [vmem:[%s5288_s4 + $0x2cc] sm:$0xf] %vm1940_vm1, %v2516_v8  ;;  %v1777_v21 = vmax.f32 %v1679_v15, 0.0  ;;  %v2370_v22 = vmax.f32 %v2272_v16, 0.0  ;;  %v551_v26 = vadd.f32 %v4516_v10, %v550_v23 }
 0x19f   :  { %v1728_v24 = vadd.f32 %v1630_v19, %v1530_v17  ;;  %v2321_v25 = vadd.f32 %v2223_v20, %v2123_v18  ;;  %v1254_v27 = vpop.f32.mrf.mxu1 }
 0x1a0   :  { %v1875_v28 = vpack.c.bf16 %v1777_v21, %v1777_v21  ;;  %v2468_v29 = vpack.c.bf16 %v2370_v22, %v2370_v22  ;;  %v1255_v30 = vadd.f32 %v4516_v10, %v1254_v27  ;;  %v1482_v33 = vmul.f32 %v3367_v7, %v551_v26 }
 0x1a1   :  { %v1826_v31 = vmax.f32 %v1728_v24, 0.0  ;;  %v2419_v32 = vmax.f32 %v2321_v25, 0.0  ;;  %v2075_v34 = vmul.f32 %v3369_v9, %v551_v26  ;;  %v697_v35 = vpop.f32.mrf.mxu2  ;;  %v1401_v38 = vpop.f32.mrf.mxu3 }
 0x1a2   :  { %1974 = vst.msk [vmem:[%s5288_s4 + $0x84] sm:$0xf] %vm1940_vm1, %v1875_v28  ;;  %v1582_v36 = vmul.f32 %v3371_v11, %v1255_v30  ;;  %v2175_v37 = vmul.f32 %v3373_v12, %v1255_v30  ;;  %v698_v41 = vadd.f32 %v4516_v10, %v697_v35  ;;  %v1402_v42 = vadd.f32 %v4516_v10, %v1401_v38 }
 0x1a3   :  { %2967 = vst.msk [vmem:[%s5288_s4 + $0x20c] sm:$0xf] %vm1940_vm1, %v2468_v29  ;;  %v1924_v39 = vpack.c.bf16 %v1826_v31, %v1826_v31  ;;  %v2517_v40 = vpack.c.bf16 %v2419_v32, %v2419_v32 }
 0x1a4   :  { %v1680_v43 = vadd.f32 %v1582_v36, %v1482_v33  ;;  %v2273_v44 = vadd.f32 %v2175_v37, %v2075_v34  ;;  %v1531_v45 = vmul.f32 %v3367_v7, %v698_v41  ;;  %v2124_v46 = vmul.f32 %v3369_v9, %v698_v41 }
 0x1a5   :  { %2023 = vst.msk [vmem:[%s5288_s4 + $0x148] sm:$0xf] %vm1940_vm1, %v1924_v39  ;;  %v1631_v47 = vmul.f32 %v3371_v11, %v1402_v42  ;;  %v2224_v48 = vmul.f32 %v3373_v12, %v1402_v42  ;;  %v553_v51 = vpop.f32.mrf.mxu0 }
 0x1a6   :  { %3016 = vst.msk [vmem:[%s5288_s4 + $0x2d0] sm:$0xf] %vm1940_vm1, %v2517_v40  ;;  %v1778_v49 = vmax.f32 %v1680_v43, 0.0  ;;  %v2371_v50 = vmax.f32 %v2273_v44, 0.0  ;;  %v554_v54 = vadd.f32 %v4516_v10, %v553_v51 }
 0x1a7   :  { %v1729_v52 = vadd.f32 %v1631_v47, %v1531_v45  ;;  %v2322_v53 = vadd.f32 %v2224_v48, %v2124_v46  ;;  %v1257_v55 = vpop.f32.mrf.mxu1 }
 0x1a8   :  { %v1876_v56 = vpack.c.bf16 %v1778_v49, %v1778_v49  ;;  %v2469_v57 = vpack.c.bf16 %v2371_v50, %v2371_v50  ;;  %v1258_v58 = vadd.f32 %v4516_v10, %v1257_v55  ;;  %v1483_v4 = vmul.f32 %v3367_v7, %v554_v54 }
 0x1a9   :  { %v1827_v59 = vmax.f32 %v1729_v52, 0.0  ;;  %v2420_v60 = vmax.f32 %v2322_v53, 0.0  ;;  %v2076_v61 = vmul.f32 %v3369_v9, %v554_v54  ;;  %v700_v62 = vpop.f32.mrf.mxu2  ;;  %v1404_v0 = vpop.f32.mrf.mxu3 }
 0x1aa   :  { %1975 = vst.msk [vmem:[%s5288_s4 + $0x88] sm:$0xf] %vm1940_vm1, %v1876_v56  ;;  %v1583_v6 = vmul.f32 %v3371_v11, %v1258_v58  ;;  %v2176_v63 = vmul.f32 %v3373_v12, %v1258_v58  ;;  %v701_v3 = vadd.f32 %v4516_v10, %v700_v62  ;;  %v1405_v5 = vadd.f32 %v4516_v10, %v1404_v0 }
 0x1ab   :  { %2968 = vst.msk [vmem:[%s5288_s4 + $0x210] sm:$0xf] %vm1940_vm1, %v2469_v57  ;;  %v1925_v1 = vpack.c.bf16 %v1827_v59, %v1827_v59  ;;  %v2518_v2 = vpack.c.bf16 %v2420_v60, %v2420_v60 }
 0x1ac   :  { %v1681_v8 = vadd.f32 %v1583_v6, %v1483_v4  ;;  %v2274_v13 = vadd.f32 %v2176_v63, %v2076_v61  ;;  %v1532_v14 = vmul.f32 %v3367_v7, %v701_v3  ;;  %v2125_v15 = vmul.f32 %v3369_v9, %v701_v3 }
 0x1ad   :  { %2024 = vst.msk [vmem:[%s5288_s4 + $0x14c] sm:$0xf] %vm1940_vm1, %v1925_v1  ;;  %v1632_v16 = vmul.f32 %v3371_v11, %v1405_v5  ;;  %v2225_v17 = vmul.f32 %v3373_v12, %v1405_v5  ;;  %v556_v20 = vpop.f32.mrf.mxu0 }
 0x1ae   :  { %3017 = vst.msk [vmem:[%s5288_s4 + $0x2d4] sm:$0xf] %vm1940_vm1, %v2518_v2  ;;  %v1779_v18 = vmax.f32 %v1681_v8, 0.0  ;;  %v2372_v19 = vmax.f32 %v2274_v13, 0.0  ;;  %v557_v23 = vadd.f32 %v4516_v10, %v556_v20 }
 0x1af   :  { %v1730_v21 = vadd.f32 %v1632_v16, %v1532_v14  ;;  %v2323_v22 = vadd.f32 %v2225_v17, %v2125_v15  ;;  %v1260_v24 = vpop.f32.mrf.mxu1 }
 0x1b0   :  { %v1877_v25 = vpack.c.bf16 %v1779_v18, %v1779_v18  ;;  %v2470_v26 = vpack.c.bf16 %v2372_v19, %v2372_v19  ;;  %v1261_v27 = vadd.f32 %v4516_v10, %v1260_v24  ;;  %v1484_v30 = vmul.f32 %v3367_v7, %v557_v23 }
 0x1b1   :  { %v1828_v28 = vmax.f32 %v1730_v21, 0.0  ;;  %v2421_v29 = vmax.f32 %v2323_v22, 0.0  ;;  %v2077_v31 = vmul.f32 %v3369_v9, %v557_v23  ;;  %v703_v32 = vpop.f32.mrf.mxu2  ;;  %v1407_v35 = vpop.f32.mrf.mxu3 }
 0x1b2   :  { %1976 = vst.msk [vmem:[%s5288_s4 + $0x8c] sm:$0xf] %vm1940_vm1, %v1877_v25  ;;  %v1584_v33 = vmul.f32 %v3371_v11, %v1261_v27  ;;  %v2177_v34 = vmul.f32 %v3373_v12, %v1261_v27  ;;  %v704_v38 = vadd.f32 %v4516_v10, %v703_v32  ;;  %v1408_v39 = vadd.f32 %v4516_v10, %v1407_v35 }
 0x1b3   :  { %2969 = vst.msk [vmem:[%s5288_s4 + $0x214] sm:$0xf] %vm1940_vm1, %v2470_v26  ;;  %v1926_v36 = vpack.c.bf16 %v1828_v28, %v1828_v28  ;;  %v2519_v37 = vpack.c.bf16 %v2421_v29, %v2421_v29 }
 0x1b4   :  { %v1682_v40 = vadd.f32 %v1584_v33, %v1484_v30  ;;  %v2275_v41 = vadd.f32 %v2177_v34, %v2077_v31  ;;  %v1533_v42 = vmul.f32 %v3367_v7, %v704_v38  ;;  %v2126_v43 = vmul.f32 %v3369_v9, %v704_v38 }
 0x1b5   :  { %2025 = vst.msk [vmem:[%s5288_s4 + $0x150] sm:$0xf] %vm1940_vm1, %v1926_v36  ;;  %v1633_v44 = vmul.f32 %v3371_v11, %v1408_v39  ;;  %v2226_v45 = vmul.f32 %v3373_v12, %v1408_v39  ;;  %v559_v48 = vpop.f32.mrf.mxu0 }
 0x1b6   :  { %3018 = vst.msk [vmem:[%s5288_s4 + $0x2d8] sm:$0xf] %vm1940_vm1, %v2519_v37  ;;  %v1780_v46 = vmax.f32 %v1682_v40, 0.0  ;;  %v2373_v47 = vmax.f32 %v2275_v41, 0.0  ;;  %v560_v51 = vadd.f32 %v4516_v10, %v559_v48 }
 0x1b7   :  { %v1731_v49 = vadd.f32 %v1633_v44, %v1533_v42  ;;  %v2324_v50 = vadd.f32 %v2226_v45, %v2126_v43  ;;  %v1263_v52 = vpop.f32.mrf.mxu1 }
 0x1b8   :  { %v1878_v53 = vpack.c.bf16 %v1780_v46, %v1780_v46  ;;  %v2471_v54 = vpack.c.bf16 %v2373_v47, %v2373_v47  ;;  %v1264_v55 = vadd.f32 %v4516_v10, %v1263_v52  ;;  %v1485_v58 = vmul.f32 %v3367_v7, %v560_v51 }
 0x1b9   :  { %v1829_v56 = vmax.f32 %v1731_v49, 0.0  ;;  %v2422_v57 = vmax.f32 %v2324_v50, 0.0  ;;  %v2078_v59 = vmul.f32 %v3369_v9, %v560_v51  ;;  %v706_v60 = vpop.f32.mrf.mxu2  ;;  %v1410_v62 = vpop.f32.mrf.mxu3 }
 0x1ba   :  { %1977 = vst.msk [vmem:[%s5288_s4 + $0x90] sm:$0xf] %vm1940_vm1, %v1878_v53  ;;  %v1585_v4 = vmul.f32 %v3371_v11, %v1264_v55  ;;  %v2178_v61 = vmul.f32 %v3373_v12, %v1264_v55  ;;  %v707_v0 = vadd.f32 %v4516_v10, %v706_v60  ;;  %v1411_v1 = vadd.f32 %v4516_v10, %v1410_v62 }
 0x1bb   :  { %2970 = vst.msk [vmem:[%s5288_s4 + $0x218] sm:$0xf] %vm1940_vm1, %v2471_v54  ;;  %v1927_v6 = vpack.c.bf16 %v1829_v56, %v1829_v56  ;;  %v2520_v63 = vpack.c.bf16 %v2422_v57, %v2422_v57 }
 0x1bc   :  { %v1683_v2 = vadd.f32 %v1585_v4, %v1485_v58  ;;  %v2276_v3 = vadd.f32 %v2178_v61, %v2078_v59  ;;  %v1534_v5 = vmul.f32 %v3367_v7, %v707_v0  ;;  %v2127_v8 = vmul.f32 %v3369_v9, %v707_v0 }
 0x1bd   :  { %2026 = vst.msk [vmem:[%s5288_s4 + $0x154] sm:$0xf] %vm1940_vm1, %v1927_v6  ;;  %v1634_v13 = vmul.f32 %v3371_v11, %v1411_v1  ;;  %v2227_v14 = vmul.f32 %v3373_v12, %v1411_v1  ;;  %v562_v17 = vpop.f32.mrf.mxu0 }
 0x1be   :  { %3019 = vst.msk [vmem:[%s5288_s4 + $0x2dc] sm:$0xf] %vm1940_vm1, %v2520_v63  ;;  %v1781_v15 = vmax.f32 %v1683_v2, 0.0  ;;  %v2374_v16 = vmax.f32 %v2276_v3, 0.0  ;;  %v563_v20 = vadd.f32 %v4516_v10, %v562_v17 }
 0x1bf   :  { %v1732_v18 = vadd.f32 %v1634_v13, %v1534_v5  ;;  %v2325_v19 = vadd.f32 %v2227_v14, %v2127_v8  ;;  %v1266_v21 = vpop.f32.mrf.mxu1 }
 0x1c0   :  { %v1879_v22 = vpack.c.bf16 %v1781_v15, %v1781_v15  ;;  %v2472_v23 = vpack.c.bf16 %v2374_v16, %v2374_v16  ;;  %v1267_v24 = vadd.f32 %v4516_v10, %v1266_v21  ;;  %v1486_v27 = vmul.f32 %v3367_v7, %v563_v20 }
 0x1c1   :  { %v1830_v25 = vmax.f32 %v1732_v18, 0.0  ;;  %v2423_v26 = vmax.f32 %v2325_v19, 0.0  ;;  %v2079_v28 = vmul.f32 %v3369_v9, %v563_v20  ;;  %v709_v29 = vpop.f32.mrf.mxu2  ;;  %v1413_v32 = vpop.f32.mrf.mxu3 }
 0x1c2   :  { %1978 = vst.msk [vmem:[%s5288_s4 + $0x94] sm:$0xf] %vm1940_vm1, %v1879_v22  ;;  %v1586_v30 = vmul.f32 %v3371_v11, %v1267_v24  ;;  %v2179_v31 = vmul.f32 %v3373_v12, %v1267_v24  ;;  %v710_v35 = vadd.f32 %v4516_v10, %v709_v29  ;;  %v1414_v36 = vadd.f32 %v4516_v10, %v1413_v32 }
 0x1c3   :  { %2971 = vst.msk [vmem:[%s5288_s4 + $0x21c] sm:$0xf] %vm1940_vm1, %v2472_v23  ;;  %v1928_v33 = vpack.c.bf16 %v1830_v25, %v1830_v25  ;;  %v2521_v34 = vpack.c.bf16 %v2423_v26, %v2423_v26 }
 0x1c4   :  { %v1684_v37 = vadd.f32 %v1586_v30, %v1486_v27  ;;  %v2277_v38 = vadd.f32 %v2179_v31, %v2079_v28  ;;  %v1535_v39 = vmul.f32 %v3367_v7, %v710_v35  ;;  %v2128_v40 = vmul.f32 %v3369_v9, %v710_v35  ;;  %v5028_v31 = vld [vmem:[%s5286_s2] ss:$0 sm:$0xff] }
 0x1c5   :  { %2027 = vst.msk [vmem:[%s5288_s4 + $0x158] sm:$0xf] %vm1940_vm1, %v1928_v33  ;;  %v1635_v41 = vmul.f32 %v3371_v11, %v1414_v36  ;;  %v2228_v42 = vmul.f32 %v3373_v12, %v1414_v36  ;;  %v565_v45 = vpop.f32.mrf.mxu0 }
 0x1c6   :  { %3020 = vst.msk [vmem:[%s5288_s4 + $0x2e0] sm:$0xf] %vm1940_vm1, %v2521_v34  ;;  %v1782_v43 = vmax.f32 %v1684_v37, 0.0  ;;  %v2375_v44 = vmax.f32 %v2277_v38, 0.0  ;;  %v566_v48 = vadd.f32 %v4516_v10, %v565_v45 }
 0x1c7   :  { %v1733_v46 = vadd.f32 %v1635_v41, %v1535_v39  ;;  %v2326_v47 = vadd.f32 %v2228_v42, %v2128_v40  ;;  %v1269_v49 = vpop.f32.mrf.mxu1 }
 0x1c8   :  { %v1880_v50 = vpack.c.bf16 %v1782_v43, %v1782_v43  ;;  %v2473_v51 = vpack.c.bf16 %v2375_v44, %v2375_v44  ;;  %v1270_v52 = vadd.f32 %v4516_v10, %v1269_v49  ;;  %v1487_v55 = vmul.f32 %v3367_v7, %v566_v48 }
 0x1c9   :  { %v1831_v53 = vmax.f32 %v1733_v46, 0.0  ;;  %v2424_v54 = vmax.f32 %v2326_v47, 0.0  ;;  %v2080_v56 = vmul.f32 %v3369_v9, %v566_v48  ;;  %v712_v57 = vpop.f32.mrf.mxu2  ;;  %v1416_v60 = vpop.f32.mrf.mxu3 }
 0x1ca   :  { %1979 = vst.msk [vmem:[%s5288_s4 + $0x98] sm:$0xf] %vm1940_vm1, %v1880_v50  ;;  %v1587_v58 = vmul.f32 %v3371_v11, %v1270_v52  ;;  %v2180_v59 = vmul.f32 %v3373_v12, %v1270_v52  ;;  %v713_v62 = vadd.f32 %v4516_v10, %v712_v57  ;;  %v1417_v6 = vadd.f32 %v4516_v10, %v1416_v60 }
 0x1cb   :  { %2972 = vst.msk [vmem:[%s5288_s4 + $0x220] sm:$0xf] %vm1940_vm1, %v2473_v51  ;;  %v1929_v4 = vpack.c.bf16 %v1831_v53, %v1831_v53  ;;  %v2522_v61 = vpack.c.bf16 %v2424_v54, %v2424_v54 }
 0x1cc   :  { %v1685_v63 = vadd.f32 %v1587_v58, %v1487_v55  ;;  %v2278_v0 = vadd.f32 %v2180_v59, %v2080_v56  ;;  %v1536_v1 = vmul.f32 %v3367_v7, %v713_v62  ;;  %v2129_v2 = vmul.f32 %v3369_v9, %v713_v62 }
 0x1cd   :  { %2028 = vst.msk [vmem:[%s5288_s4 + $0x15c] sm:$0xf] %vm1940_vm1, %v1929_v4  ;;  %v1636_v3 = vmul.f32 %v3371_v11, %v1417_v6  ;;  %v2229_v5 = vmul.f32 %v3373_v12, %v1417_v6  ;;  %v568_v14 = vpop.f32.mrf.mxu0 }
 0x1ce   :  { %3021 = vst.msk [vmem:[%s5288_s4 + $0x2e4] sm:$0xf] %vm1940_vm1, %v2522_v61  ;;  %v1783_v8 = vmax.f32 %v1685_v63, 0.0  ;;  %v2376_v13 = vmax.f32 %v2278_v0, 0.0  ;;  %v569_v17 = vadd.f32 %v4516_v10, %v568_v14 }
 0x1cf   :  { %v1734_v15 = vadd.f32 %v1636_v3, %v1536_v1  ;;  %v2327_v16 = vadd.f32 %v2229_v5, %v2129_v2  ;;  %v1272_v18 = vpop.f32.mrf.mxu1 }
 0x1d0   :  { %v1881_v19 = vpack.c.bf16 %v1783_v8, %v1783_v8  ;;  %v2474_v20 = vpack.c.bf16 %v2376_v13, %v2376_v13  ;;  %v1273_v21 = vadd.f32 %v4516_v10, %v1272_v18  ;;  %v1488_v24 = vmul.f32 %v3367_v7, %v569_v17 }
 0x1d1   :  { %v1832_v22 = vmax.f32 %v1734_v15, 0.0  ;;  %v2425_v23 = vmax.f32 %v2327_v16, 0.0  ;;  %v2081_v25 = vmul.f32 %v3369_v9, %v569_v17  ;;  %v715_v26 = vpop.f32.mrf.mxu2  ;;  %v1419_v29 = vpop.f32.mrf.mxu3 }
 0x1d2   :  { %1980 = vst.msk [vmem:[%s5288_s4 + $0x9c] sm:$0xf] %vm1940_vm1, %v1881_v19  ;;  %v1588_v27 = vmul.f32 %v3371_v11, %v1273_v21  ;;  %v2181_v28 = vmul.f32 %v3373_v12, %v1273_v21  ;;  %v716_v32 = vadd.f32 %v5028_v31, %v715_v26  ;;  %v1420_v33 = vadd.f32 %v5028_v31, %v1419_v29 }
 0x1d3   :  { %2973 = vst.msk [vmem:[%s5288_s4 + $0x224] sm:$0xf] %vm1940_vm1, %v2474_v20  ;;  %v1930_v10 = vpack.c.bf16 %v1832_v22, %v1832_v22  ;;  %v2523_v30 = vpack.c.bf16 %v2425_v23, %v2425_v23 }
 0x1d4   :  { %v1686_v34 = vadd.f32 %v1588_v27, %v1488_v24  ;;  %v2279_v35 = vadd.f32 %v2181_v28, %v2081_v25  ;;  %v1537_v36 = vmul.f32 %v3367_v7, %v716_v32  ;;  %v2130_v37 = vmul.f32 %v3369_v9, %v716_v32 }
 0x1d5   :  { %2029 = vst.msk [vmem:[%s5288_s4 + $0x160] sm:$0xf] %vm1940_vm1, %v1930_v10  ;;  %v1637_v38 = vmul.f32 %v3371_v11, %v1420_v33  ;;  %v2230_v39 = vmul.f32 %v3373_v12, %v1420_v33  ;;  %v571_v42 = vpop.f32.mrf.mxu0 }
 0x1d6   :  { %3022 = vst.msk [vmem:[%s5288_s4 + $0x2e8] sm:$0xf] %vm1940_vm1, %v2523_v30  ;;  %v1784_v40 = vmax.f32 %v1686_v34, 0.0  ;;  %v2377_v41 = vmax.f32 %v2279_v35, 0.0  ;;  %v572_v45 = vadd.f32 %v5028_v31, %v571_v42 }
 0x1d7   :  { %v1735_v43 = vadd.f32 %v1637_v38, %v1537_v36  ;;  %v2328_v44 = vadd.f32 %v2230_v39, %v2130_v37  ;;  %v1275_v46 = vpop.f32.mrf.mxu1 }
 0x1d8   :  { %v1882_v47 = vpack.c.bf16 %v1784_v40, %v1784_v40  ;;  %v2475_v48 = vpack.c.bf16 %v2377_v41, %v2377_v41  ;;  %v1276_v49 = vadd.f32 %v5028_v31, %v1275_v46  ;;  %v1489_v52 = vmul.f32 %v3367_v7, %v572_v45 }
 0x1d9   :  { %v1833_v50 = vmax.f32 %v1735_v43, 0.0  ;;  %v2426_v51 = vmax.f32 %v2328_v44, 0.0  ;;  %v2082_v53 = vmul.f32 %v3369_v9, %v572_v45  ;;  %v718_v54 = vpop.f32.mrf.mxu2  ;;  %v1422_v57 = vpop.f32.mrf.mxu3 }
 0x1da   :  { %1981 = vst.msk [vmem:[%s5288_s4 + $0xa0] sm:$0xf] %vm1940_vm1, %v1882_v47  ;;  %v1589_v55 = vmul.f32 %v3371_v11, %v1276_v49  ;;  %v2182_v56 = vmul.f32 %v3373_v12, %v1276_v49  ;;  %v719_v60 = vadd.f32 %v5028_v31, %v718_v54  ;;  %v1423_v4 = vadd.f32 %v5028_v31, %v1422_v57 }
 0x1db   :  { %2974 = vst.msk [vmem:[%s5288_s4 + $0x228] sm:$0xf] %vm1940_vm1, %v2475_v48  ;;  %v1931_v58 = vpack.c.bf16 %v1833_v50, %v1833_v50  ;;  %v2524_v59 = vpack.c.bf16 %v2426_v51, %v2426_v51 }
 0x1dc   :  { %v1687_v61 = vadd.f32 %v1589_v55, %v1489_v52  ;;  %v2280_v62 = vadd.f32 %v2182_v56, %v2082_v53  ;;  %v1538_v6 = vmul.f32 %v3367_v7, %v719_v60  ;;  %v2131_v63 = vmul.f32 %v3369_v9, %v719_v60 }
 0x1dd   :  { %2030 = vst.msk [vmem:[%s5288_s4 + $0x164] sm:$0xf] %vm1940_vm1, %v1931_v58  ;;  %v1638_v0 = vmul.f32 %v3371_v11, %v1423_v4  ;;  %v2231_v1 = vmul.f32 %v3373_v12, %v1423_v4  ;;  %v574_v5 = vpop.f32.mrf.mxu0 }
 0x1de   :  { %3023 = vst.msk [vmem:[%s5288_s4 + $0x2ec] sm:$0xf] %vm1940_vm1, %v2524_v59  ;;  %v1785_v2 = vmax.f32 %v1687_v61, 0.0  ;;  %v2378_v3 = vmax.f32 %v2280_v62, 0.0  ;;  %v575_v14 = vadd.f32 %v5028_v31, %v574_v5 }
 0x1df   :  { %v1736_v8 = vadd.f32 %v1638_v0, %v1538_v6  ;;  %v2329_v13 = vadd.f32 %v2231_v1, %v2131_v63  ;;  %v1278_v15 = vpop.f32.mrf.mxu1 }
 0x1e0   :  { %v1883_v16 = vpack.c.bf16 %v1785_v2, %v1785_v2  ;;  %v2476_v17 = vpack.c.bf16 %v2378_v3, %v2378_v3  ;;  %v1279_v18 = vadd.f32 %v5028_v31, %v1278_v15  ;;  %v1490_v21 = vmul.f32 %v3367_v7, %v575_v14 }
 0x1e1   :  { %v1834_v19 = vmax.f32 %v1736_v8, 0.0  ;;  %v2427_v20 = vmax.f32 %v2329_v13, 0.0  ;;  %v2083_v22 = vmul.f32 %v3369_v9, %v575_v14  ;;  %v721_v23 = vpop.f32.mrf.mxu2  ;;  %v1425_v26 = vpop.f32.mrf.mxu3 }
 0x1e2   :  { %1982 = vst.msk [vmem:[%s5288_s4 + $0xa4] sm:$0xf] %vm1940_vm1, %v1883_v16  ;;  %v1590_v24 = vmul.f32 %v3371_v11, %v1279_v18  ;;  %v2183_v25 = vmul.f32 %v3373_v12, %v1279_v18  ;;  %v722_v29 = vadd.f32 %v5028_v31, %v721_v23  ;;  %v1426_v10 = vadd.f32 %v5028_v31, %v1425_v26 }
 0x1e3   :  { %2975 = vst.msk [vmem:[%s5288_s4 + $0x22c] sm:$0xf] %vm1940_vm1, %v2476_v17  ;;  %v1932_v27 = vpack.c.bf16 %v1834_v19, %v1834_v19  ;;  %v2525_v28 = vpack.c.bf16 %v2427_v20, %v2427_v20 }
 0x1e4   :  { %v1688_v30 = vadd.f32 %v1590_v24, %v1490_v21  ;;  %v2281_v32 = vadd.f32 %v2183_v25, %v2083_v22  ;;  %v1539_v33 = vmul.f32 %v3367_v7, %v722_v29  ;;  %v2132_v34 = vmul.f32 %v3369_v9, %v722_v29 }
 0x1e5   :  { %2031 = vst.msk [vmem:[%s5288_s4 + $0x168] sm:$0xf] %vm1940_vm1, %v1932_v27  ;;  %v1639_v35 = vmul.f32 %v3371_v11, %v1426_v10  ;;  %v2232_v36 = vmul.f32 %v3373_v12, %v1426_v10  ;;  %v577_v39 = vpop.f32.mrf.mxu0 }
 0x1e6   :  { %3024 = vst.msk [vmem:[%s5288_s4 + $0x2f0] sm:$0xf] %vm1940_vm1, %v2525_v28  ;;  %v1786_v37 = vmax.f32 %v1688_v30, 0.0  ;;  %v2379_v38 = vmax.f32 %v2281_v32, 0.0  ;;  %v578_v42 = vadd.f32 %v5028_v31, %v577_v39 }
 0x1e7   :  { %v1737_v40 = vadd.f32 %v1639_v35, %v1539_v33  ;;  %v2330_v41 = vadd.f32 %v2232_v36, %v2132_v34  ;;  %v1281_v43 = vpop.f32.mrf.mxu1 }
 0x1e8   :  { %v1884_v44 = vpack.c.bf16 %v1786_v37, %v1786_v37  ;;  %v2477_v45 = vpack.c.bf16 %v2379_v38, %v2379_v38  ;;  %v1282_v46 = vadd.f32 %v5028_v31, %v1281_v43  ;;  %v1491_v49 = vmul.f32 %v3367_v7, %v578_v42 }
 0x1e9   :  { %v1835_v47 = vmax.f32 %v1737_v40, 0.0  ;;  %v2428_v48 = vmax.f32 %v2330_v41, 0.0  ;;  %v2084_v50 = vmul.f32 %v3369_v9, %v578_v42  ;;  %v724_v51 = vpop.f32.mrf.mxu2  ;;  %v1428_v54 = vpop.f32.mrf.mxu3 }
 0x1ea   :  { %1983 = vst.msk [vmem:[%s5288_s4 + $0xa8] sm:$0xf] %vm1940_vm1, %v1884_v44  ;;  %v1591_v52 = vmul.f32 %v3371_v11, %v1282_v46  ;;  %v2184_v53 = vmul.f32 %v3373_v12, %v1282_v46  ;;  %v725_v57 = vadd.f32 %v5028_v31, %v724_v51  ;;  %v1429_v58 = vadd.f32 %v5028_v31, %v1428_v54 }
 0x1eb   :  { %2976 = vst.msk [vmem:[%s5288_s4 + $0x230] sm:$0xf] %vm1940_vm1, %v2477_v45  ;;  %v1933_v55 = vpack.c.bf16 %v1835_v47, %v1835_v47  ;;  %v2526_v56 = vpack.c.bf16 %v2428_v48, %v2428_v48 }
 0x1ec   :  { %v1689_v59 = vadd.f32 %v1591_v52, %v1491_v49  ;;  %v2282_v60 = vadd.f32 %v2184_v53, %v2084_v50  ;;  %v1540_v4 = vmul.f32 %v3367_v7, %v725_v57  ;;  %v2133_v61 = vmul.f32 %v3369_v9, %v725_v57 }
 0x1ed   :  { %2032 = vst.msk [vmem:[%s5288_s4 + $0x16c] sm:$0xf] %vm1940_vm1, %v1933_v55  ;;  %v1640_v62 = vmul.f32 %v3371_v11, %v1429_v58  ;;  %v2233_v6 = vmul.f32 %v3373_v12, %v1429_v58  ;;  %v580_v1 = vpop.f32.mrf.mxu0 }
 0x1ee   :  { %3025 = vst.msk [vmem:[%s5288_s4 + $0x2f4] sm:$0xf] %vm1940_vm1, %v2526_v56  ;;  %v1787_v63 = vmax.f32 %v1689_v59, 0.0  ;;  %v2380_v0 = vmax.f32 %v2282_v60, 0.0  ;;  %v581_v5 = vadd.f32 %v5028_v31, %v580_v1 }
 0x1ef   :  { %v1738_v2 = vadd.f32 %v1640_v62, %v1540_v4  ;;  %v2331_v3 = vadd.f32 %v2233_v6, %v2133_v61  ;;  %v1284_v8 = vpop.f32.mrf.mxu1 }
 0x1f0   :  { %v1885_v13 = vpack.c.bf16 %v1787_v63, %v1787_v63  ;;  %v2478_v14 = vpack.c.bf16 %v2380_v0, %v2380_v0  ;;  %v1285_v15 = vadd.f32 %v5028_v31, %v1284_v8  ;;  %v1492_v18 = vmul.f32 %v3367_v7, %v581_v5 }
 0x1f1   :  { %v1836_v16 = vmax.f32 %v1738_v2, 0.0  ;;  %v2429_v17 = vmax.f32 %v2331_v3, 0.0  ;;  %v2085_v19 = vmul.f32 %v3369_v9, %v581_v5  ;;  %v727_v20 = vpop.f32.mrf.mxu2  ;;  %v1431_v23 = vpop.f32.mrf.mxu3 }
 0x1f2   :  { %1984 = vst.msk [vmem:[%s5288_s4 + $0xac] sm:$0xf] %vm1940_vm1, %v1885_v13  ;;  %v1592_v21 = vmul.f32 %v3371_v11, %v1285_v15  ;;  %v2185_v22 = vmul.f32 %v3373_v12, %v1285_v15  ;;  %v728_v26 = vadd.f32 %v5028_v31, %v727_v20  ;;  %v1432_v27 = vadd.f32 %v5028_v31, %v1431_v23 }
 0x1f3   :  { %2977 = vst.msk [vmem:[%s5288_s4 + $0x234] sm:$0xf] %vm1940_vm1, %v2478_v14  ;;  %v1934_v24 = vpack.c.bf16 %v1836_v16, %v1836_v16  ;;  %v2527_v25 = vpack.c.bf16 %v2429_v17, %v2429_v17 }
 0x1f4   :  { %v1690_v28 = vadd.f32 %v1592_v21, %v1492_v18  ;;  %v2283_v29 = vadd.f32 %v2185_v22, %v2085_v19  ;;  %v1541_v10 = vmul.f32 %v3367_v7, %v728_v26  ;;  %v2134_v30 = vmul.f32 %v3369_v9, %v728_v26 }
 0x1f5   :  { %2033 = vst.msk [vmem:[%s5288_s4 + $0x170] sm:$0xf] %vm1940_vm1, %v1934_v24  ;;  %v1641_v32 = vmul.f32 %v3371_v11, %v1432_v27  ;;  %v2234_v33 = vmul.f32 %v3373_v12, %v1432_v27  ;;  %v583_v36 = vpop.f32.mrf.mxu0 }
 0x1f6   :  { %3026 = vst.msk [vmem:[%s5288_s4 + $0x2f8] sm:$0xf] %vm1940_vm1, %v2527_v25  ;;  %v1788_v34 = vmax.f32 %v1690_v28, 0.0  ;;  %v2381_v35 = vmax.f32 %v2283_v29, 0.0  ;;  %v584_v39 = vadd.f32 %v5028_v31, %v583_v36 }
 0x1f7   :  { %v1739_v37 = vadd.f32 %v1641_v32, %v1541_v10  ;;  %v2332_v38 = vadd.f32 %v2234_v33, %v2134_v30  ;;  %v1287_v40 = vpop.f32.mrf.mxu1 }
 0x1f8   :  { %v1886_v41 = vpack.c.bf16 %v1788_v34, %v1788_v34  ;;  %v2479_v42 = vpack.c.bf16 %v2381_v35, %v2381_v35  ;;  %v1288_v43 = vadd.f32 %v5028_v31, %v1287_v40  ;;  %v1493_v46 = vmul.f32 %v3367_v7, %v584_v39 }
 0x1f9   :  { %v1837_v44 = vmax.f32 %v1739_v37, 0.0  ;;  %v2430_v45 = vmax.f32 %v2332_v38, 0.0  ;;  %v2086_v47 = vmul.f32 %v3369_v9, %v584_v39  ;;  %v730_v48 = vpop.f32.mrf.mxu2  ;;  %v1434_v51 = vpop.f32.mrf.mxu3 }
 0x1fa   :  { %1985 = vst.msk [vmem:[%s5288_s4 + $0xb0] sm:$0xf] %vm1940_vm1, %v1886_v41  ;;  %v1593_v49 = vmul.f32 %v3371_v11, %v1288_v43  ;;  %v2186_v50 = vmul.f32 %v3373_v12, %v1288_v43  ;;  %v731_v54 = vadd.f32 %v5028_v31, %v730_v48  ;;  %v1435_v55 = vadd.f32 %v5028_v31, %v1434_v51 }
 0x1fb   :  { %2978 = vst.msk [vmem:[%s5288_s4 + $0x238] sm:$0xf] %vm1940_vm1, %v2479_v42  ;;  %v1935_v52 = vpack.c.bf16 %v1837_v44, %v1837_v44  ;;  %v2528_v53 = vpack.c.bf16 %v2430_v45, %v2430_v45 }
 0x1fc   :  { %v1691_v56 = vadd.f32 %v1593_v49, %v1493_v46  ;;  %v2284_v57 = vadd.f32 %v2186_v50, %v2086_v47  ;;  %v1542_v58 = vmul.f32 %v3367_v7, %v731_v54  ;;  %v2135_v59 = vmul.f32 %v3369_v9, %v731_v54 }
 0x1fd   :  { %2034 = vst.msk [vmem:[%s5288_s4 + $0x174] sm:$0xf] %vm1940_vm1, %v1935_v52  ;;  %v1642_v60 = vmul.f32 %v3371_v11, %v1435_v55  ;;  %v2235_v4 = vmul.f32 %v3373_v12, %v1435_v55  ;;  %v586_v6 = vpop.f32.mrf.mxu0 }
 0x1fe   :  { %3027 = vst.msk [vmem:[%s5288_s4 + $0x2fc] sm:$0xf] %vm1940_vm1, %v2528_v53  ;;  %v1789_v61 = vmax.f32 %v1691_v56, 0.0  ;;  %v2382_v62 = vmax.f32 %v2284_v57, 0.0  ;;  %v587_v1 = vadd.f32 %v5028_v31, %v586_v6 }
 0x1ff   :  { %v1740_v63 = vadd.f32 %v1642_v60, %v1542_v58  ;;  %v2333_v0 = vadd.f32 %v2235_v4, %v2135_v59  ;;  %v1290_v2 = vpop.f32.mrf.mxu1 }
 0x200   :  { %v1887_v3 = vpack.c.bf16 %v1789_v61, %v1789_v61  ;;  %v2480_v5 = vpack.c.bf16 %v2382_v62, %v2382_v62  ;;  %v1291_v8 = vadd.f32 %v5028_v31, %v1290_v2  ;;  %v1494_v15 = vmul.f32 %v3367_v7, %v587_v1 }
 0x201   :  { %v1838_v13 = vmax.f32 %v1740_v63, 0.0  ;;  %v2431_v14 = vmax.f32 %v2333_v0, 0.0  ;;  %v2087_v16 = vmul.f32 %v3369_v9, %v587_v1  ;;  %v733_v17 = vpop.f32.mrf.mxu2  ;;  %v1437_v20 = vpop.f32.mrf.mxu3 }
 0x202   :  { %1986 = vst.msk [vmem:[%s5288_s4 + $0xb4] sm:$0xf] %vm1940_vm1, %v1887_v3  ;;  %v1594_v18 = vmul.f32 %v3371_v11, %v1291_v8  ;;  %v2187_v19 = vmul.f32 %v3373_v12, %v1291_v8  ;;  %v734_v23 = vadd.f32 %v5028_v31, %v733_v17  ;;  %v1438_v24 = vadd.f32 %v5028_v31, %v1437_v20 }
 0x203   :  { %2979 = vst.msk [vmem:[%s5288_s4 + $0x23c] sm:$0xf] %vm1940_vm1, %v2480_v5  ;;  %v1936_v21 = vpack.c.bf16 %v1838_v13, %v1838_v13  ;;  %v2529_v22 = vpack.c.bf16 %v2431_v14, %v2431_v14 }
 0x204   :  { %v1692_v25 = vadd.f32 %v1594_v18, %v1494_v15  ;;  %v2285_v26 = vadd.f32 %v2187_v19, %v2087_v16  ;;  %v1543_v27 = vmul.f32 %v3367_v7, %v734_v23  ;;  %v2136_v28 = vmul.f32 %v3369_v9, %v734_v23 }
 0x205   :  { %2035 = vst.msk [vmem:[%s5288_s4 + $0x178] sm:$0xf] %vm1940_vm1, %v1936_v21  ;;  %v1643_v29 = vmul.f32 %v3371_v11, %v1438_v24  ;;  %v2236_v10 = vmul.f32 %v3373_v12, %v1438_v24  ;;  %v589_v33 = vpop.f32.mrf.mxu0 }
 0x206   :  { %3028 = vst.msk [vmem:[%s5288_s4 + $0x300] sm:$0xf] %vm1940_vm1, %v2529_v22  ;;  %v1790_v30 = vmax.f32 %v1692_v25, 0.0  ;;  %v2383_v32 = vmax.f32 %v2285_v26, 0.0  ;;  %v590_v36 = vadd.f32 %v5028_v31, %v589_v33 }
 0x207   :  { %v1741_v34 = vadd.f32 %v1643_v29, %v1543_v27  ;;  %v2334_v35 = vadd.f32 %v2236_v10, %v2136_v28  ;;  %v1293_v37 = vpop.f32.mrf.mxu1 }
 0x208   :  { %v1888_v38 = vpack.c.bf16 %v1790_v30, %v1790_v30  ;;  %v2481_v39 = vpack.c.bf16 %v2383_v32, %v2383_v32  ;;  %v1294_v40 = vadd.f32 %v5028_v31, %v1293_v37  ;;  %v1495_v43 = vmul.f32 %v3367_v7, %v590_v36 }
 0x209   :  { %v1839_v41 = vmax.f32 %v1741_v34, 0.0  ;;  %v2432_v42 = vmax.f32 %v2334_v35, 0.0  ;;  %v2088_v44 = vmul.f32 %v3369_v9, %v590_v36  ;;  %v736_v45 = vpop.f32.mrf.mxu2  ;;  %v1440_v48 = vpop.f32.mrf.mxu3 }
 0x20a   :  { %1987 = vst.msk [vmem:[%s5288_s4 + $0xb8] sm:$0xf] %vm1940_vm1, %v1888_v38  ;;  %v1595_v46 = vmul.f32 %v3371_v11, %v1294_v40  ;;  %v2188_v47 = vmul.f32 %v3373_v12, %v1294_v40  ;;  %v737_v51 = vadd.f32 %v5028_v31, %v736_v45  ;;  %v1441_v52 = vadd.f32 %v5028_v31, %v1440_v48 }
 0x20b   :  { %2980 = vst.msk [vmem:[%s5288_s4 + $0x240] sm:$0xf] %vm1940_vm1, %v2481_v39  ;;  %v1937_v49 = vpack.c.bf16 %v1839_v41, %v1839_v41  ;;  %v2530_v50 = vpack.c.bf16 %v2432_v42, %v2432_v42 }
 0x20c   :  { %v1693_v53 = vadd.f32 %v1595_v46, %v1495_v43  ;;  %v2286_v54 = vadd.f32 %v2188_v47, %v2088_v44  ;;  %v1544_v55 = vmul.f32 %v3367_v7, %v737_v51  ;;  %v2137_v56 = vmul.f32 %v3369_v9, %v737_v51 }
 0x20d   :  { %2036 = vst.msk [vmem:[%s5288_s4 + $0x17c] sm:$0xf] %vm1940_vm1, %v1937_v49  ;;  %v1644_v57 = vmul.f32 %v3371_v11, %v1441_v52  ;;  %v2237_v58 = vmul.f32 %v3373_v12, %v1441_v52  ;;  %v592_v4 = vpop.f32.mrf.mxu0 }
 0x20e   :  { %3029 = vst.msk [vmem:[%s5288_s4 + $0x304] sm:$0xf] %vm1940_vm1, %v2530_v50  ;;  %v1791_v59 = vmax.f32 %v1693_v53, 0.0  ;;  %v2384_v60 = vmax.f32 %v2286_v54, 0.0  ;;  %v593_v6 = vadd.f32 %v5028_v31, %v592_v4 }
 0x20f   :  { %v1742_v61 = vadd.f32 %v1644_v57, %v1544_v55  ;;  %v2335_v62 = vadd.f32 %v2237_v58, %v2137_v56  ;;  %v1296_v63 = vpop.f32.mrf.mxu1 }
 0x210   :  { %v1889_v0 = vpack.c.bf16 %v1791_v59, %v1791_v59  ;;  %v2482_v1 = vpack.c.bf16 %v2384_v60, %v2384_v60  ;;  %v1297_v2 = vadd.f32 %v5028_v31, %v1296_v63  ;;  %v1496_v8 = vmul.f32 %v3367_v7, %v593_v6 }
 0x211   :  { %v1840_v3 = vmax.f32 %v1742_v61, 0.0  ;;  %v2433_v5 = vmax.f32 %v2335_v62, 0.0  ;;  %v2089_v13 = vmul.f32 %v3369_v9, %v593_v6  ;;  %v739_v14 = vpop.f32.mrf.mxu2  ;;  %v1443_v17 = vpop.f32.mrf.mxu3 }
 0x212   :  { %1988 = vst.msk [vmem:[%s5288_s4 + $0xbc] sm:$0xf] %vm1940_vm1, %v1889_v0  ;;  %v1596_v15 = vmul.f32 %v3371_v11, %v1297_v2  ;;  %v2189_v16 = vmul.f32 %v3373_v12, %v1297_v2  ;;  %v740_v20 = vadd.f32 %v5028_v31, %v739_v14  ;;  %v1444_v21 = vadd.f32 %v5028_v31, %v1443_v17 }
 0x213   :  { %2981 = vst.msk [vmem:[%s5288_s4 + $0x244] sm:$0xf] %vm1940_vm1, %v2482_v1  ;;  %v1938_v18 = vpack.c.bf16 %v1840_v3, %v1840_v3  ;;  %v2531_v19 = vpack.c.bf16 %v2433_v5, %v2433_v5 }
 0x214   :  { %v1694_v22 = vadd.f32 %v1596_v15, %v1496_v8  ;;  %v2287_v23 = vadd.f32 %v2189_v16, %v2089_v13  ;;  %v1545_v24 = vmul.f32 %v3367_v7, %v740_v20  ;;  %v2138_v25 = vmul.f32 %v3369_v9, %v740_v20 }
 0x215   :  { %2037 = vst.msk [vmem:[%s5288_s4 + $0x180] sm:$0xf] %vm1940_vm1, %v1938_v18  ;;  %v1645_v26 = vmul.f32 %v3371_v11, %v1444_v21  ;;  %v2238_v27 = vmul.f32 %v3373_v12, %v1444_v21 }
 0x216   :  { %3030 = vst.msk [vmem:[%s5288_s4 + $0x308] sm:$0xf] %vm1940_vm1, %v2531_v19  ;;  %v1792_v31 = vmax.f32 %v1694_v22, 0.0  ;;  %v2385_v28 = vmax.f32 %v2287_v23, 0.0 }
 0x217   :  { %v1743_v29 = vadd.f32 %v1645_v26, %v1545_v24  ;;  %v2336_v10 = vadd.f32 %v2238_v27, %v2138_v25 }
 0x218   :  { %v1890_v30 = vpack.c.bf16 %v1792_v31, %v1792_v31  ;;  %v2483_v32 = vpack.c.bf16 %v2385_v28, %v2385_v28 }
 0x219   :  { %v1841_v33 = vmax.f32 %v1743_v29, 0.0  ;;  %v2434_v34 = vmax.f32 %v2336_v10, 0.0 }
 0x21a   :  { %1989 = vst.msk [vmem:[%s5288_s4 + $0xc0] sm:$0xf] %vm1940_vm1, %v1890_v30 }
 0x21b   :  { %2982 = vst.msk [vmem:[%s5288_s4 + $0x248] sm:$0xf] %vm1940_vm1, %v2483_v32  ;;  %v1939_v7 = vpack.c.bf16 %v1841_v33, %v1841_v33  ;;  %v2532_v9 = vpack.c.bf16 %v2434_v34, %v2434_v34 }
 0x21d   :  { %2038 = vst.msk [vmem:[%s5288_s4 + $0x184] sm:$0xf] %vm1940_vm1, %v1939_v7 }
 0x21e   :  { %3031 = vst.msk [vmem:[%s5288_s4 + $0x30c] sm:$0xf] %vm1940_vm1, %v2532_v9 }
 0x21f   :  { %2636 = vsyncpa [#allocation3], 1 }

// kernel: mdn_conv_forward.4
= control target key start
LH: loop header
LB: loop body
LE: loop exit
PB: predicated region body
PF: predicated region fallthrough
CT: control target
= control target key end

     0   :  { %9 = vsyncpa [#allocation4], 0  ;;  %s2683_s15 = smov 0   ;;  %s2685_s16 = smov 0   ;;  %s3599_s0 = inlined_call_operand.vmem [shape: bf16[2,576,512], index: 0, kind: input, shape index: {}]   ;;  %s3600_s1 = inlined_call_operand.vmem [shape: bf16[512,32], index: 1, kind: input, shape index: {}]   ;;  %s3601_s2 = inlined_call_operand.vmem [shape: f32[1,32], index: 2, kind: input, shape index: {}]   ;;  %s3602_s3 = inlined_call_operand.vmem [shape: f32[2,2], index: 3, kind: input, shape index: {}]   ;;  %s3603_s4 = inlined_call_operand.vmem [shape: bf16[2,576,32], index: 4, kind: output, shape index: {}]  }
   0x1   :  { %s2687_s17 = smov 0  }
   0x2 LB: > { %s2699_s18 = sadd.s32 4294967295, %s2655_s17   ;;  %s2702_s19 = sadd.s32 1, %s2655_s17   ;;  %s2655_s17 = sphi %s2687_s17, %s3609_s17   ;;  %s2651_s16 = sphi %s2685_s16, %s3608_s16   ;;  %s2647_s15 = sphi %s2683_s15, %s3607_s15  }
   0x3   : > { %s19_s20 = ssub.s32 %s2655_s17, %s2702_s19  ;;  %s22_s21 = sadd.s32 1, %s2651_s16 }
   0x4   : > { %p20_p0 = scmp.eq.s32.totalorder %s19_s20, 0  ;;  %p29_p1 = scmp.ne.s32.totalorder %s2651_s16, %s2647_s15 }
   0x5   : > { %p30_p2 = scmp.eq.s32.totalorder %s2655_s17, 0  ;;  %p122_p3 = scmp.eq.s32.totalorder %s2699_s18, 3 }
   0x6   : > { %s2712_s22 = scalar_select %p20_p0, %s2651_s16, %s22_s21  }
   0x7   : > { %p2714_p4 = por %p30_p2, %p29_p1  ;;  %p2718_p5 = por %p122_p3, %p29_p1 }
   0x8   : > { %p1983_p6 = scmp.ge.s32.totalorder %s2655_s17, 1  ;;  %p135_p7 = scmp.lt.s32.totalorder %s2655_s17, 5 }
   0x9   : > { %p2585_p8 = scmp.eq.s32.totalorder %s2699_s18, 0  ;;  %s153_s28 = sshll.u32 %s3602_s3, 4  ;;  %s154_s28 = int_to_ptr.vmem [resolvable:$true] %s153_s28 }
   0xa   : > { %p2725_p9 = pnand %p1983_p6, %p135_p7  ;;  %s2657_s29 = smov [#allocation3]  }
   0xb   : > { %p1985_p12 = scmp.ge.s32.totalorder %s2655_s17, 4 }
   0xc   : > { %p2581_p10 = pneg %p2725_p9 }
   0xd   : > { %160 = sbr.rel (%p1985_p12) target bundleno = 95 (0x5f), region = 28 }
   0xe   : > { %p2582_p11 = pnand %p2585_p8, %p2581_p10 }
  0x10   : > { %2584 = dma.vmem_to_smem (!%p2582_p11), %s154_s28, 32, %s2657_s29, [#allocation4]  }
  0x12   : > { %163 = sbr.rel (!%p2714_p4) target bundleno = 95 (0x5f), region = 32  ;;  %s165_s30 = sand.u32 (%p2714_p4), 1, %s2651_s16  }
  0x13   : > { %s2573_s5 = smul.u32 (%p2714_p4), 288, %s2655_s17 }
  0x14   : > { %s2574_s6 = smul.u32 (%p2714_p4), 576, %s165_s30 }
  0x15   : > { %s2744_s9 = scalar_lea.vmem (%p2714_p4), %s3599_s0, %s2573_s5 }
  0x16   : > { %v184_v0 = vld [vmem:[%s2744_s9] sm:$0xff] (%p2714_p4)  ;;  %v186_v1 = vld [vmem:[%s2744_s9 + $0x8] sm:$0xff] (%p2714_p4)  ;;  %v188_v2 = vld [vmem:[%s2744_s9 + $0x10] sm:$0xff] (%p2714_p4)  ;;  %s2749_s10 = scalar_lea.vmem (%p2714_p4), [#allocation2], %s2574_s6 }
  0x17   : > { %185 = vst [vmem:[%s2749_s10] sm:$0xff] %v184_v0  ;;  %v190_v3 = vld [vmem:[%s2744_s9 + $0x18] sm:$0xff]  ;;  %v192_v4 = vld [vmem:[%s2744_s9 + $0x20] sm:$0xff]  ;;  %v194_v5 = vld [vmem:[%s2744_s9 + $0x28] sm:$0xff] }
  0x18   : > { %187 = vst [vmem:[%s2749_s10 + $0x8] sm:$0xff] %v186_v1  ;;  %v196_v6 = vld [vmem:[%s2744_s9 + $0x30] sm:$0xff]  ;;  %v198_v7 = vld [vmem:[%s2744_s9 + $0x38] sm:$0xff]  ;;  %v200_v8 = vld [vmem:[%s2744_s9 + $0x40] sm:$0xff] }
  0x19   : > { %189 = vst [vmem:[%s2749_s10 + $0x10] sm:$0xff] %v188_v2  ;;  %v202_v9 = vld [vmem:[%s2744_s9 + $0x48] sm:$0xff]  ;;  %v204_v10 = vld [vmem:[%s2744_s9 + $0x50] sm:$0xff]  ;;  %v206_v11 = vld [vmem:[%s2744_s9 + $0x58] sm:$0xff] }
  0x1a   : > { %191 = vst [vmem:[%s2749_s10 + $0x18] sm:$0xff] %v190_v3  ;;  %v208_v12 = vld [vmem:[%s2744_s9 + $0x60] sm:$0xff]  ;;  %v210_v13 = vld [vmem:[%s2744_s9 + $0x68] sm:$0xff]  ;;  %v212_v14 = vld [vmem:[%s2744_s9 + $0x70] sm:$0xff] }
  0x1b   : > { %193 = vst [vmem:[%s2749_s10 + $0x20] sm:$0xff] %v192_v4  ;;  %v214_v15 = vld [vmem:[%s2744_s9 + $0x78] sm:$0xff]  ;;  %v216_v16 = vld [vmem:[%s2744_s9 + $0x80] sm:$0xff]  ;;  %v218_v17 = vld [vmem:[%s2744_s9 + $0x88] sm:$0xff] }
  0x1c   : > { %195 = vst [vmem:[%s2749_s10 + $0x28] sm:$0xff] %v194_v5  ;;  %v220_v18 = vld [vmem:[%s2744_s9 + $0x90] sm:$0xff]  ;;  %v222_v19 = vld [vmem:[%s2744_s9 + $0x98] sm:$0xff]  ;;  %v224_v20 = vld [vmem:[%s2744_s9 + $0xa0] sm:$0xff] }
  0x1d   : > { %197 = vst [vmem:[%s2749_s10 + $0x30] sm:$0xff] %v196_v6  ;;  %v226_v21 = vld [vmem:[%s2744_s9 + $0xa8] sm:$0xff]  ;;  %v228_v22 = vld [vmem:[%s2744_s9 + $0xb0] sm:$0xff]  ;;  %v230_v23 = vld [vmem:[%s2744_s9 + $0xb8] sm:$0xff] }
  0x1e   : > { %199 = vst [vmem:[%s2749_s10 + $0x38] sm:$0xff] %v198_v7  ;;  %v232_v24 = vld [vmem:[%s2744_s9 + $0xc0] sm:$0xff]  ;;  %v234_v25 = vld [vmem:[%s2744_s9 + $0xc8] sm:$0xff]  ;;  %v236_v26 = vld [vmem:[%s2744_s9 + $0xd0] sm:$0xff] }
  0x1f   : > { %201 = vst [vmem:[%s2749_s10 + $0x40] sm:$0xff] %v200_v8  ;;  %v238_v27 = vld [vmem:[%s2744_s9 + $0xd8] sm:$0xff]  ;;  %v240_v28 = vld [vmem:[%s2744_s9 + $0xe0] sm:$0xff]  ;;  %v242_v29 = vld [vmem:[%s2744_s9 + $0xe8] sm:$0xff] }
  0x20   : > { %203 = vst [vmem:[%s2749_s10 + $0x48] sm:$0xff] %v202_v9  ;;  %v244_v30 = vld [vmem:[%s2744_s9 + $0xf0] sm:$0xff]  ;;  %v246_v31 = vld [vmem:[%s2744_s9 + $0xf8] sm:$0xff]  ;;  %v248_v32 = vld [vmem:[%s2744_s9 + $0x100] sm:$0xff] }
  0x21   : > { %205 = vst [vmem:[%s2749_s10 + $0x50] sm:$0xff] %v204_v10  ;;  %v250_v33 = vld [vmem:[%s2744_s9 + $0x108] sm:$0xff]  ;;  %v252_v34 = vld [vmem:[%s2744_s9 + $0x110] sm:$0xff]  ;;  %v254_v35 = vld [vmem:[%s2744_s9 + $0x118] sm:$0xff] }
  0x22   : > { %207 = vst [vmem:[%s2749_s10 + $0x58] sm:$0xff] %v206_v11  ;;  %v256_v36 = vld [vmem:[%s2744_s9 + $0x480] sm:$0xff]  ;;  %v258_v37 = vld [vmem:[%s2744_s9 + $0x488] sm:$0xff]  ;;  %v260_v38 = vld [vmem:[%s2744_s9 + $0x490] sm:$0xff] }
  0x23   : > { %209 = vst [vmem:[%s2749_s10 + $0x60] sm:$0xff] %v208_v12  ;;  %v262_v39 = vld [vmem:[%s2744_s9 + $0x498] sm:$0xff]  ;;  %v264_v40 = vld [vmem:[%s2744_s9 + $0x4a0] sm:$0xff]  ;;  %v266_v41 = vld [vmem:[%s2744_s9 + $0x4a8] sm:$0xff] }
  0x24   : > { %211 = vst [vmem:[%s2749_s10 + $0x68] sm:$0xff] %v210_v13  ;;  %v268_v42 = vld [vmem:[%s2744_s9 + $0x4b0] sm:$0xff]  ;;  %v270_v43 = vld [vmem:[%s2744_s9 + $0x4b8] sm:$0xff]  ;;  %v272_v44 = vld [vmem:[%s2744_s9 + $0x4c0] sm:$0xff] }
  0x25   : > { %213 = vst [vmem:[%s2749_s10 + $0x70] sm:$0xff] %v212_v14  ;;  %v274_v45 = vld [vmem:[%s2744_s9 + $0x4c8] sm:$0xff]  ;;  %v276_v46 = vld [vmem:[%s2744_s9 + $0x4d0] sm:$0xff]  ;;  %v278_v47 = vld [vmem:[%s2744_s9 + $0x4d8] sm:$0xff] }
  0x26   : > { %215 = vst [vmem:[%s2749_s10 + $0x78] sm:$0xff] %v214_v15  ;;  %v280_v48 = vld [vmem:[%s2744_s9 + $0x4e0] sm:$0xff]  ;;  %v282_v49 = vld [vmem:[%s2744_s9 + $0x4e8] sm:$0xff]  ;;  %v284_v50 = vld [vmem:[%s2744_s9 + $0x4f0] sm:$0xff] }
  0x27   : > { %217 = vst [vmem:[%s2749_s10 + $0x80] sm:$0xff] %v216_v16  ;;  %v286_v51 = vld [vmem:[%s2744_s9 + $0x4f8] sm:$0xff]  ;;  %v288_v52 = vld [vmem:[%s2744_s9 + $0x500] sm:$0xff]  ;;  %v290_v53 = vld [vmem:[%s2744_s9 + $0x508] sm:$0xff] }
  0x28   : > { %219 = vst [vmem:[%s2749_s10 + $0x88] sm:$0xff] %v218_v17  ;;  %v292_v54 = vld [vmem:[%s2744_s9 + $0x510] sm:$0xff]  ;;  %v294_v55 = vld [vmem:[%s2744_s9 + $0x518] sm:$0xff]  ;;  %v296_v56 = vld [vmem:[%s2744_s9 + $0x520] sm:$0xff] }
  0x29   : > { %221 = vst [vmem:[%s2749_s10 + $0x90] sm:$0xff] %v220_v18  ;;  %v298_v57 = vld [vmem:[%s2744_s9 + $0x528] sm:$0xff]  ;;  %v300_v58 = vld [vmem:[%s2744_s9 + $0x530] sm:$0xff]  ;;  %v302_v59 = vld [vmem:[%s2744_s9 + $0x538] sm:$0xff] }
  0x2a   : > { %223 = vst [vmem:[%s2749_s10 + $0x98] sm:$0xff] %v222_v19  ;;  %v304_v60 = vld [vmem:[%s2744_s9 + $0x540] sm:$0xff]  ;;  %v306_v61 = vld [vmem:[%s2744_s9 + $0x548] sm:$0xff]  ;;  %v308_v62 = vld [vmem:[%s2744_s9 + $0x550] sm:$0xff] }
  0x2b   : > { %225 = vst [vmem:[%s2749_s10 + $0xa0] sm:$0xff] %v224_v20  ;;  %v310_v63 = vld [vmem:[%s2744_s9 + $0x558] sm:$0xff]  ;;  %v312_v0 = vld [vmem:[%s2744_s9 + $0x560] sm:$0xff]  ;;  %v314_v1 = vld [vmem:[%s2744_s9 + $0x568] sm:$0xff] }
  0x2c   : > { %227 = vst [vmem:[%s2749_s10 + $0xa8] sm:$0xff] %v226_v21  ;;  %v316_v2 = vld [vmem:[%s2744_s9 + $0x570] sm:$0xff]  ;;  %v318_v3 = vld [vmem:[%s2744_s9 + $0x578] sm:$0xff]  ;;  %v320_v4 = vld [vmem:[%s2744_s9 + $0x580] sm:$0xff] }
  0x2d   : > { %229 = vst [vmem:[%s2749_s10 + $0xb0] sm:$0xff] %v228_v22  ;;  %v322_v5 = vld [vmem:[%s2744_s9 + $0x588] sm:$0xff]  ;;  %v324_v6 = vld [vmem:[%s2744_s9 + $0x590] sm:$0xff]  ;;  %v326_v7 = vld [vmem:[%s2744_s9 + $0x598] sm:$0xff] }
  0x2e   : > { %231 = vst [vmem:[%s2749_s10 + $0xb8] sm:$0xff] %v230_v23 }
  0x2f   : > { %233 = vst [vmem:[%s2749_s10 + $0xc0] sm:$0xff] %v232_v24 }
  0x30   : > { %235 = vst [vmem:[%s2749_s10 + $0xc8] sm:$0xff] %v234_v25 }
  0x31   : > { %237 = vst [vmem:[%s2749_s10 + $0xd0] sm:$0xff] %v236_v26 }
  0x32   : > { %239 = vst [vmem:[%s2749_s10 + $0xd8] sm:$0xff] %v238_v27 }
  0x33   : > { %241 = vst [vmem:[%s2749_s10 + $0xe0] sm:$0xff] %v240_v28 }
  0x34   : > { %243 = vst [vmem:[%s2749_s10 + $0xe8] sm:$0xff] %v242_v29 }
  0x35   : > { %245 = vst [vmem:[%s2749_s10 + $0xf0] sm:$0xff] %v244_v30 }
  0x36   : > { %247 = vst [vmem:[%s2749_s10 + $0xf8] sm:$0xff] %v246_v31 }
  0x37   : > { %249 = vst [vmem:[%s2749_s10 + $0x100] sm:$0xff] %v248_v32 }
  0x38   : > { %251 = vst [vmem:[%s2749_s10 + $0x108] sm:$0xff] %v250_v33 }
  0x39   : > { %253 = vst [vmem:[%s2749_s10 + $0x110] sm:$0xff] %v252_v34 }
  0x3a   : > { %255 = vst [vmem:[%s2749_s10 + $0x118] sm:$0xff] %v254_v35 }
  0x3b   : > { %257 = vst [vmem:[%s2749_s10 + $0x120] sm:$0xff] %v256_v36 }
  0x3c   : > { %259 = vst [vmem:[%s2749_s10 + $0x128] sm:$0xff] %v258_v37 }
  0x3d   : > { %261 = vst [vmem:[%s2749_s10 + $0x130] sm:$0xff] %v260_v38 }
  0x3e   : > { %263 = vst [vmem:[%s2749_s10 + $0x138] sm:$0xff] %v262_v39 }
  0x3f   : > { %265 = vst [vmem:[%s2749_s10 + $0x140] sm:$0xff] %v264_v40 }
  0x40   : > { %267 = vst [vmem:[%s2749_s10 + $0x148] sm:$0xff] %v266_v41 }
  0x41   : > { %269 = vst [vmem:[%s2749_s10 + $0x150] sm:$0xff] %v268_v42 }
  0x42   : > { %271 = vst [vmem:[%s2749_s10 + $0x158] sm:$0xff] %v270_v43 }
  0x43   : > { %273 = vst [vmem:[%s2749_s10 + $0x160] sm:$0xff] %v272_v44 }
  0x44   : > { %275 = vst [vmem:[%s2749_s10 + $0x168] sm:$0xff] %v274_v45 }
  0x45   : > { %277 = vst [vmem:[%s2749_s10 + $0x170] sm:$0xff] %v276_v46 }
  0x46   : > { %279 = vst [vmem:[%s2749_s10 + $0x178] sm:$0xff] %v278_v47 }
  0x47   : > { %281 = vst [vmem:[%s2749_s10 + $0x180] sm:$0xff] %v280_v48 }
  0x48   : > { %283 = vst [vmem:[%s2749_s10 + $0x188] sm:$0xff] %v282_v49 }
  0x49   : > { %285 = vst [vmem:[%s2749_s10 + $0x190] sm:$0xff] %v284_v50 }
  0x4a   : > { %287 = vst [vmem:[%s2749_s10 + $0x198] sm:$0xff] %v286_v51 }
  0x4b   : > { %289 = vst [vmem:[%s2749_s10 + $0x1a0] sm:$0xff] %v288_v52 }
  0x4c   : > { %291 = vst [vmem:[%s2749_s10 + $0x1a8] sm:$0xff] %v290_v53 }
  0x4d   : > { %293 = vst [vmem:[%s2749_s10 + $0x1b0] sm:$0xff] %v292_v54 }
  0x4e   : > { %295 = vst [vmem:[%s2749_s10 + $0x1b8] sm:$0xff] %v294_v55 }
  0x4f   : > { %297 = vst [vmem:[%s2749_s10 + $0x1c0] sm:$0xff] %v296_v56 }
  0x50   : > { %299 = vst [vmem:[%s2749_s10 + $0x1c8] sm:$0xff] %v298_v57 }
  0x51   : > { %301 = vst [vmem:[%s2749_s10 + $0x1d0] sm:$0xff] %v300_v58 }
  0x52   : > { %303 = vst [vmem:[%s2749_s10 + $0x1d8] sm:$0xff] %v302_v59 }
  0x53   : > { %305 = vst [vmem:[%s2749_s10 + $0x1e0] sm:$0xff] %v304_v60 }
  0x54   : > { %307 = vst [vmem:[%s2749_s10 + $0x1e8] sm:$0xff] %v306_v61 }
  0x55   : > { %309 = vst [vmem:[%s2749_s10 + $0x1f0] sm:$0xff] %v308_v62 }
  0x56   : > { %311 = vst [vmem:[%s2749_s10 + $0x1f8] sm:$0xff] %v310_v63 }
  0x57   : > { %313 = vst [vmem:[%s2749_s10 + $0x200] sm:$0xff] %v312_v0 }
  0x58   : > { %315 = vst [vmem:[%s2749_s10 + $0x208] sm:$0xff] %v314_v1 }
  0x59   : > { %317 = vst [vmem:[%s2749_s10 + $0x210] sm:$0xff] %v316_v2 }
  0x5a   : > { %319 = vst [vmem:[%s2749_s10 + $0x218] sm:$0xff] %v318_v3 }
  0x5b   : > { %321 = vst [vmem:[%s2749_s10 + $0x220] sm:$0xff] %v320_v4 }
  0x5c   : > { %323 = vst [vmem:[%s2749_s10 + $0x228] sm:$0xff] %v322_v5 }
  0x5d   : > { %325 = vst [vmem:[%s2749_s10 + $0x230] sm:$0xff] %v324_v6 }
  0x5e   : > { %327 = vst [vmem:[%s2749_s10 + $0x238] sm:$0xff] %v326_v7 }
  0x5f PF: > { %336 = sbr.rel (%p2725_p9) target bundleno = 571 (0x23b), region = 55  ;;  %s339_s11 = sand.u32 (!%p2725_p9), 1, %s2647_s15  }
  0x60   : > { %s2575_s12 = smul.u32 (!%p2725_p9), 576, %s339_s11 }
  0x62   : > { %s2897_s13 = scalar_lea.vmem (!%p2725_p9), [#allocation2], %s2575_s12 }
  0x64   : > { %2642 = dma.done.wait (%p2585_p8), [#allocation4], 32  }
  0x65   : > { %2644 = vsyncadd (%p2585_p8), [#allocation4], 4294967264 }
  0x66   : > { %350 = sfence }
  0x67   : > { %v2906_v8 = vld [vmem:[%s3600_s1 + $0x38] sm:$0xff]  ;;  %v2928_v12 = vld [vmem:[%s3600_s1 + $0x30] sm:$0xff]  ;;  %v2952_v16 = vld [vmem:[%s3600_s1 + $0x28] sm:$0xff]  ;;  %s1496_s6 = sld [smem:[#allocation3]]  ;;  %vm1590_vm0 = vcmask 257024   ;;  %s2572_s12 = smul.u32 (%p2718_p5), 72, %s2699_s18 }
  0x68   : > { %v2911_v9 = vld [vmem:[%s3600_s1 + $0x78] sm:$0xff]  ;;  %847 = vmatpush.bf16.msra.mxu0 %v2906_v8  ;;  %v2933_v13 = vld [vmem:[%s3600_s1 + $0x70] sm:$0xff]  ;;  %v2957_v17 = vld [vmem:[%s3600_s1 + $0x68] sm:$0xff]  ;;  %s2443_s7 = sld [smem:[#allocation3 + $0x80]] }
  0x69   : > { %v2916_v10 = vld [vmem:[%s3600_s1 + $0xb8] sm:$0xff]  ;;  %901 = vmatpush.bf16.msra.mxu1 %v2911_v9  ;;  %v2940_v14 = vld [vmem:[%s3600_s1 + $0xb0] sm:$0xff]  ;;  %v2964_v18 = vld [vmem:[%s3600_s1 + $0xa8] sm:$0xff]  ;;  %s2442_s8 = sld [smem:[#allocation3 + $0x1]]  ;;  %s3553_s20 = scalar_lea.vmem (%p2718_p5), %s3603_s4, %s2572_s12 }
  0x6a   : > { %v2921_v11 = vld [vmem:[%s3600_s1 + $0xf8] sm:$0xff]  ;;  %955 = vmatpush.bf16.msra.mxu2 %v2916_v10  ;;  %v2945_v15 = vld [vmem:[%s3600_s1 + $0xf0] sm:$0xff]  ;;  %v2969_v19 = vld [vmem:[%s3600_s1 + $0xe8] sm:$0xff]  ;;  %s2444_s9 = sld [smem:[#allocation3 + $0x81]] }
  0x6b   : > { %1009 = vmatpush.bf16.msra.mxu3 %v2921_v11  ;;  %v2976_v20 = vld [vmem:[%s3600_s1 + $0x20] sm:$0xff]  ;;  %v3000_v24 = vld [vmem:[%s3600_s1 + $0x18] sm:$0xff]  ;;  %v3024_v28 = vld [vmem:[%s3600_s1 + $0x10] sm:$0xff] }
  0x6c   : > { %848 = vmatpush.bf16.msra.mxu0 %v2928_v12  ;;  %v2981_v21 = vld [vmem:[%s3600_s1 + $0x60] sm:$0xff]  ;;  %v3005_v25 = vld [vmem:[%s3600_s1 + $0x58] sm:$0xff]  ;;  %v3029_v29 = vld [vmem:[%s3600_s1 + $0x50] sm:$0xff] }
  0x6d   : > { %902 = vmatpush.bf16.msra.mxu1 %v2933_v13  ;;  %v2988_v22 = vld [vmem:[%s3600_s1 + $0xa0] sm:$0xff]  ;;  %v3012_v26 = vld [vmem:[%s3600_s1 + $0x98] sm:$0xff]  ;;  %v3036_v30 = vld [vmem:[%s3600_s1 + $0x90] sm:$0xff] }
  0x6e   : > { %956 = vmatpush.bf16.msra.mxu2 %v2940_v14  ;;  %v2993_v23 = vld [vmem:[%s3600_s1 + $0xe0] sm:$0xff]  ;;  %v3017_v27 = vld [vmem:[%s3600_s1 + $0xd8] sm:$0xff]  ;;  %v3041_v31 = vld [vmem:[%s3600_s1 + $0xd0] sm:$0xff] }
  0x6f   : > { %1010 = vmatpush.bf16.msra.mxu3 %v2945_v15  ;;  %v3048_v32 = vld [vmem:[%s3600_s1 + $0x8] sm:$0xff]  ;;  %v3070_v36 = vld [vmem:[%s3600_s1] sm:$0xff]  ;;  %v2470_v41 = vld [vmem:[%s2897_s13 + $0xc] sm:$0xf0] }
  0x70   : > { %849 = vmatpush.bf16.msra.mxu0 %v2952_v16  ;;  %v3053_v33 = vld [vmem:[%s3600_s1 + $0x48] sm:$0xff]  ;;  %v3075_v37 = vld [vmem:[%s3600_s1 + $0x40] sm:$0xff]  ;;  %v1994_v43 = vld [vmem:[%s2897_s13 + $0x10] sm:$0xf0] }
  0x71   : > { %903 = vmatpush.bf16.msra.mxu1 %v2957_v17  ;;  %v3060_v34 = vld [vmem:[%s3600_s1 + $0x88] sm:$0xff]  ;;  %v3080_v38 = vld [vmem:[%s3600_s1 + $0x80] sm:$0xff]  ;;  %v2471_v45 = vld [vmem:[%s2897_s13 + $0x14] sm:$0xf0] }
  0x72   : > { %957 = vmatpush.bf16.msra.mxu2 %v2964_v18  ;;  %v3065_v35 = vld [vmem:[%s3600_s1 + $0xc8] sm:$0xff]  ;;  %v3085_v39 = vld [vmem:[%s3600_s1 + $0xc0] sm:$0xff]  ;;  %v2002_v47 = vld [vmem:[%s2897_s13 + $0x18] sm:$0xf0] }
  0x73   : > { %1011 = vmatpush.bf16.msra.mxu3 %v2969_v19  ;;  %v1992_v40 = vld [vmem:[%s2897_s13] sm:$0xf]  ;;  %v2468_v42 = vld [vmem:[%s2897_s13 + $0x4] sm:$0xf]  ;;  %v2000_v44 = vld [vmem:[%s2897_s13 + $0x8] sm:$0xf] }
  0x74   : > { %850 = vmatpush.bf16.msra.mxu0 %v2976_v20  ;;  %v2469_v46 = vld [vmem:[%s2897_s13 + $0xc] sm:$0xf]  ;;  %v1993_v48 = vor.u32 %v2470_v41, %v1992_v40  ;;  %v1997_v49 = vor.u32 %v2468_v42, %v1994_v43  ;;  %v2001_v50 = vor.u32 %v2471_v45, %v2000_v44  ;;  %v2008_v52 = vld [vmem:[%s2897_s13 + $0x20] sm:$0xf]  ;;  %v2474_v53 = vld [vmem:[%s2897_s13 + $0x2c] sm:$0xf0] }
  0x75   : > { %904 = vmatpush.bf16.msra.mxu1 %v2981_v21  ;;  %v2005_v51 = vor.u32 %v2469_v46, %v2002_v47  ;;  %v2472_v54 = vld [vmem:[%s2897_s13 + $0x24] sm:$0xf]  ;;  %v2010_v55 = vld [vmem:[%s2897_s13 + $0x30] sm:$0xf0]  ;;  %v2016_v56 = vld [vmem:[%s2897_s13 + $0x28] sm:$0xf]  ;;  %v2009_v60 = vor.u32 %v2474_v53, %v2008_v52 }
  0x76   : > { %958 = vmatpush.bf16.msra.mxu2 %v2988_v22  ;;  %v2475_v57 = vld [vmem:[%s2897_s13 + $0x34] sm:$0xf0]  ;;  %v2473_v58 = vld [vmem:[%s2897_s13 + $0x2c] sm:$0xf]  ;;  %v2018_v59 = vld [vmem:[%s2897_s13 + $0x38] sm:$0xf0]  ;;  %v2013_v61 = vor.u32 %v2472_v54, %v2010_v55 }
  0x77   : > { %1012 = vmatpush.bf16.msra.mxu3 %v2993_v23  ;;  %v2017_v62 = vor.u32 %v2475_v57, %v2016_v56  ;;  %v2021_v63 = vor.u32 %v2473_v58, %v2018_v59  ;;  %v2024_v0 = vld [vmem:[%s2897_s13 + $0x40] sm:$0xf]  ;;  %v2478_v1 = vld [vmem:[%s2897_s13 + $0x4c] sm:$0xf0]  ;;  %v2476_v2 = vld [vmem:[%s2897_s13 + $0x44] sm:$0xf] }
  0x78   : > { %851 = vmatpush.bf16.msra.mxu0 %v3000_v24  ;;  %v2026_v3 = vld [vmem:[%s2897_s13 + $0x50] sm:$0xf0]  ;;  %v2032_v4 = vld [vmem:[%s2897_s13 + $0x48] sm:$0xf]  ;;  %v2479_v5 = vld [vmem:[%s2897_s13 + $0x54] sm:$0xf0] }
  0x79   : > { %905 = vmatpush.bf16.msra.mxu1 %v3005_v25  ;;  %v2477_v6 = vld [vmem:[%s2897_s13 + $0x4c] sm:$0xf]  ;;  %v2034_v7 = vld [vmem:[%s2897_s13 + $0x58] sm:$0xf0]  ;;  %v2080_v40 = vld [vmem:[%s2897_s13 + $0xa8] sm:$0xf] }
  0x7a   : > { %959 = vmatpush.bf16.msra.mxu2 %v3012_v26  ;;  %v2491_v41 = vld [vmem:[%s2897_s13 + $0xb4] sm:$0xf0]  ;;  %v2489_v42 = vld [vmem:[%s2897_s13 + $0xac] sm:$0xf]  ;;  %v2082_v43 = vld [vmem:[%s2897_s13 + $0xb8] sm:$0xf0] }
  0x7b   : > { %1013 = vmatpush.bf16.msra.mxu3 %v3017_v27  ;;  %v2081_v46 = vor.u32 %v2491_v41, %v2080_v40  ;;  %v2085_v47 = vor.u32 %v2489_v42, %v2082_v43  ;;  %v2096_v52 = vld [vmem:[%s2897_s13 + $0xc8] sm:$0xf]  ;;  %v2495_v53 = vld [vmem:[%s2897_s13 + $0xd4] sm:$0xf0]  ;;  %v2493_v54 = vld [vmem:[%s2897_s13 + $0xcc] sm:$0xf] }
  0x7c   : > { %852 = vmatpush.bf16.msra.mxu0 %v3024_v28  ;;  %v2098_v55 = vld [vmem:[%s2897_s13 + $0xd8] sm:$0xf0]  ;;  %v2097_v58 = vor.u32 %v2495_v53, %v2096_v52 }
  0x7d   : > { %906 = vmatpush.bf16.msra.mxu1 %v3029_v29  ;;  %v2101_v59 = vor.u32 %v2493_v54, %v2098_v55  ;;  %v2310_v40 = vld [vmem:[%s2897_s13 + $0x138] sm:$0xf0] }
  0x7e   : > { %960 = vmatpush.bf16.msra.mxu2 %v3036_v30 }
  0x7f   : > { %1014 = vmatpush.bf16.msra.mxu3 %v3041_v31 }
  0x80   : > { %853 = vmatpush.bf16.msra.mxu0 %v3048_v32 }
  0x81   : > { %907 = vmatpush.bf16.msra.mxu1 %v3053_v33 }
  0x82   : > { %961 = vmatpush.bf16.msra.mxu2 %v3060_v34 }
  0x83   : > { %1015 = vmatpush.bf16.msra.mxu3 %v3065_v35 }
  0x84   : > { %854 = vmatpush.bf16.msra.mxu0 %v3070_v36 }
  0x85   : > { %908 = vmatpush.bf16.msra.mxu1 %v3075_v37 }
  0x86   : > { %962 = vmatpush.bf16.msra.mxu2 %v3080_v38 }
  0x87   : > { %1016 = vmatpush.bf16.msra.mxu3 %v3085_v39  ;;  %855 = vmatmul.bf16.vlgmr.msra.gmra.mxu0 %v1993_v48  ;;  %v2088_v48 = vld [vmem:[%s2897_s13 + $0xc0] sm:$0xf] }
  0x88   : > { %1280 = vmatpush.bf16.msrb.mxu0 %v2906_v8  ;;  %909 = vmatmul.bf16.vlgmr.msra.gmra.mxu1 %v1997_v49  ;;  %v2025_v8 = vor.u32 %v2478_v1, %v2024_v0  ;;  %v2494_v49 = vld [vmem:[%s2897_s13 + $0xcc] sm:$0xf0]  ;;  %v2112_v0 = vld [vmem:[%s2897_s13 + $0xe8] sm:$0xf]  ;;  %v2499_v1 = vld [vmem:[%s2897_s13 + $0xf4] sm:$0xf0] }
  0x89   : > { %963 = vmatmul.bf16.vlgmr.msra.gmra.mxu2 %v2001_v50  ;;  %1334 = vmatpush.bf16.msrb.mxu1 %v2911_v9  ;;  %v2029_v9 = vor.u32 %v2476_v2, %v2026_v3  ;;  %v2492_v50 = vld [vmem:[%s2897_s13 + $0xc4] sm:$0xf]  ;;  %v2089_v56 = vor.u32 %v2494_v49, %v2088_v48  ;;  %v2497_v2 = vld [vmem:[%s2897_s13 + $0xec] sm:$0xf]  ;;  %v2114_v3 = vld [vmem:[%s2897_s13 + $0xf8] sm:$0xf0] }
  0x8a   : > { %1388 = vmatpush.bf16.msrb.mxu2 %v2916_v10  ;;  %1017 = vmatmul.bf16.vlgmr.msra.gmra.mxu3 %v2005_v51  ;;  %v2033_v10 = vor.u32 %v2479_v5, %v2032_v4  ;;  %v2090_v51 = vld [vmem:[%s2897_s13 + $0xd0] sm:$0xf0] }
  0x8b   : > { %1442 = vmatpush.bf16.msrb.mxu3 %v2921_v11  ;;  %v2037_v11 = vor.u32 %v2477_v6, %v2034_v7  ;;  %v2093_v57 = vor.u32 %v2492_v50, %v2090_v51  ;;  %v2113_v6 = vor.u32 %v2499_v1, %v2112_v0  ;;  %v2117_v7 = vor.u32 %v2497_v2, %v2114_v3  ;;  %v2318_v0 = vld [vmem:[%s2897_s13 + $0x150] sm:$0xf0]  ;;  %v2324_v1 = vld [vmem:[%s2897_s13 + $0x148] sm:$0xf]  ;;  %v2543_v2 = vld [vmem:[%s2897_s13 + $0x154] sm:$0xf0] }
  0x8c   : > { %1281 = vmatpush.bf16.msrb.mxu0 %v2928_v12  ;;  %v2040_v12 = vld [vmem:[%s2897_s13 + $0x60] sm:$0xf]  ;;  %v2541_v3 = vld [vmem:[%s2897_s13 + $0x14c] sm:$0xf] }
  0x8d   : > { %1335 = vmatpush.bf16.msrb.mxu1 %v2933_v13  ;;  %v2482_v13 = vld [vmem:[%s2897_s13 + $0x6c] sm:$0xf0] }
  0x8e   : > { %1389 = vmatpush.bf16.msrb.mxu2 %v2940_v14  ;;  %v2480_v14 = vld [vmem:[%s2897_s13 + $0x64] sm:$0xf] }
  0x8f   : > { %1443 = vmatpush.bf16.msrb.mxu3 %v2945_v15  ;;  %v2042_v15 = vld [vmem:[%s2897_s13 + $0x70] sm:$0xf0] }
  0x90   : > { %1282 = vmatpush.bf16.msrb.mxu0 %v2952_v16  ;;  %v2048_v16 = vld [vmem:[%s2897_s13 + $0x68] sm:$0xf] }
  0x91   : > { %1336 = vmatpush.bf16.msrb.mxu1 %v2957_v17  ;;  %v2483_v17 = vld [vmem:[%s2897_s13 + $0x74] sm:$0xf0] }
  0x92   : > { %1390 = vmatpush.bf16.msrb.mxu2 %v2964_v18  ;;  %v2481_v18 = vld [vmem:[%s2897_s13 + $0x6c] sm:$0xf] }
  0x93   : > { %1444 = vmatpush.bf16.msrb.mxu3 %v2969_v19  ;;  %v2050_v19 = vld [vmem:[%s2897_s13 + $0x78] sm:$0xf0] }
  0x94   : > { %1283 = vmatpush.bf16.msrb.mxu0 %v2976_v20  ;;  %v2041_v20 = vor.u32 %v2482_v13, %v2040_v12  ;;  %v2122_v12 = vld [vmem:[%s2897_s13 + $0x110] sm:$0xf0]  ;;  %v2128_v13 = vld [vmem:[%s2897_s13 + $0x108] sm:$0xf] }
  0x95   : > { %1337 = vmatpush.bf16.msrb.mxu1 %v2981_v21  ;;  %v2045_v21 = vor.u32 %v2480_v14, %v2042_v15  ;;  %v2503_v14 = vld [vmem:[%s2897_s13 + $0x114] sm:$0xf0]  ;;  %v2501_v15 = vld [vmem:[%s2897_s13 + $0x10c] sm:$0xf] }
  0x96   : > { %1391 = vmatpush.bf16.msrb.mxu2 %v2988_v22  ;;  %v2049_v22 = vor.u32 %v2483_v17, %v2048_v16  ;;  %v2130_v16 = vld [vmem:[%s2897_s13 + $0x118] sm:$0xf0] }
  0x97   : > { %1445 = vmatpush.bf16.msrb.mxu3 %v2993_v23  ;;  %860 = vmatmul.bf16.gmra.mxu0 %v2009_v60  ;;  %v2053_v23 = vor.u32 %v2481_v18, %v2050_v19  ;;  %v2104_v60 = vld [vmem:[%s2897_s13 + $0xe0] sm:$0xf] }
  0x98   : > { %1284 = vmatpush.bf16.msrb.mxu0 %v3000_v24  ;;  %914 = vmatmul.bf16.gmra.mxu1 %v2013_v61  ;;  %v2056_v24 = vld [vmem:[%s2897_s13 + $0x80] sm:$0xf]  ;;  %v2498_v61 = vld [vmem:[%s2897_s13 + $0xec] sm:$0xf0] }
  0x99   : > { %968 = vmatmul.bf16.gmra.mxu2 %v2017_v62  ;;  %1338 = vmatpush.bf16.msrb.mxu1 %v3005_v25  ;;  %v2486_v25 = vld [vmem:[%s2897_s13 + $0x8c] sm:$0xf0]  ;;  %v2496_v62 = vld [vmem:[%s2897_s13 + $0xe4] sm:$0xf]  ;;  %v2105_v4 = vor.u32 %v2498_v61, %v2104_v60  ;;  %v2316_v61 = vld [vmem:[%s2897_s13 + $0x140] sm:$0xf] }
  0x9a   : > { %1392 = vmatpush.bf16.msrb.mxu2 %v3012_v26  ;;  %1022 = vmatmul.bf16.gmra.mxu3 %v2021_v63  ;;  %v2484_v26 = vld [vmem:[%s2897_s13 + $0x84] sm:$0xf]  ;;  %v2106_v63 = vld [vmem:[%s2897_s13 + $0xf0] sm:$0xf0] }
  0x9b   : > { %1446 = vmatpush.bf16.msrb.mxu3 %v3017_v27  ;;  %v2058_v27 = vld [vmem:[%s2897_s13 + $0x90] sm:$0xf0]  ;;  %v2109_v5 = vor.u32 %v2496_v62, %v2106_v63  ;;  %v2542_v62 = vld [vmem:[%s2897_s13 + $0x14c] sm:$0xf0]  ;;  %v2540_v63 = vld [vmem:[%s2897_s13 + $0x144] sm:$0xf] }
  0x9c   : > { %1285 = vmatpush.bf16.msrb.mxu0 %v3024_v28  ;;  %v2064_v28 = vld [vmem:[%s2897_s13 + $0x88] sm:$0xf] }
  0x9d   : > { %1339 = vmatpush.bf16.msrb.mxu1 %v3029_v29  ;;  %v2487_v29 = vld [vmem:[%s2897_s13 + $0x94] sm:$0xf0] }
  0x9e   : > { %1393 = vmatpush.bf16.msrb.mxu2 %v3036_v30  ;;  %v2485_v30 = vld [vmem:[%s2897_s13 + $0x8c] sm:$0xf] }
  0x9f   : > { %1447 = vmatpush.bf16.msrb.mxu3 %v3041_v31  ;;  %v2066_v31 = vld [vmem:[%s2897_s13 + $0x98] sm:$0xf0] }
  0xa0   : > { %1286 = vmatpush.bf16.msrb.mxu0 %v3048_v32  ;;  %v2057_v32 = vor.u32 %v2486_v25, %v2056_v24 }
  0xa1   : > { %1340 = vmatpush.bf16.msrb.mxu1 %v3053_v33  ;;  %v2061_v33 = vor.u32 %v2484_v26, %v2058_v27 }
  0xa2   : > { %1394 = vmatpush.bf16.msrb.mxu2 %v3060_v34  ;;  %v2065_v34 = vor.u32 %v2487_v29, %v2064_v28 }
  0xa3   : > { %1448 = vmatpush.bf16.msrb.mxu3 %v3065_v35  ;;  %v2069_v35 = vor.u32 %v2485_v30, %v2066_v31 }
  0xa4   : > { %1287 = vmatpush.bf16.msrb.mxu0 %v3070_v36  ;;  %v2072_v36 = vld [vmem:[%s2897_s13 + $0xa0] sm:$0xf] }
  0xa5   : > { %1341 = vmatpush.bf16.msrb.mxu1 %v3075_v37  ;;  %v2490_v37 = vld [vmem:[%s2897_s13 + $0xac] sm:$0xf0] }
  0xa6   : > { %1395 = vmatpush.bf16.msrb.mxu2 %v3080_v38  ;;  %v2488_v38 = vld [vmem:[%s2897_s13 + $0xa4] sm:$0xf]  ;;  %v2073_v44 = vor.u32 %v2490_v37, %v2072_v36  ;;  %v2302_v36 = vld [vmem:[%s2897_s13 + $0x130] sm:$0xf0]  ;;  %v2308_v37 = vld [vmem:[%s2897_s13 + $0x128] sm:$0xf] }
  0xa7   : > { %1449 = vmatpush.bf16.msrb.mxu3 %v3085_v39  ;;  %865 = vmatmul.bf16.gmra.mxu0 %v2025_v8  ;;  %v2074_v39 = vld [vmem:[%s2897_s13 + $0xb0] sm:$0xf0]  ;;  %v3194_v8 = vld [vmem:[%s3601_s2] ss:$0 sm:$0xff] }
  0xa8   : > { %919 = vmatmul.bf16.gmra.mxu1 %v2029_v9  ;;  %v2077_v45 = vor.u32 %v2488_v38, %v2074_v39  ;;  %v2120_v9 = vld [vmem:[%s2897_s13 + $0x100] sm:$0xf]  ;;  %v2539_v38 = vld [vmem:[%s2897_s13 + $0x134] sm:$0xf0]  ;;  %v2537_v39 = vld [vmem:[%s2897_s13 + $0x12c] sm:$0xf] }
  0xa9   : > { %973 = vmatmul.bf16.gmra.mxu2 %v2033_v10  ;;  %v2502_v10 = vld [vmem:[%s2897_s13 + $0x10c] sm:$0xf0]  ;;  %v2309_v48 = vor.u32 %v2539_v38, %v2308_v37  ;;  %v2313_v49 = vor.u32 %v2537_v39, %v2310_v40 }
  0xaa   : > { %1027 = vmatmul.bf16.gmra.mxu3 %v2037_v11  ;;  %v2500_v11 = vld [vmem:[%s2897_s13 + $0x104] sm:$0xf]  ;;  %v2121_v17 = vor.u32 %v2502_v10, %v2120_v9  ;;  %v2321_v9 = vor.u32 %v2540_v63, %v2318_v0  ;;  %v2549_v63 = vld [vmem:[%s2897_s13 + $0x18c] sm:$0xf]  ;;  %v2358_v0 = vld [vmem:[%s2897_s13 + $0x198] sm:$0xf0] }
  0xab   : > { %v2125_v18 = vor.u32 %v2500_v11, %v2122_v12 }
  0xb7   : > { %870 = vmatmul.bf16.gmra.mxu0 %v2041_v20 }
  0xb8   : > { %924 = vmatmul.bf16.gmra.mxu1 %v2045_v21  ;;  %v2129_v21 = vor.u32 %v2503_v14, %v2128_v13  ;;  %v2325_v13 = vor.u32 %v2543_v2, %v2324_v1 }
  0xb9   : > { %978 = vmatmul.bf16.gmra.mxu2 %v2049_v22  ;;  %v2133_v22 = vor.u32 %v2501_v15, %v2130_v16 }
  0xba   : > { %1032 = vmatmul.bf16.gmra.mxu3 %v2053_v23 }
  0xc7   : > { %875 = vmatmul.bf16.gmra.mxu0 %v2057_v32 }
  0xc8   : > { %929 = vmatmul.bf16.gmra.mxu1 %v2061_v33  ;;  %v2300_v33 = vld [vmem:[%s2897_s13 + $0x120] sm:$0xf] }
  0xc9   : > { %983 = vmatmul.bf16.gmra.mxu2 %v2065_v34  ;;  %v2538_v34 = vld [vmem:[%s2897_s13 + $0x12c] sm:$0xf0] }
  0xca   : > { %1037 = vmatmul.bf16.gmra.mxu3 %v2069_v35  ;;  %v2536_v35 = vld [vmem:[%s2897_s13 + $0x124] sm:$0xf]  ;;  %v2301_v43 = vor.u32 %v2538_v34, %v2300_v33  ;;  %v2545_v33 = vld [vmem:[%s2897_s13 + $0x16c] sm:$0xf]  ;;  %v2342_v34 = vld [vmem:[%s2897_s13 + $0x178] sm:$0xf0] }
  0xd7   : > { %880 = vmatmul.bf16.gmra.mxu0 %v2073_v44  ;;  %v2305_v44 = vor.u32 %v2536_v35, %v2302_v36 }
  0xd8   : > { %934 = vmatmul.bf16.gmra.mxu1 %v2077_v45 }
  0xd9   : > { %988 = vmatmul.bf16.gmra.mxu2 %v2081_v46 }
  0xda   : > { %1042 = vmatmul.bf16.gmra.mxu3 %v2085_v47 }
  0xe7   : > { %885 = vmatmul.bf16.gmra.mxu0 %v2089_v56 }
  0xe8   : > { %939 = vmatmul.bf16.gmra.mxu1 %v2093_v57 }
  0xe9   : > { %993 = vmatmul.bf16.gmra.mxu2 %v2097_v58 }
  0xea   : > { %1047 = vmatmul.bf16.gmra.mxu3 %v2101_v59 }
  0xf7   : > { %890 = vmatmul.bf16.gmra.mxu0 %v2105_v4  ;;  %v2326_v4 = vld [vmem:[%s2897_s13 + $0x158] sm:$0xf0] }
  0xf8   : > { %944 = vmatmul.bf16.gmra.mxu1 %v2109_v5  ;;  %v2329_v14 = vor.u32 %v2541_v3, %v2326_v4 }
  0xf9   : > { %998 = vmatmul.bf16.gmra.mxu2 %v2113_v6 }
  0xfa   : > { %1052 = vmatmul.bf16.gmra.mxu3 %v2117_v7  ;;  %v2317_v7 = vor.u32 %v2542_v62, %v2316_v61  ;;  %v2356_v61 = vld [vmem:[%s2897_s13 + $0x188] sm:$0xf]  ;;  %v2551_v62 = vld [vmem:[%s2897_s13 + $0x194] sm:$0xf0] }
 0x104   : > { %v856_v19 = vpop.f32.mrf.mxu0 }
 0x105   : > { %v910_v20 = vpop.f32.mrf.mxu1  ;;  %v857_v23 = vadd.f32 %v3194_v8, %v856_v19 }
 0x107   : > { %v911_v24 = vadd.f32 %v910_v20, %v857_v23  ;;  %895 = vmatmul.bf16.gmra.mxu0 %v2121_v17 }
 0x108   : > { %949 = vmatmul.bf16.gmra.mxu1 %v2125_v18 }
 0x109   : > { %1003 = vmatmul.bf16.gmra.mxu2 %v2129_v21 }
 0x10a   : > { %1057 = vmatmul.bf16.gmra.mxu3 %v2133_v22 }
 0x10c   : > { %v964_v25 = vpop.f32.mrf.mxu2  ;;  %v858_v28 = vpop.f32.mrf.mxu0 }
 0x10d   : > { %v1018_v26 = vpop.f32.mrf.mxu3  ;;  %v965_v27 = vadd.f32 %v964_v25, %v911_v24  ;;  %v912_v29 = vpop.f32.mrf.mxu1  ;;  %v859_v30 = vadd.f32 %v3194_v8, %v858_v28  ;;  %v2544_v28 = vld [vmem:[%s2897_s13 + $0x164] sm:$0xf] }
 0x10f   : > { %v3206_v31 = vadd.f32 %v1018_v26, %v965_v27  ;;  %v913_v32 = vadd.f32 %v912_v29, %v859_v30  ;;  %v2332_v26 = vld [vmem:[%s2897_s13 + $0x160] sm:$0xf]  ;;  %v2546_v27 = vld [vmem:[%s2897_s13 + $0x16c] sm:$0xf0]  ;;  %v2334_v29 = vld [vmem:[%s2897_s13 + $0x170] sm:$0xf0] }
 0x110   : > { %v2340_v30 = vld [vmem:[%s2897_s13 + $0x168] sm:$0xf]  ;;  %v2333_v37 = vor.u32 %v2546_v27, %v2332_v26  ;;  %v2337_v38 = vor.u32 %v2544_v28, %v2334_v29  ;;  %v2552_v26 = vld [vmem:[%s2897_s13 + $0x1a4] sm:$0xf]  ;;  %v2366_v27 = vld [vmem:[%s2897_s13 + $0x1b0] sm:$0xf0] }
 0x111   : > { %v2372_v28 = vld [vmem:[%s2897_s13 + $0x1a8] sm:$0xf]  ;;  %v2555_v29 = vld [vmem:[%s2897_s13 + $0x1b4] sm:$0xf0] }
 0x114   : > { %v966_v41 = vpop.f32.mrf.mxu2  ;;  %v861_v46 = vpop.f32.mrf.mxu0 }
 0x115   : > { %v1020_v42 = vpop.f32.mrf.mxu3  ;;  %v967_v45 = vadd.f32 %v966_v41, %v913_v32  ;;  %v915_v47 = vpop.f32.mrf.mxu1  ;;  %v862_v50 = vadd.f32 %v3194_v8, %v861_v46  ;;  %v2547_v32 = vld [vmem:[%s2897_s13 + $0x174] sm:$0xf0] }
 0x117   : > { %v3217_v51 = vadd.f32 %v1020_v42, %v967_v45  ;;  %v916_v52 = vadd.f32 %v915_v47, %v862_v50  ;;  %1288 = vmatmul.bf16.vlgmr.msrb.gmra.mxu0 %v2301_v43  ;;  %v2341_v42 = vor.u32 %v2547_v32, %v2340_v30  ;;  %v2345_v43 = vor.u32 %v2545_v33, %v2342_v34  ;;  %v2553_v30 = vld [vmem:[%s2897_s13 + $0x1ac] sm:$0xf]  ;;  %v2374_v32 = vld [vmem:[%s2897_s13 + $0x1b8] sm:$0xf0] }
 0x118   : > { %1342 = vmatmul.bf16.vlgmr.msrb.gmra.mxu1 %v2305_v44 }
 0x119   : > { %1396 = vmatmul.bf16.vlgmr.msrb.gmra.mxu2 %v2309_v48 }
 0x11a   : > { %1450 = vmatmul.bf16.vlgmr.msrb.gmra.mxu3 %v2313_v49 }
 0x11c   : > { %v969_v53 = vpop.f32.mrf.mxu2  ;;  %v863_v56 = vpop.f32.mrf.mxu0 }
 0x11d   : > { %v1023_v54 = vpop.f32.mrf.mxu3  ;;  %v970_v55 = vadd.f32 %v969_v53, %v916_v52  ;;  %v917_v57 = vpop.f32.mrf.mxu1  ;;  %v864_v58 = vadd.f32 %v3194_v8, %v863_v56  ;;  %v2348_v56 = vld [vmem:[%s2897_s13 + $0x180] sm:$0xf] }
 0x11f   : > { %v3220_v59 = vadd.f32 %v1023_v54, %v970_v55  ;;  %v918_v60 = vadd.f32 %v917_v57, %v864_v58  ;;  %v2550_v57 = vld [vmem:[%s2897_s13 + $0x18c] sm:$0xf0]  ;;  %v2548_v58 = vld [vmem:[%s2897_s13 + $0x184] sm:$0xf] }
 0x120   : > { %v2349_v3 = vor.u32 %v2550_v57, %v2348_v56  ;;  %v2380_v56 = vld [vmem:[%s2897_s13 + $0x1c0] sm:$0xf]  ;;  %v2558_v57 = vld [vmem:[%s2897_s13 + $0x1cc] sm:$0xf0] }
 0x124   : > { %v971_v5 = vpop.f32.mrf.mxu2  ;;  %v866_v11 = vpop.f32.mrf.mxu0 }
 0x125   : > { %v1025_v6 = vpop.f32.mrf.mxu3  ;;  %v972_v10 = vadd.f32 %v971_v5, %v918_v60  ;;  %v920_v12 = vpop.f32.mrf.mxu1  ;;  %v867_v15 = vadd.f32 %v3194_v8, %v866_v11  ;;  %v2350_v60 = vld [vmem:[%s2897_s13 + $0x190] sm:$0xf0] }
 0x126   : > { %v2353_v4 = vor.u32 %v2548_v58, %v2350_v60  ;;  %v2556_v58 = vld [vmem:[%s2897_s13 + $0x1c4] sm:$0xf]  ;;  %v2382_v60 = vld [vmem:[%s2897_s13 + $0x1d0] sm:$0xf0] }
 0x127   : > { %v3231_v16 = vadd.f32 %v1025_v6, %v972_v10  ;;  %v921_v17 = vadd.f32 %v920_v12, %v867_v15  ;;  %1293 = vmatmul.bf16.gmra.mxu0 %v2317_v7  ;;  %v2361_v10 = vor.u32 %v2549_v63, %v2358_v0  ;;  %v2557_v63 = vld [vmem:[%s2897_s13 + $0x1cc] sm:$0xf]  ;;  %v2390_v0 = vld [vmem:[%s2897_s13 + $0x1d8] sm:$0xf0] }
 0x128   : > { %1347 = vmatmul.bf16.gmra.mxu1 %v2321_v9  ;;  %v2357_v9 = vor.u32 %v2551_v62, %v2356_v61  ;;  %v2388_v61 = vld [vmem:[%s2897_s13 + $0x1c8] sm:$0xf]  ;;  %v2559_v62 = vld [vmem:[%s2897_s13 + $0x1d4] sm:$0xf0] }
 0x129   : > { %1401 = vmatmul.bf16.gmra.mxu2 %v2325_v13 }
 0x12a   : > { %1455 = vmatmul.bf16.gmra.mxu3 %v2329_v14 }
 0x12c   : > { %v974_v18 = vpop.f32.mrf.mxu2  ;;  %v868_v21 = vpop.f32.mrf.mxu0 }
 0x12d   : > { %v1028_v19 = vpop.f32.mrf.mxu3  ;;  %v975_v20 = vadd.f32 %v974_v18, %v921_v17  ;;  %v922_v22 = vpop.f32.mrf.mxu1  ;;  %v869_v23 = vadd.f32 %v3194_v8, %v868_v21 }
 0x12f   : > { %v3234_v24 = vadd.f32 %v1028_v19, %v975_v20  ;;  %v923_v25 = vadd.f32 %v922_v22, %v869_v23  ;;  %v2364_v23 = vld [vmem:[%s2897_s13 + $0x1a0] sm:$0xf] }
 0x134   : > { %v976_v35 = vpop.f32.mrf.mxu2  ;;  %v871_v40 = vpop.f32.mrf.mxu0 }
 0x135   : > { %v1030_v36 = vpop.f32.mrf.mxu3  ;;  %v977_v39 = vadd.f32 %v976_v35, %v923_v25  ;;  %v925_v41 = vpop.f32.mrf.mxu1  ;;  %v872_v44 = vadd.f32 %v3194_v8, %v871_v40  ;;  %v2554_v25 = vld [vmem:[%s2897_s13 + $0x1ac] sm:$0xf0]  ;;  %v2373_v40 = vor.u32 %v2555_v29, %v2372_v28  ;;  %v2560_v28 = vld [vmem:[%s2897_s13 + $0x1e4] sm:$0xf]  ;;  %v2398_v29 = vld [vmem:[%s2897_s13 + $0x1f0] sm:$0xf0] }
 0x136   : > { %v2365_v35 = vor.u32 %v2554_v25, %v2364_v23 }
 0x137   : > { %v3245_v45 = vadd.f32 %v1030_v36, %v977_v39  ;;  %v926_v46 = vadd.f32 %v925_v41, %v872_v44  ;;  %1298 = vmatmul.bf16.gmra.mxu0 %v2333_v37  ;;  %v2369_v36 = vor.u32 %v2552_v26, %v2366_v27  ;;  %v2377_v41 = vor.u32 %v2553_v30, %v2374_v32  ;;  %v2396_v26 = vld [vmem:[%s2897_s13 + $0x1e0] sm:$0xf]  ;;  %v2562_v27 = vld [vmem:[%s2897_s13 + $0x1ec] sm:$0xf0]  ;;  %v2404_v30 = vld [vmem:[%s2897_s13 + $0x1e8] sm:$0xf] }
 0x138   : > { %1352 = vmatmul.bf16.gmra.mxu1 %v2337_v38  ;;  %v2563_v32 = vld [vmem:[%s2897_s13 + $0x1f4] sm:$0xf0] }
 0x139   : > { %1406 = vmatmul.bf16.gmra.mxu2 %v2341_v42 }
 0x13a   : > { %1460 = vmatmul.bf16.gmra.mxu3 %v2345_v43 }
 0x13c   : > { %v979_v47 = vpop.f32.mrf.mxu2  ;;  %v873_v50 = vpop.f32.mrf.mxu0 }
 0x13d   : > { %v1033_v48 = vpop.f32.mrf.mxu3  ;;  %v980_v49 = vadd.f32 %v979_v47, %v926_v46  ;;  %v927_v52 = vpop.f32.mrf.mxu1  ;;  %v874_v53 = vadd.f32 %v3194_v8, %v873_v50 }
 0x13f   : > { %v3248_v54 = vadd.f32 %v1033_v48, %v980_v49  ;;  %v928_v55 = vadd.f32 %v927_v52, %v874_v53 }
 0x144   : > { %v981_v1 = vpop.f32.mrf.mxu2  ;;  %v876_v6 = vpop.f32.mrf.mxu0 }
 0x145   : > { %v1035_v2 = vpop.f32.mrf.mxu3  ;;  %v982_v5 = vadd.f32 %v981_v1, %v928_v55  ;;  %v930_v7 = vpop.f32.mrf.mxu1  ;;  %v877_v11 = vadd.f32 %v3194_v8, %v876_v6 }
 0x147   : > { %v3259_v12 = vadd.f32 %v1035_v2, %v982_v5  ;;  %v931_v13 = vadd.f32 %v930_v7, %v877_v11  ;;  %1303 = vmatmul.bf16.gmra.mxu0 %v2349_v3  ;;  %v2381_v3 = vor.u32 %v2558_v57, %v2380_v56 }
 0x148   : > { %1357 = vmatmul.bf16.gmra.mxu1 %v2353_v4  ;;  %v2385_v4 = vor.u32 %v2556_v58, %v2382_v60 }
 0x149   : > { %1411 = vmatmul.bf16.gmra.mxu2 %v2357_v9  ;;  %v2389_v9 = vor.u32 %v2559_v62, %v2388_v61  ;;  %v2412_v61 = vld [vmem:[%s2897_s13 + $0x200] sm:$0xf]  ;;  %v2566_v62 = vld [vmem:[%s2897_s13 + $0x20c] sm:$0xf0] }
 0x14a   : > { %1465 = vmatmul.bf16.gmra.mxu3 %v2361_v10  ;;  %v2393_v10 = vor.u32 %v2557_v63, %v2390_v0  ;;  %v2564_v63 = vld [vmem:[%s2897_s13 + $0x204] sm:$0xf]  ;;  %v2414_v0 = vld [vmem:[%s2897_s13 + $0x210] sm:$0xf0] }
 0x14c   : > { %v984_v14 = vpop.f32.mrf.mxu2  ;;  %v878_v18 = vpop.f32.mrf.mxu0 }
 0x14d   : > { %v1038_v15 = vpop.f32.mrf.mxu3  ;;  %v985_v17 = vadd.f32 %v984_v14, %v931_v13  ;;  %v932_v19 = vpop.f32.mrf.mxu1  ;;  %v879_v20 = vadd.f32 %v3194_v8, %v878_v18 }
 0x14f   : > { %v3262_v21 = vadd.f32 %v1038_v15, %v985_v17  ;;  %v933_v22 = vadd.f32 %v932_v19, %v879_v20 }
 0x154   : > { %v986_v33 = vpop.f32.mrf.mxu2  ;;  %v881_v38 = vpop.f32.mrf.mxu0 }
 0x155   : > { %v1040_v34 = vpop.f32.mrf.mxu3  ;;  %v987_v37 = vadd.f32 %v986_v33, %v933_v22  ;;  %v935_v39 = vpop.f32.mrf.mxu1  ;;  %v882_v42 = vadd.f32 %v3194_v8, %v881_v38  ;;  %v2561_v33 = vld [vmem:[%s2897_s13 + $0x1ec] sm:$0xf]  ;;  %v2401_v38 = vor.u32 %v2560_v28, %v2398_v29 }
 0x157   : > { %v3273_v43 = vadd.f32 %v1040_v34, %v987_v37  ;;  %v936_v44 = vadd.f32 %v935_v39, %v882_v42  ;;  %1308 = vmatmul.bf16.gmra.mxu0 %v2365_v35  ;;  %v2406_v34 = vld [vmem:[%s2897_s13 + $0x1f8] sm:$0xf0]  ;;  %v2397_v37 = vor.u32 %v2562_v27, %v2396_v26  ;;  %v2405_v42 = vor.u32 %v2563_v32, %v2404_v30 }
 0x158   : > { %1362 = vmatmul.bf16.gmra.mxu1 %v2369_v36 }
 0x159   : > { %1416 = vmatmul.bf16.gmra.mxu2 %v2373_v40 }
 0x15a   : > { %1470 = vmatmul.bf16.gmra.mxu3 %v2377_v41 }
 0x15c   : > { %v989_v46 = vpop.f32.mrf.mxu2  ;;  %v883_v49 = vpop.f32.mrf.mxu0 }
 0x15d   : > { %v1043_v47 = vpop.f32.mrf.mxu3  ;;  %v990_v48 = vadd.f32 %v989_v46, %v936_v44  ;;  %v937_v50 = vpop.f32.mrf.mxu1  ;;  %v884_v52 = vadd.f32 %v3194_v8, %v883_v49  ;;  %v2409_v44 = vor.u32 %v2561_v33, %v2406_v34  ;;  %v2428_v33 = vld [vmem:[%s2897_s13 + $0x220] sm:$0xf]  ;;  %v2570_v34 = vld [vmem:[%s2897_s13 + $0x22c] sm:$0xf0] }
 0x15f   : > { %v3276_v53 = vadd.f32 %v1043_v47, %v990_v48  ;;  %v938_v55 = vadd.f32 %v937_v50, %v884_v52 }
 0x164   : > { %v991_v1 = vpop.f32.mrf.mxu2  ;;  %v886_v6 = vpop.f32.mrf.mxu0 }
 0x165   : > { %v1045_v2 = vpop.f32.mrf.mxu3  ;;  %v992_v5 = vadd.f32 %v991_v1, %v938_v55  ;;  %v940_v7 = vpop.f32.mrf.mxu1  ;;  %v887_v11 = vadd.f32 %v3194_v8, %v886_v6  ;;  %v2420_v1 = vld [vmem:[%s2897_s13 + $0x208] sm:$0xf] }
 0x167   : > { %v3287_v13 = vadd.f32 %v1045_v2, %v992_v5  ;;  %v941_v14 = vadd.f32 %v940_v7, %v887_v11  ;;  %1313 = vmatmul.bf16.gmra.mxu0 %v2381_v3  ;;  %v2567_v2 = vld [vmem:[%s2897_s13 + $0x214] sm:$0xf0]  ;;  %v2565_v3 = vld [vmem:[%s2897_s13 + $0x20c] sm:$0xf]  ;;  %v2413_v7 = vor.u32 %v2566_v62, %v2412_v61 }
 0x168   : > { %1367 = vmatmul.bf16.gmra.mxu1 %v2385_v4  ;;  %v2422_v4 = vld [vmem:[%s2897_s13 + $0x218] sm:$0xf0] }
 0x169   : > { %1421 = vmatmul.bf16.gmra.mxu2 %v2389_v9  ;;  %v2417_v9 = vor.u32 %v2564_v63, %v2414_v0 }
 0x16a   : > { %1475 = vmatmul.bf16.gmra.mxu3 %v2393_v10 }
 0x16c   : > { %v994_v15 = vpop.f32.mrf.mxu2  ;;  %v888_v19 = vpop.f32.mrf.mxu0 }
 0x16d   : > { %v1048_v17 = vpop.f32.mrf.mxu3  ;;  %v995_v18 = vadd.f32 %v994_v15, %v941_v14  ;;  %v942_v20 = vpop.f32.mrf.mxu1  ;;  %v889_v22 = vadd.f32 %v3194_v8, %v888_v19  ;;  %v2421_v15 = vor.u32 %v2567_v2, %v2420_v1  ;;  %v3331_v2 = vstv %s1496_s6 }
 0x16f   : > { %v3290_v23 = vadd.f32 %v1048_v17, %v995_v18  ;;  %v943_v25 = vadd.f32 %v942_v20, %v889_v22  ;;  %v2425_v17 = vor.u32 %v2565_v3, %v2422_v4  ;;  %v3333_v3 = vstv %s2443_s7 }
 0x170   : > { %v3335_v4 = vstv %s2442_s8 }
 0x174   : > { %v996_v35 = vpop.f32.mrf.mxu2  ;;  %v891_v40 = vpop.f32.mrf.mxu0 }
 0x175   : > { %v1050_v36 = vpop.f32.mrf.mxu3  ;;  %v997_v39 = vadd.f32 %v996_v35, %v943_v25  ;;  %v945_v41 = vpop.f32.mrf.mxu1  ;;  %v892_v46 = vadd.f32 %v3194_v8, %v891_v40  ;;  %v2568_v35 = vld [vmem:[%s2897_s13 + $0x224] sm:$0xf]  ;;  %v2438_v40 = vld [vmem:[%s2897_s13 + $0x238] sm:$0xf0] }
 0x177   : > { %v3301_v47 = vadd.f32 %v1050_v36, %v997_v39  ;;  %v946_v48 = vadd.f32 %v945_v41, %v892_v46  ;;  %1318 = vmatmul.bf16.gmra.mxu0 %v2397_v37  ;;  %v2430_v36 = vld [vmem:[%s2897_s13 + $0x230] sm:$0xf0]  ;;  %v2436_v37 = vld [vmem:[%s2897_s13 + $0x228] sm:$0xf]  ;;  %v2569_v39 = vld [vmem:[%s2897_s13 + $0x22c] sm:$0xf] }
 0x178   : > { %1372 = vmatmul.bf16.gmra.mxu1 %v2401_v38  ;;  %v2571_v38 = vld [vmem:[%s2897_s13 + $0x234] sm:$0xf0]  ;;  %v2433_v46 = vor.u32 %v2568_v35, %v2430_v36  ;;  %s2576_s13 = smul.u32 144, %s339_s11  ;;  %v1499_v35 = vmul.f32 %v3331_v2, %v3217_v51  ;;  %v1612_v36 = vmul.f32 %v3333_v3, %v3217_v51 }
 0x179   : > { %1426 = vmatmul.bf16.gmra.mxu2 %v2405_v42 }
 0x17a   : > { %1480 = vmatmul.bf16.gmra.mxu3 %v2409_v44  ;;  %v2429_v44 = vor.u32 %v2570_v34, %v2428_v33  ;;  %s3353_s15 = scalar_lea.vmem [#allocation5], %s2576_s13 }
 0x17c   : > { %v999_v49 = vpop.f32.mrf.mxu2  ;;  %v893_v55 = vpop.f32.mrf.mxu0 }
 0x17d   : > { %v1053_v50 = vpop.f32.mrf.mxu3  ;;  %v1000_v52 = vadd.f32 %v999_v49, %v946_v48  ;;  %v947_v56 = vpop.f32.mrf.mxu1  ;;  %v894_v57 = vadd.f32 %v3194_v8, %v893_v55  ;;  %v2441_v55 = vor.u32 %v2569_v39, %v2438_v40 }
 0x17f   : > { %v3304_v58 = vadd.f32 %v1053_v50, %v1000_v52  ;;  %v948_v60 = vadd.f32 %v947_v56, %v894_v57  ;;  %v2437_v52 = vor.u32 %v2571_v38, %v2436_v37 }
 0x184   : > { %v1001_v5 = vpop.f32.mrf.mxu2  ;;  %v896_v11 = vpop.f32.mrf.mxu0 }
 0x185   : > { %v1055_v6 = vpop.f32.mrf.mxu3  ;;  %v1002_v10 = vadd.f32 %v1001_v5, %v948_v60  ;;  %v950_v14 = vpop.f32.mrf.mxu1  ;;  %v897_v18 = vadd.f32 %v3194_v8, %v896_v11  ;;  %v3337_v5 = vstv %s2444_s9 }
 0x187   : > { %v3315_v19 = vadd.f32 %v1055_v6, %v1002_v10  ;;  %v951_v20 = vadd.f32 %v950_v14, %v897_v18  ;;  %1323 = vmatmul.bf16.gmra.mxu0 %v2413_v7  ;;  %v1611_v10 = vmul.f32 %v3333_v3, %v3206_v31 }
 0x188   : > { %1377 = vmatmul.bf16.gmra.mxu1 %v2417_v9  ;;  %v1498_v9 = vmul.f32 %v3331_v2, %v3206_v31 }
 0x189   : > { %1431 = vmatmul.bf16.gmra.mxu2 %v2421_v15 }
 0x18a   : > { %1485 = vmatmul.bf16.gmra.mxu3 %v2425_v17 }
 0x18c   : > { %v1004_v22 = vpop.f32.mrf.mxu2  ;;  %v898_v27 = vpop.f32.mrf.mxu0 }
 0x18d   : > { %v1058_v25 = vpop.f32.mrf.mxu3  ;;  %v1005_v26 = vadd.f32 %v1004_v22, %v951_v20  ;;  %v952_v28 = vpop.f32.mrf.mxu1  ;;  %v899_v29 = vadd.f32 %v3194_v8, %v898_v27 }
 0x18f   : > { %v3318_v30 = vadd.f32 %v1058_v25, %v1005_v26  ;;  %v953_v32 = vadd.f32 %v952_v28, %v899_v29 }
 0x194   : > { %v1006_v41 = vpop.f32.mrf.mxu2  ;;  %v1289_v49 = vpop.f32.mrf.mxu0 }
 0x195   : > { %v1060_v42 = vpop.f32.mrf.mxu3  ;;  %v1007_v48 = vadd.f32 %v1006_v41, %v953_v32  ;;  %v1343_v50 = vpop.f32.mrf.mxu1  ;;  %v1290_v56 = vadd.f32 %v3194_v8, %v1289_v49 }
 0x197   : > { %v3329_v57 = vadd.f32 %v1060_v42, %v1007_v48  ;;  %1328 = vmatmul.bf16.gmra.mxu0 %v2429_v44  ;;  %v1344_v60 = vadd.f32 %v1343_v50, %v1290_v56 }
 0x198   : > { %1382 = vmatmul.bf16.gmra.mxu1 %v2433_v46 }
 0x199   : > { %1436 = vmatmul.bf16.gmra.mxu2 %v2437_v52 }
 0x19a   : > { %1490 = vmatmul.bf16.gmra.mxu3 %v2441_v55 }
 0x19c   : > { %v1397_v61 = vpop.f32.mrf.mxu2  ;;  %v1291_v0 = vpop.f32.mrf.mxu0 }
 0x19d   : > { %v1451_v62 = vpop.f32.mrf.mxu3  ;;  %v1398_v63 = vadd.f32 %v1397_v61, %v1344_v60  ;;  %v1345_v1 = vpop.f32.mrf.mxu1  ;;  %v1292_v7 = vadd.f32 %v3194_v8, %v1291_v0  ;;  %v1500_v61 = vmul.f32 %v3331_v2, %v3220_v59 }
 0x19f   : > { %v1452_v6 = vadd.f32 %v1451_v62, %v1398_v63  ;;  %v1346_v18 = vadd.f32 %v1345_v1, %v1292_v7  ;;  %v1613_v62 = vmul.f32 %v3333_v3, %v3220_v59 }
 0x1a1   : > { %v1518_v11 = vmul.f32 %v3335_v4, %v1452_v6  ;;  %v1631_v14 = vmul.f32 %v3337_v5, %v1452_v6 }
 0x1a3   : > { %v1536_v15 = vadd.f32 %v1518_v11, %v1498_v9  ;;  %v1649_v17 = vadd.f32 %v1631_v14, %v1611_v10 }
 0x1a4   : > { %v1399_v20 = vpop.f32.mrf.mxu2  ;;  %v1294_v28 = vpop.f32.mrf.mxu0 }
 0x1a5   : > { %v1453_v22 = vpop.f32.mrf.mxu3  ;;  %v1554_v25 = vmax.f32 %v1536_v15, 0.0  ;;  %v1667_v26 = vmax.f32 %v1649_v17, 0.0  ;;  %v1400_v27 = vadd.f32 %v1399_v20, %v1346_v18  ;;  %v1348_v29 = vpop.f32.mrf.mxu1  ;;  %v1295_v32 = vadd.f32 %v3194_v8, %v1294_v28 }
 0x1a7   : > { %v1572_v31 = vpack.c.bf16 %v1554_v25, %v1554_v25  ;;  %v1685_v33 = vpack.c.bf16 %v1667_v26, %v1667_v26  ;;  %v1454_v34 = vadd.f32 %v1453_v22, %v1400_v27  ;;  %v1349_v39 = vadd.f32 %v1348_v29, %v1295_v32 }
 0x1a8   : > { %v1501_v26 = vmul.f32 %v3331_v2, %v3231_v16  ;;  %v1614_v27 = vmul.f32 %v3333_v3, %v3231_v16 }
 0x1a9   : > { %1591 = vst.msk [vmem:[%s3353_s15] sm:$0xf] %vm1590_vm0, %v1572_v31  ;;  %v1519_v37 = vmul.f32 %v3335_v4, %v1454_v34  ;;  %v1632_v38 = vmul.f32 %v3337_v5, %v1454_v34 }
 0x1aa   : > { %2445 = vst.msk [vmem:[%s3353_s15 + $0x48] sm:$0xf] %vm1590_vm0, %v1685_v33 }
 0x1ab   : > { %v1537_v40 = vadd.f32 %v1519_v37, %v1499_v35  ;;  %v1650_v41 = vadd.f32 %v1632_v38, %v1612_v36 }
 0x1ac   : > { %v1402_v42 = vpop.f32.mrf.mxu2  ;;  %v1296_v49 = vpop.f32.mrf.mxu0 }
 0x1ad   : > { %v1456_v44 = vpop.f32.mrf.mxu3  ;;  %v1555_v51 = vmax.f32 %v1537_v40, 0.0  ;;  %v1668_v46 = vmax.f32 %v1650_v41, 0.0  ;;  %v1403_v48 = vadd.f32 %v1402_v42, %v1349_v39  ;;  %v1350_v50 = vpop.f32.mrf.mxu1  ;;  %v1297_v60 = vadd.f32 %v3194_v8, %v1296_v49 }
 0x1af   : > { %v1573_v52 = vpack.c.bf16 %v1555_v51, %v1555_v51  ;;  %v1686_v55 = vpack.c.bf16 %v1668_v46, %v1668_v46  ;;  %v1457_v56 = vadd.f32 %v1456_v44, %v1403_v48  ;;  %v1351_v7 = vadd.f32 %v1350_v50, %v1297_v60 }
 0x1b0   : > { %v1502_v51 = vmul.f32 %v3331_v2, %v3234_v24  ;;  %v1615_v46 = vmul.f32 %v3333_v3, %v3234_v24 }
 0x1b1   : > { %1592 = vst.msk [vmem:[%s3353_s15 + $0x4] sm:$0xf] %vm1590_vm0, %v1573_v52  ;;  %v1520_v63 = vmul.f32 %v3335_v4, %v1457_v56  ;;  %v1633_v0 = vmul.f32 %v3337_v5, %v1457_v56 }
 0x1b2   : > { %2446 = vst.msk [vmem:[%s3353_s15 + $0x4c] sm:$0xf] %vm1590_vm0, %v1686_v55 }
 0x1b3   : > { %v1538_v1 = vadd.f32 %v1520_v63, %v1500_v61  ;;  %v1651_v6 = vadd.f32 %v1633_v0, %v1613_v62 }
 0x1b4   : > { %v1404_v9 = vpop.f32.mrf.mxu2  ;;  %v1299_v17 = vpop.f32.mrf.mxu0 }
 0x1b5   : > { %v1458_v10 = vpop.f32.mrf.mxu3  ;;  %v1556_v11 = vmax.f32 %v1538_v1, 0.0  ;;  %v1669_v14 = vmax.f32 %v1651_v6, 0.0  ;;  %v1405_v15 = vadd.f32 %v1404_v9, %v1351_v7  ;;  %v1353_v59 = vpop.f32.mrf.mxu1  ;;  %v1300_v18 = vadd.f32 %v3194_v8, %v1299_v17 }
 0x1b7   : > { %v1574_v20 = vpack.c.bf16 %v1556_v11, %v1556_v11  ;;  %v1687_v22 = vpack.c.bf16 %v1669_v14, %v1669_v14  ;;  %v1459_v25 = vadd.f32 %v1458_v10, %v1405_v15  ;;  %v1354_v32 = vadd.f32 %v1353_v59, %v1300_v18 }
 0x1b8   : > { %v1503_v10 = vmul.f32 %v3331_v2, %v3245_v45  ;;  %v1616_v11 = vmul.f32 %v3333_v3, %v3245_v45 }
 0x1b9   : > { %1593 = vst.msk [vmem:[%s3353_s15 + $0x8] sm:$0xf] %vm1590_vm0, %v1574_v20  ;;  %v1521_v28 = vmul.f32 %v3335_v4, %v1459_v25  ;;  %v1634_v29 = vmul.f32 %v3337_v5, %v1459_v25 }
 0x1ba   : > { %2447 = vst.msk [vmem:[%s3353_s15 + $0x50] sm:$0xf] %vm1590_vm0, %v1687_v22 }
 0x1bb   : > { %v1539_v31 = vadd.f32 %v1521_v28, %v1501_v26  ;;  %v1652_v33 = vadd.f32 %v1634_v29, %v1614_v27 }
 0x1bc   : > { %v1407_v34 = vpop.f32.mrf.mxu2  ;;  %v1301_v39 = vpop.f32.mrf.mxu0 }
 0x1bd   : > { %v1461_v35 = vpop.f32.mrf.mxu3  ;;  %v1557_v36 = vmax.f32 %v1539_v31, 0.0  ;;  %v1670_v37 = vmax.f32 %v1652_v33, 0.0  ;;  %v1408_v38 = vadd.f32 %v1407_v34, %v1354_v32  ;;  %v1355_v16 = vpop.f32.mrf.mxu1  ;;  %v1302_v44 = vadd.f32 %v3194_v8, %v1301_v39 }
 0x1be   : > { %v1504_v34 = vmul.f32 %v3331_v2, %v3248_v54 }
 0x1bf   : > { %v1575_v40 = vpack.c.bf16 %v1557_v36, %v1557_v36  ;;  %v1688_v41 = vpack.c.bf16 %v1670_v37, %v1670_v37  ;;  %v1462_v42 = vadd.f32 %v1461_v35, %v1408_v38  ;;  %v1356_v55 = vadd.f32 %v1355_v16, %v1302_v44 }
 0x1c0   : > { %v1617_v35 = vmul.f32 %v3333_v3, %v3248_v54 }
 0x1c1   : > { %1594 = vst.msk [vmem:[%s3353_s15 + $0xc] sm:$0xf] %vm1590_vm0, %v1575_v40  ;;  %v1522_v48 = vmul.f32 %v3335_v4, %v1462_v42  ;;  %v1635_v49 = vmul.f32 %v3337_v5, %v1462_v42 }
 0x1c2   : > { %2448 = vst.msk [vmem:[%s3353_s15 + $0x54] sm:$0xf] %vm1590_vm0, %v1688_v41 }
 0x1c3   : > { %v1540_v50 = vadd.f32 %v1522_v48, %v1502_v51  ;;  %v1653_v52 = vadd.f32 %v1635_v49, %v1615_v46 }
 0x1c4   : > { %v1409_v56 = vpop.f32.mrf.mxu2  ;;  %v1304_v0 = vpop.f32.mrf.mxu0 }
 0x1c5   : > { %v1463_v60 = vpop.f32.mrf.mxu3  ;;  %v1558_v61 = vmax.f32 %v1540_v50, 0.0  ;;  %v1671_v62 = vmax.f32 %v1653_v52, 0.0  ;;  %v1410_v63 = vadd.f32 %v1409_v56, %v1356_v55  ;;  %v1358_v24 = vpop.f32.mrf.mxu1  ;;  %v1305_v1 = vadd.f32 %v3194_v8, %v1304_v0 }
 0x1c6   : > { %v1505_v55 = vmul.f32 %v3331_v2, %v3259_v12  ;;  %v1618_v56 = vmul.f32 %v3333_v3, %v3259_v12 }
 0x1c7   : > { %v1576_v6 = vpack.c.bf16 %v1558_v61, %v1558_v61  ;;  %v1689_v7 = vpack.c.bf16 %v1671_v62, %v1671_v62  ;;  %v1464_v9 = vadd.f32 %v1463_v60, %v1410_v63  ;;  %v1359_v17 = vadd.f32 %v1358_v24, %v1305_v1 }
 0x1c9   : > { %1595 = vst.msk [vmem:[%s3353_s15 + $0x10] sm:$0xf] %vm1590_vm0, %v1576_v6  ;;  %v1523_v14 = vmul.f32 %v3335_v4, %v1464_v9  ;;  %v1636_v15 = vmul.f32 %v3337_v5, %v1464_v9 }
 0x1ca   : > { %2449 = vst.msk [vmem:[%s3353_s15 + $0x58] sm:$0xf] %vm1590_vm0, %v1689_v7 }
 0x1cb   : > { %v1541_v59 = vadd.f32 %v1523_v14, %v1503_v10  ;;  %v1654_v18 = vadd.f32 %v1636_v15, %v1616_v11 }
 0x1cc   : > { %v1412_v20 = vpop.f32.mrf.mxu2  ;;  %v1306_v28 = vpop.f32.mrf.mxu0 }
 0x1cd   : > { %v1466_v22 = vpop.f32.mrf.mxu3  ;;  %v1559_v25 = vmax.f32 %v1541_v59, 0.0  ;;  %v1672_v26 = vmax.f32 %v1654_v18, 0.0  ;;  %v1413_v27 = vadd.f32 %v1412_v20, %v1359_v17  ;;  %v1360_v45 = vpop.f32.mrf.mxu1  ;;  %v1307_v33 = vadd.f32 %v3194_v8, %v1306_v28 }
 0x1ce   : > { %v1506_v59 = vmul.f32 %v3331_v2, %v3262_v21  ;;  %v1619_v18 = vmul.f32 %v3333_v3, %v3262_v21 }
 0x1cf   : > { %v1577_v29 = vpack.c.bf16 %v1559_v25, %v1559_v25  ;;  %v1690_v32 = vpack.c.bf16 %v1672_v26, %v1672_v26  ;;  %v1467_v31 = vadd.f32 %v1466_v22, %v1413_v27  ;;  %v1361_v16 = vadd.f32 %v1360_v45, %v1307_v33 }
 0x1d1   : > { %1596 = vst.msk [vmem:[%s3353_s15 + $0x14] sm:$0xf] %vm1590_vm0, %v1577_v29  ;;  %v1524_v36 = vmul.f32 %v3335_v4, %v1467_v31  ;;  %v1637_v37 = vmul.f32 %v3337_v5, %v1467_v31 }
 0x1d2   : > { %2450 = vst.msk [vmem:[%s3353_s15 + $0x5c] sm:$0xf] %vm1590_vm0, %v1690_v32 }
 0x1d3   : > { %v1542_v38 = vadd.f32 %v1524_v36, %v1504_v34  ;;  %v1655_v39 = vadd.f32 %v1637_v37, %v1617_v35 }
 0x1d4   : > { %v1414_v40 = vpop.f32.mrf.mxu2  ;;  %v1309_v46 = vpop.f32.mrf.mxu0 }
 0x1d5   : > { %v1468_v41 = vpop.f32.mrf.mxu3  ;;  %v1560_v42 = vmax.f32 %v1542_v38, 0.0  ;;  %v1673_v44 = vmax.f32 %v1655_v39, 0.0  ;;  %v1415_v51 = vadd.f32 %v1414_v40, %v1361_v16  ;;  %v1363_v54 = vpop.f32.mrf.mxu1  ;;  %v1310_v48 = vadd.f32 %v3194_v8, %v1309_v46 }
 0x1d6   : > { %v1507_v38 = vmul.f32 %v3331_v2, %v3273_v43  ;;  %v1620_v39 = vmul.f32 %v3333_v3, %v3273_v43 }
 0x1d7   : > { %v1578_v49 = vpack.c.bf16 %v1560_v42, %v1560_v42  ;;  %v1691_v50 = vpack.c.bf16 %v1673_v44, %v1673_v44  ;;  %v1469_v52 = vadd.f32 %v1468_v41, %v1415_v51  ;;  %v1364_v62 = vadd.f32 %v1363_v54, %v1310_v48 }
 0x1d9   : > { %1597 = vst.msk [vmem:[%s3353_s15 + $0x18] sm:$0xf] %vm1590_vm0, %v1578_v49  ;;  %v1525_v60 = vmul.f32 %v3335_v4, %v1469_v52  ;;  %v1638_v61 = vmul.f32 %v3337_v5, %v1469_v52 }
 0x1da   : > { %2451 = vst.msk [vmem:[%s3353_s15 + $0x60] sm:$0xf] %vm1590_vm0, %v1691_v50 }
 0x1db   : > { %v1543_v63 = vadd.f32 %v1525_v60, %v1505_v55  ;;  %v1656_v0 = vadd.f32 %v1638_v61, %v1618_v56  ;;  %v3452_v56 = vld [vmem:[%s3601_s2] ss:$0 sm:$0xff]  ;;  %v1508_v61 = vmul.f32 %v3331_v2, %v3276_v53 }
 0x1dc   : > { %v1417_v24 = vpop.f32.mrf.mxu2  ;;  %v1311_v10 = vpop.f32.mrf.mxu0 }
 0x1dd   : > { %v1471_v1 = vpop.f32.mrf.mxu3  ;;  %v1561_v6 = vmax.f32 %v1543_v63, 0.0  ;;  %v1674_v7 = vmax.f32 %v1656_v0, 0.0  ;;  %v1418_v9 = vadd.f32 %v1417_v24, %v1364_v62  ;;  %v1365_v12 = vpop.f32.mrf.mxu1  ;;  %v1312_v17 = vadd.f32 %v3194_v8, %v1311_v10 }
 0x1de   : > { %v1621_v62 = vmul.f32 %v3333_v3, %v3276_v53 }
 0x1df   : > { %v1579_v11 = vpack.c.bf16 %v1561_v6, %v1561_v6  ;;  %v1692_v14 = vpack.c.bf16 %v1674_v7, %v1674_v7  ;;  %v1472_v15 = vadd.f32 %v1471_v1, %v1418_v9  ;;  %v1366_v27 = vadd.f32 %v1365_v12, %v1312_v17 }
 0x1e1   : > { %1598 = vst.msk [vmem:[%s3353_s15 + $0x1c] sm:$0xf] %vm1590_vm0, %v1579_v11  ;;  %v1526_v20 = vmul.f32 %v3335_v4, %v1472_v15  ;;  %v1639_v22 = vmul.f32 %v3337_v5, %v1472_v15 }
 0x1e2   : > { %2452 = vst.msk [vmem:[%s3353_s15 + $0x64] sm:$0xf] %vm1590_vm0, %v1692_v14 }
 0x1e3   : > { %v1544_v25 = vadd.f32 %v1526_v20, %v1506_v59  ;;  %v1657_v26 = vadd.f32 %v1639_v22, %v1619_v18  ;;  %v1509_v20 = vmul.f32 %v3331_v2, %v3287_v13  ;;  %v1622_v22 = vmul.f32 %v3333_v3, %v3287_v13 }
 0x1e4   : > { %v1419_v28 = vpop.f32.mrf.mxu2  ;;  %v1314_v33 = vpop.f32.mrf.mxu0 }
 0x1e5   : > { %v1473_v45 = vpop.f32.mrf.mxu3  ;;  %v1562_v29 = vmax.f32 %v1544_v25, 0.0  ;;  %v1675_v32 = vmax.f32 %v1657_v26, 0.0  ;;  %v1420_v31 = vadd.f32 %v1419_v28, %v1366_v27  ;;  %v1368_v21 = vpop.f32.mrf.mxu1  ;;  %v1315_v34 = vadd.f32 %v3194_v8, %v1314_v33 }
 0x1e7   : > { %v1580_v35 = vpack.c.bf16 %v1562_v29, %v1562_v29  ;;  %v1693_v36 = vpack.c.bf16 %v1675_v32, %v1675_v32  ;;  %v1474_v37 = vadd.f32 %v1473_v45, %v1420_v31  ;;  %v1369_v41 = vadd.f32 %v1368_v21, %v1315_v34 }
 0x1e9   : > { %1599 = vst.msk [vmem:[%s3353_s15 + $0x20] sm:$0xf] %vm1590_vm0, %v1580_v35  ;;  %v1527_v16 = vmul.f32 %v3335_v4, %v1474_v37  ;;  %v1640_v40 = vmul.f32 %v3337_v5, %v1474_v37 }
 0x1ea   : > { %2453 = vst.msk [vmem:[%s3353_s15 + $0x68] sm:$0xf] %vm1590_vm0, %v1693_v36 }
 0x1eb   : > { %v1545_v42 = vadd.f32 %v1527_v16, %v1507_v38  ;;  %v1658_v8 = vadd.f32 %v1640_v40, %v1620_v39  ;;  %v1510_v39 = vmul.f32 %v3331_v2, %v3290_v23  ;;  %v1623_v16 = vmul.f32 %v3333_v3, %v3290_v23 }
 0x1ec   : > { %v1422_v44 = vpop.f32.mrf.mxu2  ;;  %v1316_v49 = vpop.f32.mrf.mxu0 }
 0x1ed   : > { %v1476_v51 = vpop.f32.mrf.mxu3  ;;  %v1563_v46 = vmax.f32 %v1545_v42, 0.0  ;;  %v1676_v54 = vmax.f32 %v1658_v8, 0.0  ;;  %v1423_v48 = vadd.f32 %v1422_v44, %v1369_v41  ;;  %v1370_v43 = vpop.f32.mrf.mxu1  ;;  %v1317_v60 = vadd.f32 %v3452_v56, %v1316_v49 }
 0x1ef   : > { %v1581_v50 = vpack.c.bf16 %v1563_v46, %v1563_v46  ;;  %v1694_v52 = vpack.c.bf16 %v1676_v54, %v1676_v54  ;;  %v1477_v55 = vadd.f32 %v1476_v51, %v1423_v48  ;;  %v1371_v6 = vadd.f32 %v1370_v43, %v1317_v60 }
 0x1f1   : > { %1600 = vst.msk [vmem:[%s3353_s15 + $0x24] sm:$0xf] %vm1590_vm0, %v1581_v50  ;;  %v1528_v63 = vmul.f32 %v3335_v4, %v1477_v55  ;;  %v1641_v0 = vmul.f32 %v3337_v5, %v1477_v55 }
 0x1f2   : > { %2454 = vst.msk [vmem:[%s3353_s15 + $0x6c] sm:$0xf] %vm1590_vm0, %v1694_v52 }
 0x1f3   : > { %v1546_v24 = vadd.f32 %v1528_v63, %v1508_v61  ;;  %v1659_v1 = vadd.f32 %v1641_v0, %v1621_v62  ;;  %v1511_v61 = vmul.f32 %v3331_v2, %v3301_v47  ;;  %v1624_v62 = vmul.f32 %v3333_v3, %v3301_v47 }
 0x1f4   : > { %v1424_v7 = vpop.f32.mrf.mxu2  ;;  %v1319_v14 = vpop.f32.mrf.mxu0 }
 0x1f5   : > { %v1478_v9 = vpop.f32.mrf.mxu3  ;;  %v1564_v10 = vmax.f32 %v1546_v24, 0.0  ;;  %v1677_v12 = vmax.f32 %v1659_v1, 0.0  ;;  %v1425_v11 = vadd.f32 %v1424_v7, %v1371_v6  ;;  %v1373_v53 = vpop.f32.mrf.mxu1  ;;  %v1320_v15 = vadd.f32 %v3452_v56, %v1319_v14 }
 0x1f7   : > { %v1582_v17 = vpack.c.bf16 %v1564_v10, %v1564_v10  ;;  %v1695_v59 = vpack.c.bf16 %v1677_v12, %v1677_v12  ;;  %v1479_v18 = vadd.f32 %v1478_v9, %v1425_v11  ;;  %v1374_v27 = vadd.f32 %v1373_v53, %v1320_v15 }
 0x1f9   : > { %1601 = vst.msk [vmem:[%s3353_s15 + $0x28] sm:$0xf] %vm1590_vm0, %v1582_v17  ;;  %v1529_v25 = vmul.f32 %v3335_v4, %v1479_v18  ;;  %v1642_v26 = vmul.f32 %v3337_v5, %v1479_v18  ;;  %v1512_v18 = vmul.f32 %v3331_v2, %v3304_v58 }
 0x1fa   : > { %2455 = vst.msk [vmem:[%s3353_s15 + $0x70] sm:$0xf] %vm1590_vm0, %v1695_v59 }
 0x1fb   : > { %v1547_v28 = vadd.f32 %v1529_v25, %v1509_v20  ;;  %v1660_v45 = vadd.f32 %v1642_v26, %v1622_v22  ;;  %v1625_v20 = vmul.f32 %v3333_v3, %v3304_v58 }
 0x1fc   : > { %v1427_v29 = vpop.f32.mrf.mxu2  ;;  %v1321_v34 = vpop.f32.mrf.mxu0 }
 0x1fd   : > { %v1481_v32 = vpop.f32.mrf.mxu3  ;;  %v1565_v31 = vmax.f32 %v1547_v28, 0.0  ;;  %v1678_v33 = vmax.f32 %v1660_v45, 0.0  ;;  %v1428_v21 = vadd.f32 %v1427_v29, %v1374_v27  ;;  %v1375_v13 = vpop.f32.mrf.mxu1  ;;  %v1322_v38 = vadd.f32 %v3452_v56, %v1321_v34 }
 0x1ff   : > { %v1583_v35 = vpack.c.bf16 %v1565_v31, %v1565_v31  ;;  %v1696_v36 = vpack.c.bf16 %v1678_v33, %v1678_v33  ;;  %v1482_v37 = vadd.f32 %v1481_v32, %v1428_v21  ;;  %v1376_v44 = vadd.f32 %v1375_v13, %v1322_v38 }
 0x200   : > { %v1626_v38 = vmul.f32 %v3333_v3, %v3315_v19 }
 0x201   : > { %1602 = vst.msk [vmem:[%s3353_s15 + $0x2c] sm:$0xf] %vm1590_vm0, %v1583_v35  ;;  %v1530_v40 = vmul.f32 %v3335_v4, %v1482_v37  ;;  %v1643_v41 = vmul.f32 %v3337_v5, %v1482_v37 }
 0x202   : > { %2456 = vst.msk [vmem:[%s3353_s15 + $0x74] sm:$0xf] %vm1590_vm0, %v1696_v36  ;;  %v1513_v36 = vmul.f32 %v3331_v2, %v3315_v19 }
 0x203   : > { %v1548_v42 = vadd.f32 %v1530_v40, %v1510_v39  ;;  %v1661_v8 = vadd.f32 %v1643_v41, %v1623_v16 }
 0x204   : > { %v1429_v51 = vpop.f32.mrf.mxu2  ;;  %v1324_v43 = vpop.f32.mrf.mxu0 }
 0x205   : > { %v1483_v46 = vpop.f32.mrf.mxu3  ;;  %v1566_v54 = vmax.f32 %v1548_v42, 0.0  ;;  %v1679_v48 = vmax.f32 %v1661_v8, 0.0  ;;  %v1430_v49 = vadd.f32 %v1429_v51, %v1376_v44  ;;  %v1378_v23 = vpop.f32.mrf.mxu1  ;;  %v1325_v50 = vadd.f32 %v3452_v56, %v1324_v43 }
 0x207   : > { %v1584_v52 = vpack.c.bf16 %v1566_v54, %v1566_v54  ;;  %v1697_v55 = vpack.c.bf16 %v1679_v48, %v1679_v48  ;;  %v1484_v60 = vadd.f32 %v1483_v46, %v1430_v49  ;;  %v1379_v24 = vadd.f32 %v1378_v23, %v1325_v50 }
 0x208   : > { %v1514_v50 = vmul.f32 %v3331_v2, %v3318_v30 }
 0x209   : > { %1603 = vst.msk [vmem:[%s3353_s15 + $0x30] sm:$0xf] %vm1590_vm0, %v1584_v52  ;;  %v1531_v63 = vmul.f32 %v3335_v4, %v1484_v60  ;;  %v1644_v0 = vmul.f32 %v3337_v5, %v1484_v60  ;;  %v1627_v52 = vmul.f32 %v3333_v3, %v3318_v30 }
 0x20a   : > { %2457 = vst.msk [vmem:[%s3353_s15 + $0x78] sm:$0xf] %vm1590_vm0, %v1697_v55 }
 0x20b   : > { %v1549_v1 = vadd.f32 %v1531_v63, %v1511_v61  ;;  %v1662_v6 = vadd.f32 %v1644_v0, %v1624_v62 }
 0x20c   : > { %v1432_v7 = vpop.f32.mrf.mxu2  ;;  %v1326_v14 = vpop.f32.mrf.mxu0 }
 0x20d   : > { %v1486_v9 = vpop.f32.mrf.mxu3  ;;  %v1567_v10 = vmax.f32 %v1549_v1, 0.0  ;;  %v1680_v12 = vmax.f32 %v1662_v6, 0.0  ;;  %v1433_v11 = vadd.f32 %v1432_v7, %v1379_v24  ;;  %v1380_v47 = vpop.f32.mrf.mxu1  ;;  %v1327_v59 = vadd.f32 %v3452_v56, %v1326_v14 }
 0x20f   : > { %v1585_v53 = vpack.c.bf16 %v1567_v10, %v1567_v10  ;;  %v1698_v15 = vpack.c.bf16 %v1680_v12, %v1680_v12  ;;  %v1487_v17 = vadd.f32 %v1486_v9, %v1433_v11  ;;  %v1381_v28 = vadd.f32 %v1380_v47, %v1327_v59 }
 0x210   : > { %v1515_v12 = vmul.f32 %v3331_v2, %v3329_v57  ;;  %v1628_v11 = vmul.f32 %v3333_v3, %v3329_v57  ;;  %v1748_v57 = vld [vmem:[%s3353_s15] sm:$0xff] (%p2718_p5)   ;;  %v1752_v2 = vld [vmem:[%s3353_s15 + $0x8] sm:$0xff] (%p2718_p5)   ;;  %v1756_v3 = vld [vmem:[%s3353_s15 + $0x10] sm:$0xff] (%p2718_p5)  }
 0x211   : > { %1604 = vst.msk [vmem:[%s3353_s15 + $0x34] sm:$0xf] %vm1590_vm0, %v1585_v53  ;;  %v1532_v22 = vmul.f32 %v3335_v4, %v1487_v17  ;;  %v1645_v25 = vmul.f32 %v3337_v5, %v1487_v17 }
 0x212   : > { %2458 = vst.msk [vmem:[%s3353_s15 + $0x7c] sm:$0xf] %vm1590_vm0, %v1698_v15 }
 0x213   : > { %v1550_v26 = vadd.f32 %v1532_v22, %v1512_v18  ;;  %v1663_v27 = vadd.f32 %v1645_v25, %v1625_v20  ;;  %1749 = vst [vmem:[%s3553_s20] sm:$0xff] (%p2718_p5), %v1748_v57   ;;  %v1768_v22 = vld [vmem:[%s3353_s15 + $0x28] sm:$0xff] (%p2718_p5)  }
 0x214   : > { %v1434_v45 = vpop.f32.mrf.mxu2  ;;  %v1329_v21 = vpop.f32.mrf.mxu0  ;;  %1753 = vst [vmem:[%s3553_s20 + $0x8] sm:$0xff] (%p2718_p5), %v1752_v2  }
 0x215   : > { %v1488_v29 = vpop.f32.mrf.mxu3  ;;  %v1568_v32 = vmax.f32 %v1550_v26, 0.0  ;;  %v1681_v31 = vmax.f32 %v1663_v27, 0.0  ;;  %v1435_v33 = vadd.f32 %v1434_v45, %v1381_v28  ;;  %v1330_v58 = vadd.f32 %v3452_v56, %v1329_v21  ;;  %v1383_v37 = vpop.f32.mrf.mxu1  ;;  %1757 = vst [vmem:[%s3553_s20 + $0x10] sm:$0xff] (%p2718_p5), %v1756_v3   ;;  %v1784_v28 = vld [vmem:[%s3353_s15 + $0x48] sm:$0xff] (%p2718_p5)   ;;  %v1788_v45 = vld [vmem:[%s3353_s15 + $0x50] sm:$0xff] (%p2718_p5)  }
 0x216   : > { %1769 = vst [vmem:[%s3553_s20 + $0x28] sm:$0xff] (%p2718_p5), %v1768_v22  }
 0x217   : > { %v1586_v34 = vpack.c.bf16 %v1568_v32, %v1568_v32  ;;  %v1699_v13 = vpack.c.bf16 %v1681_v31, %v1681_v31  ;;  %v1489_v35 = vadd.f32 %v1488_v29, %v1435_v33  ;;  %v1384_v40 = vadd.f32 %v1383_v37, %v1330_v58  ;;  %v1792_v29 = vld [vmem:[%s3353_s15 + $0x58] sm:$0xff] (%p2718_p5)   ;;  %1785 = vst [vmem:[%s3553_s20 + $0x120] sm:$0xff] (%p2718_p5), %v1784_v28   ;;  %v1796_v32 = vld [vmem:[%s3353_s15 + $0x60] sm:$0xff] (%p2718_p5)   ;;  %v1800_v31 = vld [vmem:[%s3353_s15 + $0x68] sm:$0xff] (%p2718_p5)  }
 0x218   : > { %v1772_v25 = vld [vmem:[%s3353_s15 + $0x30] sm:$0xff] (%p2718_p5)   ;;  %1789 = vst [vmem:[%s3553_s20 + $0x128] sm:$0xff] (%p2718_p5), %v1788_v45  }
 0x219   : > { %1605 = vst.msk [vmem:[%s3353_s15 + $0x38] sm:$0xf] %vm1590_vm0, %v1586_v34  ;;  %v1533_v39 = vmul.f32 %v3335_v4, %v1489_v35  ;;  %v1646_v16 = vmul.f32 %v3337_v5, %v1489_v35  ;;  %v1804_v33 = vld [vmem:[%s3353_s15 + $0x70] sm:$0xff] (%p2718_p5)   ;;  %v1808_v21 = vld [vmem:[%s3353_s15 + $0x78] sm:$0xff] (%p2718_p5)  }
 0x21a   : > { %2459 = vst.msk [vmem:[%s3353_s15 + $0x80] sm:$0xf] %vm1590_vm0, %v1699_v13 }
 0x21b   : > { %v1551_v41 = vadd.f32 %v1533_v39, %v1513_v36  ;;  %v1664_v42 = vadd.f32 %v1646_v16, %v1626_v38  ;;  %1773 = vst [vmem:[%s3553_s20 + $0x30] sm:$0xff] (%p2718_p5), %v1772_v25  }
 0x21c   : > { %v1437_v8 = vpop.f32.mrf.mxu2  ;;  %v1331_v48 = vpop.f32.mrf.mxu0  ;;  %1793 = vst [vmem:[%s3553_s20 + $0x130] sm:$0xff] (%p2718_p5), %v1792_v29  }
 0x21d   : > { %v1491_v44 = vpop.f32.mrf.mxu3  ;;  %v1569_v51 = vmax.f32 %v1551_v41, 0.0  ;;  %v1682_v46 = vmax.f32 %v1664_v42, 0.0  ;;  %v1438_v54 = vadd.f32 %v1437_v8, %v1384_v40  ;;  %v1332_v23 = vadd.f32 %v3452_v56, %v1331_v48  ;;  %v1385_v61 = vpop.f32.mrf.mxu1  ;;  %1797 = vst [vmem:[%s3553_s20 + $0x138] sm:$0xff] (%p2718_p5), %v1796_v32  }
 0x21e   : > { %1801 = vst [vmem:[%s3553_s20 + $0x140] sm:$0xff] (%p2718_p5), %v1800_v31  }
 0x21f   : > { %v1587_v19 = vpack.c.bf16 %v1569_v51, %v1569_v51  ;;  %v1700_v49 = vpack.c.bf16 %v1682_v46, %v1682_v46  ;;  %v1492_v43 = vadd.f32 %v1491_v44, %v1438_v54  ;;  %v1386_v56 = vadd.f32 %v1385_v61, %v1332_v23  ;;  %1805 = vst [vmem:[%s3553_s20 + $0x148] sm:$0xff] (%p2718_p5), %v1804_v33  }
 0x220   : > { %1809 = vst [vmem:[%s3553_s20 + $0x150] sm:$0xff] (%p2718_p5), %v1808_v21  }
 0x221   : > { %1606 = vst.msk [vmem:[%s3353_s15 + $0x3c] sm:$0xf] %vm1590_vm0, %v1587_v19  ;;  %v1534_v55 = vmul.f32 %v3335_v4, %v1492_v43  ;;  %v1647_v60 = vmul.f32 %v3337_v5, %v1492_v43 }
 0x222   : > { %2460 = vst.msk [vmem:[%s3353_s15 + $0x84] sm:$0xf] %vm1590_vm0, %v1700_v49 }
 0x223   : > { %v1552_v62 = vadd.f32 %v1534_v55, %v1514_v50  ;;  %v1665_v63 = vadd.f32 %v1647_v60, %v1627_v52 }
 0x224   : > { %v1439_v0 = vpop.f32.mrf.mxu2 }
 0x225   : > { %v1570_v24 = vmax.f32 %v1552_v62, 0.0  ;;  %v1683_v1 = vmax.f32 %v1665_v63, 0.0  ;;  %v1440_v6 = vadd.f32 %v1439_v0, %v1386_v56  ;;  %v1493_v7 = vpop.f32.mrf.mxu3 }
 0x227   : > { %v1588_v30 = vpack.c.bf16 %v1570_v24, %v1570_v24  ;;  %v1701_v9 = vpack.c.bf16 %v1683_v1, %v1683_v1  ;;  %v1494_v10 = vadd.f32 %v1493_v7, %v1440_v6 }
 0x228   : > { %v1776_v26 = vld [vmem:[%s3353_s15 + $0x38] sm:$0xff] (%p2718_p5)  }
 0x229   : > { %1607 = vst.msk [vmem:[%s3353_s15 + $0x40] sm:$0xf] %vm1590_vm0, %v1588_v30  ;;  %v1535_v14 = vmul.f32 %v3335_v4, %v1494_v10  ;;  %v1648_v47 = vmul.f32 %v3337_v5, %v1494_v10  ;;  %v1760_v4 = vld [vmem:[%s3353_s15 + $0x18] sm:$0xff] (%p2718_p5)   ;;  %v1764_v5 = vld [vmem:[%s3353_s15 + $0x20] sm:$0xff] (%p2718_p5)  }
 0x22a   : > { %2461 = vst.msk [vmem:[%s3353_s15 + $0x88] sm:$0xf] %vm1590_vm0, %v1701_v9  ;;  %v1812_v58 = vld [vmem:[%s3353_s15 + $0x80] sm:$0xff] (%p2718_p5)  }
 0x22b   : > { %v1553_v53 = vadd.f32 %v1535_v14, %v1515_v12  ;;  %v1666_v15 = vadd.f32 %v1648_v47, %v1628_v11  ;;  %1761 = vst [vmem:[%s3553_s20 + $0x18] sm:$0xff] (%p2718_p5), %v1760_v4  }
 0x22c   : > { %1765 = vst [vmem:[%s3553_s20 + $0x20] sm:$0xff] (%p2718_p5), %v1764_v5  }
 0x22d   : > { %v1571_v17 = vmax.f32 %v1553_v53, 0.0  ;;  %v1684_v59 = vmax.f32 %v1666_v15, 0.0  ;;  %1777 = vst [vmem:[%s3553_s20 + $0x38] sm:$0xff] (%p2718_p5), %v1776_v26  }
 0x22e   : > { %1728 = sbr.rel (!%p2718_p5) target bundleno = 571 (0x23b), region = 67  ;;  %1813 = vst [vmem:[%s3553_s20 + $0x158] sm:$0xff] (%p2718_p5), %v1812_v58  }
 0x22f   : > { %v1589_v18 = vpack.c.bf16 %v1571_v17, %v1571_v17  ;;  %v1702_v20 = vpack.c.bf16 %v1684_v59, %v1684_v59 }
 0x231   : > { %1608 = vst.msk [vmem:[%s3353_s15 + $0x44] sm:$0xf] %vm1590_vm0, %v1589_v18 }
 0x232   : > { %2462 = vst.msk [vmem:[%s3353_s15 + $0x8c] sm:$0xf] %vm1590_vm0, %v1702_v20 }
 0x238   : > { %v1780_v27 = vld [vmem:[%s3353_s15 + $0x40] sm:$0xff]  }
 0x239   : > { %1781 = vst [vmem:[%s3553_s20 + $0x40] sm:$0xff] %v1780_v27   ;;  %v1816_v34 = vld [vmem:[%s3353_s15 + $0x88] sm:$0xff]  }
 0x23a   : > { %1817 = vst [vmem:[%s3553_s20 + $0x160] sm:$0xff] %v1816_v34  }
 0x23b PF: > { %p12_p13 = scmp.ge.s32.totalorder %s2702_s19, 6   ;;  %s3607_s15 = smov %s2651_s16 }
 0x23c   : > { %s3608_s16 = smov %s2712_s22  ;;  %s3609_s17 = smov %s2702_s19 }
 0x23d   :  { %14 = sbr.rel (!%p12_p13) target bundleno = 2 (0x2), region = 142 }
 0x242   :  { %1925 = vsyncpa [#allocation4], 1 }
 0x243   :  { %1927 = vsyncpa [#allocation4 + $0x1], 1 }

// kernel: mdn_conv_forward.5
= control target key start
LH: loop header
LB: loop body
LE: loop exit
PB: predicated region body
PF: predicated region fallthrough
CT: control target
= control target key end

     0   :  { %s21019_s0 = inlined_call_operand.vmem [shape: bf16[2,18432], index: 0, kind: input, shape index: {}]   ;;  %s21020_s1 = inlined_call_operand.vmem [shape: bf16[18432,84], index: 1, kind: input, shape index: {}]   ;;  %s21021_s2 = inlined_call_operand.vmem [shape: f32[1,84], index: 2, kind: input, shape index: {}]   ;;  %s21022_s3 = inlined_call_operand.vmem [shape: f32[2,2], index: 3, kind: input, shape index: {}]   ;;  %s21023_s4 = inlined_call_operand.vmem [shape: f32[84,1], index: 4, kind: input, shape index: {}]   ;;  %s21024_s5 = inlined_call_operand.<no memory space> [shape: f32[1,1], index: 5, kind: input, shape index: {}]   ;;  %s21025_s6 = inlined_call_operand.hbm [shape: f32[2,84], index: 6, kind: output, shape index: {0}]   ;;  %s21026_s7 = inlined_call_operand.vmem [shape: f32[2,1], index: 7, kind: output, shape index: {1}]  }
   0x1   :  { %v13_v0 = vstv %s21024_s5 }
   0x2   :  { %14 = vst [vmem:[#allocation2] sm:$0x1] %v13_v0 }
   0x3   :  { %v16197_v1 = vld [vmem:[%s21020_s1 + $0x38] sm:$0xff]  ;;  %v16196_v5 = vld [vmem:[%s21020_s1 + $0x30] sm:$0xff]  ;;  %v16195_v9 = vld [vmem:[%s21020_s1 + $0x28] sm:$0xff] }
   0x4   :  { %v16205_v2 = vld [vmem:[%s21020_s1 + $0x78] sm:$0xff]  ;;  %9590 = vmatpush.bf16.msra.mxu0 %v16197_v1  ;;  %v16204_v6 = vld [vmem:[%s21020_s1 + $0x70] sm:$0xff]  ;;  %v16203_v10 = vld [vmem:[%s21020_s1 + $0x68] sm:$0xff] }
   0x5   :  { %v16213_v3 = vld [vmem:[%s21020_s1 + $0xb8] sm:$0xff]  ;;  %9603 = vmatpush.bf16.msra.mxu1 %v16205_v2  ;;  %v16212_v7 = vld [vmem:[%s21020_s1 + $0xb0] sm:$0xff]  ;;  %v16211_v11 = vld [vmem:[%s21020_s1 + $0xa8] sm:$0xff] }
   0x6   :  { %v16221_v4 = vld [vmem:[%s21020_s1 + $0xf8] sm:$0xff]  ;;  %9616 = vmatpush.bf16.msra.mxu2 %v16213_v3  ;;  %v16220_v8 = vld [vmem:[%s21020_s1 + $0xf0] sm:$0xff]  ;;  %v16219_v12 = vld [vmem:[%s21020_s1 + $0xe8] sm:$0xff] }
   0x7   :  { %9629 = vmatpush.bf16.msra.mxu3 %v16221_v4  ;;  %v16194_v13 = vld [vmem:[%s21020_s1 + $0x20] sm:$0xff]  ;;  %v16193_v17 = vld [vmem:[%s21020_s1 + $0x18] sm:$0xff]  ;;  %v16192_v21 = vld [vmem:[%s21020_s1 + $0x10] sm:$0xff] }
   0x8   :  { %9591 = vmatpush.bf16.msra.mxu0 %v16196_v5  ;;  %v16202_v14 = vld [vmem:[%s21020_s1 + $0x60] sm:$0xff]  ;;  %v16201_v18 = vld [vmem:[%s21020_s1 + $0x58] sm:$0xff]  ;;  %v16200_v22 = vld [vmem:[%s21020_s1 + $0x50] sm:$0xff] }
   0x9   :  { %9604 = vmatpush.bf16.msra.mxu1 %v16204_v6  ;;  %v16210_v15 = vld [vmem:[%s21020_s1 + $0xa0] sm:$0xff]  ;;  %v16209_v19 = vld [vmem:[%s21020_s1 + $0x98] sm:$0xff]  ;;  %v16208_v24 = vld [vmem:[%s21020_s1 + $0x90] sm:$0xff] }
   0xa   :  { %9617 = vmatpush.bf16.msra.mxu2 %v16212_v7  ;;  %v16218_v16 = vld [vmem:[%s21020_s1 + $0xe0] sm:$0xff]  ;;  %v16217_v20 = vld [vmem:[%s21020_s1 + $0xd8] sm:$0xff]  ;;  %v16216_v25 = vld [vmem:[%s21020_s1 + $0xd0] sm:$0xff] }
   0xb   :  { %9630 = vmatpush.bf16.msra.mxu3 %v16220_v8  ;;  %v28_v23 = vld [vmem:[%s21019_s0] sm:$0xff] }
   0xc   :  { %9592 = vmatpush.bf16.msra.mxu0 %v16195_v9  ;;  %2355 = vst [vmem:[#allocation1] ss:$9 sm:$0xff] %v28_v23 }
   0xd   :  { %9605 = vmatpush.bf16.msra.mxu1 %v16203_v10 }
   0xe   :  { %9618 = vmatpush.bf16.msra.mxu2 %v16211_v11 }
   0xf   :  { %9631 = vmatpush.bf16.msra.mxu3 %v16219_v12 }
  0x10   :  { %9593 = vmatpush.bf16.msra.mxu0 %v16194_v13 }
  0x11   :  { %9606 = vmatpush.bf16.msra.mxu1 %v16202_v14 }
  0x12   :  { %9619 = vmatpush.bf16.msra.mxu2 %v16210_v15 }
  0x13   :  { %9632 = vmatpush.bf16.msra.mxu3 %v16218_v16 }
  0x14   :  { %9594 = vmatpush.bf16.msra.mxu0 %v16193_v17 }
  0x15   :  { %9607 = vmatpush.bf16.msra.mxu1 %v16201_v18 }
  0x16   :  { %9620 = vmatpush.bf16.msra.mxu2 %v16209_v19 }
  0x17   :  { %9633 = vmatpush.bf16.msra.mxu3 %v16217_v20 }
  0x18   :  { %15 = vsyncpa [#allocation4], 0  ;;  %9595 = vmatpush.bf16.msra.mxu0 %v16192_v21  ;;  %v16191_v26 = vld [vmem:[%s21020_s1 + $0x8] sm:$0xff]  ;;  %v16190_v30 = vld [vmem:[%s21020_s1] sm:$0xff]  ;;  %vm11513_vm0 = vcmask 1043456   ;;  %vm11467_vm1 = vcmask 1041408  }
  0x19   :  { %9608 = vmatpush.bf16.msra.mxu1 %v16200_v22  ;;  %v16199_v27 = vld [vmem:[%s21020_s1 + $0x48] sm:$0xff]  ;;  %v16198_v31 = vld [vmem:[%s21020_s1 + $0x40] sm:$0xff]  ;;  %v16229_v34 = vld [vmem:[%s21020_s1 + $0x138] sm:$0xff]  ;;  %vm11463_vm2 = vcmask 15360   ;;  %vm11491_vm3 = vcmask 680960   ;;  %vm11509_vm4 = vcmask 687104  }
  0x1a   :  { %9621 = vmatpush.bf16.msra.mxu2 %v16208_v24  ;;  %v16207_v28 = vld [vmem:[%s21020_s1 + $0x88] sm:$0xff]  ;;  %v16206_v32 = vld [vmem:[%s21020_s1 + $0x80] sm:$0xff]  ;;  %v16237_v35 = vld [vmem:[%s21020_s1 + $0x178] sm:$0xff]  ;;  %vm11556_vm8 = vcmask 1024  }
  0x1b   :  { %9634 = vmatpush.bf16.msra.mxu3 %v16216_v25  ;;  %v16215_v29 = vld [vmem:[%s21020_s1 + $0xc8] sm:$0xff]  ;;  %v16214_v33 = vld [vmem:[%s21020_s1 + $0xc0] sm:$0xff]  ;;  %v16245_v36 = vld [vmem:[%s21020_s1 + $0x1b8] sm:$0xff] }
  0x1c   :  { %9596 = vmatpush.bf16.msra.mxu0 %v16191_v26  ;;  %v16253_v37 = vld [vmem:[%s21020_s1 + $0x1f8] sm:$0xff]  ;;  %v16228_v38 = vld [vmem:[%s21020_s1 + $0x130] sm:$0xff]  ;;  %v2356_v40 = vld [vmem:[#allocation1] sm:$0xff] }
  0x1d   :  { %9609 = vmatpush.bf16.msra.mxu1 %v16199_v27  ;;  %v2358_v39 = vld [vmem:[#allocation1 + $0x12] sm:$0xff]  ;;  %v2359_v42 = vld [vmem:[#allocation1 + $0x1b] sm:$0xff]  ;;  %v2357_v43 = vld [vmem:[#allocation1 + $0x9] sm:$0xff] }
  0x1e   :  { %9622 = vmatpush.bf16.msra.mxu2 %v16207_v28  ;;  %v16236_v41 = vld [vmem:[%s21020_s1 + $0x170] sm:$0xff]  ;;  %v16227_v46 = vld [vmem:[%s21020_s1 + $0x128] sm:$0xff]  ;;  %v16226_v50 = vld [vmem:[%s21020_s1 + $0x120] sm:$0xff] }
  0x1f   :  { %9635 = vmatpush.bf16.msra.mxu3 %v16215_v29  ;;  %v16244_v44 = vld [vmem:[%s21020_s1 + $0x1b0] sm:$0xff]  ;;  %v16235_v47 = vld [vmem:[%s21020_s1 + $0x168] sm:$0xff]  ;;  %v16234_v51 = vld [vmem:[%s21020_s1 + $0x160] sm:$0xff] }
  0x20   :  { %9597 = vmatpush.bf16.msra.mxu0 %v16190_v30  ;;  %v16252_v45 = vld [vmem:[%s21020_s1 + $0x1f0] sm:$0xff]  ;;  %v16243_v48 = vld [vmem:[%s21020_s1 + $0x1a8] sm:$0xff]  ;;  %v16242_v52 = vld [vmem:[%s21020_s1 + $0x1a0] sm:$0xff] }
  0x21   :  { %9610 = vmatpush.bf16.msra.mxu1 %v16198_v31  ;;  %v16251_v49 = vld [vmem:[%s21020_s1 + $0x1e8] sm:$0xff]  ;;  %v16250_v53 = vld [vmem:[%s21020_s1 + $0x1e0] sm:$0xff]  ;;  %v16225_v54 = vld [vmem:[%s21020_s1 + $0x118] sm:$0xff] }
  0x22   :  { %9623 = vmatpush.bf16.msra.mxu2 %v16206_v32  ;;  %v16233_v55 = vld [vmem:[%s21020_s1 + $0x158] sm:$0xff]  ;;  %v16224_v58 = vld [vmem:[%s21020_s1 + $0x110] sm:$0xff]  ;;  %v16223_v62 = vld [vmem:[%s21020_s1 + $0x108] sm:$0xff] }
  0x23   :  { %9636 = vmatpush.bf16.msra.mxu3 %v16214_v33  ;;  %9598 = vmatmul.bf16.vlgmr.msra.gmra.mxu0 %v2356_v40  ;;  %v16241_v56 = vld [vmem:[%s21020_s1 + $0x198] sm:$0xff]  ;;  %v16232_v59 = vld [vmem:[%s21020_s1 + $0x150] sm:$0xff]  ;;  %v16231_v63 = vld [vmem:[%s21020_s1 + $0x148] sm:$0xff] }
  0x24   :  { %9642 = vmatpush.bf16.msrb.mxu0 %v16229_v34  ;;  %9611 = vmatmul.bf16.vlgmr.msra.gmra.mxu1 %v2357_v43  ;;  %v16249_v57 = vld [vmem:[%s21020_s1 + $0x1d8] sm:$0xff]  ;;  %v16240_v60 = vld [vmem:[%s21020_s1 + $0x190] sm:$0xff]  ;;  %v16239_v0 = vld [vmem:[%s21020_s1 + $0x188] sm:$0xff] }
  0x25   :  { %9655 = vmatpush.bf16.msrb.mxu1 %v16237_v35  ;;  %9624 = vmatmul.bf16.vlgmr.msra.gmra.mxu2 %v2358_v39  ;;  %v16248_v61 = vld [vmem:[%s21020_s1 + $0x1d0] sm:$0xff]  ;;  %v16247_v1 = vld [vmem:[%s21020_s1 + $0x1c8] sm:$0xff]  ;;  %v2363_v4 = vld [vmem:[#allocation1 + $0x3f] sm:$0xff] }
  0x26   :  { %9668 = vmatpush.bf16.msrb.mxu2 %v16245_v36  ;;  %9637 = vmatmul.bf16.vlgmr.msra.gmra.mxu3 %v2359_v42  ;;  %v2362_v2 = vld [vmem:[#allocation1 + $0x36] sm:$0xff]  ;;  %v2360_v3 = vld [vmem:[#allocation1 + $0x24] sm:$0xff]  ;;  %v2361_v5 = vld [vmem:[#allocation1 + $0x2d] sm:$0xff] }
  0x27   :  { %9681 = vmatpush.bf16.msrb.mxu3 %v16253_v37  ;;  %v29_v6 = vld [vmem:[%s21019_s0 + $0x8] sm:$0xff]  ;;  %v16222_v7 = vld [vmem:[%s21020_s1 + $0x100] sm:$0xff]  ;;  %v16261_v11 = vld [vmem:[%s21020_s1 + $0x238] sm:$0xff] }
  0x28   :  { %9643 = vmatpush.bf16.msrb.mxu0 %v16228_v38  ;;  %2365 = vst [vmem:[#allocation1] ss:$9 sm:$0xff] %v29_v6  ;;  %v16230_v8 = vld [vmem:[%s21020_s1 + $0x140] sm:$0xff]  ;;  %v16269_v12 = vld [vmem:[%s21020_s1 + $0x278] sm:$0xff]  ;;  %v16260_v15 = vld [vmem:[%s21020_s1 + $0x230] sm:$0xff] }
  0x29   :  { %9656 = vmatpush.bf16.msrb.mxu1 %v16236_v41  ;;  %v16238_v9 = vld [vmem:[%s21020_s1 + $0x180] sm:$0xff]  ;;  %v16277_v13 = vld [vmem:[%s21020_s1 + $0x2b8] sm:$0xff]  ;;  %v16268_v16 = vld [vmem:[%s21020_s1 + $0x270] sm:$0xff] }
  0x2a   :  { %9669 = vmatpush.bf16.msrb.mxu2 %v16244_v44  ;;  %v16246_v10 = vld [vmem:[%s21020_s1 + $0x1c0] sm:$0xff]  ;;  %v16285_v14 = vld [vmem:[%s21020_s1 + $0x2f8] sm:$0xff]  ;;  %v16276_v17 = vld [vmem:[%s21020_s1 + $0x2b0] sm:$0xff] }
  0x2b   :  { %9682 = vmatpush.bf16.msrb.mxu3 %v16252_v45  ;;  %v16284_v18 = vld [vmem:[%s21020_s1 + $0x2f0] sm:$0xff]  ;;  %v16259_v19 = vld [vmem:[%s21020_s1 + $0x228] sm:$0xff]  ;;  %v16258_v23 = vld [vmem:[%s21020_s1 + $0x220] sm:$0xff] }
  0x2c   :  { %9644 = vmatpush.bf16.msrb.mxu0 %v16227_v46  ;;  %v16267_v20 = vld [vmem:[%s21020_s1 + $0x268] sm:$0xff]  ;;  %v16266_v24 = vld [vmem:[%s21020_s1 + $0x260] sm:$0xff]  ;;  %v16257_v27 = vld [vmem:[%s21020_s1 + $0x218] sm:$0xff] }
  0x2d   :  { %9657 = vmatpush.bf16.msrb.mxu1 %v16235_v47  ;;  %v16275_v21 = vld [vmem:[%s21020_s1 + $0x2a8] sm:$0xff]  ;;  %v16274_v25 = vld [vmem:[%s21020_s1 + $0x2a0] sm:$0xff]  ;;  %v16265_v28 = vld [vmem:[%s21020_s1 + $0x258] sm:$0xff] }
  0x2e   :  { %9670 = vmatpush.bf16.msrb.mxu2 %v16243_v48  ;;  %v16283_v22 = vld [vmem:[%s21020_s1 + $0x2e8] sm:$0xff]  ;;  %v16282_v26 = vld [vmem:[%s21020_s1 + $0x2e0] sm:$0xff]  ;;  %v16273_v29 = vld [vmem:[%s21020_s1 + $0x298] sm:$0xff] }
  0x2f   :  { %9683 = vmatpush.bf16.msrb.mxu3 %v16251_v49  ;;  %v16281_v30 = vld [vmem:[%s21020_s1 + $0x2d8] sm:$0xff]  ;;  %v16256_v31 = vld [vmem:[%s21020_s1 + $0x210] sm:$0xff]  ;;  %v16255_v35 = vld [vmem:[%s21020_s1 + $0x208] sm:$0xff] }
  0x30   :  { %9645 = vmatpush.bf16.msrb.mxu0 %v16226_v50  ;;  %v16264_v32 = vld [vmem:[%s21020_s1 + $0x250] sm:$0xff]  ;;  %v16263_v36 = vld [vmem:[%s21020_s1 + $0x248] sm:$0xff]  ;;  %v16254_v39 = vld [vmem:[%s21020_s1 + $0x200] sm:$0xff] }
  0x31   :  { %9658 = vmatpush.bf16.msrb.mxu1 %v16234_v51  ;;  %v16272_v33 = vld [vmem:[%s21020_s1 + $0x290] sm:$0xff]  ;;  %v16271_v37 = vld [vmem:[%s21020_s1 + $0x288] sm:$0xff]  ;;  %v16262_v40 = vld [vmem:[%s21020_s1 + $0x240] sm:$0xff] }
  0x32   :  { %9671 = vmatpush.bf16.msrb.mxu2 %v16242_v52  ;;  %v16280_v34 = vld [vmem:[%s21020_s1 + $0x2d0] sm:$0xff]  ;;  %v16279_v38 = vld [vmem:[%s21020_s1 + $0x2c8] sm:$0xff]  ;;  %v16270_v41 = vld [vmem:[%s21020_s1 + $0x280] sm:$0xff] }
  0x33   :  { %9684 = vmatpush.bf16.msrb.mxu3 %v16250_v53  ;;  %v16278_v42 = vld [vmem:[%s21020_s1 + $0x2c0] sm:$0xff]  ;;  %v16293_v43 = vld [vmem:[%s21020_s1 + $0x338] sm:$0xff]  ;;  %v2367_v49 = vld [vmem:[#allocation1 + $0x9] sm:$0xff] }
  0x34   :  { %9646 = vmatpush.bf16.msrb.mxu0 %v16225_v54  ;;  %v16301_v44 = vld [vmem:[%s21020_s1 + $0x378] sm:$0xff]  ;;  %v2366_v47 = vld [vmem:[#allocation1] sm:$0xff]  ;;  %v16292_v51 = vld [vmem:[%s21020_s1 + $0x330] sm:$0xff] }
  0x35   :  { %9659 = vmatpush.bf16.msrb.mxu1 %v16233_v55  ;;  %v16309_v45 = vld [vmem:[%s21020_s1 + $0x3b8] sm:$0xff]  ;;  %v16300_v52 = vld [vmem:[%s21020_s1 + $0x370] sm:$0xff]  ;;  %v16291_v55 = vld [vmem:[%s21020_s1 + $0x328] sm:$0xff] }
  0x36   :  { %9672 = vmatpush.bf16.msrb.mxu2 %v16241_v56  ;;  %v16317_v46 = vld [vmem:[%s21020_s1 + $0x3f8] sm:$0xff]  ;;  %v16308_v53 = vld [vmem:[%s21020_s1 + $0x3b0] sm:$0xff]  ;;  %v16299_v56 = vld [vmem:[%s21020_s1 + $0x368] sm:$0xff] }
  0x37   :  { %9685 = vmatpush.bf16.msrb.mxu3 %v16249_v57  ;;  %v2368_v48 = vld [vmem:[#allocation1 + $0x12] sm:$0xff]  ;;  %v2369_v50 = vld [vmem:[#allocation1 + $0x1b] sm:$0xff]  ;;  %v16307_v57 = vld [vmem:[%s21020_s1 + $0x3a8] sm:$0xff] }
  0x38   :  { %9647 = vmatpush.bf16.msrb.mxu0 %v16224_v58  ;;  %v16316_v54 = vld [vmem:[%s21020_s1 + $0x3f0] sm:$0xff]  ;;  %v16315_v58 = vld [vmem:[%s21020_s1 + $0x3e8] sm:$0xff] }
  0x39   :  { %9660 = vmatpush.bf16.msrb.mxu1 %v16232_v59  ;;  %v16290_v59 = vld [vmem:[%s21020_s1 + $0x320] sm:$0xff]  ;;  %v16312_v6 = vld [vmem:[%s21020_s1 + $0x3d0] sm:$0xff] }
  0x3a   :  { %9673 = vmatpush.bf16.msrb.mxu2 %v16240_v60  ;;  %v16298_v60 = vld [vmem:[%s21020_s1 + $0x360] sm:$0xff] }
  0x3b   :  { %9686 = vmatpush.bf16.msrb.mxu3 %v16248_v61  ;;  %v16306_v61 = vld [vmem:[%s21020_s1 + $0x3a0] sm:$0xff] }
  0x3c   :  { %9648 = vmatpush.bf16.msrb.mxu0 %v16223_v62  ;;  %v16314_v62 = vld [vmem:[%s21020_s1 + $0x3e0] sm:$0xff] }
  0x3d   :  { %9661 = vmatpush.bf16.msrb.mxu1 %v16231_v63  ;;  %v16289_v63 = vld [vmem:[%s21020_s1 + $0x318] sm:$0xff] }
  0x3e   :  { %9674 = vmatpush.bf16.msrb.mxu2 %v16239_v0  ;;  %v16297_v0 = vld [vmem:[%s21020_s1 + $0x358] sm:$0xff] }
  0x3f   :  { %9687 = vmatpush.bf16.msrb.mxu3 %v16247_v1  ;;  %v16305_v1 = vld [vmem:[%s21020_s1 + $0x398] sm:$0xff] }
  0x40   :  { %9649 = vmatpush.bf16.msrb.mxu0 %v16222_v7  ;;  %v16287_v7 = vld [vmem:[%s21020_s1 + $0x308] sm:$0xff] }
  0x41   :  { %9662 = vmatpush.bf16.msrb.mxu1 %v16230_v8  ;;  %v16295_v8 = vld [vmem:[%s21020_s1 + $0x348] sm:$0xff] }
  0x42   :  { %9675 = vmatpush.bf16.msrb.mxu2 %v16238_v9  ;;  %v16303_v9 = vld [vmem:[%s21020_s1 + $0x388] sm:$0xff] }
  0x43   :  { %9688 = vmatpush.bf16.msrb.mxu3 %v16246_v10  ;;  %9650 = vmatmul.bf16.vlgmr.msrb.gmra.mxu0 %v2360_v3  ;;  %v16288_v3 = vld [vmem:[%s21020_s1 + $0x310] sm:$0xff]  ;;  %v16311_v10 = vld [vmem:[%s21020_s1 + $0x3c8] sm:$0xff] }
  0x44   :  { %9694 = vmatpush.bf16.msra.mxu0 %v16261_v11  ;;  %9663 = vmatmul.bf16.vlgmr.msrb.gmra.mxu1 %v2361_v5  ;;  %v16304_v5 = vld [vmem:[%s21020_s1 + $0x390] sm:$0xff]  ;;  %v2370_v11 = vld [vmem:[#allocation1 + $0x24] sm:$0xff] }
  0x45   :  { %9707 = vmatpush.bf16.msra.mxu1 %v16269_v12  ;;  %9676 = vmatmul.bf16.vlgmr.msrb.gmra.mxu2 %v2362_v2  ;;  %v16313_v2 = vld [vmem:[%s21020_s1 + $0x3d8] sm:$0xff] }
  0x46   :  { %9720 = vmatpush.bf16.msra.mxu2 %v16277_v13  ;;  %9689 = vmatmul.bf16.vlgmr.msrb.gmra.mxu3 %v2363_v4  ;;  %v16296_v4 = vld [vmem:[%s21020_s1 + $0x350] sm:$0xff] }
  0x47   :  { %9733 = vmatpush.bf16.msra.mxu3 %v16285_v14  ;;  %v2372_v12 = vld [vmem:[#allocation1 + $0x36] sm:$0xff]  ;;  %v2371_v13 = vld [vmem:[#allocation1 + $0x2d] sm:$0xff]  ;;  %v2373_v14 = vld [vmem:[#allocation1 + $0x3f] sm:$0xff] }
  0x48   :  { %9695 = vmatpush.bf16.msra.mxu0 %v16260_v15  ;;  %v30_v15 = vld [vmem:[%s21019_s0 + $0x10] sm:$0xff] }
  0x49   :  { %9708 = vmatpush.bf16.msra.mxu1 %v16268_v16  ;;  %2375 = vst [vmem:[#allocation1] ss:$9 sm:$0xff] %v30_v15  ;;  %v16286_v16 = vld [vmem:[%s21020_s1 + $0x300] sm:$0xff]  ;;  %v16369_v15 = vld [vmem:[%s21020_s1 + $0x598] sm:$0xff] }
  0x4a   :  { %9721 = vmatpush.bf16.msra.mxu2 %v16276_v17  ;;  %v16294_v17 = vld [vmem:[%s21020_s1 + $0x340] sm:$0xff] }
  0x4b   :  { %9734 = vmatpush.bf16.msra.mxu3 %v16284_v18  ;;  %v16302_v18 = vld [vmem:[%s21020_s1 + $0x380] sm:$0xff] }
  0x4c   :  { %9696 = vmatpush.bf16.msra.mxu0 %v16259_v19  ;;  %v16310_v19 = vld [vmem:[%s21020_s1 + $0x3c0] sm:$0xff] }
  0x4d   :  { %9709 = vmatpush.bf16.msra.mxu1 %v16267_v20  ;;  %v16325_v20 = vld [vmem:[%s21020_s1 + $0x438] sm:$0xff] }
  0x4e   :  { %9722 = vmatpush.bf16.msra.mxu2 %v16275_v21  ;;  %v16333_v21 = vld [vmem:[%s21020_s1 + $0x478] sm:$0xff] }
  0x4f   :  { %9735 = vmatpush.bf16.msra.mxu3 %v16283_v22  ;;  %v16341_v22 = vld [vmem:[%s21020_s1 + $0x4b8] sm:$0xff] }
  0x50   :  { %9697 = vmatpush.bf16.msra.mxu0 %v16258_v23  ;;  %v16349_v23 = vld [vmem:[%s21020_s1 + $0x4f8] sm:$0xff] }
  0x51   :  { %9710 = vmatpush.bf16.msra.mxu1 %v16266_v24  ;;  %v16324_v24 = vld [vmem:[%s21020_s1 + $0x430] sm:$0xff] }
  0x52   :  { %9723 = vmatpush.bf16.msra.mxu2 %v16274_v25  ;;  %v16332_v25 = vld [vmem:[%s21020_s1 + $0x470] sm:$0xff] }
  0x53   :  { %9736 = vmatpush.bf16.msra.mxu3 %v16282_v26  ;;  %v16340_v26 = vld [vmem:[%s21020_s1 + $0x4b0] sm:$0xff] }
  0x54   :  { %9698 = vmatpush.bf16.msra.mxu0 %v16257_v27  ;;  %v16348_v27 = vld [vmem:[%s21020_s1 + $0x4f0] sm:$0xff] }
  0x55   :  { %9711 = vmatpush.bf16.msra.mxu1 %v16265_v28  ;;  %v16323_v28 = vld [vmem:[%s21020_s1 + $0x428] sm:$0xff] }
  0x56   :  { %9724 = vmatpush.bf16.msra.mxu2 %v16273_v29  ;;  %v16331_v29 = vld [vmem:[%s21020_s1 + $0x468] sm:$0xff] }
  0x57   :  { %9737 = vmatpush.bf16.msra.mxu3 %v16281_v30  ;;  %v16339_v30 = vld [vmem:[%s21020_s1 + $0x4a8] sm:$0xff] }
  0x58   :  { %9699 = vmatpush.bf16.msra.mxu0 %v16256_v31  ;;  %v16347_v31 = vld [vmem:[%s21020_s1 + $0x4e8] sm:$0xff] }
  0x59   :  { %9712 = vmatpush.bf16.msra.mxu1 %v16264_v32  ;;  %v16322_v32 = vld [vmem:[%s21020_s1 + $0x420] sm:$0xff] }
  0x5a   :  { %9725 = vmatpush.bf16.msra.mxu2 %v16272_v33  ;;  %v16330_v33 = vld [vmem:[%s21020_s1 + $0x460] sm:$0xff] }
  0x5b   :  { %9738 = vmatpush.bf16.msra.mxu3 %v16280_v34  ;;  %v16338_v34 = vld [vmem:[%s21020_s1 + $0x4a0] sm:$0xff] }
  0x5c   :  { %9700 = vmatpush.bf16.msra.mxu0 %v16255_v35  ;;  %v16346_v35 = vld [vmem:[%s21020_s1 + $0x4e0] sm:$0xff] }
  0x5d   :  { %9713 = vmatpush.bf16.msra.mxu1 %v16263_v36  ;;  %v16321_v36 = vld [vmem:[%s21020_s1 + $0x418] sm:$0xff] }
  0x5e   :  { %9726 = vmatpush.bf16.msra.mxu2 %v16271_v37  ;;  %v16329_v37 = vld [vmem:[%s21020_s1 + $0x458] sm:$0xff] }
  0x5f   :  { %9739 = vmatpush.bf16.msra.mxu3 %v16279_v38  ;;  %v16337_v38 = vld [vmem:[%s21020_s1 + $0x498] sm:$0xff] }
  0x60   :  { %9701 = vmatpush.bf16.msra.mxu0 %v16254_v39  ;;  %v16345_v39 = vld [vmem:[%s21020_s1 + $0x4d8] sm:$0xff] }
  0x61   :  { %9714 = vmatpush.bf16.msra.mxu1 %v16262_v40  ;;  %v16320_v40 = vld [vmem:[%s21020_s1 + $0x410] sm:$0xff] }
  0x62   :  { %9727 = vmatpush.bf16.msra.mxu2 %v16270_v41  ;;  %v16328_v41 = vld [vmem:[%s21020_s1 + $0x450] sm:$0xff] }
  0x63   :  { %9740 = vmatpush.bf16.msra.mxu3 %v16278_v42  ;;  %9702 = vmatmul.bf16.vlgmr.msra.gmra.mxu0 %v2366_v47  ;;  %v16336_v42 = vld [vmem:[%s21020_s1 + $0x490] sm:$0xff]  ;;  %v16343_v47 = vld [vmem:[%s21020_s1 + $0x4c8] sm:$0xff] }
  0x64   :  { %9746 = vmatpush.bf16.msrb.mxu0 %v16293_v43  ;;  %9715 = vmatmul.bf16.vlgmr.msra.gmra.mxu1 %v2367_v49  ;;  %v16344_v43 = vld [vmem:[%s21020_s1 + $0x4d0] sm:$0xff]  ;;  %v16326_v49 = vld [vmem:[%s21020_s1 + $0x440] sm:$0xff] }
  0x65   :  { %9759 = vmatpush.bf16.msrb.mxu1 %v16301_v44  ;;  %9728 = vmatmul.bf16.vlgmr.msra.gmra.mxu2 %v2368_v48  ;;  %v16319_v44 = vld [vmem:[%s21020_s1 + $0x408] sm:$0xff]  ;;  %v16318_v48 = vld [vmem:[%s21020_s1 + $0x400] sm:$0xff] }
  0x66   :  { %9772 = vmatpush.bf16.msrb.mxu2 %v16309_v45  ;;  %9741 = vmatmul.bf16.vlgmr.msra.gmra.mxu3 %v2369_v50  ;;  %v16327_v45 = vld [vmem:[%s21020_s1 + $0x448] sm:$0xff]  ;;  %v16334_v50 = vld [vmem:[%s21020_s1 + $0x480] sm:$0xff] }
  0x67   :  { %9785 = vmatpush.bf16.msrb.mxu3 %v16317_v46  ;;  %v16335_v46 = vld [vmem:[%s21020_s1 + $0x488] sm:$0xff] }
  0x68   :  { %9747 = vmatpush.bf16.msrb.mxu0 %v16292_v51  ;;  %v16342_v51 = vld [vmem:[%s21020_s1 + $0x4c0] sm:$0xff] }
  0x69   :  { %9760 = vmatpush.bf16.msrb.mxu1 %v16300_v52  ;;  %v16357_v52 = vld [vmem:[%s21020_s1 + $0x538] sm:$0xff] }
  0x6a   :  { %9773 = vmatpush.bf16.msrb.mxu2 %v16308_v53  ;;  %v16365_v53 = vld [vmem:[%s21020_s1 + $0x578] sm:$0xff] }
  0x6b   :  { %9786 = vmatpush.bf16.msrb.mxu3 %v16316_v54  ;;  %v16373_v54 = vld [vmem:[%s21020_s1 + $0x5b8] sm:$0xff] }
  0x6c   :  { %9748 = vmatpush.bf16.msrb.mxu0 %v16291_v55  ;;  %v16381_v55 = vld [vmem:[%s21020_s1 + $0x5f8] sm:$0xff] }
  0x6d   :  { %9761 = vmatpush.bf16.msrb.mxu1 %v16299_v56  ;;  %v2376_v56 = vld [vmem:[#allocation1] sm:$0xff] }
  0x6e   :  { %9774 = vmatpush.bf16.msrb.mxu2 %v16307_v57  ;;  %v2378_v57 = vld [vmem:[#allocation1 + $0x12] sm:$0xff] }
  0x6f   :  { %9787 = vmatpush.bf16.msrb.mxu3 %v16315_v58  ;;  %v2377_v58 = vld [vmem:[#allocation1 + $0x9] sm:$0xff] }
  0x70   :  { %9749 = vmatpush.bf16.msrb.mxu0 %v16290_v59  ;;  %v2379_v59 = vld [vmem:[#allocation1 + $0x1b] sm:$0xff] }
  0x71   :  { %9762 = vmatpush.bf16.msrb.mxu1 %v16298_v60  ;;  %v16356_v60 = vld [vmem:[%s21020_s1 + $0x530] sm:$0xff] }
  0x72   :  { %9775 = vmatpush.bf16.msrb.mxu2 %v16306_v61  ;;  %v16364_v61 = vld [vmem:[%s21020_s1 + $0x570] sm:$0xff] }
  0x73   :  { %9788 = vmatpush.bf16.msrb.mxu3 %v16314_v62  ;;  %v16372_v62 = vld [vmem:[%s21020_s1 + $0x5b0] sm:$0xff] }
  0x74   :  { %9750 = vmatpush.bf16.msrb.mxu0 %v16289_v63  ;;  %v16380_v63 = vld [vmem:[%s21020_s1 + $0x5f0] sm:$0xff] }
  0x75   :  { %9763 = vmatpush.bf16.msrb.mxu1 %v16297_v0  ;;  %v16355_v0 = vld [vmem:[%s21020_s1 + $0x528] sm:$0xff] }
  0x76   :  { %9776 = vmatpush.bf16.msrb.mxu2 %v16305_v1  ;;  %v16363_v1 = vld [vmem:[%s21020_s1 + $0x568] sm:$0xff] }
  0x77   :  { %9789 = vmatpush.bf16.msrb.mxu3 %v16313_v2  ;;  %v17343_v2 = vld [vmem:[%s21021_s2] ss:$0 sm:$0xff] }
  0x78   :  { %9751 = vmatpush.bf16.msrb.mxu0 %v16288_v3  ;;  %v16371_v3 = vld [vmem:[%s21020_s1 + $0x5a8] sm:$0xff] }
  0x79   :  { %9764 = vmatpush.bf16.msrb.mxu1 %v16296_v4  ;;  %v16379_v4 = vld [vmem:[%s21020_s1 + $0x5e8] sm:$0xff] }
  0x7a   :  { %9777 = vmatpush.bf16.msrb.mxu2 %v16304_v5 }
  0x7b   :  { %9790 = vmatpush.bf16.msrb.mxu3 %v16312_v6  ;;  %v16354_v6 = vld [vmem:[%s21020_s1 + $0x520] sm:$0xff] }
  0x7c   :  { %9752 = vmatpush.bf16.msrb.mxu0 %v16287_v7  ;;  %v16362_v7 = vld [vmem:[%s21020_s1 + $0x560] sm:$0xff] }
  0x7d   :  { %9765 = vmatpush.bf16.msrb.mxu1 %v16295_v8 }
  0x7e   :  { %9778 = vmatpush.bf16.msrb.mxu2 %v16303_v9 }
  0x7f   :  { %9791 = vmatpush.bf16.msrb.mxu3 %v16311_v10  ;;  %v16370_v10 = vld [vmem:[%s21020_s1 + $0x5a0] sm:$0xff] }
  0x80   :  { %9753 = vmatpush.bf16.msrb.mxu0 %v16286_v16  ;;  %v16377_v16 = vld [vmem:[%s21020_s1 + $0x5d8] sm:$0xff] }
  0x81   :  { %9766 = vmatpush.bf16.msrb.mxu1 %v16294_v17 }
  0x82   :  { %9779 = vmatpush.bf16.msrb.mxu2 %v16302_v18 }
  0x83   :  { %9792 = vmatpush.bf16.msrb.mxu3 %v16310_v19  ;;  %9754 = vmatmul.bf16.vlgmr.msrb.gmra.mxu0 %v2370_v11  ;;  %v16378_v11 = vld [vmem:[%s21020_s1 + $0x5e0] sm:$0xff] }
  0x84   :  { %9798 = vmatpush.bf16.msra.mxu0 %v16325_v20  ;;  %9767 = vmatmul.bf16.vlgmr.msrb.gmra.mxu1 %v2371_v13  ;;  %v16353_v13 = vld [vmem:[%s21020_s1 + $0x518] sm:$0xff] }
  0x85   :  { %9811 = vmatpush.bf16.msra.mxu1 %v16333_v21  ;;  %9780 = vmatmul.bf16.vlgmr.msrb.gmra.mxu2 %v2372_v12  ;;  %v16352_v21 = vld [vmem:[%s21020_s1 + $0x510] sm:$0xff] }
  0x86   :  { %9824 = vmatpush.bf16.msra.mxu2 %v16341_v22  ;;  %9793 = vmatmul.bf16.vlgmr.msrb.gmra.mxu3 %v2373_v14  ;;  %v16361_v14 = vld [vmem:[%s21020_s1 + $0x558] sm:$0xff]  ;;  %v16360_v22 = vld [vmem:[%s21020_s1 + $0x550] sm:$0xff] }
  0x87   :  { %9837 = vmatpush.bf16.msra.mxu3 %v16349_v23 }
  0x88   :  { %9799 = vmatpush.bf16.msra.mxu0 %v16324_v24 }
  0x89   :  { %9812 = vmatpush.bf16.msra.mxu1 %v16332_v25  ;;  %v16368_v25 = vld [vmem:[%s21020_s1 + $0x590] sm:$0xff] }
  0x8a   :  { %9825 = vmatpush.bf16.msra.mxu2 %v16340_v26  ;;  %v16376_v26 = vld [vmem:[%s21020_s1 + $0x5d0] sm:$0xff] }
  0x8b   :  { %9838 = vmatpush.bf16.msra.mxu3 %v16348_v27  ;;  %v16351_v27 = vld [vmem:[%s21020_s1 + $0x508] sm:$0xff] }
  0x8c   :  { %9800 = vmatpush.bf16.msra.mxu0 %v16323_v28  ;;  %v16359_v28 = vld [vmem:[%s21020_s1 + $0x548] sm:$0xff] }
  0x8d   :  { %9813 = vmatpush.bf16.msra.mxu1 %v16331_v29  ;;  %v16367_v29 = vld [vmem:[%s21020_s1 + $0x588] sm:$0xff] }
  0x8e   :  { %9826 = vmatpush.bf16.msra.mxu2 %v16339_v30  ;;  %v16375_v30 = vld [vmem:[%s21020_s1 + $0x5c8] sm:$0xff] }
  0x8f   :  { %9839 = vmatpush.bf16.msra.mxu3 %v16347_v31  ;;  %v2380_v31 = vld [vmem:[#allocation1 + $0x24] sm:$0xff] }
  0x90   :  { %9801 = vmatpush.bf16.msra.mxu0 %v16322_v32  ;;  %v2382_v32 = vld [vmem:[#allocation1 + $0x36] sm:$0xff] }
  0x91   :  { %9814 = vmatpush.bf16.msra.mxu1 %v16330_v33 }
  0x92   :  { %9827 = vmatpush.bf16.msra.mxu2 %v16338_v34  ;;  %v2381_v34 = vld [vmem:[#allocation1 + $0x2d] sm:$0xff] }
  0x93   :  { %9840 = vmatpush.bf16.msra.mxu3 %v16346_v35  ;;  %v2383_v35 = vld [vmem:[#allocation1 + $0x3f] sm:$0xff] }
  0x94   :  { %9802 = vmatpush.bf16.msra.mxu0 %v16321_v36 }
  0x95   :  { %9815 = vmatpush.bf16.msra.mxu1 %v16329_v37  ;;  %v31_v37 = vld [vmem:[%s21019_s0 + $0x18] sm:$0xff] }
  0x96   :  { %9828 = vmatpush.bf16.msra.mxu2 %v16337_v38  ;;  %2385 = vst [vmem:[#allocation1] ss:$9 sm:$0xff] %v31_v37  ;;  %v16350_v38 = vld [vmem:[%s21020_s1 + $0x500] sm:$0xff]  ;;  %v16443_v37 = vld [vmem:[%s21020_s1 + $0x7e8] sm:$0xff] }
  0x97   :  { %9841 = vmatpush.bf16.msra.mxu3 %v16345_v39  ;;  %v16358_v39 = vld [vmem:[%s21020_s1 + $0x540] sm:$0xff] }
  0x98   :  { %9803 = vmatpush.bf16.msra.mxu0 %v16320_v40  ;;  %v16366_v40 = vld [vmem:[%s21020_s1 + $0x580] sm:$0xff] }
  0x99   :  { %9816 = vmatpush.bf16.msra.mxu1 %v16328_v41  ;;  %v16374_v41 = vld [vmem:[%s21020_s1 + $0x5c0] sm:$0xff] }
  0x9a   :  { %9829 = vmatpush.bf16.msra.mxu2 %v16336_v42  ;;  %v16389_v42 = vld [vmem:[%s21020_s1 + $0x638] sm:$0xff] }
  0x9b   :  { %9842 = vmatpush.bf16.msra.mxu3 %v16344_v43  ;;  %v16397_v43 = vld [vmem:[%s21020_s1 + $0x678] sm:$0xff] }
  0x9c   :  { %9804 = vmatpush.bf16.msra.mxu0 %v16319_v44  ;;  %v16405_v44 = vld [vmem:[%s21020_s1 + $0x6b8] sm:$0xff] }
  0x9d   :  { %9817 = vmatpush.bf16.msra.mxu1 %v16327_v45  ;;  %v16413_v45 = vld [vmem:[%s21020_s1 + $0x6f8] sm:$0xff] }
  0x9e   :  { %9830 = vmatpush.bf16.msra.mxu2 %v16335_v46  ;;  %v16388_v46 = vld [vmem:[%s21020_s1 + $0x630] sm:$0xff] }
  0x9f   :  { %9843 = vmatpush.bf16.msra.mxu3 %v16343_v47  ;;  %v16396_v47 = vld [vmem:[%s21020_s1 + $0x670] sm:$0xff] }
  0xa0   :  { %9805 = vmatpush.bf16.msra.mxu0 %v16318_v48  ;;  %v9599_v5 = vpop.f32.mrf.mxu0  ;;  %v16404_v48 = vld [vmem:[%s21020_s1 + $0x6b0] sm:$0xff] }
  0xa1   :  { %9818 = vmatpush.bf16.msra.mxu1 %v16326_v49  ;;  %v9600_v8 = vadd.f32 %v17343_v2, %v9599_v5  ;;  %v9612_v9 = vpop.f32.mrf.mxu1  ;;  %v16412_v49 = vld [vmem:[%s21020_s1 + $0x6f0] sm:$0xff] }
  0xa2   :  { %9831 = vmatpush.bf16.msra.mxu2 %v16334_v50  ;;  %v16387_v50 = vld [vmem:[%s21020_s1 + $0x628] sm:$0xff] }
  0xa3   :  { %9844 = vmatpush.bf16.msra.mxu3 %v16342_v51  ;;  %9806 = vmatmul.bf16.vlgmr.msra.gmra.mxu0 %v2376_v56  ;;  %v9613_v12 = vadd.f32 %v9612_v9, %v9600_v8  ;;  %v16395_v51 = vld [vmem:[%s21020_s1 + $0x668] sm:$0xff]  ;;  %v16394_v56 = vld [vmem:[%s21020_s1 + $0x660] sm:$0xff] }
  0xa4   :  { %9850 = vmatpush.bf16.msrb.mxu0 %v16357_v52  ;;  %9819 = vmatmul.bf16.vlgmr.msra.gmra.mxu1 %v2377_v58  ;;  %v16403_v52 = vld [vmem:[%s21020_s1 + $0x6a8] sm:$0xff] }
  0xa5   :  { %9863 = vmatpush.bf16.msrb.mxu1 %v16365_v53  ;;  %9832 = vmatmul.bf16.vlgmr.msra.gmra.mxu2 %v2378_v57  ;;  %v16411_v53 = vld [vmem:[%s21020_s1 + $0x6e8] sm:$0xff] }
  0xa6   :  { %9876 = vmatpush.bf16.msrb.mxu2 %v16373_v54  ;;  %9845 = vmatmul.bf16.vlgmr.msra.gmra.mxu3 %v2379_v59  ;;  %v16402_v59 = vld [vmem:[%s21020_s1 + $0x6a0] sm:$0xff] }
  0xa7   :  { %9889 = vmatpush.bf16.msrb.mxu3 %v16381_v55  ;;  %v16386_v55 = vld [vmem:[%s21020_s1 + $0x620] sm:$0xff] }
  0xa8   :  { %9851 = vmatpush.bf16.msrb.mxu0 %v16356_v60  ;;  %v9625_v17 = vpop.f32.mrf.mxu2  ;;  %v9601_v20 = vpop.f32.mrf.mxu0  ;;  %v16410_v60 = vld [vmem:[%s21020_s1 + $0x6e0] sm:$0xff] }
  0xa9   :  { %9864 = vmatpush.bf16.msrb.mxu1 %v16364_v61  ;;  %v9626_v18 = vadd.f32 %v9625_v17, %v9613_v12  ;;  %v9638_v19 = vpop.f32.mrf.mxu3  ;;  %v9614_v24 = vpop.f32.mrf.mxu1  ;;  %v16383_v12 = vld [vmem:[%s21020_s1 + $0x608] sm:$0xff]  ;;  %v16398_v20 = vld [vmem:[%s21020_s1 + $0x680] sm:$0xff] }
  0xaa   :  { %9877 = vmatpush.bf16.msrb.mxu2 %v16372_v62  ;;  %v16385_v62 = vld [vmem:[%s21020_s1 + $0x618] sm:$0xff] }
  0xab   :  { %9890 = vmatpush.bf16.msrb.mxu3 %v16380_v63  ;;  %v17977_v23 = vadd.f32 %v9638_v19, %v9626_v18  ;;  %v16393_v63 = vld [vmem:[%s21020_s1 + $0x658] sm:$0xff]  ;;  %v16382_v18 = vld [vmem:[%s21020_s1 + $0x600] sm:$0xff] }
  0xac   :  { %9852 = vmatpush.bf16.msrb.mxu0 %v16355_v0  ;;  %v16401_v0 = vld [vmem:[%s21020_s1 + $0x698] sm:$0xff]  ;;  %v16390_v19 = vld [vmem:[%s21020_s1 + $0x640] sm:$0xff] }
  0xad   :  { %9865 = vmatpush.bf16.msrb.mxu1 %v16363_v1  ;;  %v16409_v1 = vld [vmem:[%s21020_s1 + $0x6d8] sm:$0xff] }
  0xae   :  { %9878 = vmatpush.bf16.msrb.mxu2 %v16371_v3  ;;  %v16437_v24 = vld [vmem:[%s21020_s1 + $0x7b8] sm:$0xff] }
  0xaf   :  { %9891 = vmatpush.bf16.msrb.mxu3 %v16379_v4 }
  0xb0   :  { %9853 = vmatpush.bf16.msrb.mxu0 %v16354_v6  ;;  %v9627_v33 = vpop.f32.mrf.mxu2  ;;  %v16384_v6 = vld [vmem:[%s21020_s1 + $0x610] sm:$0xff] }
  0xb1   :  { %9866 = vmatpush.bf16.msrb.mxu1 %v16362_v7  ;;  %v9640_v36 = vpop.f32.mrf.mxu3  ;;  %v16392_v7 = vld [vmem:[%s21020_s1 + $0x650] sm:$0xff] }
  0xb2   :  { %9879 = vmatpush.bf16.msrb.mxu2 %v16370_v10  ;;  %v16400_v10 = vld [vmem:[%s21020_s1 + $0x690] sm:$0xff]  ;;  %v16435_v36 = vld [vmem:[%s21020_s1 + $0x7a8] sm:$0xff] }
  0xb3   :  { %9892 = vmatpush.bf16.msrb.mxu3 %v16378_v11  ;;  %v16408_v11 = vld [vmem:[%s21020_s1 + $0x6d0] sm:$0xff] }
  0xb4   :  { %9854 = vmatpush.bf16.msrb.mxu0 %v16353_v13  ;;  %v16391_v13 = vld [vmem:[%s21020_s1 + $0x648] sm:$0xff]  ;;  %v16444_v33 = vld [vmem:[%s21020_s1 + $0x7f0] sm:$0xff] }
  0xb5   :  { %9867 = vmatpush.bf16.msrb.mxu1 %v16361_v14  ;;  %v16399_v14 = vld [vmem:[%s21020_s1 + $0x688] sm:$0xff] }
  0xb6   :  { %9880 = vmatpush.bf16.msrb.mxu2 %v16369_v15  ;;  %v16407_v15 = vld [vmem:[%s21020_s1 + $0x6c8] sm:$0xff] }
  0xb7   :  { %9893 = vmatpush.bf16.msrb.mxu3 %v16377_v16 }
  0xb8   :  { %9855 = vmatpush.bf16.msrb.mxu0 %v16352_v21  ;;  %v16406_v21 = vld [vmem:[%s21020_s1 + $0x6c0] sm:$0xff] }
  0xb9   :  { %9868 = vmatpush.bf16.msrb.mxu1 %v16360_v22  ;;  %v16421_v22 = vld [vmem:[%s21020_s1 + $0x738] sm:$0xff] }
  0xba   :  { %9881 = vmatpush.bf16.msrb.mxu2 %v16368_v25  ;;  %v16445_v25 = vld [vmem:[%s21020_s1 + $0x7f8] sm:$0xff] }
  0xbb   :  { %9894 = vmatpush.bf16.msrb.mxu3 %v16376_v26  ;;  %v2386_v26 = vld [vmem:[#allocation1] sm:$0xff] }
  0xbc   :  { %9856 = vmatpush.bf16.msrb.mxu0 %v16351_v27  ;;  %v2388_v27 = vld [vmem:[#allocation1 + $0x12] sm:$0xff] }
  0xbd   :  { %9869 = vmatpush.bf16.msrb.mxu1 %v16359_v28  ;;  %v2387_v28 = vld [vmem:[#allocation1 + $0x9] sm:$0xff] }
  0xbe   :  { %9882 = vmatpush.bf16.msrb.mxu2 %v16367_v29  ;;  %v2389_v29 = vld [vmem:[#allocation1 + $0x1b] sm:$0xff] }
  0xbf   :  { %9895 = vmatpush.bf16.msrb.mxu3 %v16375_v30  ;;  %v16420_v30 = vld [vmem:[%s21020_s1 + $0x730] sm:$0xff] }
  0xc0   :  { %9857 = vmatpush.bf16.msrb.mxu0 %v16350_v38  ;;  %v9651_v54 = vpop.f32.mrf.mxu0 }
  0xc1   :  { %9870 = vmatpush.bf16.msrb.mxu1 %v16358_v39  ;;  %v9652_v57 = vadd.f32 %v9651_v54, %v17977_v23  ;;  %v9664_v58 = vpop.f32.mrf.mxu1  ;;  %v16429_v23 = vld [vmem:[%s21020_s1 + $0x778] sm:$0xff] }
  0xc2   :  { %9883 = vmatpush.bf16.msrb.mxu2 %v16366_v40  ;;  %v16418_v40 = vld [vmem:[%s21020_s1 + $0x720] sm:$0xff] }
  0xc3   :  { %9896 = vmatpush.bf16.msrb.mxu3 %v16374_v41  ;;  %9858 = vmatmul.bf16.vlgmr.msrb.gmra.mxu0 %v2380_v31  ;;  %v9665_v61 = vadd.f32 %v9664_v58, %v9652_v57  ;;  %v16428_v31 = vld [vmem:[%s21020_s1 + $0x770] sm:$0xff]  ;;  %v16426_v41 = vld [vmem:[%s21020_s1 + $0x760] sm:$0xff] }
  0xc4   :  { %9902 = vmatpush.bf16.msra.mxu0 %v16389_v42  ;;  %9871 = vmatmul.bf16.vlgmr.msrb.gmra.mxu1 %v2381_v34  ;;  %v16419_v34 = vld [vmem:[%s21020_s1 + $0x728] sm:$0xff]  ;;  %v16432_v58 = vld [vmem:[%s21020_s1 + $0x790] sm:$0xff] }
  0xc5   :  { %9915 = vmatpush.bf16.msra.mxu1 %v16397_v43  ;;  %9884 = vmatmul.bf16.vlgmr.msrb.gmra.mxu2 %v2382_v32  ;;  %v16436_v32 = vld [vmem:[%s21020_s1 + $0x7b0] sm:$0xff]  ;;  %v16434_v43 = vld [vmem:[%s21020_s1 + $0x7a0] sm:$0xff] }
  0xc6   :  { %9928 = vmatpush.bf16.msra.mxu2 %v16405_v44  ;;  %9897 = vmatmul.bf16.vlgmr.msrb.gmra.mxu3 %v2383_v35  ;;  %v16427_v35 = vld [vmem:[%s21020_s1 + $0x768] sm:$0xff]  ;;  %v16442_v44 = vld [vmem:[%s21020_s1 + $0x7e0] sm:$0xff] }
  0xc7   :  { %9941 = vmatpush.bf16.msra.mxu3 %v16413_v45 }
  0xc8   :  { %9903 = vmatpush.bf16.msra.mxu0 %v16388_v46  ;;  %v9677_v2 = vpop.f32.mrf.mxu2  ;;  %v9653_v5 = vpop.f32.mrf.mxu0  ;;  %v16417_v46 = vld [vmem:[%s21020_s1 + $0x718] sm:$0xff] }
  0xc9   :  { %9916 = vmatpush.bf16.msra.mxu1 %v16396_v47  ;;  %v9678_v3 = vadd.f32 %v9677_v2, %v9665_v61  ;;  %v9690_v4 = vpop.f32.mrf.mxu3  ;;  %v9666_v9 = vpop.f32.mrf.mxu1  ;;  %v16425_v47 = vld [vmem:[%s21020_s1 + $0x758] sm:$0xff]  ;;  %v16423_v61 = vld [vmem:[%s21020_s1 + $0x748] sm:$0xff] }
  0xca   :  { %9929 = vmatpush.bf16.msra.mxu2 %v16404_v48  ;;  %v16433_v48 = vld [vmem:[%s21020_s1 + $0x798] sm:$0xff]  ;;  %v16430_v9 = vld [vmem:[%s21020_s1 + $0x780] sm:$0xff] }
  0xcb   :  { %9942 = vmatpush.bf16.msra.mxu3 %v16412_v49  ;;  %v9691_v8 = vadd.f32 %v9690_v4, %v9678_v3  ;;  %v16441_v49 = vld [vmem:[%s21020_s1 + $0x7d8] sm:$0xff]  ;;  %v2391_v3 = vld [vmem:[#allocation1 + $0x2d] sm:$0xff] }
  0xcc   :  { %9904 = vmatpush.bf16.msra.mxu0 %v16387_v50  ;;  %v2393_v4 = vld [vmem:[#allocation1 + $0x3f] sm:$0xff] }
  0xcd   :  { %9917 = vmatpush.bf16.msra.mxu1 %v16395_v51 }
  0xce   :  { %9930 = vmatpush.bf16.msra.mxu2 %v16403_v52 }
  0xcf   :  { %9943 = vmatpush.bf16.msra.mxu3 %v16411_v53 }
  0xd0   :  { %9905 = vmatpush.bf16.msra.mxu0 %v16386_v55  ;;  %v9679_v16 = vpop.f32.mrf.mxu2  ;;  %v16416_v55 = vld [vmem:[%s21020_s1 + $0x710] sm:$0xff] }
  0xd1   :  { %9918 = vmatpush.bf16.msra.mxu1 %v16394_v56  ;;  %v9692_v17 = vpop.f32.mrf.mxu3  ;;  %v16424_v56 = vld [vmem:[%s21020_s1 + $0x750] sm:$0xff] }
  0xd2   :  { %9931 = vmatpush.bf16.msra.mxu2 %v16402_v59  ;;  %v16440_v59 = vld [vmem:[%s21020_s1 + $0x7d0] sm:$0xff] }
  0xd3   :  { %9944 = vmatpush.bf16.msra.mxu3 %v16410_v60  ;;  %v16415_v60 = vld [vmem:[%s21020_s1 + $0x708] sm:$0xff]  ;;  %v16460_v16 = vld [vmem:[%s21020_s1 + $0x870] sm:$0xff] }
  0xd4   :  { %9906 = vmatpush.bf16.msra.mxu0 %v16385_v62  ;;  %v16431_v62 = vld [vmem:[%s21020_s1 + $0x788] sm:$0xff]  ;;  %v16468_v17 = vld [vmem:[%s21020_s1 + $0x8b0] sm:$0xff] }
  0xd5   :  { %9919 = vmatpush.bf16.msra.mxu1 %v16393_v63  ;;  %v16439_v63 = vld [vmem:[%s21020_s1 + $0x7c8] sm:$0xff] }
  0xd6   :  { %9932 = vmatpush.bf16.msra.mxu2 %v16401_v0  ;;  %v2390_v0 = vld [vmem:[#allocation1 + $0x24] sm:$0xff] }
  0xd7   :  { %9945 = vmatpush.bf16.msra.mxu3 %v16409_v1  ;;  %v2392_v1 = vld [vmem:[#allocation1 + $0x36] sm:$0xff] }
  0xd8   :  { %9907 = vmatpush.bf16.msra.mxu0 %v16384_v6  ;;  %v32_v6 = vld [vmem:[%s21019_s0 + $0x20] sm:$0xff] }
  0xd9   :  { %9920 = vmatpush.bf16.msra.mxu1 %v16392_v7  ;;  %2395 = vst [vmem:[#allocation1] ss:$9 sm:$0xff] %v32_v6  ;;  %v16414_v7 = vld [vmem:[%s21020_s1 + $0x700] sm:$0xff]  ;;  %v16507_v6 = vld [vmem:[%s21020_s1 + $0x9e8] sm:$0xff] }
  0xda   :  { %9933 = vmatpush.bf16.msra.mxu2 %v16400_v10  ;;  %v16438_v10 = vld [vmem:[%s21020_s1 + $0x7c0] sm:$0xff] }
  0xdb   :  { %9946 = vmatpush.bf16.msra.mxu3 %v16408_v11  ;;  %v16453_v11 = vld [vmem:[%s21020_s1 + $0x838] sm:$0xff] }
  0xdc   :  { %9908 = vmatpush.bf16.msra.mxu0 %v16383_v12  ;;  %v16461_v12 = vld [vmem:[%s21020_s1 + $0x878] sm:$0xff] }
  0xdd   :  { %9921 = vmatpush.bf16.msra.mxu1 %v16391_v13  ;;  %v16469_v13 = vld [vmem:[%s21020_s1 + $0x8b8] sm:$0xff] }
  0xde   :  { %9934 = vmatpush.bf16.msra.mxu2 %v16399_v14  ;;  %v16477_v14 = vld [vmem:[%s21020_s1 + $0x8f8] sm:$0xff] }
  0xdf   :  { %9947 = vmatpush.bf16.msra.mxu3 %v16407_v15  ;;  %v16452_v15 = vld [vmem:[%s21020_s1 + $0x830] sm:$0xff] }
  0xe0   :  { %9909 = vmatpush.bf16.msra.mxu0 %v16382_v18  ;;  %v9703_v38 = vpop.f32.mrf.mxu0  ;;  %v16476_v18 = vld [vmem:[%s21020_s1 + $0x8f0] sm:$0xff] }
  0xe1   :  { %9922 = vmatpush.bf16.msra.mxu1 %v16390_v19  ;;  %v9704_v39 = vadd.f32 %v9703_v38, %v9691_v8  ;;  %v9716_v42 = vpop.f32.mrf.mxu1  ;;  %v16422_v8 = vld [vmem:[%s21020_s1 + $0x740] sm:$0xff]  ;;  %v16451_v19 = vld [vmem:[%s21020_s1 + $0x828] sm:$0xff] }
  0xe2   :  { %9935 = vmatpush.bf16.msra.mxu2 %v16398_v20  ;;  %v16459_v20 = vld [vmem:[%s21020_s1 + $0x868] sm:$0xff] }
  0xe3   :  { %9948 = vmatpush.bf16.msra.mxu3 %v16406_v21  ;;  %9910 = vmatmul.bf16.vlgmr.msra.gmra.mxu0 %v2386_v26  ;;  %v9717_v45 = vadd.f32 %v9716_v42, %v9704_v39  ;;  %v16467_v21 = vld [vmem:[%s21020_s1 + $0x8a8] sm:$0xff]  ;;  %v16458_v26 = vld [vmem:[%s21020_s1 + $0x860] sm:$0xff] }
  0xe4   :  { %9954 = vmatpush.bf16.msrb.mxu0 %v16421_v22  ;;  %9923 = vmatmul.bf16.vlgmr.msra.gmra.mxu1 %v2387_v28  ;;  %v16475_v22 = vld [vmem:[%s21020_s1 + $0x8e8] sm:$0xff]  ;;  %v16466_v28 = vld [vmem:[%s21020_s1 + $0x8a0] sm:$0xff] }
  0xe5   :  { %9967 = vmatpush.bf16.msrb.mxu1 %v16429_v23  ;;  %9936 = vmatmul.bf16.vlgmr.msra.gmra.mxu2 %v2388_v27 }
  0xe6   :  { %9980 = vmatpush.bf16.msrb.mxu2 %v16437_v24  ;;  %9949 = vmatmul.bf16.vlgmr.msra.gmra.mxu3 %v2389_v29  ;;  %v16474_v29 = vld [vmem:[%s21020_s1 + $0x8e0] sm:$0xff] }
  0xe7   :  { %9993 = vmatpush.bf16.msrb.mxu3 %v16445_v25  ;;  %v16450_v25 = vld [vmem:[%s21020_s1 + $0x820] sm:$0xff] }
  0xe8   :  { %9955 = vmatpush.bf16.msrb.mxu0 %v16420_v30  ;;  %v9729_v50 = vpop.f32.mrf.mxu2  ;;  %v9705_v53 = vpop.f32.mrf.mxu0 }
  0xe9   :  { %9968 = vmatpush.bf16.msrb.mxu1 %v16428_v31  ;;  %v9730_v51 = vadd.f32 %v9729_v50, %v9717_v45  ;;  %v9742_v52 = vpop.f32.mrf.mxu3  ;;  %v9718_v57 = vpop.f32.mrf.mxu1  ;;  %v16449_v31 = vld [vmem:[%s21020_s1 + $0x818] sm:$0xff]  ;;  %v16447_v45 = vld [vmem:[%s21020_s1 + $0x808] sm:$0xff]  ;;  %v16462_v53 = vld [vmem:[%s21020_s1 + $0x880] sm:$0xff] }
  0xea   :  { %9981 = vmatpush.bf16.msrb.mxu2 %v16436_v32  ;;  %v16457_v32 = vld [vmem:[%s21020_s1 + $0x858] sm:$0xff] }
  0xeb   :  { %9994 = vmatpush.bf16.msrb.mxu3 %v16444_v33  ;;  %v18169_v54 = vadd.f32 %v9742_v52, %v9730_v51  ;;  %v16465_v33 = vld [vmem:[%s21020_s1 + $0x898] sm:$0xff]  ;;  %v16446_v51 = vld [vmem:[%s21020_s1 + $0x800] sm:$0xff] }
  0xec   :  { %9956 = vmatpush.bf16.msrb.mxu0 %v16419_v34  ;;  %v16473_v34 = vld [vmem:[%s21020_s1 + $0x8d8] sm:$0xff]  ;;  %v16454_v52 = vld [vmem:[%s21020_s1 + $0x840] sm:$0xff] }
  0xed   :  { %9969 = vmatpush.bf16.msrb.mxu1 %v16427_v35  ;;  %v16501_v57 = vld [vmem:[%s21020_s1 + $0x9b8] sm:$0xff] }
  0xee   :  { %9982 = vmatpush.bf16.msrb.mxu2 %v16435_v36 }
  0xef   :  { %9995 = vmatpush.bf16.msrb.mxu3 %v16443_v37 }
  0xf0   :  { %9957 = vmatpush.bf16.msrb.mxu0 %v16418_v40  ;;  %v9731_v2 = vpop.f32.mrf.mxu2  ;;  %v16448_v40 = vld [vmem:[%s21020_s1 + $0x810] sm:$0xff] }
  0xf1   :  { %9970 = vmatpush.bf16.msrb.mxu1 %v16426_v41  ;;  %v9744_v5 = vpop.f32.mrf.mxu3  ;;  %v16456_v41 = vld [vmem:[%s21020_s1 + $0x850] sm:$0xff] }
  0xf2   :  { %9983 = vmatpush.bf16.msrb.mxu2 %v16434_v43  ;;  %v16464_v43 = vld [vmem:[%s21020_s1 + $0x890] sm:$0xff]  ;;  %v16499_v5 = vld [vmem:[%s21020_s1 + $0x9a8] sm:$0xff] }
  0xf3   :  { %9996 = vmatpush.bf16.msrb.mxu3 %v16442_v44  ;;  %v16472_v44 = vld [vmem:[%s21020_s1 + $0x8d0] sm:$0xff] }
  0xf4   :  { %9958 = vmatpush.bf16.msrb.mxu0 %v16417_v46  ;;  %v16455_v46 = vld [vmem:[%s21020_s1 + $0x848] sm:$0xff]  ;;  %v16508_v2 = vld [vmem:[%s21020_s1 + $0x9f0] sm:$0xff] }
  0xf5   :  { %9971 = vmatpush.bf16.msrb.mxu1 %v16425_v47  ;;  %v16463_v47 = vld [vmem:[%s21020_s1 + $0x888] sm:$0xff] }
  0xf6   :  { %9984 = vmatpush.bf16.msrb.mxu2 %v16433_v48  ;;  %v16471_v48 = vld [vmem:[%s21020_s1 + $0x8c8] sm:$0xff] }
  0xf7   :  { %9997 = vmatpush.bf16.msrb.mxu3 %v16441_v49 }
  0xf8   :  { %9959 = vmatpush.bf16.msrb.mxu0 %v16416_v55  ;;  %v16485_v55 = vld [vmem:[%s21020_s1 + $0x938] sm:$0xff] }
  0xf9   :  { %9972 = vmatpush.bf16.msrb.mxu1 %v16424_v56  ;;  %v16493_v56 = vld [vmem:[%s21020_s1 + $0x978] sm:$0xff] }
  0xfa   :  { %9985 = vmatpush.bf16.msrb.mxu2 %v16432_v58  ;;  %v16509_v58 = vld [vmem:[%s21020_s1 + $0x9f8] sm:$0xff] }
  0xfb   :  { %9998 = vmatpush.bf16.msrb.mxu3 %v16440_v59  ;;  %v2396_v59 = vld [vmem:[#allocation1] sm:$0xff] }
  0xfc   :  { %9960 = vmatpush.bf16.msrb.mxu0 %v16415_v60  ;;  %v2398_v60 = vld [vmem:[#allocation1 + $0x12] sm:$0xff] }
  0xfd   :  { %9973 = vmatpush.bf16.msrb.mxu1 %v16423_v61  ;;  %v2397_v61 = vld [vmem:[#allocation1 + $0x9] sm:$0xff] }
  0xfe   :  { %9986 = vmatpush.bf16.msrb.mxu2 %v16431_v62  ;;  %v2399_v62 = vld [vmem:[#allocation1 + $0x1b] sm:$0xff] }
  0xff   :  { %9999 = vmatpush.bf16.msrb.mxu3 %v16439_v63  ;;  %v16484_v63 = vld [vmem:[%s21020_s1 + $0x930] sm:$0xff] }
 0x100   :  { %9961 = vmatpush.bf16.msrb.mxu0 %v16414_v7  ;;  %v9755_v23 = vpop.f32.mrf.mxu0 }
 0x101   :  { %9974 = vmatpush.bf16.msrb.mxu1 %v16422_v8  ;;  %v9756_v24 = vadd.f32 %v9755_v23, %v18169_v54  ;;  %v9768_v27 = vpop.f32.mrf.mxu1  ;;  %v16470_v54 = vld [vmem:[%s21020_s1 + $0x8c0] sm:$0xff] }
 0x102   :  { %9987 = vmatpush.bf16.msrb.mxu2 %v16430_v9  ;;  %v16482_v9 = vld [vmem:[%s21020_s1 + $0x920] sm:$0xff] }
 0x103   :  { %10000 = vmatpush.bf16.msrb.mxu3 %v16438_v10  ;;  %9962 = vmatmul.bf16.vlgmr.msrb.gmra.mxu0 %v2390_v0  ;;  %v9769_v30 = vadd.f32 %v9768_v27, %v9756_v24  ;;  %v16492_v0 = vld [vmem:[%s21020_s1 + $0x970] sm:$0xff]  ;;  %v16490_v10 = vld [vmem:[%s21020_s1 + $0x960] sm:$0xff] }
 0x104   :  { %10006 = vmatpush.bf16.msra.mxu0 %v16453_v11  ;;  %9975 = vmatmul.bf16.vlgmr.msrb.gmra.mxu1 %v2391_v3  ;;  %v16483_v3 = vld [vmem:[%s21020_s1 + $0x928] sm:$0xff]  ;;  %v16480_v24 = vld [vmem:[%s21020_s1 + $0x910] sm:$0xff] }
 0x105   :  { %10019 = vmatpush.bf16.msra.mxu1 %v16461_v12  ;;  %9988 = vmatmul.bf16.vlgmr.msrb.gmra.mxu2 %v2392_v1  ;;  %v16500_v1 = vld [vmem:[%s21020_s1 + $0x9b0] sm:$0xff]  ;;  %v16498_v12 = vld [vmem:[%s21020_s1 + $0x9a0] sm:$0xff] }
 0x106   :  { %10032 = vmatpush.bf16.msra.mxu2 %v16469_v13  ;;  %10001 = vmatmul.bf16.vlgmr.msrb.gmra.mxu3 %v2393_v4  ;;  %v16491_v4 = vld [vmem:[%s21020_s1 + $0x968] sm:$0xff]  ;;  %v16506_v13 = vld [vmem:[%s21020_s1 + $0x9e0] sm:$0xff]  ;;  %v16496_v27 = vld [vmem:[%s21020_s1 + $0x990] sm:$0xff] }
 0x107   :  { %10045 = vmatpush.bf16.msra.mxu3 %v16477_v14 }
 0x108   :  { %10007 = vmatpush.bf16.msra.mxu0 %v16452_v15  ;;  %v9781_v35 = vpop.f32.mrf.mxu2  ;;  %v9757_v38 = vpop.f32.mrf.mxu0  ;;  %v16481_v15 = vld [vmem:[%s21020_s1 + $0x918] sm:$0xff] }
 0x109   :  { %10020 = vmatpush.bf16.msra.mxu1 %v16460_v16  ;;  %v9782_v36 = vadd.f32 %v9781_v35, %v9769_v30  ;;  %v9794_v37 = vpop.f32.mrf.mxu3  ;;  %v9770_v42 = vpop.f32.mrf.mxu1  ;;  %v16489_v16 = vld [vmem:[%s21020_s1 + $0x958] sm:$0xff]  ;;  %v16487_v30 = vld [vmem:[%s21020_s1 + $0x948] sm:$0xff] }
 0x10a   :  { %10033 = vmatpush.bf16.msra.mxu2 %v16468_v17  ;;  %v16497_v17 = vld [vmem:[%s21020_s1 + $0x998] sm:$0xff]  ;;  %v16494_v42 = vld [vmem:[%s21020_s1 + $0x980] sm:$0xff] }
 0x10b   :  { %10046 = vmatpush.bf16.msra.mxu3 %v16476_v18  ;;  %v9795_v39 = vadd.f32 %v9794_v37, %v9782_v36  ;;  %v16505_v18 = vld [vmem:[%s21020_s1 + $0x9d8] sm:$0xff]  ;;  %v2401_v36 = vld [vmem:[#allocation1 + $0x2d] sm:$0xff] }
 0x10c   :  { %10008 = vmatpush.bf16.msra.mxu0 %v16451_v19  ;;  %v2403_v37 = vld [vmem:[#allocation1 + $0x3f] sm:$0xff] }
 0x10d   :  { %10021 = vmatpush.bf16.msra.mxu1 %v16459_v20 }
 0x10e   :  { %10034 = vmatpush.bf16.msra.mxu2 %v16467_v21 }
 0x10f   :  { %10047 = vmatpush.bf16.msra.mxu3 %v16475_v22 }
 0x110   :  { %10009 = vmatpush.bf16.msra.mxu0 %v16450_v25  ;;  %v9783_v49 = vpop.f32.mrf.mxu2  ;;  %v16488_v25 = vld [vmem:[%s21020_s1 + $0x950] sm:$0xff] }
 0x111   :  { %10022 = vmatpush.bf16.msra.mxu1 %v16458_v26  ;;  %v9796_v50 = vpop.f32.mrf.mxu3  ;;  %v16524_v49 = vld [vmem:[%s21020_s1 + $0xa70] sm:$0xff] }
 0x112   :  { %10035 = vmatpush.bf16.msra.mxu2 %v16466_v28  ;;  %v16504_v28 = vld [vmem:[%s21020_s1 + $0x9d0] sm:$0xff] }
 0x113   :  { %10048 = vmatpush.bf16.msra.mxu3 %v16474_v29  ;;  %v16479_v29 = vld [vmem:[%s21020_s1 + $0x908] sm:$0xff]  ;;  %v16532_v50 = vld [vmem:[%s21020_s1 + $0xab0] sm:$0xff] }
 0x114   :  { %10010 = vmatpush.bf16.msra.mxu0 %v16449_v31  ;;  %v16495_v31 = vld [vmem:[%s21020_s1 + $0x988] sm:$0xff] }
 0x115   :  { %10023 = vmatpush.bf16.msra.mxu1 %v16457_v32  ;;  %v16503_v32 = vld [vmem:[%s21020_s1 + $0x9c8] sm:$0xff] }
 0x116   :  { %10036 = vmatpush.bf16.msra.mxu2 %v16465_v33  ;;  %v2400_v33 = vld [vmem:[#allocation1 + $0x24] sm:$0xff] }
 0x117   :  { %10049 = vmatpush.bf16.msra.mxu3 %v16473_v34  ;;  %v2402_v34 = vld [vmem:[#allocation1 + $0x36] sm:$0xff] }
 0x118   :  { %10011 = vmatpush.bf16.msra.mxu0 %v16448_v40  ;;  %v16478_v40 = vld [vmem:[%s21020_s1 + $0x900] sm:$0xff] }
 0x119   :  { %10024 = vmatpush.bf16.msra.mxu1 %v16456_v41  ;;  %v16486_v41 = vld [vmem:[%s21020_s1 + $0x940] sm:$0xff] }
 0x11a   :  { %10037 = vmatpush.bf16.msra.mxu2 %v16464_v43  ;;  %v16502_v43 = vld [vmem:[%s21020_s1 + $0x9c0] sm:$0xff] }
 0x11b   :  { %10050 = vmatpush.bf16.msra.mxu3 %v16472_v44  ;;  %v16517_v44 = vld [vmem:[%s21020_s1 + $0xa38] sm:$0xff] }
 0x11c   :  { %10012 = vmatpush.bf16.msra.mxu0 %v16447_v45  ;;  %v16525_v45 = vld [vmem:[%s21020_s1 + $0xa78] sm:$0xff] }
 0x11d   :  { %10025 = vmatpush.bf16.msra.mxu1 %v16455_v46  ;;  %v16533_v46 = vld [vmem:[%s21020_s1 + $0xab8] sm:$0xff] }
 0x11e   :  { %10038 = vmatpush.bf16.msra.mxu2 %v16463_v47  ;;  %v16541_v47 = vld [vmem:[%s21020_s1 + $0xaf8] sm:$0xff] }
 0x11f   :  { %10051 = vmatpush.bf16.msra.mxu3 %v16471_v48  ;;  %v16516_v48 = vld [vmem:[%s21020_s1 + $0xa30] sm:$0xff] }
 0x120   :  { %10013 = vmatpush.bf16.msra.mxu0 %v16446_v51  ;;  %v9807_v7 = vpop.f32.mrf.mxu0  ;;  %v16540_v51 = vld [vmem:[%s21020_s1 + $0xaf0] sm:$0xff] }
 0x121   :  { %10026 = vmatpush.bf16.msra.mxu1 %v16454_v52  ;;  %v9808_v8 = vadd.f32 %v9807_v7, %v9795_v39  ;;  %v9820_v11 = vpop.f32.mrf.mxu1  ;;  %v33_v39 = vld [vmem:[%s21019_s0 + $0x28] sm:$0xff] }
 0x122   :  { %10039 = vmatpush.bf16.msra.mxu2 %v16462_v53  ;;  %2405 = vst [vmem:[#allocation1] ss:$9 sm:$0xff] %v33_v39  ;;  %v16515_v52 = vld [vmem:[%s21020_s1 + $0xa28] sm:$0xff] }
 0x123   :  { %10052 = vmatpush.bf16.msra.mxu3 %v16470_v54  ;;  %10014 = vmatmul.bf16.vlgmr.msra.gmra.mxu0 %v2396_v59  ;;  %v9821_v14 = vadd.f32 %v9820_v11, %v9808_v8  ;;  %v16523_v53 = vld [vmem:[%s21020_s1 + $0xa68] sm:$0xff]  ;;  %v16522_v59 = vld [vmem:[%s21020_s1 + $0xa60] sm:$0xff] }
 0x124   :  { %10058 = vmatpush.bf16.msrb.mxu0 %v16485_v55  ;;  %10027 = vmatmul.bf16.vlgmr.msra.gmra.mxu1 %v2397_v61  ;;  %v16531_v54 = vld [vmem:[%s21020_s1 + $0xaa8] sm:$0xff]  ;;  %v16530_v61 = vld [vmem:[%s21020_s1 + $0xaa0] sm:$0xff] }
 0x125   :  { %10071 = vmatpush.bf16.msrb.mxu1 %v16493_v56  ;;  %10040 = vmatmul.bf16.vlgmr.msra.gmra.mxu2 %v2398_v60  ;;  %v16539_v55 = vld [vmem:[%s21020_s1 + $0xae8] sm:$0xff] }
 0x126   :  { %10084 = vmatpush.bf16.msrb.mxu2 %v16501_v57  ;;  %10053 = vmatmul.bf16.vlgmr.msra.gmra.mxu3 %v2399_v62  ;;  %v16538_v62 = vld [vmem:[%s21020_s1 + $0xae0] sm:$0xff]  ;;  %v16571_v39 = vld [vmem:[%s21020_s1 + $0xbe8] sm:$0xff] }
 0x127   :  { %10097 = vmatpush.bf16.msrb.mxu3 %v16509_v58  ;;  %v16514_v58 = vld [vmem:[%s21020_s1 + $0xa20] sm:$0xff] }
 0x128   :  { %10059 = vmatpush.bf16.msrb.mxu0 %v16484_v63  ;;  %v9833_v19 = vpop.f32.mrf.mxu2  ;;  %v9809_v22 = vpop.f32.mrf.mxu0 }
 0x129   :  { %10072 = vmatpush.bf16.msrb.mxu1 %v16492_v0  ;;  %v9834_v20 = vadd.f32 %v9833_v19, %v9821_v14  ;;  %v9846_v21 = vpop.f32.mrf.mxu3  ;;  %v9822_v26 = vpop.f32.mrf.mxu1  ;;  %v16513_v0 = vld [vmem:[%s21020_s1 + $0xa18] sm:$0xff]  ;;  %v16511_v14 = vld [vmem:[%s21020_s1 + $0xa08] sm:$0xff]  ;;  %v16526_v22 = vld [vmem:[%s21020_s1 + $0xa80] sm:$0xff] }
 0x12a   :  { %10085 = vmatpush.bf16.msrb.mxu2 %v16500_v1  ;;  %v16521_v1 = vld [vmem:[%s21020_s1 + $0xa58] sm:$0xff] }
 0x12b   :  { %10098 = vmatpush.bf16.msrb.mxu3 %v16508_v2  ;;  %v18367_v23 = vadd.f32 %v9846_v21, %v9834_v20  ;;  %v16529_v2 = vld [vmem:[%s21020_s1 + $0xa98] sm:$0xff]  ;;  %v16510_v20 = vld [vmem:[%s21020_s1 + $0xa00] sm:$0xff] }
 0x12c   :  { %10060 = vmatpush.bf16.msrb.mxu0 %v16483_v3  ;;  %v16537_v3 = vld [vmem:[%s21020_s1 + $0xad8] sm:$0xff]  ;;  %v16518_v21 = vld [vmem:[%s21020_s1 + $0xa40] sm:$0xff] }
 0x12d   :  { %10073 = vmatpush.bf16.msrb.mxu1 %v16491_v4  ;;  %v16565_v26 = vld [vmem:[%s21020_s1 + $0xbb8] sm:$0xff] }
 0x12e   :  { %10086 = vmatpush.bf16.msrb.mxu2 %v16499_v5 }
 0x12f   :  { %10099 = vmatpush.bf16.msrb.mxu3 %v16507_v6 }
 0x130   :  { %10061 = vmatpush.bf16.msrb.mxu0 %v16482_v9  ;;  %v9835_v35 = vpop.f32.mrf.mxu2  ;;  %v16512_v9 = vld [vmem:[%s21020_s1 + $0xa10] sm:$0xff] }
 0x131   :  { %10074 = vmatpush.bf16.msrb.mxu1 %v16490_v10  ;;  %v9848_v38 = vpop.f32.mrf.mxu3  ;;  %v16520_v10 = vld [vmem:[%s21020_s1 + $0xa50] sm:$0xff] }
 0x132   :  { %10087 = vmatpush.bf16.msrb.mxu2 %v16498_v12  ;;  %v16528_v12 = vld [vmem:[%s21020_s1 + $0xa90] sm:$0xff]  ;;  %v16563_v38 = vld [vmem:[%s21020_s1 + $0xba8] sm:$0xff] }
 0x133   :  { %10100 = vmatpush.bf16.msrb.mxu3 %v16506_v13  ;;  %v16536_v13 = vld [vmem:[%s21020_s1 + $0xad0] sm:$0xff] }
 0x134   :  { %10062 = vmatpush.bf16.msrb.mxu0 %v16481_v15  ;;  %v16519_v15 = vld [vmem:[%s21020_s1 + $0xa48] sm:$0xff]  ;;  %v16572_v35 = vld [vmem:[%s21020_s1 + $0xbf0] sm:$0xff] }
 0x135   :  { %10075 = vmatpush.bf16.msrb.mxu1 %v16489_v16  ;;  %v16527_v16 = vld [vmem:[%s21020_s1 + $0xa88] sm:$0xff] }
 0x136   :  { %10088 = vmatpush.bf16.msrb.mxu2 %v16497_v17  ;;  %v16535_v17 = vld [vmem:[%s21020_s1 + $0xac8] sm:$0xff] }
 0x137   :  { %10101 = vmatpush.bf16.msrb.mxu3 %v16505_v18 }
 0x138   :  { %10063 = vmatpush.bf16.msrb.mxu0 %v16480_v24  ;;  %v16549_v24 = vld [vmem:[%s21020_s1 + $0xb38] sm:$0xff] }
 0x139   :  { %10076 = vmatpush.bf16.msrb.mxu1 %v16488_v25  ;;  %v16557_v25 = vld [vmem:[%s21020_s1 + $0xb78] sm:$0xff] }
 0x13a   :  { %10089 = vmatpush.bf16.msrb.mxu2 %v16496_v27  ;;  %v16573_v27 = vld [vmem:[%s21020_s1 + $0xbf8] sm:$0xff] }
 0x13b   :  { %10102 = vmatpush.bf16.msrb.mxu3 %v16504_v28  ;;  %v2406_v28 = vld [vmem:[#allocation1] sm:$0xff] }
 0x13c   :  { %10064 = vmatpush.bf16.msrb.mxu0 %v16479_v29  ;;  %v2408_v29 = vld [vmem:[#allocation1 + $0x12] sm:$0xff] }
 0x13d   :  { %10077 = vmatpush.bf16.msrb.mxu1 %v16487_v30  ;;  %v2407_v30 = vld [vmem:[#allocation1 + $0x9] sm:$0xff] }
 0x13e   :  { %10090 = vmatpush.bf16.msrb.mxu2 %v16495_v31  ;;  %v2409_v31 = vld [vmem:[#allocation1 + $0x1b] sm:$0xff] }
 0x13f   :  { %10103 = vmatpush.bf16.msrb.mxu3 %v16503_v32  ;;  %v16548_v32 = vld [vmem:[%s21020_s1 + $0xb30] sm:$0xff] }
 0x140   :  { %10065 = vmatpush.bf16.msrb.mxu0 %v16478_v40  ;;  %v9859_v56 = vpop.f32.mrf.mxu0 }
 0x141   :  { %10078 = vmatpush.bf16.msrb.mxu1 %v16486_v41  ;;  %v9860_v57 = vadd.f32 %v9859_v56, %v18367_v23  ;;  %v9872_v60 = vpop.f32.mrf.mxu1  ;;  %v16534_v23 = vld [vmem:[%s21020_s1 + $0xac0] sm:$0xff] }
 0x142   :  { %10091 = vmatpush.bf16.msrb.mxu2 %v16494_v42  ;;  %v16546_v42 = vld [vmem:[%s21020_s1 + $0xb20] sm:$0xff] }
 0x143   :  { %10104 = vmatpush.bf16.msrb.mxu3 %v16502_v43  ;;  %10066 = vmatmul.bf16.vlgmr.msrb.gmra.mxu0 %v2400_v33  ;;  %v9873_v63 = vadd.f32 %v9872_v60, %v9860_v57  ;;  %v16556_v33 = vld [vmem:[%s21020_s1 + $0xb70] sm:$0xff]  ;;  %v16554_v43 = vld [vmem:[%s21020_s1 + $0xb60] sm:$0xff] }
 0x144   :  { %10110 = vmatpush.bf16.msra.mxu0 %v16517_v44  ;;  %10079 = vmatmul.bf16.vlgmr.msrb.gmra.mxu1 %v2401_v36  ;;  %v16547_v36 = vld [vmem:[%s21020_s1 + $0xb28] sm:$0xff]  ;;  %v16544_v57 = vld [vmem:[%s21020_s1 + $0xb10] sm:$0xff] }
 0x145   :  { %10123 = vmatpush.bf16.msra.mxu1 %v16525_v45  ;;  %10092 = vmatmul.bf16.vlgmr.msrb.gmra.mxu2 %v2402_v34  ;;  %v16564_v34 = vld [vmem:[%s21020_s1 + $0xbb0] sm:$0xff]  ;;  %v16562_v45 = vld [vmem:[%s21020_s1 + $0xba0] sm:$0xff] }
 0x146   :  { %10136 = vmatpush.bf16.msra.mxu2 %v16533_v46  ;;  %10105 = vmatmul.bf16.vlgmr.msrb.gmra.mxu3 %v2403_v37  ;;  %v16555_v37 = vld [vmem:[%s21020_s1 + $0xb68] sm:$0xff]  ;;  %v16570_v46 = vld [vmem:[%s21020_s1 + $0xbe0] sm:$0xff]  ;;  %v16560_v60 = vld [vmem:[%s21020_s1 + $0xb90] sm:$0xff] }
 0x147   :  { %10149 = vmatpush.bf16.msra.mxu3 %v16541_v47 }
 0x148   :  { %10111 = vmatpush.bf16.msra.mxu0 %v16516_v48  ;;  %v9885_v4 = vpop.f32.mrf.mxu2  ;;  %v9861_v7 = vpop.f32.mrf.mxu0  ;;  %v16545_v48 = vld [vmem:[%s21020_s1 + $0xb18] sm:$0xff] }
 0x149   :  { %10124 = vmatpush.bf16.msra.mxu1 %v16524_v49  ;;  %v9886_v5 = vadd.f32 %v9885_v4, %v9873_v63  ;;  %v9898_v6 = vpop.f32.mrf.mxu3  ;;  %v9874_v11 = vpop.f32.mrf.mxu1  ;;  %v16553_v49 = vld [vmem:[%s21020_s1 + $0xb58] sm:$0xff]  ;;  %v16551_v63 = vld [vmem:[%s21020_s1 + $0xb48] sm:$0xff] }
 0x14a   :  { %10137 = vmatpush.bf16.msra.mxu2 %v16532_v50  ;;  %v16561_v50 = vld [vmem:[%s21020_s1 + $0xb98] sm:$0xff]  ;;  %v16558_v11 = vld [vmem:[%s21020_s1 + $0xb80] sm:$0xff] }
 0x14b   :  { %10150 = vmatpush.bf16.msra.mxu3 %v16540_v51  ;;  %v9899_v8 = vadd.f32 %v9898_v6, %v9886_v5  ;;  %v16569_v51 = vld [vmem:[%s21020_s1 + $0xbd8] sm:$0xff]  ;;  %v2411_v5 = vld [vmem:[#allocation1 + $0x2d] sm:$0xff] }
 0x14c   :  { %10112 = vmatpush.bf16.msra.mxu0 %v16515_v52  ;;  %v2413_v6 = vld [vmem:[#allocation1 + $0x3f] sm:$0xff] }
 0x14d   :  { %10125 = vmatpush.bf16.msra.mxu1 %v16523_v53 }
 0x14e   :  { %10138 = vmatpush.bf16.msra.mxu2 %v16531_v54 }
 0x14f   :  { %10151 = vmatpush.bf16.msra.mxu3 %v16539_v55 }
 0x150   :  { %10113 = vmatpush.bf16.msra.mxu0 %v16514_v58  ;;  %v9887_v18 = vpop.f32.mrf.mxu2  ;;  %v16552_v58 = vld [vmem:[%s21020_s1 + $0xb50] sm:$0xff] }
 0x151   :  { %10126 = vmatpush.bf16.msra.mxu1 %v16522_v59  ;;  %v9900_v19 = vpop.f32.mrf.mxu3  ;;  %v16588_v18 = vld [vmem:[%s21020_s1 + $0xc70] sm:$0xff] }
 0x152   :  { %10139 = vmatpush.bf16.msra.mxu2 %v16530_v61  ;;  %v16568_v61 = vld [vmem:[%s21020_s1 + $0xbd0] sm:$0xff] }
 0x153   :  { %10152 = vmatpush.bf16.msra.mxu3 %v16538_v62  ;;  %v16543_v62 = vld [vmem:[%s21020_s1 + $0xb08] sm:$0xff]  ;;  %v16596_v19 = vld [vmem:[%s21020_s1 + $0xcb0] sm:$0xff] }
 0x154   :  { %10114 = vmatpush.bf16.msra.mxu0 %v16513_v0  ;;  %v16559_v0 = vld [vmem:[%s21020_s1 + $0xb88] sm:$0xff] }
 0x155   :  { %10127 = vmatpush.bf16.msra.mxu1 %v16521_v1  ;;  %v16567_v1 = vld [vmem:[%s21020_s1 + $0xbc8] sm:$0xff] }
 0x156   :  { %10140 = vmatpush.bf16.msra.mxu2 %v16529_v2  ;;  %v2410_v2 = vld [vmem:[#allocation1 + $0x24] sm:$0xff] }
 0x157   :  { %10153 = vmatpush.bf16.msra.mxu3 %v16537_v3  ;;  %v2412_v3 = vld [vmem:[#allocation1 + $0x36] sm:$0xff] }
 0x158   :  { %10115 = vmatpush.bf16.msra.mxu0 %v16512_v9  ;;  %v16542_v9 = vld [vmem:[%s21020_s1 + $0xb00] sm:$0xff] }
 0x159   :  { %10128 = vmatpush.bf16.msra.mxu1 %v16520_v10  ;;  %v16550_v10 = vld [vmem:[%s21020_s1 + $0xb40] sm:$0xff] }
 0x15a   :  { %10141 = vmatpush.bf16.msra.mxu2 %v16528_v12  ;;  %v16566_v12 = vld [vmem:[%s21020_s1 + $0xbc0] sm:$0xff] }
 0x15b   :  { %10154 = vmatpush.bf16.msra.mxu3 %v16536_v13  ;;  %v16581_v13 = vld [vmem:[%s21020_s1 + $0xc38] sm:$0xff] }
 0x15c   :  { %10116 = vmatpush.bf16.msra.mxu0 %v16511_v14  ;;  %v16589_v14 = vld [vmem:[%s21020_s1 + $0xc78] sm:$0xff] }
 0x15d   :  { %10129 = vmatpush.bf16.msra.mxu1 %v16519_v15  ;;  %v16597_v15 = vld [vmem:[%s21020_s1 + $0xcb8] sm:$0xff] }
 0x15e   :  { %10142 = vmatpush.bf16.msra.mxu2 %v16527_v16  ;;  %v16605_v16 = vld [vmem:[%s21020_s1 + $0xcf8] sm:$0xff] }
 0x15f   :  { %10155 = vmatpush.bf16.msra.mxu3 %v16535_v17  ;;  %v16580_v17 = vld [vmem:[%s21020_s1 + $0xc30] sm:$0xff] }
 0x160   :  { %10117 = vmatpush.bf16.msra.mxu0 %v16510_v20  ;;  %v9911_v40 = vpop.f32.mrf.mxu0  ;;  %v16604_v20 = vld [vmem:[%s21020_s1 + $0xcf0] sm:$0xff] }
 0x161   :  { %10130 = vmatpush.bf16.msra.mxu1 %v16518_v21  ;;  %v9912_v41 = vadd.f32 %v9911_v40, %v9899_v8  ;;  %v9924_v44 = vpop.f32.mrf.mxu1  ;;  %v34_v8 = vld [vmem:[%s21019_s0 + $0x30] sm:$0xff]  ;;  %v16579_v21 = vld [vmem:[%s21020_s1 + $0xc28] sm:$0xff] }
 0x162   :  { %10143 = vmatpush.bf16.msra.mxu2 %v16526_v22  ;;  %2415 = vst [vmem:[#allocation1] ss:$9 sm:$0xff] %v34_v8  ;;  %v16587_v22 = vld [vmem:[%s21020_s1 + $0xc68] sm:$0xff] }
 0x163   :  { %10156 = vmatpush.bf16.msra.mxu3 %v16534_v23  ;;  %10118 = vmatmul.bf16.vlgmr.msra.gmra.mxu0 %v2406_v28  ;;  %v9925_v47 = vadd.f32 %v9924_v44, %v9912_v41  ;;  %v16595_v23 = vld [vmem:[%s21020_s1 + $0xca8] sm:$0xff]  ;;  %v16586_v28 = vld [vmem:[%s21020_s1 + $0xc60] sm:$0xff] }
 0x164   :  { %10162 = vmatpush.bf16.msrb.mxu0 %v16549_v24  ;;  %10131 = vmatmul.bf16.vlgmr.msra.gmra.mxu1 %v2407_v30  ;;  %v16603_v24 = vld [vmem:[%s21020_s1 + $0xce8] sm:$0xff]  ;;  %v16594_v30 = vld [vmem:[%s21020_s1 + $0xca0] sm:$0xff] }
 0x165   :  { %10175 = vmatpush.bf16.msrb.mxu1 %v16557_v25  ;;  %10144 = vmatmul.bf16.vlgmr.msra.gmra.mxu2 %v2408_v29  ;;  %v16635_v8 = vld [vmem:[%s21020_s1 + $0xde8] sm:$0xff] }
 0x166   :  { %10188 = vmatpush.bf16.msrb.mxu2 %v16565_v26  ;;  %10157 = vmatmul.bf16.vlgmr.msra.gmra.mxu3 %v2409_v31  ;;  %v16602_v31 = vld [vmem:[%s21020_s1 + $0xce0] sm:$0xff] }
 0x167   :  { %10201 = vmatpush.bf16.msrb.mxu3 %v16573_v27  ;;  %v16578_v27 = vld [vmem:[%s21020_s1 + $0xc20] sm:$0xff] }
 0x168   :  { %10163 = vmatpush.bf16.msrb.mxu0 %v16548_v32  ;;  %v9937_v52 = vpop.f32.mrf.mxu2  ;;  %v9913_v55 = vpop.f32.mrf.mxu0 }
 0x169   :  { %10176 = vmatpush.bf16.msrb.mxu1 %v16556_v33  ;;  %v9938_v53 = vadd.f32 %v9937_v52, %v9925_v47  ;;  %v9950_v54 = vpop.f32.mrf.mxu3  ;;  %v9926_v59 = vpop.f32.mrf.mxu1  ;;  %v16577_v33 = vld [vmem:[%s21020_s1 + $0xc18] sm:$0xff]  ;;  %v16575_v47 = vld [vmem:[%s21020_s1 + $0xc08] sm:$0xff]  ;;  %v16590_v55 = vld [vmem:[%s21020_s1 + $0xc80] sm:$0xff] }
 0x16a   :  { %10189 = vmatpush.bf16.msrb.mxu2 %v16564_v34  ;;  %v16585_v34 = vld [vmem:[%s21020_s1 + $0xc58] sm:$0xff] }
 0x16b   :  { %10202 = vmatpush.bf16.msrb.mxu3 %v16572_v35  ;;  %v18565_v56 = vadd.f32 %v9950_v54, %v9938_v53  ;;  %v16593_v35 = vld [vmem:[%s21020_s1 + $0xc98] sm:$0xff]  ;;  %v16574_v53 = vld [vmem:[%s21020_s1 + $0xc00] sm:$0xff] }
 0x16c   :  { %10164 = vmatpush.bf16.msrb.mxu0 %v16547_v36  ;;  %v16601_v36 = vld [vmem:[%s21020_s1 + $0xcd8] sm:$0xff]  ;;  %v16582_v54 = vld [vmem:[%s21020_s1 + $0xc40] sm:$0xff] }
 0x16d   :  { %10177 = vmatpush.bf16.msrb.mxu1 %v16555_v37  ;;  %v16629_v59 = vld [vmem:[%s21020_s1 + $0xdb8] sm:$0xff] }
 0x16e   :  { %10190 = vmatpush.bf16.msrb.mxu2 %v16563_v38 }
 0x16f   :  { %10203 = vmatpush.bf16.msrb.mxu3 %v16571_v39 }
 0x170   :  { %10165 = vmatpush.bf16.msrb.mxu0 %v16546_v42  ;;  %v9939_v4 = vpop.f32.mrf.mxu2  ;;  %v16576_v42 = vld [vmem:[%s21020_s1 + $0xc10] sm:$0xff] }
 0x171   :  { %10178 = vmatpush.bf16.msrb.mxu1 %v16554_v43  ;;  %v9952_v7 = vpop.f32.mrf.mxu3  ;;  %v16584_v43 = vld [vmem:[%s21020_s1 + $0xc50] sm:$0xff] }
 0x172   :  { %10191 = vmatpush.bf16.msrb.mxu2 %v16562_v45  ;;  %v16592_v45 = vld [vmem:[%s21020_s1 + $0xc90] sm:$0xff]  ;;  %v16627_v7 = vld [vmem:[%s21020_s1 + $0xda8] sm:$0xff] }
 0x173   :  { %10204 = vmatpush.bf16.msrb.mxu3 %v16570_v46  ;;  %v16600_v46 = vld [vmem:[%s21020_s1 + $0xcd0] sm:$0xff] }
 0x174   :  { %10166 = vmatpush.bf16.msrb.mxu0 %v16545_v48  ;;  %v16583_v48 = vld [vmem:[%s21020_s1 + $0xc48] sm:$0xff]  ;;  %v16636_v4 = vld [vmem:[%s21020_s1 + $0xdf0] sm:$0xff] }
 0x175   :  { %10179 = vmatpush.bf16.msrb.mxu1 %v16553_v49  ;;  %v16591_v49 = vld [vmem:[%s21020_s1 + $0xc88] sm:$0xff] }
 0x176   :  { %10192 = vmatpush.bf16.msrb.mxu2 %v16561_v50  ;;  %v16599_v50 = vld [vmem:[%s21020_s1 + $0xcc8] sm:$0xff] }
 0x177   :  { %10205 = vmatpush.bf16.msrb.mxu3 %v16569_v51 }
 0x178   :  { %10167 = vmatpush.bf16.msrb.mxu0 %v16544_v57  ;;  %v16613_v57 = vld [vmem:[%s21020_s1 + $0xd38] sm:$0xff] }
 0x179   :  { %10180 = vmatpush.bf16.msrb.mxu1 %v16552_v58  ;;  %v16621_v58 = vld [vmem:[%s21020_s1 + $0xd78] sm:$0xff] }
 0x17a   :  { %10193 = vmatpush.bf16.msrb.mxu2 %v16560_v60  ;;  %v16637_v60 = vld [vmem:[%s21020_s1 + $0xdf8] sm:$0xff] }
 0x17b   :  { %10206 = vmatpush.bf16.msrb.mxu3 %v16568_v61  ;;  %v2416_v61 = vld [vmem:[#allocation1] sm:$0xff] }
 0x17c   :  { %10168 = vmatpush.bf16.msrb.mxu0 %v16543_v62  ;;  %v2418_v62 = vld [vmem:[#allocation1 + $0x12] sm:$0xff] }
 0x17d   :  { %10181 = vmatpush.bf16.msrb.mxu1 %v16551_v63  ;;  %v2417_v63 = vld [vmem:[#allocation1 + $0x9] sm:$0xff] }
 0x17e   :  { %10194 = vmatpush.bf16.msrb.mxu2 %v16559_v0  ;;  %v2419_v0 = vld [vmem:[#allocation1 + $0x1b] sm:$0xff] }
 0x17f   :  { %10207 = vmatpush.bf16.msrb.mxu3 %v16567_v1  ;;  %v16612_v1 = vld [vmem:[%s21020_s1 + $0xd30] sm:$0xff] }
 0x180   :  { %10169 = vmatpush.bf16.msrb.mxu0 %v16542_v9  ;;  %v9963_v25 = vpop.f32.mrf.mxu0 }
 0x181   :  { %10182 = vmatpush.bf16.msrb.mxu1 %v16550_v10  ;;  %v9964_v26 = vadd.f32 %v9963_v25, %v18565_v56  ;;  %v9976_v29 = vpop.f32.mrf.mxu1  ;;  %v16598_v56 = vld [vmem:[%s21020_s1 + $0xcc0] sm:$0xff] }
 0x182   :  { %10195 = vmatpush.bf16.msrb.mxu2 %v16558_v11  ;;  %v16610_v11 = vld [vmem:[%s21020_s1 + $0xd20] sm:$0xff] }
 0x183   :  { %10208 = vmatpush.bf16.msrb.mxu3 %v16566_v12  ;;  %10170 = vmatmul.bf16.vlgmr.msrb.gmra.mxu0 %v2410_v2  ;;  %v9977_v32 = vadd.f32 %v9976_v29, %v9964_v26  ;;  %v16620_v2 = vld [vmem:[%s21020_s1 + $0xd70] sm:$0xff]  ;;  %v16618_v12 = vld [vmem:[%s21020_s1 + $0xd60] sm:$0xff] }
 0x184   :  { %10214 = vmatpush.bf16.msra.mxu0 %v16581_v13  ;;  %10183 = vmatmul.bf16.vlgmr.msrb.gmra.mxu1 %v2411_v5  ;;  %v16611_v5 = vld [vmem:[%s21020_s1 + $0xd28] sm:$0xff]  ;;  %v16608_v26 = vld [vmem:[%s21020_s1 + $0xd10] sm:$0xff] }
 0x185   :  { %10227 = vmatpush.bf16.msra.mxu1 %v16589_v14  ;;  %10196 = vmatmul.bf16.vlgmr.msrb.gmra.mxu2 %v2412_v3  ;;  %v16628_v3 = vld [vmem:[%s21020_s1 + $0xdb0] sm:$0xff]  ;;  %v16626_v14 = vld [vmem:[%s21020_s1 + $0xda0] sm:$0xff] }
 0x186   :  { %10240 = vmatpush.bf16.msra.mxu2 %v16597_v15  ;;  %10209 = vmatmul.bf16.vlgmr.msrb.gmra.mxu3 %v2413_v6  ;;  %v16619_v6 = vld [vmem:[%s21020_s1 + $0xd68] sm:$0xff]  ;;  %v16634_v15 = vld [vmem:[%s21020_s1 + $0xde0] sm:$0xff]  ;;  %v16624_v29 = vld [vmem:[%s21020_s1 + $0xd90] sm:$0xff] }
 0x187   :  { %10253 = vmatpush.bf16.msra.mxu3 %v16605_v16 }
 0x188   :  { %10215 = vmatpush.bf16.msra.mxu0 %v16580_v17  ;;  %v9989_v37 = vpop.f32.mrf.mxu2  ;;  %v9965_v40 = vpop.f32.mrf.mxu0  ;;  %v16609_v17 = vld [vmem:[%s21020_s1 + $0xd18] sm:$0xff] }
 0x189   :  { %10228 = vmatpush.bf16.msra.mxu1 %v16588_v18  ;;  %v9990_v38 = vadd.f32 %v9989_v37, %v9977_v32  ;;  %v10002_v39 = vpop.f32.mrf.mxu3  ;;  %v9978_v44 = vpop.f32.mrf.mxu1  ;;  %v16617_v18 = vld [vmem:[%s21020_s1 + $0xd58] sm:$0xff]  ;;  %v16615_v32 = vld [vmem:[%s21020_s1 + $0xd48] sm:$0xff] }
 0x18a   :  { %10241 = vmatpush.bf16.msra.mxu2 %v16596_v19  ;;  %v16625_v19 = vld [vmem:[%s21020_s1 + $0xd98] sm:$0xff]  ;;  %v16622_v44 = vld [vmem:[%s21020_s1 + $0xd80] sm:$0xff] }
 0x18b   :  { %10254 = vmatpush.bf16.msra.mxu3 %v16604_v20  ;;  %v10003_v41 = vadd.f32 %v10002_v39, %v9990_v38  ;;  %v16633_v20 = vld [vmem:[%s21020_s1 + $0xdd8] sm:$0xff]  ;;  %v2421_v38 = vld [vmem:[#allocation1 + $0x2d] sm:$0xff] }
 0x18c   :  { %10216 = vmatpush.bf16.msra.mxu0 %v16579_v21  ;;  %v2423_v39 = vld [vmem:[#allocation1 + $0x3f] sm:$0xff] }
 0x18d   :  { %10229 = vmatpush.bf16.msra.mxu1 %v16587_v22 }
 0x18e   :  { %10242 = vmatpush.bf16.msra.mxu2 %v16595_v23 }
 0x18f   :  { %10255 = vmatpush.bf16.msra.mxu3 %v16603_v24 }
 0x190   :  { %10217 = vmatpush.bf16.msra.mxu0 %v16578_v27  ;;  %v9991_v51 = vpop.f32.mrf.mxu2  ;;  %v16616_v27 = vld [vmem:[%s21020_s1 + $0xd50] sm:$0xff] }
 0x191   :  { %10230 = vmatpush.bf16.msra.mxu1 %v16586_v28  ;;  %v10004_v52 = vpop.f32.mrf.mxu3  ;;  %v16652_v51 = vld [vmem:[%s21020_s1 + $0xe70] sm:$0xff] }
 0x192   :  { %10243 = vmatpush.bf16.msra.mxu2 %v16594_v30  ;;  %v16632_v30 = vld [vmem:[%s21020_s1 + $0xdd0] sm:$0xff] }
 0x193   :  { %10256 = vmatpush.bf16.msra.mxu3 %v16602_v31  ;;  %v16607_v31 = vld [vmem:[%s21020_s1 + $0xd08] sm:$0xff]  ;;  %v16660_v52 = vld [vmem:[%s21020_s1 + $0xeb0] sm:$0xff] }
 0x194   :  { %10218 = vmatpush.bf16.msra.mxu0 %v16577_v33  ;;  %v16623_v33 = vld [vmem:[%s21020_s1 + $0xd88] sm:$0xff] }
 0x195   :  { %10231 = vmatpush.bf16.msra.mxu1 %v16585_v34  ;;  %v16631_v34 = vld [vmem:[%s21020_s1 + $0xdc8] sm:$0xff] }
 0x196   :  { %10244 = vmatpush.bf16.msra.mxu2 %v16593_v35  ;;  %v2420_v35 = vld [vmem:[#allocation1 + $0x24] sm:$0xff] }
 0x197   :  { %10257 = vmatpush.bf16.msra.mxu3 %v16601_v36  ;;  %v2422_v36 = vld [vmem:[#allocation1 + $0x36] sm:$0xff] }
 0x198   :  { %10219 = vmatpush.bf16.msra.mxu0 %v16576_v42  ;;  %v16606_v42 = vld [vmem:[%s21020_s1 + $0xd00] sm:$0xff] }
 0x199   :  { %10232 = vmatpush.bf16.msra.mxu1 %v16584_v43  ;;  %v16614_v43 = vld [vmem:[%s21020_s1 + $0xd40] sm:$0xff] }
 0x19a   :  { %10245 = vmatpush.bf16.msra.mxu2 %v16592_v45  ;;  %v16630_v45 = vld [vmem:[%s21020_s1 + $0xdc0] sm:$0xff] }
 0x19b   :  { %10258 = vmatpush.bf16.msra.mxu3 %v16600_v46  ;;  %v16645_v46 = vld [vmem:[%s21020_s1 + $0xe38] sm:$0xff] }
 0x19c   :  { %10220 = vmatpush.bf16.msra.mxu0 %v16575_v47  ;;  %v16653_v47 = vld [vmem:[%s21020_s1 + $0xe78] sm:$0xff] }
 0x19d   :  { %10233 = vmatpush.bf16.msra.mxu1 %v16583_v48  ;;  %v16661_v48 = vld [vmem:[%s21020_s1 + $0xeb8] sm:$0xff] }
 0x19e   :  { %10246 = vmatpush.bf16.msra.mxu2 %v16591_v49  ;;  %v16669_v49 = vld [vmem:[%s21020_s1 + $0xef8] sm:$0xff] }
 0x19f   :  { %10259 = vmatpush.bf16.msra.mxu3 %v16599_v50  ;;  %v16644_v50 = vld [vmem:[%s21020_s1 + $0xe30] sm:$0xff] }
 0x1a0   :  { %10221 = vmatpush.bf16.msra.mxu0 %v16574_v53  ;;  %v10015_v9 = vpop.f32.mrf.mxu0  ;;  %v16668_v53 = vld [vmem:[%s21020_s1 + $0xef0] sm:$0xff] }
 0x1a1   :  { %10234 = vmatpush.bf16.msra.mxu1 %v16582_v54  ;;  %v10016_v10 = vadd.f32 %v10015_v9, %v10003_v41  ;;  %v10028_v13 = vpop.f32.mrf.mxu1  ;;  %v35_v41 = vld [vmem:[%s21019_s0 + $0x38] sm:$0xff]  ;;  %v16643_v54 = vld [vmem:[%s21020_s1 + $0xe28] sm:$0xff] }
 0x1a2   :  { %10247 = vmatpush.bf16.msra.mxu2 %v16590_v55  ;;  %2425 = vst [vmem:[#allocation1] ss:$9 sm:$0xff] %v35_v41  ;;  %v16651_v55 = vld [vmem:[%s21020_s1 + $0xe68] sm:$0xff] }
 0x1a3   :  { %10260 = vmatpush.bf16.msra.mxu3 %v16598_v56  ;;  %10222 = vmatmul.bf16.vlgmr.msra.gmra.mxu0 %v2416_v61  ;;  %v10029_v16 = vadd.f32 %v10028_v13, %v10016_v10  ;;  %v16659_v56 = vld [vmem:[%s21020_s1 + $0xea8] sm:$0xff]  ;;  %v16650_v61 = vld [vmem:[%s21020_s1 + $0xe60] sm:$0xff] }
 0x1a4   :  { %10266 = vmatpush.bf16.msrb.mxu0 %v16613_v57  ;;  %10235 = vmatmul.bf16.vlgmr.msra.gmra.mxu1 %v2417_v63  ;;  %v16667_v57 = vld [vmem:[%s21020_s1 + $0xee8] sm:$0xff]  ;;  %v16658_v63 = vld [vmem:[%s21020_s1 + $0xea0] sm:$0xff] }
 0x1a5   :  { %10279 = vmatpush.bf16.msrb.mxu1 %v16621_v58  ;;  %10248 = vmatmul.bf16.vlgmr.msra.gmra.mxu2 %v2418_v62  ;;  %v16699_v41 = vld [vmem:[%s21020_s1 + $0xfe8] sm:$0xff] }
 0x1a6   :  { %10292 = vmatpush.bf16.msrb.mxu2 %v16629_v59  ;;  %10261 = vmatmul.bf16.vlgmr.msra.gmra.mxu3 %v2419_v0  ;;  %v16666_v0 = vld [vmem:[%s21020_s1 + $0xee0] sm:$0xff] }
 0x1a7   :  { %10305 = vmatpush.bf16.msrb.mxu3 %v16637_v60  ;;  %v16642_v60 = vld [vmem:[%s21020_s1 + $0xe20] sm:$0xff] }
 0x1a8   :  { %10267 = vmatpush.bf16.msrb.mxu0 %v16612_v1  ;;  %v10041_v21 = vpop.f32.mrf.mxu2  ;;  %v10017_v24 = vpop.f32.mrf.mxu0 }
 0x1a9   :  { %10280 = vmatpush.bf16.msrb.mxu1 %v16620_v2  ;;  %v10042_v22 = vadd.f32 %v10041_v21, %v10029_v16  ;;  %v10054_v23 = vpop.f32.mrf.mxu3  ;;  %v10030_v28 = vpop.f32.mrf.mxu1  ;;  %v16641_v2 = vld [vmem:[%s21020_s1 + $0xe18] sm:$0xff]  ;;  %v16639_v16 = vld [vmem:[%s21020_s1 + $0xe08] sm:$0xff]  ;;  %v16654_v24 = vld [vmem:[%s21020_s1 + $0xe80] sm:$0xff] }
 0x1aa   :  { %10293 = vmatpush.bf16.msrb.mxu2 %v16628_v3  ;;  %v16649_v3 = vld [vmem:[%s21020_s1 + $0xe58] sm:$0xff] }
 0x1ab   :  { %10306 = vmatpush.bf16.msrb.mxu3 %v16636_v4  ;;  %v18763_v25 = vadd.f32 %v10054_v23, %v10042_v22  ;;  %v16657_v4 = vld [vmem:[%s21020_s1 + $0xe98] sm:$0xff]  ;;  %v16638_v22 = vld [vmem:[%s21020_s1 + $0xe00] sm:$0xff] }
 0x1ac   :  { %10268 = vmatpush.bf16.msrb.mxu0 %v16611_v5  ;;  %v16665_v5 = vld [vmem:[%s21020_s1 + $0xed8] sm:$0xff]  ;;  %v16646_v23 = vld [vmem:[%s21020_s1 + $0xe40] sm:$0xff] }
 0x1ad   :  { %10281 = vmatpush.bf16.msrb.mxu1 %v16619_v6  ;;  %v16693_v28 = vld [vmem:[%s21020_s1 + $0xfb8] sm:$0xff] }
 0x1ae   :  { %10294 = vmatpush.bf16.msrb.mxu2 %v16627_v7 }
 0x1af   :  { %10307 = vmatpush.bf16.msrb.mxu3 %v16635_v8 }
 0x1b0   :  { %10269 = vmatpush.bf16.msrb.mxu0 %v16610_v11  ;;  %v10043_v37 = vpop.f32.mrf.mxu2  ;;  %v16640_v11 = vld [vmem:[%s21020_s1 + $0xe10] sm:$0xff] }
 0x1b1   :  { %10282 = vmatpush.bf16.msrb.mxu1 %v16618_v12  ;;  %v10056_v40 = vpop.f32.mrf.mxu3  ;;  %v16648_v12 = vld [vmem:[%s21020_s1 + $0xe50] sm:$0xff] }
 0x1b2   :  { %10295 = vmatpush.bf16.msrb.mxu2 %v16626_v14  ;;  %v16656_v14 = vld [vmem:[%s21020_s1 + $0xe90] sm:$0xff]  ;;  %v16691_v40 = vld [vmem:[%s21020_s1 + $0xfa8] sm:$0xff] }
 0x1b3   :  { %10308 = vmatpush.bf16.msrb.mxu3 %v16634_v15  ;;  %v16664_v15 = vld [vmem:[%s21020_s1 + $0xed0] sm:$0xff] }
 0x1b4   :  { %10270 = vmatpush.bf16.msrb.mxu0 %v16609_v17  ;;  %v16647_v17 = vld [vmem:[%s21020_s1 + $0xe48] sm:$0xff]  ;;  %v16700_v37 = vld [vmem:[%s21020_s1 + $0xff0] sm:$0xff] }
 0x1b5   :  { %10283 = vmatpush.bf16.msrb.mxu1 %v16617_v18  ;;  %v16655_v18 = vld [vmem:[%s21020_s1 + $0xe88] sm:$0xff] }
 0x1b6   :  { %10296 = vmatpush.bf16.msrb.mxu2 %v16625_v19  ;;  %v16663_v19 = vld [vmem:[%s21020_s1 + $0xec8] sm:$0xff] }
 0x1b7   :  { %10309 = vmatpush.bf16.msrb.mxu3 %v16633_v20 }
 0x1b8   :  { %10271 = vmatpush.bf16.msrb.mxu0 %v16608_v26  ;;  %v16677_v26 = vld [vmem:[%s21020_s1 + $0xf38] sm:$0xff] }
 0x1b9   :  { %10284 = vmatpush.bf16.msrb.mxu1 %v16616_v27  ;;  %v16685_v27 = vld [vmem:[%s21020_s1 + $0xf78] sm:$0xff] }
 0x1ba   :  { %10297 = vmatpush.bf16.msrb.mxu2 %v16624_v29  ;;  %v16701_v29 = vld [vmem:[%s21020_s1 + $0xff8] sm:$0xff] }
 0x1bb   :  { %10310 = vmatpush.bf16.msrb.mxu3 %v16632_v30  ;;  %v2426_v30 = vld [vmem:[#allocation1] sm:$0xff] }
 0x1bc   :  { %10272 = vmatpush.bf16.msrb.mxu0 %v16607_v31  ;;  %v2428_v31 = vld [vmem:[#allocation1 + $0x12] sm:$0xff] }
 0x1bd   :  { %10285 = vmatpush.bf16.msrb.mxu1 %v16615_v32  ;;  %v2427_v32 = vld [vmem:[#allocation1 + $0x9] sm:$0xff] }
 0x1be   :  { %10298 = vmatpush.bf16.msrb.mxu2 %v16623_v33  ;;  %v2429_v33 = vld [vmem:[#allocation1 + $0x1b] sm:$0xff] }
 0x1bf   :  { %10311 = vmatpush.bf16.msrb.mxu3 %v16631_v34  ;;  %v16676_v34 = vld [vmem:[%s21020_s1 + $0xf30] sm:$0xff] }
 0x1c0   :  { %10273 = vmatpush.bf16.msrb.mxu0 %v16606_v42  ;;  %v10067_v58 = vpop.f32.mrf.mxu0 }
 0x1c1   :  { %10286 = vmatpush.bf16.msrb.mxu1 %v16614_v43  ;;  %v10068_v59 = vadd.f32 %v10067_v58, %v18763_v25  ;;  %v10080_v62 = vpop.f32.mrf.mxu1  ;;  %v16662_v25 = vld [vmem:[%s21020_s1 + $0xec0] sm:$0xff] }
 0x1c2   :  { %10299 = vmatpush.bf16.msrb.mxu2 %v16622_v44  ;;  %v16674_v44 = vld [vmem:[%s21020_s1 + $0xf20] sm:$0xff] }
 0x1c3   :  { %10312 = vmatpush.bf16.msrb.mxu3 %v16630_v45  ;;  %10274 = vmatmul.bf16.vlgmr.msrb.gmra.mxu0 %v2420_v35  ;;  %v10081_v1 = vadd.f32 %v10080_v62, %v10068_v59  ;;  %v16684_v35 = vld [vmem:[%s21020_s1 + $0xf70] sm:$0xff]  ;;  %v16682_v45 = vld [vmem:[%s21020_s1 + $0xf60] sm:$0xff] }
 0x1c4   :  { %10318 = vmatpush.bf16.msra.mxu0 %v16645_v46  ;;  %10287 = vmatmul.bf16.vlgmr.msrb.gmra.mxu1 %v2421_v38  ;;  %v16675_v38 = vld [vmem:[%s21020_s1 + $0xf28] sm:$0xff]  ;;  %v16672_v59 = vld [vmem:[%s21020_s1 + $0xf10] sm:$0xff] }
 0x1c5   :  { %10331 = vmatpush.bf16.msra.mxu1 %v16653_v47  ;;  %10300 = vmatmul.bf16.vlgmr.msrb.gmra.mxu2 %v2422_v36  ;;  %v16692_v36 = vld [vmem:[%s21020_s1 + $0xfb0] sm:$0xff]  ;;  %v16690_v47 = vld [vmem:[%s21020_s1 + $0xfa0] sm:$0xff] }
 0x1c6   :  { %10344 = vmatpush.bf16.msra.mxu2 %v16661_v48  ;;  %10313 = vmatmul.bf16.vlgmr.msrb.gmra.mxu3 %v2423_v39  ;;  %v16683_v39 = vld [vmem:[%s21020_s1 + $0xf68] sm:$0xff]  ;;  %v16698_v48 = vld [vmem:[%s21020_s1 + $0xfe0] sm:$0xff]  ;;  %v16688_v62 = vld [vmem:[%s21020_s1 + $0xf90] sm:$0xff] }
 0x1c7   :  { %10357 = vmatpush.bf16.msra.mxu3 %v16669_v49 }
 0x1c8   :  { %10319 = vmatpush.bf16.msra.mxu0 %v16644_v50  ;;  %v10093_v6 = vpop.f32.mrf.mxu2  ;;  %v10069_v9 = vpop.f32.mrf.mxu0  ;;  %v16673_v50 = vld [vmem:[%s21020_s1 + $0xf18] sm:$0xff] }
 0x1c9   :  { %10332 = vmatpush.bf16.msra.mxu1 %v16652_v51  ;;  %v10094_v7 = vadd.f32 %v10093_v6, %v10081_v1  ;;  %v10106_v8 = vpop.f32.mrf.mxu3  ;;  %v10082_v13 = vpop.f32.mrf.mxu1  ;;  %v16681_v51 = vld [vmem:[%s21020_s1 + $0xf58] sm:$0xff]  ;;  %v16679_v1 = vld [vmem:[%s21020_s1 + $0xf48] sm:$0xff] }
 0x1ca   :  { %10345 = vmatpush.bf16.msra.mxu2 %v16660_v52  ;;  %v16689_v52 = vld [vmem:[%s21020_s1 + $0xf98] sm:$0xff]  ;;  %v16686_v13 = vld [vmem:[%s21020_s1 + $0xf80] sm:$0xff] }
 0x1cb   :  { %10358 = vmatpush.bf16.msra.mxu3 %v16668_v53  ;;  %v10107_v10 = vadd.f32 %v10106_v8, %v10094_v7  ;;  %v16697_v53 = vld [vmem:[%s21020_s1 + $0xfd8] sm:$0xff]  ;;  %v2431_v7 = vld [vmem:[#allocation1 + $0x2d] sm:$0xff] }
 0x1cc   :  { %10320 = vmatpush.bf16.msra.mxu0 %v16643_v54  ;;  %v2433_v8 = vld [vmem:[#allocation1 + $0x3f] sm:$0xff] }
 0x1cd   :  { %10333 = vmatpush.bf16.msra.mxu1 %v16651_v55 }
 0x1ce   :  { %10346 = vmatpush.bf16.msra.mxu2 %v16659_v56 }
 0x1cf   :  { %10359 = vmatpush.bf16.msra.mxu3 %v16667_v57 }
 0x1d0   :  { %10321 = vmatpush.bf16.msra.mxu0 %v16642_v60  ;;  %v10095_v20 = vpop.f32.mrf.mxu2  ;;  %v16680_v60 = vld [vmem:[%s21020_s1 + $0xf50] sm:$0xff] }
 0x1d1   :  { %10334 = vmatpush.bf16.msra.mxu1 %v16650_v61  ;;  %v10108_v21 = vpop.f32.mrf.mxu3  ;;  %v16716_v20 = vld [vmem:[%s21020_s1 + $0x1070] sm:$0xff] }
 0x1d2   :  { %10347 = vmatpush.bf16.msra.mxu2 %v16658_v63  ;;  %v16696_v63 = vld [vmem:[%s21020_s1 + $0xfd0] sm:$0xff] }
 0x1d3   :  { %10360 = vmatpush.bf16.msra.mxu3 %v16666_v0  ;;  %v16671_v0 = vld [vmem:[%s21020_s1 + $0xf08] sm:$0xff]  ;;  %v16724_v21 = vld [vmem:[%s21020_s1 + $0x10b0] sm:$0xff] }
 0x1d4   :  { %10322 = vmatpush.bf16.msra.mxu0 %v16641_v2  ;;  %v16687_v2 = vld [vmem:[%s21020_s1 + $0xf88] sm:$0xff] }
 0x1d5   :  { %10335 = vmatpush.bf16.msra.mxu1 %v16649_v3  ;;  %v16695_v3 = vld [vmem:[%s21020_s1 + $0xfc8] sm:$0xff] }
 0x1d6   :  { %10348 = vmatpush.bf16.msra.mxu2 %v16657_v4  ;;  %v2430_v4 = vld [vmem:[#allocation1 + $0x24] sm:$0xff] }
 0x1d7   :  { %10361 = vmatpush.bf16.msra.mxu3 %v16665_v5  ;;  %v2432_v5 = vld [vmem:[#allocation1 + $0x36] sm:$0xff] }
 0x1d8   :  { %10323 = vmatpush.bf16.msra.mxu0 %v16640_v11  ;;  %v16670_v11 = vld [vmem:[%s21020_s1 + $0xf00] sm:$0xff] }
 0x1d9   :  { %10336 = vmatpush.bf16.msra.mxu1 %v16648_v12  ;;  %v16678_v12 = vld [vmem:[%s21020_s1 + $0xf40] sm:$0xff] }
 0x1da   :  { %10349 = vmatpush.bf16.msra.mxu2 %v16656_v14  ;;  %v16694_v14 = vld [vmem:[%s21020_s1 + $0xfc0] sm:$0xff] }
 0x1db   :  { %10362 = vmatpush.bf16.msra.mxu3 %v16664_v15  ;;  %v16709_v15 = vld [vmem:[%s21020_s1 + $0x1038] sm:$0xff] }
 0x1dc   :  { %10324 = vmatpush.bf16.msra.mxu0 %v16639_v16  ;;  %v16717_v16 = vld [vmem:[%s21020_s1 + $0x1078] sm:$0xff] }
 0x1dd   :  { %10337 = vmatpush.bf16.msra.mxu1 %v16647_v17  ;;  %v16725_v17 = vld [vmem:[%s21020_s1 + $0x10b8] sm:$0xff] }
 0x1de   :  { %10350 = vmatpush.bf16.msra.mxu2 %v16655_v18  ;;  %v16733_v18 = vld [vmem:[%s21020_s1 + $0x10f8] sm:$0xff] }
 0x1df   :  { %10363 = vmatpush.bf16.msra.mxu3 %v16663_v19  ;;  %v16708_v19 = vld [vmem:[%s21020_s1 + $0x1030] sm:$0xff] }
 0x1e0   :  { %10325 = vmatpush.bf16.msra.mxu0 %v16638_v22  ;;  %v10119_v42 = vpop.f32.mrf.mxu0  ;;  %v16732_v22 = vld [vmem:[%s21020_s1 + $0x10f0] sm:$0xff] }
 0x1e1   :  { %10338 = vmatpush.bf16.msra.mxu1 %v16646_v23  ;;  %v10120_v43 = vadd.f32 %v10119_v42, %v10107_v10  ;;  %v10132_v46 = vpop.f32.mrf.mxu1  ;;  %v36_v10 = vld [vmem:[%s21019_s0 + $0x40] sm:$0xff]  ;;  %v16707_v23 = vld [vmem:[%s21020_s1 + $0x1028] sm:$0xff] }
 0x1e2   :  { %10351 = vmatpush.bf16.msra.mxu2 %v16654_v24  ;;  %2435 = vst [vmem:[#allocation1] ss:$9 sm:$0xff] %v36_v10  ;;  %v16715_v24 = vld [vmem:[%s21020_s1 + $0x1068] sm:$0xff] }
 0x1e3   :  { %10364 = vmatpush.bf16.msra.mxu3 %v16662_v25  ;;  %10326 = vmatmul.bf16.vlgmr.msra.gmra.mxu0 %v2426_v30  ;;  %v10133_v49 = vadd.f32 %v10132_v46, %v10120_v43  ;;  %v16723_v25 = vld [vmem:[%s21020_s1 + $0x10a8] sm:$0xff]  ;;  %v16714_v30 = vld [vmem:[%s21020_s1 + $0x1060] sm:$0xff] }
 0x1e4   :  { %10370 = vmatpush.bf16.msrb.mxu0 %v16677_v26  ;;  %10339 = vmatmul.bf16.vlgmr.msra.gmra.mxu1 %v2427_v32  ;;  %v16731_v26 = vld [vmem:[%s21020_s1 + $0x10e8] sm:$0xff]  ;;  %v16722_v32 = vld [vmem:[%s21020_s1 + $0x10a0] sm:$0xff] }
 0x1e5   :  { %10383 = vmatpush.bf16.msrb.mxu1 %v16685_v27  ;;  %10352 = vmatmul.bf16.vlgmr.msra.gmra.mxu2 %v2428_v31  ;;  %v16763_v10 = vld [vmem:[%s21020_s1 + $0x11e8] sm:$0xff] }
 0x1e6   :  { %10396 = vmatpush.bf16.msrb.mxu2 %v16693_v28  ;;  %10365 = vmatmul.bf16.vlgmr.msra.gmra.mxu3 %v2429_v33  ;;  %v16730_v33 = vld [vmem:[%s21020_s1 + $0x10e0] sm:$0xff] }
 0x1e7   :  { %10409 = vmatpush.bf16.msrb.mxu3 %v16701_v29  ;;  %v16706_v29 = vld [vmem:[%s21020_s1 + $0x1020] sm:$0xff] }
 0x1e8   :  { %10371 = vmatpush.bf16.msrb.mxu0 %v16676_v34  ;;  %v10145_v54 = vpop.f32.mrf.mxu2  ;;  %v10121_v57 = vpop.f32.mrf.mxu0 }
 0x1e9   :  { %10384 = vmatpush.bf16.msrb.mxu1 %v16684_v35  ;;  %v10146_v55 = vadd.f32 %v10145_v54, %v10133_v49  ;;  %v10158_v56 = vpop.f32.mrf.mxu3  ;;  %v10134_v61 = vpop.f32.mrf.mxu1  ;;  %v16705_v35 = vld [vmem:[%s21020_s1 + $0x1018] sm:$0xff]  ;;  %v16703_v49 = vld [vmem:[%s21020_s1 + $0x1008] sm:$0xff]  ;;  %v16718_v57 = vld [vmem:[%s21020_s1 + $0x1080] sm:$0xff] }
 0x1ea   :  { %10397 = vmatpush.bf16.msrb.mxu2 %v16692_v36  ;;  %v16713_v36 = vld [vmem:[%s21020_s1 + $0x1058] sm:$0xff] }
 0x1eb   :  { %10410 = vmatpush.bf16.msrb.mxu3 %v16700_v37  ;;  %v18961_v58 = vadd.f32 %v10158_v56, %v10146_v55  ;;  %v16721_v37 = vld [vmem:[%s21020_s1 + $0x1098] sm:$0xff]  ;;  %v16702_v55 = vld [vmem:[%s21020_s1 + $0x1000] sm:$0xff] }
 0x1ec   :  { %10372 = vmatpush.bf16.msrb.mxu0 %v16675_v38  ;;  %v16729_v38 = vld [vmem:[%s21020_s1 + $0x10d8] sm:$0xff]  ;;  %v16710_v56 = vld [vmem:[%s21020_s1 + $0x1040] sm:$0xff] }
 0x1ed   :  { %10385 = vmatpush.bf16.msrb.mxu1 %v16683_v39  ;;  %v16757_v61 = vld [vmem:[%s21020_s1 + $0x11b8] sm:$0xff] }
 0x1ee   :  { %10398 = vmatpush.bf16.msrb.mxu2 %v16691_v40 }
 0x1ef   :  { %10411 = vmatpush.bf16.msrb.mxu3 %v16699_v41 }
 0x1f0   :  { %10373 = vmatpush.bf16.msrb.mxu0 %v16674_v44  ;;  %v10147_v6 = vpop.f32.mrf.mxu2  ;;  %v16704_v44 = vld [vmem:[%s21020_s1 + $0x1010] sm:$0xff] }
 0x1f1   :  { %10386 = vmatpush.bf16.msrb.mxu1 %v16682_v45  ;;  %v10160_v9 = vpop.f32.mrf.mxu3  ;;  %v16712_v45 = vld [vmem:[%s21020_s1 + $0x1050] sm:$0xff] }
 0x1f2   :  { %10399 = vmatpush.bf16.msrb.mxu2 %v16690_v47  ;;  %v16720_v47 = vld [vmem:[%s21020_s1 + $0x1090] sm:$0xff]  ;;  %v16755_v9 = vld [vmem:[%s21020_s1 + $0x11a8] sm:$0xff] }
 0x1f3   :  { %10412 = vmatpush.bf16.msrb.mxu3 %v16698_v48  ;;  %v16728_v48 = vld [vmem:[%s21020_s1 + $0x10d0] sm:$0xff] }
 0x1f4   :  { %10374 = vmatpush.bf16.msrb.mxu0 %v16673_v50  ;;  %v16711_v50 = vld [vmem:[%s21020_s1 + $0x1048] sm:$0xff]  ;;  %v16764_v6 = vld [vmem:[%s21020_s1 + $0x11f0] sm:$0xff] }
 0x1f5   :  { %10387 = vmatpush.bf16.msrb.mxu1 %v16681_v51  ;;  %v16719_v51 = vld [vmem:[%s21020_s1 + $0x1088] sm:$0xff] }
 0x1f6   :  { %10400 = vmatpush.bf16.msrb.mxu2 %v16689_v52  ;;  %v16727_v52 = vld [vmem:[%s21020_s1 + $0x10c8] sm:$0xff] }
 0x1f7   :  { %10413 = vmatpush.bf16.msrb.mxu3 %v16697_v53 }
 0x1f8   :  { %10375 = vmatpush.bf16.msrb.mxu0 %v16672_v59  ;;  %v16741_v59 = vld [vmem:[%s21020_s1 + $0x1138] sm:$0xff] }
 0x1f9   :  { %10388 = vmatpush.bf16.msrb.mxu1 %v16680_v60  ;;  %v16749_v60 = vld [vmem:[%s21020_s1 + $0x1178] sm:$0xff] }
 0x1fa   :  { %10401 = vmatpush.bf16.msrb.mxu2 %v16688_v62  ;;  %v16765_v62 = vld [vmem:[%s21020_s1 + $0x11f8] sm:$0xff] }
 0x1fb   :  { %10414 = vmatpush.bf16.msrb.mxu3 %v16696_v63  ;;  %v2436_v63 = vld [vmem:[#allocation1] sm:$0xff] }
 0x1fc   :  { %10376 = vmatpush.bf16.msrb.mxu0 %v16671_v0  ;;  %v2438_v0 = vld [vmem:[#allocation1 + $0x12] sm:$0xff] }
 0x1fd   :  { %10389 = vmatpush.bf16.msrb.mxu1 %v16679_v1  ;;  %v2437_v1 = vld [vmem:[#allocation1 + $0x9] sm:$0xff] }
 0x1fe   :  { %10402 = vmatpush.bf16.msrb.mxu2 %v16687_v2  ;;  %v2439_v2 = vld [vmem:[#allocation1 + $0x1b] sm:$0xff] }
 0x1ff   :  { %10415 = vmatpush.bf16.msrb.mxu3 %v16695_v3  ;;  %v16740_v3 = vld [vmem:[%s21020_s1 + $0x1130] sm:$0xff] }
 0x200   :  { %10377 = vmatpush.bf16.msrb.mxu0 %v16670_v11  ;;  %v10171_v27 = vpop.f32.mrf.mxu0 }
 0x201   :  { %10390 = vmatpush.bf16.msrb.mxu1 %v16678_v12  ;;  %v10172_v28 = vadd.f32 %v10171_v27, %v18961_v58  ;;  %v10184_v31 = vpop.f32.mrf.mxu1  ;;  %v16726_v58 = vld [vmem:[%s21020_s1 + $0x10c0] sm:$0xff] }
 0x202   :  { %10403 = vmatpush.bf16.msrb.mxu2 %v16686_v13  ;;  %v16738_v13 = vld [vmem:[%s21020_s1 + $0x1120] sm:$0xff] }
 0x203   :  { %10416 = vmatpush.bf16.msrb.mxu3 %v16694_v14  ;;  %10378 = vmatmul.bf16.vlgmr.msrb.gmra.mxu0 %v2430_v4  ;;  %v10185_v34 = vadd.f32 %v10184_v31, %v10172_v28  ;;  %v16748_v4 = vld [vmem:[%s21020_s1 + $0x1170] sm:$0xff]  ;;  %v16746_v14 = vld [vmem:[%s21020_s1 + $0x1160] sm:$0xff] }
 0x204   :  { %10422 = vmatpush.bf16.msra.mxu0 %v16709_v15  ;;  %10391 = vmatmul.bf16.vlgmr.msrb.gmra.mxu1 %v2431_v7  ;;  %v16739_v7 = vld [vmem:[%s21020_s1 + $0x1128] sm:$0xff]  ;;  %v16736_v28 = vld [vmem:[%s21020_s1 + $0x1110] sm:$0xff] }
 0x205   :  { %10435 = vmatpush.bf16.msra.mxu1 %v16717_v16  ;;  %10404 = vmatmul.bf16.vlgmr.msrb.gmra.mxu2 %v2432_v5  ;;  %v16756_v5 = vld [vmem:[%s21020_s1 + $0x11b0] sm:$0xff]  ;;  %v16754_v16 = vld [vmem:[%s21020_s1 + $0x11a0] sm:$0xff] }
 0x206   :  { %10448 = vmatpush.bf16.msra.mxu2 %v16725_v17  ;;  %10417 = vmatmul.bf16.vlgmr.msrb.gmra.mxu3 %v2433_v8  ;;  %v16747_v8 = vld [vmem:[%s21020_s1 + $0x1168] sm:$0xff]  ;;  %v16762_v17 = vld [vmem:[%s21020_s1 + $0x11e0] sm:$0xff]  ;;  %v16752_v31 = vld [vmem:[%s21020_s1 + $0x1190] sm:$0xff] }
 0x207   :  { %10461 = vmatpush.bf16.msra.mxu3 %v16733_v18 }
 0x208   :  { %10423 = vmatpush.bf16.msra.mxu0 %v16708_v19  ;;  %v10197_v39 = vpop.f32.mrf.mxu2  ;;  %v10173_v42 = vpop.f32.mrf.mxu0  ;;  %v16737_v19 = vld [vmem:[%s21020_s1 + $0x1118] sm:$0xff] }
 0x209   :  { %10436 = vmatpush.bf16.msra.mxu1 %v16716_v20  ;;  %v10198_v40 = vadd.f32 %v10197_v39, %v10185_v34  ;;  %v10210_v41 = vpop.f32.mrf.mxu3  ;;  %v10186_v46 = vpop.f32.mrf.mxu1  ;;  %v16745_v20 = vld [vmem:[%s21020_s1 + $0x1158] sm:$0xff]  ;;  %v16743_v34 = vld [vmem:[%s21020_s1 + $0x1148] sm:$0xff] }
 0x20a   :  { %10449 = vmatpush.bf16.msra.mxu2 %v16724_v21  ;;  %v16753_v21 = vld [vmem:[%s21020_s1 + $0x1198] sm:$0xff]  ;;  %v16750_v46 = vld [vmem:[%s21020_s1 + $0x1180] sm:$0xff] }
 0x20b   :  { %10462 = vmatpush.bf16.msra.mxu3 %v16732_v22  ;;  %v10211_v43 = vadd.f32 %v10210_v41, %v10198_v40  ;;  %v16761_v22 = vld [vmem:[%s21020_s1 + $0x11d8] sm:$0xff]  ;;  %v2441_v40 = vld [vmem:[#allocation1 + $0x2d] sm:$0xff] }
 0x20c   :  { %10424 = vmatpush.bf16.msra.mxu0 %v16707_v23  ;;  %v2443_v41 = vld [vmem:[#allocation1 + $0x3f] sm:$0xff] }
 0x20d   :  { %10437 = vmatpush.bf16.msra.mxu1 %v16715_v24 }
 0x20e   :  { %10450 = vmatpush.bf16.msra.mxu2 %v16723_v25 }
 0x20f   :  { %10463 = vmatpush.bf16.msra.mxu3 %v16731_v26 }
 0x210   :  { %10425 = vmatpush.bf16.msra.mxu0 %v16706_v29  ;;  %v10199_v53 = vpop.f32.mrf.mxu2  ;;  %v16744_v29 = vld [vmem:[%s21020_s1 + $0x1150] sm:$0xff] }
 0x211   :  { %10438 = vmatpush.bf16.msra.mxu1 %v16714_v30  ;;  %v10212_v54 = vpop.f32.mrf.mxu3  ;;  %v16780_v53 = vld [vmem:[%s21020_s1 + $0x1270] sm:$0xff] }
 0x212   :  { %10451 = vmatpush.bf16.msra.mxu2 %v16722_v32  ;;  %v16760_v32 = vld [vmem:[%s21020_s1 + $0x11d0] sm:$0xff] }
 0x213   :  { %10464 = vmatpush.bf16.msra.mxu3 %v16730_v33  ;;  %v16735_v33 = vld [vmem:[%s21020_s1 + $0x1108] sm:$0xff]  ;;  %v16788_v54 = vld [vmem:[%s21020_s1 + $0x12b0] sm:$0xff] }
 0x214   :  { %10426 = vmatpush.bf16.msra.mxu0 %v16705_v35  ;;  %v16751_v35 = vld [vmem:[%s21020_s1 + $0x1188] sm:$0xff] }
 0x215   :  { %10439 = vmatpush.bf16.msra.mxu1 %v16713_v36  ;;  %v16759_v36 = vld [vmem:[%s21020_s1 + $0x11c8] sm:$0xff] }
 0x216   :  { %10452 = vmatpush.bf16.msra.mxu2 %v16721_v37  ;;  %v2440_v37 = vld [vmem:[#allocation1 + $0x24] sm:$0xff] }
 0x217   :  { %10465 = vmatpush.bf16.msra.mxu3 %v16729_v38  ;;  %v2442_v38 = vld [vmem:[#allocation1 + $0x36] sm:$0xff] }
 0x218   :  { %10427 = vmatpush.bf16.msra.mxu0 %v16704_v44  ;;  %v16734_v44 = vld [vmem:[%s21020_s1 + $0x1100] sm:$0xff] }
 0x219   :  { %10440 = vmatpush.bf16.msra.mxu1 %v16712_v45  ;;  %v16742_v45 = vld [vmem:[%s21020_s1 + $0x1140] sm:$0xff] }
 0x21a   :  { %10453 = vmatpush.bf16.msra.mxu2 %v16720_v47  ;;  %v16758_v47 = vld [vmem:[%s21020_s1 + $0x11c0] sm:$0xff] }
 0x21b   :  { %10466 = vmatpush.bf16.msra.mxu3 %v16728_v48  ;;  %v16773_v48 = vld [vmem:[%s21020_s1 + $0x1238] sm:$0xff] }
 0x21c   :  { %10428 = vmatpush.bf16.msra.mxu0 %v16703_v49  ;;  %v16781_v49 = vld [vmem:[%s21020_s1 + $0x1278] sm:$0xff] }
 0x21d   :  { %10441 = vmatpush.bf16.msra.mxu1 %v16711_v50  ;;  %v16789_v50 = vld [vmem:[%s21020_s1 + $0x12b8] sm:$0xff] }
 0x21e   :  { %10454 = vmatpush.bf16.msra.mxu2 %v16719_v51  ;;  %v16797_v51 = vld [vmem:[%s21020_s1 + $0x12f8] sm:$0xff] }
 0x21f   :  { %10467 = vmatpush.bf16.msra.mxu3 %v16727_v52  ;;  %v16772_v52 = vld [vmem:[%s21020_s1 + $0x1230] sm:$0xff] }
 0x220   :  { %10429 = vmatpush.bf16.msra.mxu0 %v16702_v55  ;;  %v10223_v11 = vpop.f32.mrf.mxu0  ;;  %v16796_v55 = vld [vmem:[%s21020_s1 + $0x12f0] sm:$0xff] }
 0x221   :  { %10442 = vmatpush.bf16.msra.mxu1 %v16710_v56  ;;  %v10224_v12 = vadd.f32 %v10223_v11, %v10211_v43  ;;  %v10236_v15 = vpop.f32.mrf.mxu1  ;;  %v37_v43 = vld [vmem:[%s21019_s0 + $0x48] sm:$0xff] }
 0x222   :  { %10455 = vmatpush.bf16.msra.mxu2 %v16718_v57  ;;  %2445 = vst [vmem:[#allocation1] ss:$9 sm:$0xff] %v37_v43  ;;  %v16771_v56 = vld [vmem:[%s21020_s1 + $0x1228] sm:$0xff] }
 0x223   :  { %10468 = vmatpush.bf16.msra.mxu3 %v16726_v58  ;;  %10430 = vmatmul.bf16.vlgmr.msra.gmra.mxu0 %v2436_v63  ;;  %v10237_v18 = vadd.f32 %v10236_v15, %v10224_v12  ;;  %v16779_v57 = vld [vmem:[%s21020_s1 + $0x1268] sm:$0xff]  ;;  %v16778_v63 = vld [vmem:[%s21020_s1 + $0x1260] sm:$0xff] }
 0x224   :  { %10474 = vmatpush.bf16.msrb.mxu0 %v16741_v59  ;;  %10443 = vmatmul.bf16.vlgmr.msra.gmra.mxu1 %v2437_v1  ;;  %v16787_v58 = vld [vmem:[%s21020_s1 + $0x12a8] sm:$0xff]  ;;  %v16786_v1 = vld [vmem:[%s21020_s1 + $0x12a0] sm:$0xff] }
 0x225   :  { %10487 = vmatpush.bf16.msrb.mxu1 %v16749_v60  ;;  %10456 = vmatmul.bf16.vlgmr.msra.gmra.mxu2 %v2438_v0  ;;  %v16795_v59 = vld [vmem:[%s21020_s1 + $0x12e8] sm:$0xff] }
 0x226   :  { %10500 = vmatpush.bf16.msrb.mxu2 %v16757_v61  ;;  %10469 = vmatmul.bf16.vlgmr.msra.gmra.mxu3 %v2439_v2  ;;  %v16794_v2 = vld [vmem:[%s21020_s1 + $0x12e0] sm:$0xff]  ;;  %v16827_v43 = vld [vmem:[%s21020_s1 + $0x13e8] sm:$0xff] }
 0x227   :  { %10513 = vmatpush.bf16.msrb.mxu3 %v16765_v62  ;;  %v16770_v62 = vld [vmem:[%s21020_s1 + $0x1220] sm:$0xff] }
 0x228   :  { %10475 = vmatpush.bf16.msrb.mxu0 %v16740_v3  ;;  %v10249_v23 = vpop.f32.mrf.mxu2  ;;  %v10225_v26 = vpop.f32.mrf.mxu0 }
 0x229   :  { %10488 = vmatpush.bf16.msrb.mxu1 %v16748_v4  ;;  %v10250_v24 = vadd.f32 %v10249_v23, %v10237_v18  ;;  %v10262_v25 = vpop.f32.mrf.mxu3  ;;  %v10238_v30 = vpop.f32.mrf.mxu1  ;;  %v16769_v4 = vld [vmem:[%s21020_s1 + $0x1218] sm:$0xff]  ;;  %v16767_v18 = vld [vmem:[%s21020_s1 + $0x1208] sm:$0xff]  ;;  %v16782_v26 = vld [vmem:[%s21020_s1 + $0x1280] sm:$0xff] }
 0x22a   :  { %10501 = vmatpush.bf16.msrb.mxu2 %v16756_v5  ;;  %v16777_v5 = vld [vmem:[%s21020_s1 + $0x1258] sm:$0xff] }
 0x22b   :  { %10514 = vmatpush.bf16.msrb.mxu3 %v16764_v6  ;;  %v19159_v27 = vadd.f32 %v10262_v25, %v10250_v24  ;;  %v16785_v6 = vld [vmem:[%s21020_s1 + $0x1298] sm:$0xff]  ;;  %v16766_v24 = vld [vmem:[%s21020_s1 + $0x1200] sm:$0xff] }
 0x22c   :  { %10476 = vmatpush.bf16.msrb.mxu0 %v16739_v7  ;;  %v16793_v7 = vld [vmem:[%s21020_s1 + $0x12d8] sm:$0xff]  ;;  %v16774_v25 = vld [vmem:[%s21020_s1 + $0x1240] sm:$0xff] }
 0x22d   :  { %10489 = vmatpush.bf16.msrb.mxu1 %v16747_v8  ;;  %v16821_v30 = vld [vmem:[%s21020_s1 + $0x13b8] sm:$0xff] }
 0x22e   :  { %10502 = vmatpush.bf16.msrb.mxu2 %v16755_v9 }
 0x22f   :  { %10515 = vmatpush.bf16.msrb.mxu3 %v16763_v10 }
 0x230   :  { %10477 = vmatpush.bf16.msrb.mxu0 %v16738_v13  ;;  %v10251_v39 = vpop.f32.mrf.mxu2  ;;  %v16768_v13 = vld [vmem:[%s21020_s1 + $0x1210] sm:$0xff] }
 0x231   :  { %10490 = vmatpush.bf16.msrb.mxu1 %v16746_v14  ;;  %v10264_v42 = vpop.f32.mrf.mxu3  ;;  %v16776_v14 = vld [vmem:[%s21020_s1 + $0x1250] sm:$0xff] }
 0x232   :  { %10503 = vmatpush.bf16.msrb.mxu2 %v16754_v16  ;;  %v16784_v16 = vld [vmem:[%s21020_s1 + $0x1290] sm:$0xff]  ;;  %v16819_v42 = vld [vmem:[%s21020_s1 + $0x13a8] sm:$0xff] }
 0x233   :  { %10516 = vmatpush.bf16.msrb.mxu3 %v16762_v17  ;;  %v16792_v17 = vld [vmem:[%s21020_s1 + $0x12d0] sm:$0xff] }
 0x234   :  { %10478 = vmatpush.bf16.msrb.mxu0 %v16737_v19  ;;  %v16775_v19 = vld [vmem:[%s21020_s1 + $0x1248] sm:$0xff]  ;;  %v16828_v39 = vld [vmem:[%s21020_s1 + $0x13f0] sm:$0xff] }
 0x235   :  { %10491 = vmatpush.bf16.msrb.mxu1 %v16745_v20  ;;  %v16783_v20 = vld [vmem:[%s21020_s1 + $0x1288] sm:$0xff] }
 0x236   :  { %10504 = vmatpush.bf16.msrb.mxu2 %v16753_v21  ;;  %v16791_v21 = vld [vmem:[%s21020_s1 + $0x12c8] sm:$0xff] }
 0x237   :  { %10517 = vmatpush.bf16.msrb.mxu3 %v16761_v22 }
 0x238   :  { %10479 = vmatpush.bf16.msrb.mxu0 %v16736_v28  ;;  %v16805_v28 = vld [vmem:[%s21020_s1 + $0x1338] sm:$0xff] }
 0x239   :  { %10492 = vmatpush.bf16.msrb.mxu1 %v16744_v29  ;;  %v16813_v29 = vld [vmem:[%s21020_s1 + $0x1378] sm:$0xff] }
 0x23a   :  { %10505 = vmatpush.bf16.msrb.mxu2 %v16752_v31  ;;  %v16829_v31 = vld [vmem:[%s21020_s1 + $0x13f8] sm:$0xff] }
 0x23b   :  { %10518 = vmatpush.bf16.msrb.mxu3 %v16760_v32  ;;  %v2446_v32 = vld [vmem:[#allocation1] sm:$0xff] }
 0x23c   :  { %10480 = vmatpush.bf16.msrb.mxu0 %v16735_v33  ;;  %v2448_v33 = vld [vmem:[#allocation1 + $0x12] sm:$0xff] }
 0x23d   :  { %10493 = vmatpush.bf16.msrb.mxu1 %v16743_v34  ;;  %v2447_v34 = vld [vmem:[#allocation1 + $0x9] sm:$0xff] }
 0x23e   :  { %10506 = vmatpush.bf16.msrb.mxu2 %v16751_v35  ;;  %v2449_v35 = vld [vmem:[#allocation1 + $0x1b] sm:$0xff] }
 0x23f   :  { %10519 = vmatpush.bf16.msrb.mxu3 %v16759_v36  ;;  %v16804_v36 = vld [vmem:[%s21020_s1 + $0x1330] sm:$0xff] }
 0x240   :  { %10481 = vmatpush.bf16.msrb.mxu0 %v16734_v44  ;;  %v10275_v60 = vpop.f32.mrf.mxu0 }
 0x241   :  { %10494 = vmatpush.bf16.msrb.mxu1 %v16742_v45  ;;  %v10276_v61 = vadd.f32 %v10275_v60, %v19159_v27  ;;  %v10288_v0 = vpop.f32.mrf.mxu1  ;;  %v16790_v27 = vld [vmem:[%s21020_s1 + $0x12c0] sm:$0xff] }
 0x242   :  { %10507 = vmatpush.bf16.msrb.mxu2 %v16750_v46  ;;  %v16802_v46 = vld [vmem:[%s21020_s1 + $0x1320] sm:$0xff] }
 0x243   :  { %10520 = vmatpush.bf16.msrb.mxu3 %v16758_v47  ;;  %10482 = vmatmul.bf16.vlgmr.msrb.gmra.mxu0 %v2440_v37  ;;  %v10289_v3 = vadd.f32 %v10288_v0, %v10276_v61  ;;  %v16812_v37 = vld [vmem:[%s21020_s1 + $0x1370] sm:$0xff]  ;;  %v16810_v47 = vld [vmem:[%s21020_s1 + $0x1360] sm:$0xff] }
 0x244   :  { %10526 = vmatpush.bf16.msra.mxu0 %v16773_v48  ;;  %10495 = vmatmul.bf16.vlgmr.msrb.gmra.mxu1 %v2441_v40  ;;  %v16803_v40 = vld [vmem:[%s21020_s1 + $0x1328] sm:$0xff]  ;;  %v16800_v61 = vld [vmem:[%s21020_s1 + $0x1310] sm:$0xff] }
 0x245   :  { %10539 = vmatpush.bf16.msra.mxu1 %v16781_v49  ;;  %10508 = vmatmul.bf16.vlgmr.msrb.gmra.mxu2 %v2442_v38  ;;  %v16820_v38 = vld [vmem:[%s21020_s1 + $0x13b0] sm:$0xff]  ;;  %v16818_v49 = vld [vmem:[%s21020_s1 + $0x13a0] sm:$0xff] }
 0x246   :  { %10552 = vmatpush.bf16.msra.mxu2 %v16789_v50  ;;  %10521 = vmatmul.bf16.vlgmr.msrb.gmra.mxu3 %v2443_v41  ;;  %v16811_v41 = vld [vmem:[%s21020_s1 + $0x1368] sm:$0xff]  ;;  %v16826_v50 = vld [vmem:[%s21020_s1 + $0x13e0] sm:$0xff]  ;;  %v16816_v0 = vld [vmem:[%s21020_s1 + $0x1390] sm:$0xff] }
 0x247   :  { %10565 = vmatpush.bf16.msra.mxu3 %v16797_v51 }
 0x248   :  { %10527 = vmatpush.bf16.msra.mxu0 %v16772_v52  ;;  %v10301_v8 = vpop.f32.mrf.mxu2  ;;  %v10277_v11 = vpop.f32.mrf.mxu0  ;;  %v16801_v52 = vld [vmem:[%s21020_s1 + $0x1318] sm:$0xff] }
 0x249   :  { %10540 = vmatpush.bf16.msra.mxu1 %v16780_v53  ;;  %v10302_v9 = vadd.f32 %v10301_v8, %v10289_v3  ;;  %v10314_v10 = vpop.f32.mrf.mxu3  ;;  %v10290_v15 = vpop.f32.mrf.mxu1  ;;  %v16809_v53 = vld [vmem:[%s21020_s1 + $0x1358] sm:$0xff]  ;;  %v16807_v3 = vld [vmem:[%s21020_s1 + $0x1348] sm:$0xff] }
 0x24a   :  { %10553 = vmatpush.bf16.msra.mxu2 %v16788_v54  ;;  %v16817_v54 = vld [vmem:[%s21020_s1 + $0x1398] sm:$0xff]  ;;  %v16814_v15 = vld [vmem:[%s21020_s1 + $0x1380] sm:$0xff] }
 0x24b   :  { %10566 = vmatpush.bf16.msra.mxu3 %v16796_v55  ;;  %v10315_v12 = vadd.f32 %v10314_v10, %v10302_v9  ;;  %v16825_v55 = vld [vmem:[%s21020_s1 + $0x13d8] sm:$0xff]  ;;  %v2451_v9 = vld [vmem:[#allocation1 + $0x2d] sm:$0xff] }
 0x24c   :  { %10528 = vmatpush.bf16.msra.mxu0 %v16771_v56  ;;  %v2453_v10 = vld [vmem:[#allocation1 + $0x3f] sm:$0xff] }
 0x24d   :  { %10541 = vmatpush.bf16.msra.mxu1 %v16779_v57 }
 0x24e   :  { %10554 = vmatpush.bf16.msra.mxu2 %v16787_v58 }
 0x24f   :  { %10567 = vmatpush.bf16.msra.mxu3 %v16795_v59 }
 0x250   :  { %10529 = vmatpush.bf16.msra.mxu0 %v16770_v62  ;;  %v10303_v22 = vpop.f32.mrf.mxu2  ;;  %v16808_v62 = vld [vmem:[%s21020_s1 + $0x1350] sm:$0xff] }
 0x251   :  { %10542 = vmatpush.bf16.msra.mxu1 %v16778_v63  ;;  %v10316_v23 = vpop.f32.mrf.mxu3  ;;  %v16844_v22 = vld [vmem:[%s21020_s1 + $0x1470] sm:$0xff] }
 0x252   :  { %10555 = vmatpush.bf16.msra.mxu2 %v16786_v1  ;;  %v16824_v1 = vld [vmem:[%s21020_s1 + $0x13d0] sm:$0xff] }
 0x253   :  { %10568 = vmatpush.bf16.msra.mxu3 %v16794_v2  ;;  %v16799_v2 = vld [vmem:[%s21020_s1 + $0x1308] sm:$0xff]  ;;  %v16852_v23 = vld [vmem:[%s21020_s1 + $0x14b0] sm:$0xff] }
 0x254   :  { %10530 = vmatpush.bf16.msra.mxu0 %v16769_v4  ;;  %v16815_v4 = vld [vmem:[%s21020_s1 + $0x1388] sm:$0xff] }
 0x255   :  { %10543 = vmatpush.bf16.msra.mxu1 %v16777_v5  ;;  %v16823_v5 = vld [vmem:[%s21020_s1 + $0x13c8] sm:$0xff] }
 0x256   :  { %10556 = vmatpush.bf16.msra.mxu2 %v16785_v6  ;;  %v2450_v6 = vld [vmem:[#allocation1 + $0x24] sm:$0xff] }
 0x257   :  { %10569 = vmatpush.bf16.msra.mxu3 %v16793_v7  ;;  %v2452_v7 = vld [vmem:[#allocation1 + $0x36] sm:$0xff] }
 0x258   :  { %10531 = vmatpush.bf16.msra.mxu0 %v16768_v13  ;;  %v16798_v13 = vld [vmem:[%s21020_s1 + $0x1300] sm:$0xff] }
 0x259   :  { %10544 = vmatpush.bf16.msra.mxu1 %v16776_v14  ;;  %v16806_v14 = vld [vmem:[%s21020_s1 + $0x1340] sm:$0xff] }
 0x25a   :  { %10557 = vmatpush.bf16.msra.mxu2 %v16784_v16  ;;  %v16822_v16 = vld [vmem:[%s21020_s1 + $0x13c0] sm:$0xff] }
 0x25b   :  { %10570 = vmatpush.bf16.msra.mxu3 %v16792_v17  ;;  %v16837_v17 = vld [vmem:[%s21020_s1 + $0x1438] sm:$0xff] }
 0x25c   :  { %10532 = vmatpush.bf16.msra.mxu0 %v16767_v18  ;;  %v16845_v18 = vld [vmem:[%s21020_s1 + $0x1478] sm:$0xff] }
 0x25d   :  { %10545 = vmatpush.bf16.msra.mxu1 %v16775_v19  ;;  %v16853_v19 = vld [vmem:[%s21020_s1 + $0x14b8] sm:$0xff] }
 0x25e   :  { %10558 = vmatpush.bf16.msra.mxu2 %v16783_v20  ;;  %v16861_v20 = vld [vmem:[%s21020_s1 + $0x14f8] sm:$0xff] }
 0x25f   :  { %10571 = vmatpush.bf16.msra.mxu3 %v16791_v21  ;;  %v16836_v21 = vld [vmem:[%s21020_s1 + $0x1430] sm:$0xff] }
 0x260   :  { %10533 = vmatpush.bf16.msra.mxu0 %v16766_v24  ;;  %v10327_v44 = vpop.f32.mrf.mxu0  ;;  %v16860_v24 = vld [vmem:[%s21020_s1 + $0x14f0] sm:$0xff] }
 0x261   :  { %10546 = vmatpush.bf16.msra.mxu1 %v16774_v25  ;;  %v10328_v45 = vadd.f32 %v10327_v44, %v10315_v12  ;;  %v10340_v48 = vpop.f32.mrf.mxu1  ;;  %v38_v12 = vld [vmem:[%s21019_s0 + $0x50] sm:$0xff]  ;;  %v16835_v25 = vld [vmem:[%s21020_s1 + $0x1428] sm:$0xff] }
 0x262   :  { %10559 = vmatpush.bf16.msra.mxu2 %v16782_v26  ;;  %2455 = vst [vmem:[#allocation1] ss:$9 sm:$0xff] %v38_v12  ;;  %v16843_v26 = vld [vmem:[%s21020_s1 + $0x1468] sm:$0xff] }
 0x263   :  { %10572 = vmatpush.bf16.msra.mxu3 %v16790_v27  ;;  %10534 = vmatmul.bf16.vlgmr.msra.gmra.mxu0 %v2446_v32  ;;  %v10341_v51 = vadd.f32 %v10340_v48, %v10328_v45  ;;  %v16851_v27 = vld [vmem:[%s21020_s1 + $0x14a8] sm:$0xff]  ;;  %v16842_v32 = vld [vmem:[%s21020_s1 + $0x1460] sm:$0xff] }
 0x264   :  { %10578 = vmatpush.bf16.msrb.mxu0 %v16805_v28  ;;  %10547 = vmatmul.bf16.vlgmr.msra.gmra.mxu1 %v2447_v34  ;;  %v16859_v28 = vld [vmem:[%s21020_s1 + $0x14e8] sm:$0xff]  ;;  %v16850_v34 = vld [vmem:[%s21020_s1 + $0x14a0] sm:$0xff] }
 0x265   :  { %10591 = vmatpush.bf16.msrb.mxu1 %v16813_v29  ;;  %10560 = vmatmul.bf16.vlgmr.msra.gmra.mxu2 %v2448_v33  ;;  %v16891_v12 = vld [vmem:[%s21020_s1 + $0x15e8] sm:$0xff] }
 0x266   :  { %10604 = vmatpush.bf16.msrb.mxu2 %v16821_v30  ;;  %10573 = vmatmul.bf16.vlgmr.msra.gmra.mxu3 %v2449_v35  ;;  %v16858_v35 = vld [vmem:[%s21020_s1 + $0x14e0] sm:$0xff] }
 0x267   :  { %10617 = vmatpush.bf16.msrb.mxu3 %v16829_v31  ;;  %v16834_v31 = vld [vmem:[%s21020_s1 + $0x1420] sm:$0xff] }
 0x268   :  { %10579 = vmatpush.bf16.msrb.mxu0 %v16804_v36  ;;  %v10353_v56 = vpop.f32.mrf.mxu2  ;;  %v10329_v59 = vpop.f32.mrf.mxu0 }
 0x269   :  { %10592 = vmatpush.bf16.msrb.mxu1 %v16812_v37  ;;  %v10354_v57 = vadd.f32 %v10353_v56, %v10341_v51  ;;  %v10366_v58 = vpop.f32.mrf.mxu3  ;;  %v10342_v63 = vpop.f32.mrf.mxu1  ;;  %v16833_v37 = vld [vmem:[%s21020_s1 + $0x1418] sm:$0xff]  ;;  %v16831_v51 = vld [vmem:[%s21020_s1 + $0x1408] sm:$0xff]  ;;  %v16846_v59 = vld [vmem:[%s21020_s1 + $0x1480] sm:$0xff] }
 0x26a   :  { %10605 = vmatpush.bf16.msrb.mxu2 %v16820_v38  ;;  %v16841_v38 = vld [vmem:[%s21020_s1 + $0x1458] sm:$0xff] }
 0x26b   :  { %10618 = vmatpush.bf16.msrb.mxu3 %v16828_v39  ;;  %v19357_v60 = vadd.f32 %v10366_v58, %v10354_v57  ;;  %v16849_v39 = vld [vmem:[%s21020_s1 + $0x1498] sm:$0xff]  ;;  %v16830_v57 = vld [vmem:[%s21020_s1 + $0x1400] sm:$0xff] }
 0x26c   :  { %10580 = vmatpush.bf16.msrb.mxu0 %v16803_v40  ;;  %v16857_v40 = vld [vmem:[%s21020_s1 + $0x14d8] sm:$0xff]  ;;  %v16838_v58 = vld [vmem:[%s21020_s1 + $0x1440] sm:$0xff] }
 0x26d   :  { %10593 = vmatpush.bf16.msrb.mxu1 %v16811_v41  ;;  %v16885_v63 = vld [vmem:[%s21020_s1 + $0x15b8] sm:$0xff] }
 0x26e   :  { %10606 = vmatpush.bf16.msrb.mxu2 %v16819_v42 }
 0x26f   :  { %10619 = vmatpush.bf16.msrb.mxu3 %v16827_v43 }
 0x270   :  { %10581 = vmatpush.bf16.msrb.mxu0 %v16802_v46  ;;  %v10355_v8 = vpop.f32.mrf.mxu2  ;;  %v16832_v46 = vld [vmem:[%s21020_s1 + $0x1410] sm:$0xff] }
 0x271   :  { %10594 = vmatpush.bf16.msrb.mxu1 %v16810_v47  ;;  %v10368_v11 = vpop.f32.mrf.mxu3  ;;  %v16840_v47 = vld [vmem:[%s21020_s1 + $0x1450] sm:$0xff] }
 0x272   :  { %10607 = vmatpush.bf16.msrb.mxu2 %v16818_v49  ;;  %v16848_v49 = vld [vmem:[%s21020_s1 + $0x1490] sm:$0xff]  ;;  %v16883_v11 = vld [vmem:[%s21020_s1 + $0x15a8] sm:$0xff] }
 0x273   :  { %10620 = vmatpush.bf16.msrb.mxu3 %v16826_v50  ;;  %v16856_v50 = vld [vmem:[%s21020_s1 + $0x14d0] sm:$0xff] }
 0x274   :  { %10582 = vmatpush.bf16.msrb.mxu0 %v16801_v52  ;;  %v16839_v52 = vld [vmem:[%s21020_s1 + $0x1448] sm:$0xff]  ;;  %v16892_v8 = vld [vmem:[%s21020_s1 + $0x15f0] sm:$0xff] }
 0x275   :  { %10595 = vmatpush.bf16.msrb.mxu1 %v16809_v53  ;;  %v16847_v53 = vld [vmem:[%s21020_s1 + $0x1488] sm:$0xff] }
 0x276   :  { %10608 = vmatpush.bf16.msrb.mxu2 %v16817_v54  ;;  %v16855_v54 = vld [vmem:[%s21020_s1 + $0x14c8] sm:$0xff] }
 0x277   :  { %10621 = vmatpush.bf16.msrb.mxu3 %v16825_v55 }
 0x278   :  { %10583 = vmatpush.bf16.msrb.mxu0 %v16800_v61  ;;  %v16869_v61 = vld [vmem:[%s21020_s1 + $0x1538] sm:$0xff] }
 0x279   :  { %10596 = vmatpush.bf16.msrb.mxu1 %v16808_v62  ;;  %v16877_v62 = vld [vmem:[%s21020_s1 + $0x1578] sm:$0xff] }
 0x27a   :  { %10609 = vmatpush.bf16.msrb.mxu2 %v16816_v0  ;;  %v16893_v0 = vld [vmem:[%s21020_s1 + $0x15f8] sm:$0xff] }
 0x27b   :  { %10622 = vmatpush.bf16.msrb.mxu3 %v16824_v1  ;;  %v2456_v1 = vld [vmem:[#allocation1] sm:$0xff] }
 0x27c   :  { %10584 = vmatpush.bf16.msrb.mxu0 %v16799_v2  ;;  %v2458_v2 = vld [vmem:[#allocation1 + $0x12] sm:$0xff] }
 0x27d   :  { %10597 = vmatpush.bf16.msrb.mxu1 %v16807_v3  ;;  %v2457_v3 = vld [vmem:[#allocation1 + $0x9] sm:$0xff] }
 0x27e   :  { %10610 = vmatpush.bf16.msrb.mxu2 %v16815_v4  ;;  %v2459_v4 = vld [vmem:[#allocation1 + $0x1b] sm:$0xff] }
 0x27f   :  { %10623 = vmatpush.bf16.msrb.mxu3 %v16823_v5  ;;  %v16868_v5 = vld [vmem:[%s21020_s1 + $0x1530] sm:$0xff] }
 0x280   :  { %10585 = vmatpush.bf16.msrb.mxu0 %v16798_v13  ;;  %v10379_v29 = vpop.f32.mrf.mxu0 }
 0x281   :  { %10598 = vmatpush.bf16.msrb.mxu1 %v16806_v14  ;;  %v10380_v30 = vadd.f32 %v10379_v29, %v19357_v60  ;;  %v10392_v33 = vpop.f32.mrf.mxu1  ;;  %v16854_v60 = vld [vmem:[%s21020_s1 + $0x14c0] sm:$0xff] }
 0x282   :  { %10611 = vmatpush.bf16.msrb.mxu2 %v16814_v15  ;;  %v16866_v15 = vld [vmem:[%s21020_s1 + $0x1520] sm:$0xff] }
 0x283   :  { %10624 = vmatpush.bf16.msrb.mxu3 %v16822_v16  ;;  %10586 = vmatmul.bf16.vlgmr.msrb.gmra.mxu0 %v2450_v6  ;;  %v10393_v36 = vadd.f32 %v10392_v33, %v10380_v30  ;;  %v16876_v6 = vld [vmem:[%s21020_s1 + $0x1570] sm:$0xff]  ;;  %v16874_v16 = vld [vmem:[%s21020_s1 + $0x1560] sm:$0xff] }
 0x284   :  { %10630 = vmatpush.bf16.msra.mxu0 %v16837_v17  ;;  %10599 = vmatmul.bf16.vlgmr.msrb.gmra.mxu1 %v2451_v9  ;;  %v16867_v9 = vld [vmem:[%s21020_s1 + $0x1528] sm:$0xff]  ;;  %v16864_v30 = vld [vmem:[%s21020_s1 + $0x1510] sm:$0xff] }
 0x285   :  { %10643 = vmatpush.bf16.msra.mxu1 %v16845_v18  ;;  %10612 = vmatmul.bf16.vlgmr.msrb.gmra.mxu2 %v2452_v7  ;;  %v16884_v7 = vld [vmem:[%s21020_s1 + $0x15b0] sm:$0xff]  ;;  %v16882_v18 = vld [vmem:[%s21020_s1 + $0x15a0] sm:$0xff] }
 0x286   :  { %10656 = vmatpush.bf16.msra.mxu2 %v16853_v19  ;;  %10625 = vmatmul.bf16.vlgmr.msrb.gmra.mxu3 %v2453_v10  ;;  %v16875_v10 = vld [vmem:[%s21020_s1 + $0x1568] sm:$0xff]  ;;  %v16890_v19 = vld [vmem:[%s21020_s1 + $0x15e0] sm:$0xff]  ;;  %v16880_v33 = vld [vmem:[%s21020_s1 + $0x1590] sm:$0xff] }
 0x287   :  { %10669 = vmatpush.bf16.msra.mxu3 %v16861_v20 }
 0x288   :  { %10631 = vmatpush.bf16.msra.mxu0 %v16836_v21  ;;  %v10405_v41 = vpop.f32.mrf.mxu2  ;;  %v10381_v44 = vpop.f32.mrf.mxu0  ;;  %v16865_v21 = vld [vmem:[%s21020_s1 + $0x1518] sm:$0xff] }
 0x289   :  { %10644 = vmatpush.bf16.msra.mxu1 %v16844_v22  ;;  %v10406_v42 = vadd.f32 %v10405_v41, %v10393_v36  ;;  %v10418_v43 = vpop.f32.mrf.mxu3  ;;  %v10394_v48 = vpop.f32.mrf.mxu1  ;;  %v16873_v22 = vld [vmem:[%s21020_s1 + $0x1558] sm:$0xff]  ;;  %v16871_v36 = vld [vmem:[%s21020_s1 + $0x1548] sm:$0xff] }
 0x28a   :  { %10657 = vmatpush.bf16.msra.mxu2 %v16852_v23  ;;  %v16881_v23 = vld [vmem:[%s21020_s1 + $0x1598] sm:$0xff]  ;;  %v16878_v48 = vld [vmem:[%s21020_s1 + $0x1580] sm:$0xff] }
 0x28b   :  { %10670 = vmatpush.bf16.msra.mxu3 %v16860_v24  ;;  %v10419_v45 = vadd.f32 %v10418_v43, %v10406_v42  ;;  %v16889_v24 = vld [vmem:[%s21020_s1 + $0x15d8] sm:$0xff]  ;;  %v2461_v42 = vld [vmem:[#allocation1 + $0x2d] sm:$0xff] }
 0x28c   :  { %10632 = vmatpush.bf16.msra.mxu0 %v16835_v25  ;;  %v2463_v43 = vld [vmem:[#allocation1 + $0x3f] sm:$0xff] }
 0x28d   :  { %10645 = vmatpush.bf16.msra.mxu1 %v16843_v26 }
 0x28e   :  { %10658 = vmatpush.bf16.msra.mxu2 %v16851_v27 }
 0x28f   :  { %10671 = vmatpush.bf16.msra.mxu3 %v16859_v28 }
 0x290   :  { %10633 = vmatpush.bf16.msra.mxu0 %v16834_v31  ;;  %v10407_v55 = vpop.f32.mrf.mxu2  ;;  %v16872_v31 = vld [vmem:[%s21020_s1 + $0x1550] sm:$0xff] }
 0x291   :  { %10646 = vmatpush.bf16.msra.mxu1 %v16842_v32  ;;  %v10420_v56 = vpop.f32.mrf.mxu3  ;;  %v16908_v55 = vld [vmem:[%s21020_s1 + $0x1670] sm:$0xff] }
 0x292   :  { %10659 = vmatpush.bf16.msra.mxu2 %v16850_v34  ;;  %v16888_v34 = vld [vmem:[%s21020_s1 + $0x15d0] sm:$0xff] }
 0x293   :  { %10672 = vmatpush.bf16.msra.mxu3 %v16858_v35  ;;  %v16863_v35 = vld [vmem:[%s21020_s1 + $0x1508] sm:$0xff]  ;;  %v16916_v56 = vld [vmem:[%s21020_s1 + $0x16b0] sm:$0xff] }
 0x294   :  { %10634 = vmatpush.bf16.msra.mxu0 %v16833_v37  ;;  %v16879_v37 = vld [vmem:[%s21020_s1 + $0x1588] sm:$0xff] }
 0x295   :  { %10647 = vmatpush.bf16.msra.mxu1 %v16841_v38  ;;  %v16887_v38 = vld [vmem:[%s21020_s1 + $0x15c8] sm:$0xff] }
 0x296   :  { %10660 = vmatpush.bf16.msra.mxu2 %v16849_v39  ;;  %v2460_v39 = vld [vmem:[#allocation1 + $0x24] sm:$0xff] }
 0x297   :  { %10673 = vmatpush.bf16.msra.mxu3 %v16857_v40  ;;  %v2462_v40 = vld [vmem:[#allocation1 + $0x36] sm:$0xff] }
 0x298   :  { %10635 = vmatpush.bf16.msra.mxu0 %v16832_v46  ;;  %v16862_v46 = vld [vmem:[%s21020_s1 + $0x1500] sm:$0xff] }
 0x299   :  { %10648 = vmatpush.bf16.msra.mxu1 %v16840_v47  ;;  %v16870_v47 = vld [vmem:[%s21020_s1 + $0x1540] sm:$0xff] }
 0x29a   :  { %10661 = vmatpush.bf16.msra.mxu2 %v16848_v49  ;;  %v16886_v49 = vld [vmem:[%s21020_s1 + $0x15c0] sm:$0xff] }
 0x29b   :  { %10674 = vmatpush.bf16.msra.mxu3 %v16856_v50  ;;  %v16901_v50 = vld [vmem:[%s21020_s1 + $0x1638] sm:$0xff] }
 0x29c   :  { %10636 = vmatpush.bf16.msra.mxu0 %v16831_v51  ;;  %v16909_v51 = vld [vmem:[%s21020_s1 + $0x1678] sm:$0xff] }
 0x29d   :  { %10649 = vmatpush.bf16.msra.mxu1 %v16839_v52  ;;  %v16917_v52 = vld [vmem:[%s21020_s1 + $0x16b8] sm:$0xff] }
 0x29e   :  { %10662 = vmatpush.bf16.msra.mxu2 %v16847_v53  ;;  %v16925_v53 = vld [vmem:[%s21020_s1 + $0x16f8] sm:$0xff] }
 0x29f   :  { %10675 = vmatpush.bf16.msra.mxu3 %v16855_v54  ;;  %v16900_v54 = vld [vmem:[%s21020_s1 + $0x1630] sm:$0xff] }
 0x2a0   :  { %10637 = vmatpush.bf16.msra.mxu0 %v16830_v57  ;;  %v10431_v13 = vpop.f32.mrf.mxu0  ;;  %v16924_v57 = vld [vmem:[%s21020_s1 + $0x16f0] sm:$0xff] }
 0x2a1   :  { %10650 = vmatpush.bf16.msra.mxu1 %v16838_v58  ;;  %v10432_v14 = vadd.f32 %v10431_v13, %v10419_v45  ;;  %v10444_v17 = vpop.f32.mrf.mxu1  ;;  %v39_v45 = vld [vmem:[%s21019_s0 + $0x58] sm:$0xff]  ;;  %v16899_v58 = vld [vmem:[%s21020_s1 + $0x1628] sm:$0xff] }
 0x2a2   :  { %10663 = vmatpush.bf16.msra.mxu2 %v16846_v59  ;;  %2465 = vst [vmem:[#allocation1] ss:$9 sm:$0xff] %v39_v45  ;;  %v16907_v59 = vld [vmem:[%s21020_s1 + $0x1668] sm:$0xff] }
 0x2a3   :  { %10676 = vmatpush.bf16.msra.mxu3 %v16854_v60  ;;  %10638 = vmatmul.bf16.vlgmr.msra.gmra.mxu0 %v2456_v1  ;;  %v10445_v20 = vadd.f32 %v10444_v17, %v10432_v14  ;;  %v16915_v60 = vld [vmem:[%s21020_s1 + $0x16a8] sm:$0xff]  ;;  %v16906_v1 = vld [vmem:[%s21020_s1 + $0x1660] sm:$0xff] }
 0x2a4   :  { %10682 = vmatpush.bf16.msrb.mxu0 %v16869_v61  ;;  %10651 = vmatmul.bf16.vlgmr.msra.gmra.mxu1 %v2457_v3  ;;  %v16923_v61 = vld [vmem:[%s21020_s1 + $0x16e8] sm:$0xff]  ;;  %v16914_v3 = vld [vmem:[%s21020_s1 + $0x16a0] sm:$0xff] }
 0x2a5   :  { %10695 = vmatpush.bf16.msrb.mxu1 %v16877_v62  ;;  %10664 = vmatmul.bf16.vlgmr.msra.gmra.mxu2 %v2458_v2  ;;  %v16955_v45 = vld [vmem:[%s21020_s1 + $0x17e8] sm:$0xff] }
 0x2a6   :  { %10708 = vmatpush.bf16.msrb.mxu2 %v16885_v63  ;;  %10677 = vmatmul.bf16.vlgmr.msra.gmra.mxu3 %v2459_v4  ;;  %v16922_v4 = vld [vmem:[%s21020_s1 + $0x16e0] sm:$0xff] }
 0x2a7   :  { %10721 = vmatpush.bf16.msrb.mxu3 %v16893_v0  ;;  %v16898_v0 = vld [vmem:[%s21020_s1 + $0x1620] sm:$0xff] }
 0x2a8   :  { %10683 = vmatpush.bf16.msrb.mxu0 %v16868_v5  ;;  %v10457_v25 = vpop.f32.mrf.mxu2  ;;  %v10433_v28 = vpop.f32.mrf.mxu0 }
 0x2a9   :  { %10696 = vmatpush.bf16.msrb.mxu1 %v16876_v6  ;;  %v10458_v26 = vadd.f32 %v10457_v25, %v10445_v20  ;;  %v10470_v27 = vpop.f32.mrf.mxu3  ;;  %v10446_v32 = vpop.f32.mrf.mxu1  ;;  %v16897_v6 = vld [vmem:[%s21020_s1 + $0x1618] sm:$0xff]  ;;  %v16895_v20 = vld [vmem:[%s21020_s1 + $0x1608] sm:$0xff]  ;;  %v16910_v28 = vld [vmem:[%s21020_s1 + $0x1680] sm:$0xff] }
 0x2aa   :  { %10709 = vmatpush.bf16.msrb.mxu2 %v16884_v7  ;;  %v16905_v7 = vld [vmem:[%s21020_s1 + $0x1658] sm:$0xff] }
 0x2ab   :  { %10722 = vmatpush.bf16.msrb.mxu3 %v16892_v8  ;;  %v19555_v29 = vadd.f32 %v10470_v27, %v10458_v26  ;;  %v16913_v8 = vld [vmem:[%s21020_s1 + $0x1698] sm:$0xff]  ;;  %v16894_v26 = vld [vmem:[%s21020_s1 + $0x1600] sm:$0xff] }
 0x2ac   :  { %10684 = vmatpush.bf16.msrb.mxu0 %v16867_v9  ;;  %v16921_v9 = vld [vmem:[%s21020_s1 + $0x16d8] sm:$0xff]  ;;  %v16902_v27 = vld [vmem:[%s21020_s1 + $0x1640] sm:$0xff] }
 0x2ad   :  { %10697 = vmatpush.bf16.msrb.mxu1 %v16875_v10  ;;  %v16949_v32 = vld [vmem:[%s21020_s1 + $0x17b8] sm:$0xff] }
 0x2ae   :  { %10710 = vmatpush.bf16.msrb.mxu2 %v16883_v11 }
 0x2af   :  { %10723 = vmatpush.bf16.msrb.mxu3 %v16891_v12 }
 0x2b0   :  { %10685 = vmatpush.bf16.msrb.mxu0 %v16866_v15  ;;  %v10459_v41 = vpop.f32.mrf.mxu2  ;;  %v16896_v15 = vld [vmem:[%s21020_s1 + $0x1610] sm:$0xff] }
 0x2b1   :  { %10698 = vmatpush.bf16.msrb.mxu1 %v16874_v16  ;;  %v10472_v44 = vpop.f32.mrf.mxu3  ;;  %v16904_v16 = vld [vmem:[%s21020_s1 + $0x1650] sm:$0xff] }
 0x2b2   :  { %10711 = vmatpush.bf16.msrb.mxu2 %v16882_v18  ;;  %v16912_v18 = vld [vmem:[%s21020_s1 + $0x1690] sm:$0xff]  ;;  %v16947_v44 = vld [vmem:[%s21020_s1 + $0x17a8] sm:$0xff] }
 0x2b3   :  { %10724 = vmatpush.bf16.msrb.mxu3 %v16890_v19  ;;  %v16920_v19 = vld [vmem:[%s21020_s1 + $0x16d0] sm:$0xff] }
 0x2b4   :  { %10686 = vmatpush.bf16.msrb.mxu0 %v16865_v21  ;;  %v16903_v21 = vld [vmem:[%s21020_s1 + $0x1648] sm:$0xff]  ;;  %v16956_v41 = vld [vmem:[%s21020_s1 + $0x17f0] sm:$0xff] }
 0x2b5   :  { %10699 = vmatpush.bf16.msrb.mxu1 %v16873_v22  ;;  %v16911_v22 = vld [vmem:[%s21020_s1 + $0x1688] sm:$0xff] }
 0x2b6   :  { %10712 = vmatpush.bf16.msrb.mxu2 %v16881_v23  ;;  %v16919_v23 = vld [vmem:[%s21020_s1 + $0x16c8] sm:$0xff] }
 0x2b7   :  { %10725 = vmatpush.bf16.msrb.mxu3 %v16889_v24 }
 0x2b8   :  { %10687 = vmatpush.bf16.msrb.mxu0 %v16864_v30  ;;  %v16933_v30 = vld [vmem:[%s21020_s1 + $0x1738] sm:$0xff] }
 0x2b9   :  { %10700 = vmatpush.bf16.msrb.mxu1 %v16872_v31  ;;  %v16941_v31 = vld [vmem:[%s21020_s1 + $0x1778] sm:$0xff] }
 0x2ba   :  { %10713 = vmatpush.bf16.msrb.mxu2 %v16880_v33  ;;  %v16957_v33 = vld [vmem:[%s21020_s1 + $0x17f8] sm:$0xff] }
 0x2bb   :  { %10726 = vmatpush.bf16.msrb.mxu3 %v16888_v34  ;;  %v2466_v34 = vld [vmem:[#allocation1] sm:$0xff] }
 0x2bc   :  { %10688 = vmatpush.bf16.msrb.mxu0 %v16863_v35  ;;  %v2468_v35 = vld [vmem:[#allocation1 + $0x12] sm:$0xff] }
 0x2bd   :  { %10701 = vmatpush.bf16.msrb.mxu1 %v16871_v36  ;;  %v2467_v36 = vld [vmem:[#allocation1 + $0x9] sm:$0xff] }
 0x2be   :  { %10714 = vmatpush.bf16.msrb.mxu2 %v16879_v37  ;;  %v2469_v37 = vld [vmem:[#allocation1 + $0x1b] sm:$0xff] }
 0x2bf   :  { %10727 = vmatpush.bf16.msrb.mxu3 %v16887_v38  ;;  %v16932_v38 = vld [vmem:[%s21020_s1 + $0x1730] sm:$0xff] }
 0x2c0   :  { %10689 = vmatpush.bf16.msrb.mxu0 %v16862_v46  ;;  %v10483_v62 = vpop.f32.mrf.mxu0 }
 0x2c1   :  { %10702 = vmatpush.bf16.msrb.mxu1 %v16870_v47  ;;  %v10484_v63 = vadd.f32 %v10483_v62, %v19555_v29  ;;  %v10496_v2 = vpop.f32.mrf.mxu1  ;;  %v16918_v29 = vld [vmem:[%s21020_s1 + $0x16c0] sm:$0xff] }
 0x2c2   :  { %10715 = vmatpush.bf16.msrb.mxu2 %v16878_v48  ;;  %v16930_v48 = vld [vmem:[%s21020_s1 + $0x1720] sm:$0xff] }
 0x2c3   :  { %10728 = vmatpush.bf16.msrb.mxu3 %v16886_v49  ;;  %10690 = vmatmul.bf16.vlgmr.msrb.gmra.mxu0 %v2460_v39  ;;  %v10497_v5 = vadd.f32 %v10496_v2, %v10484_v63  ;;  %v16940_v39 = vld [vmem:[%s21020_s1 + $0x1770] sm:$0xff]  ;;  %v16938_v49 = vld [vmem:[%s21020_s1 + $0x1760] sm:$0xff] }
 0x2c4   :  { %10734 = vmatpush.bf16.msra.mxu0 %v16901_v50  ;;  %10703 = vmatmul.bf16.vlgmr.msrb.gmra.mxu1 %v2461_v42  ;;  %v16931_v42 = vld [vmem:[%s21020_s1 + $0x1728] sm:$0xff]  ;;  %v16928_v63 = vld [vmem:[%s21020_s1 + $0x1710] sm:$0xff] }
 0x2c5   :  { %10747 = vmatpush.bf16.msra.mxu1 %v16909_v51  ;;  %10716 = vmatmul.bf16.vlgmr.msrb.gmra.mxu2 %v2462_v40  ;;  %v16948_v40 = vld [vmem:[%s21020_s1 + $0x17b0] sm:$0xff]  ;;  %v16946_v51 = vld [vmem:[%s21020_s1 + $0x17a0] sm:$0xff] }
 0x2c6   :  { %10760 = vmatpush.bf16.msra.mxu2 %v16917_v52  ;;  %10729 = vmatmul.bf16.vlgmr.msrb.gmra.mxu3 %v2463_v43  ;;  %v16939_v43 = vld [vmem:[%s21020_s1 + $0x1768] sm:$0xff]  ;;  %v16954_v52 = vld [vmem:[%s21020_s1 + $0x17e0] sm:$0xff]  ;;  %v16944_v2 = vld [vmem:[%s21020_s1 + $0x1790] sm:$0xff] }
 0x2c7   :  { %10773 = vmatpush.bf16.msra.mxu3 %v16925_v53 }
 0x2c8   :  { %10735 = vmatpush.bf16.msra.mxu0 %v16900_v54  ;;  %v10509_v10 = vpop.f32.mrf.mxu2  ;;  %v10485_v13 = vpop.f32.mrf.mxu0  ;;  %v16929_v54 = vld [vmem:[%s21020_s1 + $0x1718] sm:$0xff] }
 0x2c9   :  { %10748 = vmatpush.bf16.msra.mxu1 %v16908_v55  ;;  %v10510_v11 = vadd.f32 %v10509_v10, %v10497_v5  ;;  %v10522_v12 = vpop.f32.mrf.mxu3  ;;  %v10498_v17 = vpop.f32.mrf.mxu1  ;;  %v16937_v55 = vld [vmem:[%s21020_s1 + $0x1758] sm:$0xff]  ;;  %v16935_v5 = vld [vmem:[%s21020_s1 + $0x1748] sm:$0xff] }
 0x2ca   :  { %10761 = vmatpush.bf16.msra.mxu2 %v16916_v56  ;;  %v16945_v56 = vld [vmem:[%s21020_s1 + $0x1798] sm:$0xff]  ;;  %v16942_v17 = vld [vmem:[%s21020_s1 + $0x1780] sm:$0xff] }
 0x2cb   :  { %10774 = vmatpush.bf16.msra.mxu3 %v16924_v57  ;;  %v10523_v14 = vadd.f32 %v10522_v12, %v10510_v11  ;;  %v16953_v57 = vld [vmem:[%s21020_s1 + $0x17d8] sm:$0xff]  ;;  %v2471_v11 = vld [vmem:[#allocation1 + $0x2d] sm:$0xff] }
 0x2cc   :  { %10736 = vmatpush.bf16.msra.mxu0 %v16899_v58  ;;  %v2473_v12 = vld [vmem:[#allocation1 + $0x3f] sm:$0xff] }
 0x2cd   :  { %10749 = vmatpush.bf16.msra.mxu1 %v16907_v59 }
 0x2ce   :  { %10762 = vmatpush.bf16.msra.mxu2 %v16915_v60 }
 0x2cf   :  { %10775 = vmatpush.bf16.msra.mxu3 %v16923_v61 }
 0x2d0   :  { %10737 = vmatpush.bf16.msra.mxu0 %v16898_v0  ;;  %v10511_v24 = vpop.f32.mrf.mxu2  ;;  %v16936_v0 = vld [vmem:[%s21020_s1 + $0x1750] sm:$0xff] }
 0x2d1   :  { %10750 = vmatpush.bf16.msra.mxu1 %v16906_v1  ;;  %v10524_v25 = vpop.f32.mrf.mxu3  ;;  %v16972_v24 = vld [vmem:[%s21020_s1 + $0x1870] sm:$0xff] }
 0x2d2   :  { %10763 = vmatpush.bf16.msra.mxu2 %v16914_v3  ;;  %v16952_v3 = vld [vmem:[%s21020_s1 + $0x17d0] sm:$0xff] }
 0x2d3   :  { %10776 = vmatpush.bf16.msra.mxu3 %v16922_v4  ;;  %v16927_v4 = vld [vmem:[%s21020_s1 + $0x1708] sm:$0xff]  ;;  %v16980_v25 = vld [vmem:[%s21020_s1 + $0x18b0] sm:$0xff] }
 0x2d4   :  { %10738 = vmatpush.bf16.msra.mxu0 %v16897_v6  ;;  %v16943_v6 = vld [vmem:[%s21020_s1 + $0x1788] sm:$0xff] }
 0x2d5   :  { %10751 = vmatpush.bf16.msra.mxu1 %v16905_v7  ;;  %v16951_v7 = vld [vmem:[%s21020_s1 + $0x17c8] sm:$0xff] }
 0x2d6   :  { %10764 = vmatpush.bf16.msra.mxu2 %v16913_v8  ;;  %v2470_v8 = vld [vmem:[#allocation1 + $0x24] sm:$0xff] }
 0x2d7   :  { %10777 = vmatpush.bf16.msra.mxu3 %v16921_v9  ;;  %v2472_v9 = vld [vmem:[#allocation1 + $0x36] sm:$0xff] }
 0x2d8   :  { %10739 = vmatpush.bf16.msra.mxu0 %v16896_v15  ;;  %v16926_v15 = vld [vmem:[%s21020_s1 + $0x1700] sm:$0xff] }
 0x2d9   :  { %10752 = vmatpush.bf16.msra.mxu1 %v16904_v16  ;;  %v16934_v16 = vld [vmem:[%s21020_s1 + $0x1740] sm:$0xff] }
 0x2da   :  { %10765 = vmatpush.bf16.msra.mxu2 %v16912_v18  ;;  %v16950_v18 = vld [vmem:[%s21020_s1 + $0x17c0] sm:$0xff] }
 0x2db   :  { %10778 = vmatpush.bf16.msra.mxu3 %v16920_v19  ;;  %v16965_v19 = vld [vmem:[%s21020_s1 + $0x1838] sm:$0xff] }
 0x2dc   :  { %10740 = vmatpush.bf16.msra.mxu0 %v16895_v20  ;;  %v16973_v20 = vld [vmem:[%s21020_s1 + $0x1878] sm:$0xff] }
 0x2dd   :  { %10753 = vmatpush.bf16.msra.mxu1 %v16903_v21  ;;  %v16981_v21 = vld [vmem:[%s21020_s1 + $0x18b8] sm:$0xff] }
 0x2de   :  { %10766 = vmatpush.bf16.msra.mxu2 %v16911_v22  ;;  %v16989_v22 = vld [vmem:[%s21020_s1 + $0x18f8] sm:$0xff] }
 0x2df   :  { %10779 = vmatpush.bf16.msra.mxu3 %v16919_v23  ;;  %v16964_v23 = vld [vmem:[%s21020_s1 + $0x1830] sm:$0xff] }
 0x2e0   :  { %10741 = vmatpush.bf16.msra.mxu0 %v16894_v26  ;;  %v10535_v46 = vpop.f32.mrf.mxu0  ;;  %v16988_v26 = vld [vmem:[%s21020_s1 + $0x18f0] sm:$0xff] }
 0x2e1   :  { %10754 = vmatpush.bf16.msra.mxu1 %v16902_v27  ;;  %v10536_v47 = vadd.f32 %v10535_v46, %v10523_v14  ;;  %v10548_v50 = vpop.f32.mrf.mxu1  ;;  %v40_v14 = vld [vmem:[%s21019_s0 + $0x60] sm:$0xff]  ;;  %v16963_v27 = vld [vmem:[%s21020_s1 + $0x1828] sm:$0xff] }
 0x2e2   :  { %10767 = vmatpush.bf16.msra.mxu2 %v16910_v28  ;;  %2475 = vst [vmem:[#allocation1] ss:$9 sm:$0xff] %v40_v14  ;;  %v16971_v28 = vld [vmem:[%s21020_s1 + $0x1868] sm:$0xff] }
 0x2e3   :  { %10780 = vmatpush.bf16.msra.mxu3 %v16918_v29  ;;  %10742 = vmatmul.bf16.vlgmr.msra.gmra.mxu0 %v2466_v34  ;;  %v10549_v53 = vadd.f32 %v10548_v50, %v10536_v47  ;;  %v16979_v29 = vld [vmem:[%s21020_s1 + $0x18a8] sm:$0xff]  ;;  %v16970_v34 = vld [vmem:[%s21020_s1 + $0x1860] sm:$0xff] }
 0x2e4   :  { %10786 = vmatpush.bf16.msrb.mxu0 %v16933_v30  ;;  %10755 = vmatmul.bf16.vlgmr.msra.gmra.mxu1 %v2467_v36  ;;  %v16987_v30 = vld [vmem:[%s21020_s1 + $0x18e8] sm:$0xff]  ;;  %v16978_v36 = vld [vmem:[%s21020_s1 + $0x18a0] sm:$0xff] }
 0x2e5   :  { %10799 = vmatpush.bf16.msrb.mxu1 %v16941_v31  ;;  %10768 = vmatmul.bf16.vlgmr.msra.gmra.mxu2 %v2468_v35  ;;  %v17019_v14 = vld [vmem:[%s21020_s1 + $0x19e8] sm:$0xff] }
 0x2e6   :  { %10812 = vmatpush.bf16.msrb.mxu2 %v16949_v32  ;;  %10781 = vmatmul.bf16.vlgmr.msra.gmra.mxu3 %v2469_v37  ;;  %v16986_v37 = vld [vmem:[%s21020_s1 + $0x18e0] sm:$0xff] }
 0x2e7   :  { %10825 = vmatpush.bf16.msrb.mxu3 %v16957_v33  ;;  %v16962_v33 = vld [vmem:[%s21020_s1 + $0x1820] sm:$0xff] }
 0x2e8   :  { %10787 = vmatpush.bf16.msrb.mxu0 %v16932_v38  ;;  %v10561_v58 = vpop.f32.mrf.mxu2  ;;  %v10537_v61 = vpop.f32.mrf.mxu0 }
 0x2e9   :  { %10800 = vmatpush.bf16.msrb.mxu1 %v16940_v39  ;;  %v10562_v59 = vadd.f32 %v10561_v58, %v10549_v53  ;;  %v10574_v60 = vpop.f32.mrf.mxu3  ;;  %v10550_v1 = vpop.f32.mrf.mxu1  ;;  %v16961_v39 = vld [vmem:[%s21020_s1 + $0x1818] sm:$0xff]  ;;  %v16959_v53 = vld [vmem:[%s21020_s1 + $0x1808] sm:$0xff]  ;;  %v16974_v61 = vld [vmem:[%s21020_s1 + $0x1880] sm:$0xff] }
 0x2ea   :  { %10813 = vmatpush.bf16.msrb.mxu2 %v16948_v40  ;;  %v16969_v40 = vld [vmem:[%s21020_s1 + $0x1858] sm:$0xff] }
 0x2eb   :  { %10826 = vmatpush.bf16.msrb.mxu3 %v16956_v41  ;;  %v19753_v62 = vadd.f32 %v10574_v60, %v10562_v59  ;;  %v16977_v41 = vld [vmem:[%s21020_s1 + $0x1898] sm:$0xff]  ;;  %v16958_v59 = vld [vmem:[%s21020_s1 + $0x1800] sm:$0xff] }
 0x2ec   :  { %10788 = vmatpush.bf16.msrb.mxu0 %v16931_v42  ;;  %v16985_v42 = vld [vmem:[%s21020_s1 + $0x18d8] sm:$0xff]  ;;  %v16966_v60 = vld [vmem:[%s21020_s1 + $0x1840] sm:$0xff] }
 0x2ed   :  { %10801 = vmatpush.bf16.msrb.mxu1 %v16939_v43  ;;  %v17013_v1 = vld [vmem:[%s21020_s1 + $0x19b8] sm:$0xff] }
 0x2ee   :  { %10814 = vmatpush.bf16.msrb.mxu2 %v16947_v44 }
 0x2ef   :  { %10827 = vmatpush.bf16.msrb.mxu3 %v16955_v45 }
 0x2f0   :  { %10789 = vmatpush.bf16.msrb.mxu0 %v16930_v48  ;;  %v10563_v10 = vpop.f32.mrf.mxu2  ;;  %v16960_v48 = vld [vmem:[%s21020_s1 + $0x1810] sm:$0xff] }
 0x2f1   :  { %10802 = vmatpush.bf16.msrb.mxu1 %v16938_v49  ;;  %v10576_v13 = vpop.f32.mrf.mxu3  ;;  %v16968_v49 = vld [vmem:[%s21020_s1 + $0x1850] sm:$0xff] }
 0x2f2   :  { %10815 = vmatpush.bf16.msrb.mxu2 %v16946_v51  ;;  %v16976_v51 = vld [vmem:[%s21020_s1 + $0x1890] sm:$0xff]  ;;  %v17011_v13 = vld [vmem:[%s21020_s1 + $0x19a8] sm:$0xff] }
 0x2f3   :  { %10828 = vmatpush.bf16.msrb.mxu3 %v16954_v52  ;;  %v16984_v52 = vld [vmem:[%s21020_s1 + $0x18d0] sm:$0xff] }
 0x2f4   :  { %10790 = vmatpush.bf16.msrb.mxu0 %v16929_v54  ;;  %v16967_v54 = vld [vmem:[%s21020_s1 + $0x1848] sm:$0xff]  ;;  %v17020_v10 = vld [vmem:[%s21020_s1 + $0x19f0] sm:$0xff] }
 0x2f5   :  { %10803 = vmatpush.bf16.msrb.mxu1 %v16937_v55  ;;  %v16975_v55 = vld [vmem:[%s21020_s1 + $0x1888] sm:$0xff] }
 0x2f6   :  { %10816 = vmatpush.bf16.msrb.mxu2 %v16945_v56  ;;  %v16983_v56 = vld [vmem:[%s21020_s1 + $0x18c8] sm:$0xff] }
 0x2f7   :  { %10829 = vmatpush.bf16.msrb.mxu3 %v16953_v57 }
 0x2f8   :  { %10791 = vmatpush.bf16.msrb.mxu0 %v16928_v63  ;;  %v16997_v63 = vld [vmem:[%s21020_s1 + $0x1938] sm:$0xff] }
 0x2f9   :  { %10804 = vmatpush.bf16.msrb.mxu1 %v16936_v0  ;;  %v17005_v0 = vld [vmem:[%s21020_s1 + $0x1978] sm:$0xff] }
 0x2fa   :  { %10817 = vmatpush.bf16.msrb.mxu2 %v16944_v2  ;;  %v17021_v2 = vld [vmem:[%s21020_s1 + $0x19f8] sm:$0xff] }
 0x2fb   :  { %10830 = vmatpush.bf16.msrb.mxu3 %v16952_v3  ;;  %v2476_v3 = vld [vmem:[#allocation1] sm:$0xff] }
 0x2fc   :  { %10792 = vmatpush.bf16.msrb.mxu0 %v16927_v4  ;;  %v2478_v4 = vld [vmem:[#allocation1 + $0x12] sm:$0xff] }
 0x2fd   :  { %10805 = vmatpush.bf16.msrb.mxu1 %v16935_v5  ;;  %v2477_v5 = vld [vmem:[#allocation1 + $0x9] sm:$0xff] }
 0x2fe   :  { %10818 = vmatpush.bf16.msrb.mxu2 %v16943_v6  ;;  %v2479_v6 = vld [vmem:[#allocation1 + $0x1b] sm:$0xff] }
 0x2ff   :  { %10831 = vmatpush.bf16.msrb.mxu3 %v16951_v7  ;;  %v16996_v7 = vld [vmem:[%s21020_s1 + $0x1930] sm:$0xff] }
 0x300   :  { %10793 = vmatpush.bf16.msrb.mxu0 %v16926_v15  ;;  %v10587_v31 = vpop.f32.mrf.mxu0 }
 0x301   :  { %10806 = vmatpush.bf16.msrb.mxu1 %v16934_v16  ;;  %v10588_v32 = vadd.f32 %v10587_v31, %v19753_v62  ;;  %v10600_v35 = vpop.f32.mrf.mxu1  ;;  %v16982_v62 = vld [vmem:[%s21020_s1 + $0x18c0] sm:$0xff] }
 0x302   :  { %10819 = vmatpush.bf16.msrb.mxu2 %v16942_v17  ;;  %v16994_v17 = vld [vmem:[%s21020_s1 + $0x1920] sm:$0xff] }
 0x303   :  { %10832 = vmatpush.bf16.msrb.mxu3 %v16950_v18  ;;  %10794 = vmatmul.bf16.vlgmr.msrb.gmra.mxu0 %v2470_v8  ;;  %v10601_v38 = vadd.f32 %v10600_v35, %v10588_v32  ;;  %v17004_v8 = vld [vmem:[%s21020_s1 + $0x1970] sm:$0xff]  ;;  %v17002_v18 = vld [vmem:[%s21020_s1 + $0x1960] sm:$0xff] }
 0x304   :  { %10838 = vmatpush.bf16.msra.mxu0 %v16965_v19  ;;  %10807 = vmatmul.bf16.vlgmr.msrb.gmra.mxu1 %v2471_v11  ;;  %v16995_v11 = vld [vmem:[%s21020_s1 + $0x1928] sm:$0xff]  ;;  %v16992_v32 = vld [vmem:[%s21020_s1 + $0x1910] sm:$0xff] }
 0x305   :  { %10851 = vmatpush.bf16.msra.mxu1 %v16973_v20  ;;  %10820 = vmatmul.bf16.vlgmr.msrb.gmra.mxu2 %v2472_v9  ;;  %v17012_v9 = vld [vmem:[%s21020_s1 + $0x19b0] sm:$0xff]  ;;  %v17010_v20 = vld [vmem:[%s21020_s1 + $0x19a0] sm:$0xff] }
 0x306   :  { %10864 = vmatpush.bf16.msra.mxu2 %v16981_v21  ;;  %10833 = vmatmul.bf16.vlgmr.msrb.gmra.mxu3 %v2473_v12  ;;  %v17003_v12 = vld [vmem:[%s21020_s1 + $0x1968] sm:$0xff]  ;;  %v17018_v21 = vld [vmem:[%s21020_s1 + $0x19e0] sm:$0xff]  ;;  %v17008_v35 = vld [vmem:[%s21020_s1 + $0x1990] sm:$0xff] }
 0x307   :  { %10877 = vmatpush.bf16.msra.mxu3 %v16989_v22 }
 0x308   :  { %10839 = vmatpush.bf16.msra.mxu0 %v16964_v23  ;;  %v10613_v43 = vpop.f32.mrf.mxu2  ;;  %v10589_v46 = vpop.f32.mrf.mxu0  ;;  %v16993_v23 = vld [vmem:[%s21020_s1 + $0x1918] sm:$0xff] }
 0x309   :  { %10852 = vmatpush.bf16.msra.mxu1 %v16972_v24  ;;  %v10614_v44 = vadd.f32 %v10613_v43, %v10601_v38  ;;  %v10626_v45 = vpop.f32.mrf.mxu3  ;;  %v10602_v50 = vpop.f32.mrf.mxu1  ;;  %v17001_v24 = vld [vmem:[%s21020_s1 + $0x1958] sm:$0xff]  ;;  %v16999_v38 = vld [vmem:[%s21020_s1 + $0x1948] sm:$0xff] }
 0x30a   :  { %10865 = vmatpush.bf16.msra.mxu2 %v16980_v25  ;;  %v17009_v25 = vld [vmem:[%s21020_s1 + $0x1998] sm:$0xff]  ;;  %v17006_v50 = vld [vmem:[%s21020_s1 + $0x1980] sm:$0xff] }
 0x30b   :  { %10878 = vmatpush.bf16.msra.mxu3 %v16988_v26  ;;  %v10627_v47 = vadd.f32 %v10626_v45, %v10614_v44  ;;  %v17017_v26 = vld [vmem:[%s21020_s1 + $0x19d8] sm:$0xff]  ;;  %v2481_v44 = vld [vmem:[#allocation1 + $0x2d] sm:$0xff] }
 0x30c   :  { %10840 = vmatpush.bf16.msra.mxu0 %v16963_v27  ;;  %v2483_v45 = vld [vmem:[#allocation1 + $0x3f] sm:$0xff] }
 0x30d   :  { %10853 = vmatpush.bf16.msra.mxu1 %v16971_v28 }
 0x30e   :  { %10866 = vmatpush.bf16.msra.mxu2 %v16979_v29 }
 0x30f   :  { %10879 = vmatpush.bf16.msra.mxu3 %v16987_v30 }
 0x310   :  { %10841 = vmatpush.bf16.msra.mxu0 %v16962_v33  ;;  %v10615_v57 = vpop.f32.mrf.mxu2  ;;  %v17000_v33 = vld [vmem:[%s21020_s1 + $0x1950] sm:$0xff] }
 0x311   :  { %10854 = vmatpush.bf16.msra.mxu1 %v16970_v34  ;;  %v10628_v58 = vpop.f32.mrf.mxu3  ;;  %v17036_v57 = vld [vmem:[%s21020_s1 + $0x1a70] sm:$0xff] }
 0x312   :  { %10867 = vmatpush.bf16.msra.mxu2 %v16978_v36  ;;  %v17016_v36 = vld [vmem:[%s21020_s1 + $0x19d0] sm:$0xff] }
 0x313   :  { %10880 = vmatpush.bf16.msra.mxu3 %v16986_v37  ;;  %v16991_v37 = vld [vmem:[%s21020_s1 + $0x1908] sm:$0xff]  ;;  %v17044_v58 = vld [vmem:[%s21020_s1 + $0x1ab0] sm:$0xff] }
 0x314   :  { %10842 = vmatpush.bf16.msra.mxu0 %v16961_v39  ;;  %v17007_v39 = vld [vmem:[%s21020_s1 + $0x1988] sm:$0xff] }
 0x315   :  { %10855 = vmatpush.bf16.msra.mxu1 %v16969_v40  ;;  %v17015_v40 = vld [vmem:[%s21020_s1 + $0x19c8] sm:$0xff] }
 0x316   :  { %10868 = vmatpush.bf16.msra.mxu2 %v16977_v41  ;;  %v2480_v41 = vld [vmem:[#allocation1 + $0x24] sm:$0xff] }
 0x317   :  { %10881 = vmatpush.bf16.msra.mxu3 %v16985_v42  ;;  %v2482_v42 = vld [vmem:[#allocation1 + $0x36] sm:$0xff] }
 0x318   :  { %10843 = vmatpush.bf16.msra.mxu0 %v16960_v48  ;;  %v16990_v48 = vld [vmem:[%s21020_s1 + $0x1900] sm:$0xff] }
 0x319   :  { %10856 = vmatpush.bf16.msra.mxu1 %v16968_v49  ;;  %v16998_v49 = vld [vmem:[%s21020_s1 + $0x1940] sm:$0xff] }
 0x31a   :  { %10869 = vmatpush.bf16.msra.mxu2 %v16976_v51  ;;  %v17014_v51 = vld [vmem:[%s21020_s1 + $0x19c0] sm:$0xff] }
 0x31b   :  { %10882 = vmatpush.bf16.msra.mxu3 %v16984_v52  ;;  %v17029_v52 = vld [vmem:[%s21020_s1 + $0x1a38] sm:$0xff] }
 0x31c   :  { %10844 = vmatpush.bf16.msra.mxu0 %v16959_v53  ;;  %v17037_v53 = vld [vmem:[%s21020_s1 + $0x1a78] sm:$0xff] }
 0x31d   :  { %10857 = vmatpush.bf16.msra.mxu1 %v16967_v54  ;;  %v17045_v54 = vld [vmem:[%s21020_s1 + $0x1ab8] sm:$0xff] }
 0x31e   :  { %10870 = vmatpush.bf16.msra.mxu2 %v16975_v55  ;;  %v17053_v55 = vld [vmem:[%s21020_s1 + $0x1af8] sm:$0xff] }
 0x31f   :  { %10883 = vmatpush.bf16.msra.mxu3 %v16983_v56  ;;  %v17028_v56 = vld [vmem:[%s21020_s1 + $0x1a30] sm:$0xff] }
 0x320   :  { %10845 = vmatpush.bf16.msra.mxu0 %v16958_v59  ;;  %v10639_v15 = vpop.f32.mrf.mxu0  ;;  %v17052_v59 = vld [vmem:[%s21020_s1 + $0x1af0] sm:$0xff] }
 0x321   :  { %10858 = vmatpush.bf16.msra.mxu1 %v16966_v60  ;;  %v10640_v16 = vadd.f32 %v10639_v15, %v10627_v47  ;;  %v10652_v19 = vpop.f32.mrf.mxu1  ;;  %v41_v47 = vld [vmem:[%s21019_s0 + $0x68] sm:$0xff] }
 0x322   :  { %10871 = vmatpush.bf16.msra.mxu2 %v16974_v61  ;;  %2485 = vst [vmem:[#allocation1] ss:$9 sm:$0xff] %v41_v47  ;;  %v17027_v60 = vld [vmem:[%s21020_s1 + $0x1a28] sm:$0xff] }
 0x323   :  { %10884 = vmatpush.bf16.msra.mxu3 %v16982_v62  ;;  %10846 = vmatmul.bf16.vlgmr.msra.gmra.mxu0 %v2476_v3  ;;  %v10653_v22 = vadd.f32 %v10652_v19, %v10640_v16  ;;  %v17035_v61 = vld [vmem:[%s21020_s1 + $0x1a68] sm:$0xff]  ;;  %v17034_v3 = vld [vmem:[%s21020_s1 + $0x1a60] sm:$0xff] }
 0x324   :  { %10890 = vmatpush.bf16.msrb.mxu0 %v16997_v63  ;;  %10859 = vmatmul.bf16.vlgmr.msra.gmra.mxu1 %v2477_v5  ;;  %v17043_v62 = vld [vmem:[%s21020_s1 + $0x1aa8] sm:$0xff]  ;;  %v17042_v5 = vld [vmem:[%s21020_s1 + $0x1aa0] sm:$0xff] }
 0x325   :  { %10903 = vmatpush.bf16.msrb.mxu1 %v17005_v0  ;;  %10872 = vmatmul.bf16.vlgmr.msra.gmra.mxu2 %v2478_v4  ;;  %v17051_v63 = vld [vmem:[%s21020_s1 + $0x1ae8] sm:$0xff] }
 0x326   :  { %10916 = vmatpush.bf16.msrb.mxu2 %v17013_v1  ;;  %10885 = vmatmul.bf16.vlgmr.msra.gmra.mxu3 %v2479_v6  ;;  %v17050_v6 = vld [vmem:[%s21020_s1 + $0x1ae0] sm:$0xff]  ;;  %v17083_v47 = vld [vmem:[%s21020_s1 + $0x1be8] sm:$0xff] }
 0x327   :  { %10929 = vmatpush.bf16.msrb.mxu3 %v17021_v2  ;;  %v17026_v2 = vld [vmem:[%s21020_s1 + $0x1a20] sm:$0xff] }
 0x328   :  { %10891 = vmatpush.bf16.msrb.mxu0 %v16996_v7  ;;  %v10665_v27 = vpop.f32.mrf.mxu2  ;;  %v10641_v30 = vpop.f32.mrf.mxu0 }
 0x329   :  { %10904 = vmatpush.bf16.msrb.mxu1 %v17004_v8  ;;  %v10666_v28 = vadd.f32 %v10665_v27, %v10653_v22  ;;  %v10678_v29 = vpop.f32.mrf.mxu3  ;;  %v10654_v34 = vpop.f32.mrf.mxu1  ;;  %v17025_v8 = vld [vmem:[%s21020_s1 + $0x1a18] sm:$0xff]  ;;  %v17023_v22 = vld [vmem:[%s21020_s1 + $0x1a08] sm:$0xff]  ;;  %v17038_v30 = vld [vmem:[%s21020_s1 + $0x1a80] sm:$0xff] }
 0x32a   :  { %10917 = vmatpush.bf16.msrb.mxu2 %v17012_v9  ;;  %v17033_v9 = vld [vmem:[%s21020_s1 + $0x1a58] sm:$0xff] }
 0x32b   :  { %10930 = vmatpush.bf16.msrb.mxu3 %v17020_v10  ;;  %v19951_v31 = vadd.f32 %v10678_v29, %v10666_v28  ;;  %v17041_v10 = vld [vmem:[%s21020_s1 + $0x1a98] sm:$0xff]  ;;  %v17022_v28 = vld [vmem:[%s21020_s1 + $0x1a00] sm:$0xff] }
 0x32c   :  { %10892 = vmatpush.bf16.msrb.mxu0 %v16995_v11  ;;  %v17049_v11 = vld [vmem:[%s21020_s1 + $0x1ad8] sm:$0xff]  ;;  %v17030_v29 = vld [vmem:[%s21020_s1 + $0x1a40] sm:$0xff] }
 0x32d   :  { %10905 = vmatpush.bf16.msrb.mxu1 %v17003_v12  ;;  %v17077_v34 = vld [vmem:[%s21020_s1 + $0x1bb8] sm:$0xff] }
 0x32e   :  { %10918 = vmatpush.bf16.msrb.mxu2 %v17011_v13 }
 0x32f   :  { %10931 = vmatpush.bf16.msrb.mxu3 %v17019_v14 }
 0x330   :  { %10893 = vmatpush.bf16.msrb.mxu0 %v16994_v17  ;;  %v10667_v43 = vpop.f32.mrf.mxu2  ;;  %v17024_v17 = vld [vmem:[%s21020_s1 + $0x1a10] sm:$0xff] }
 0x331   :  { %10906 = vmatpush.bf16.msrb.mxu1 %v17002_v18  ;;  %v10680_v46 = vpop.f32.mrf.mxu3  ;;  %v17032_v18 = vld [vmem:[%s21020_s1 + $0x1a50] sm:$0xff] }
 0x332   :  { %10919 = vmatpush.bf16.msrb.mxu2 %v17010_v20  ;;  %v17040_v20 = vld [vmem:[%s21020_s1 + $0x1a90] sm:$0xff]  ;;  %v17075_v46 = vld [vmem:[%s21020_s1 + $0x1ba8] sm:$0xff] }
 0x333   :  { %10932 = vmatpush.bf16.msrb.mxu3 %v17018_v21  ;;  %v17048_v21 = vld [vmem:[%s21020_s1 + $0x1ad0] sm:$0xff] }
 0x334   :  { %10894 = vmatpush.bf16.msrb.mxu0 %v16993_v23  ;;  %v17031_v23 = vld [vmem:[%s21020_s1 + $0x1a48] sm:$0xff]  ;;  %v17084_v43 = vld [vmem:[%s21020_s1 + $0x1bf0] sm:$0xff] }
 0x335   :  { %10907 = vmatpush.bf16.msrb.mxu1 %v17001_v24  ;;  %v17039_v24 = vld [vmem:[%s21020_s1 + $0x1a88] sm:$0xff] }
 0x336   :  { %10920 = vmatpush.bf16.msrb.mxu2 %v17009_v25  ;;  %v17047_v25 = vld [vmem:[%s21020_s1 + $0x1ac8] sm:$0xff] }
 0x337   :  { %10933 = vmatpush.bf16.msrb.mxu3 %v17017_v26 }
 0x338   :  { %10895 = vmatpush.bf16.msrb.mxu0 %v16992_v32  ;;  %v17061_v32 = vld [vmem:[%s21020_s1 + $0x1b38] sm:$0xff] }
 0x339   :  { %10908 = vmatpush.bf16.msrb.mxu1 %v17000_v33  ;;  %v17069_v33 = vld [vmem:[%s21020_s1 + $0x1b78] sm:$0xff] }
 0x33a   :  { %10921 = vmatpush.bf16.msrb.mxu2 %v17008_v35  ;;  %v17085_v35 = vld [vmem:[%s21020_s1 + $0x1bf8] sm:$0xff] }
 0x33b   :  { %10934 = vmatpush.bf16.msrb.mxu3 %v17016_v36  ;;  %v2486_v36 = vld [vmem:[#allocation1] sm:$0xff] }
 0x33c   :  { %10896 = vmatpush.bf16.msrb.mxu0 %v16991_v37  ;;  %v2488_v37 = vld [vmem:[#allocation1 + $0x12] sm:$0xff] }
 0x33d   :  { %10909 = vmatpush.bf16.msrb.mxu1 %v16999_v38  ;;  %v2487_v38 = vld [vmem:[#allocation1 + $0x9] sm:$0xff] }
 0x33e   :  { %10922 = vmatpush.bf16.msrb.mxu2 %v17007_v39  ;;  %v2489_v39 = vld [vmem:[#allocation1 + $0x1b] sm:$0xff] }
 0x33f   :  { %10935 = vmatpush.bf16.msrb.mxu3 %v17015_v40  ;;  %v17060_v40 = vld [vmem:[%s21020_s1 + $0x1b30] sm:$0xff] }
 0x340   :  { %10897 = vmatpush.bf16.msrb.mxu0 %v16990_v48  ;;  %v10691_v0 = vpop.f32.mrf.mxu0 }
 0x341   :  { %10910 = vmatpush.bf16.msrb.mxu1 %v16998_v49  ;;  %v10692_v1 = vadd.f32 %v10691_v0, %v19951_v31  ;;  %v10704_v4 = vpop.f32.mrf.mxu1  ;;  %v17046_v31 = vld [vmem:[%s21020_s1 + $0x1ac0] sm:$0xff] }
 0x342   :  { %10923 = vmatpush.bf16.msrb.mxu2 %v17006_v50  ;;  %v17058_v50 = vld [vmem:[%s21020_s1 + $0x1b20] sm:$0xff] }
 0x343   :  { %10936 = vmatpush.bf16.msrb.mxu3 %v17014_v51  ;;  %10898 = vmatmul.bf16.vlgmr.msrb.gmra.mxu0 %v2480_v41  ;;  %v10705_v7 = vadd.f32 %v10704_v4, %v10692_v1  ;;  %v17068_v41 = vld [vmem:[%s21020_s1 + $0x1b70] sm:$0xff]  ;;  %v17066_v51 = vld [vmem:[%s21020_s1 + $0x1b60] sm:$0xff] }
 0x344   :  { %10942 = vmatpush.bf16.msra.mxu0 %v17029_v52  ;;  %10911 = vmatmul.bf16.vlgmr.msrb.gmra.mxu1 %v2481_v44  ;;  %v17059_v44 = vld [vmem:[%s21020_s1 + $0x1b28] sm:$0xff]  ;;  %v17056_v1 = vld [vmem:[%s21020_s1 + $0x1b10] sm:$0xff] }
 0x345   :  { %10955 = vmatpush.bf16.msra.mxu1 %v17037_v53  ;;  %10924 = vmatmul.bf16.vlgmr.msrb.gmra.mxu2 %v2482_v42  ;;  %v17076_v42 = vld [vmem:[%s21020_s1 + $0x1bb0] sm:$0xff]  ;;  %v17074_v53 = vld [vmem:[%s21020_s1 + $0x1ba0] sm:$0xff] }
 0x346   :  { %10968 = vmatpush.bf16.msra.mxu2 %v17045_v54  ;;  %10937 = vmatmul.bf16.vlgmr.msrb.gmra.mxu3 %v2483_v45  ;;  %v17067_v45 = vld [vmem:[%s21020_s1 + $0x1b68] sm:$0xff]  ;;  %v17082_v54 = vld [vmem:[%s21020_s1 + $0x1be0] sm:$0xff]  ;;  %v17072_v4 = vld [vmem:[%s21020_s1 + $0x1b90] sm:$0xff] }
 0x347   :  { %10981 = vmatpush.bf16.msra.mxu3 %v17053_v55 }
 0x348   :  { %10943 = vmatpush.bf16.msra.mxu0 %v17028_v56  ;;  %v10717_v12 = vpop.f32.mrf.mxu2  ;;  %v10693_v15 = vpop.f32.mrf.mxu0  ;;  %v17057_v56 = vld [vmem:[%s21020_s1 + $0x1b18] sm:$0xff] }
 0x349   :  { %10956 = vmatpush.bf16.msra.mxu1 %v17036_v57  ;;  %v10718_v13 = vadd.f32 %v10717_v12, %v10705_v7  ;;  %v10730_v14 = vpop.f32.mrf.mxu3  ;;  %v10706_v19 = vpop.f32.mrf.mxu1  ;;  %v17065_v57 = vld [vmem:[%s21020_s1 + $0x1b58] sm:$0xff]  ;;  %v17063_v7 = vld [vmem:[%s21020_s1 + $0x1b48] sm:$0xff] }
 0x34a   :  { %10969 = vmatpush.bf16.msra.mxu2 %v17044_v58  ;;  %v17073_v58 = vld [vmem:[%s21020_s1 + $0x1b98] sm:$0xff]  ;;  %v17070_v19 = vld [vmem:[%s21020_s1 + $0x1b80] sm:$0xff] }
 0x34b   :  { %10982 = vmatpush.bf16.msra.mxu3 %v17052_v59  ;;  %v10731_v16 = vadd.f32 %v10730_v14, %v10718_v13  ;;  %v17081_v59 = vld [vmem:[%s21020_s1 + $0x1bd8] sm:$0xff]  ;;  %v2491_v13 = vld [vmem:[#allocation1 + $0x2d] sm:$0xff] }
 0x34c   :  { %10944 = vmatpush.bf16.msra.mxu0 %v17027_v60  ;;  %v2493_v14 = vld [vmem:[#allocation1 + $0x3f] sm:$0xff] }
 0x34d   :  { %10957 = vmatpush.bf16.msra.mxu1 %v17035_v61 }
 0x34e   :  { %10970 = vmatpush.bf16.msra.mxu2 %v17043_v62 }
 0x34f   :  { %10983 = vmatpush.bf16.msra.mxu3 %v17051_v63 }
 0x350   :  { %10945 = vmatpush.bf16.msra.mxu0 %v17026_v2  ;;  %v10719_v26 = vpop.f32.mrf.mxu2  ;;  %v17064_v2 = vld [vmem:[%s21020_s1 + $0x1b50] sm:$0xff] }
 0x351   :  { %10958 = vmatpush.bf16.msra.mxu1 %v17034_v3  ;;  %v10732_v27 = vpop.f32.mrf.mxu3  ;;  %v17100_v26 = vld [vmem:[%s21020_s1 + $0x1c70] sm:$0xff] }
 0x352   :  { %10971 = vmatpush.bf16.msra.mxu2 %v17042_v5  ;;  %v17080_v5 = vld [vmem:[%s21020_s1 + $0x1bd0] sm:$0xff] }
 0x353   :  { %10984 = vmatpush.bf16.msra.mxu3 %v17050_v6  ;;  %v17055_v6 = vld [vmem:[%s21020_s1 + $0x1b08] sm:$0xff]  ;;  %v17108_v27 = vld [vmem:[%s21020_s1 + $0x1cb0] sm:$0xff] }
 0x354   :  { %10946 = vmatpush.bf16.msra.mxu0 %v17025_v8  ;;  %v17071_v8 = vld [vmem:[%s21020_s1 + $0x1b88] sm:$0xff] }
 0x355   :  { %10959 = vmatpush.bf16.msra.mxu1 %v17033_v9  ;;  %v17079_v9 = vld [vmem:[%s21020_s1 + $0x1bc8] sm:$0xff] }
 0x356   :  { %10972 = vmatpush.bf16.msra.mxu2 %v17041_v10  ;;  %v2490_v10 = vld [vmem:[#allocation1 + $0x24] sm:$0xff] }
 0x357   :  { %10985 = vmatpush.bf16.msra.mxu3 %v17049_v11  ;;  %v2492_v11 = vld [vmem:[#allocation1 + $0x36] sm:$0xff] }
 0x358   :  { %10947 = vmatpush.bf16.msra.mxu0 %v17024_v17  ;;  %v17054_v17 = vld [vmem:[%s21020_s1 + $0x1b00] sm:$0xff] }
 0x359   :  { %10960 = vmatpush.bf16.msra.mxu1 %v17032_v18  ;;  %v17062_v18 = vld [vmem:[%s21020_s1 + $0x1b40] sm:$0xff] }
 0x35a   :  { %10973 = vmatpush.bf16.msra.mxu2 %v17040_v20  ;;  %v17078_v20 = vld [vmem:[%s21020_s1 + $0x1bc0] sm:$0xff] }
 0x35b   :  { %10986 = vmatpush.bf16.msra.mxu3 %v17048_v21  ;;  %v17093_v21 = vld [vmem:[%s21020_s1 + $0x1c38] sm:$0xff] }
 0x35c   :  { %10948 = vmatpush.bf16.msra.mxu0 %v17023_v22  ;;  %v17101_v22 = vld [vmem:[%s21020_s1 + $0x1c78] sm:$0xff] }
 0x35d   :  { %10961 = vmatpush.bf16.msra.mxu1 %v17031_v23  ;;  %v17109_v23 = vld [vmem:[%s21020_s1 + $0x1cb8] sm:$0xff] }
 0x35e   :  { %10974 = vmatpush.bf16.msra.mxu2 %v17039_v24  ;;  %v17117_v24 = vld [vmem:[%s21020_s1 + $0x1cf8] sm:$0xff] }
 0x35f   :  { %10987 = vmatpush.bf16.msra.mxu3 %v17047_v25  ;;  %v17092_v25 = vld [vmem:[%s21020_s1 + $0x1c30] sm:$0xff] }
 0x360   :  { %10949 = vmatpush.bf16.msra.mxu0 %v17022_v28  ;;  %v10743_v48 = vpop.f32.mrf.mxu0  ;;  %v17116_v28 = vld [vmem:[%s21020_s1 + $0x1cf0] sm:$0xff] }
 0x361   :  { %10962 = vmatpush.bf16.msra.mxu1 %v17030_v29  ;;  %v10744_v49 = vadd.f32 %v10743_v48, %v10731_v16  ;;  %v10756_v52 = vpop.f32.mrf.mxu1  ;;  %v42_v16 = vld [vmem:[%s21019_s0 + $0x70] sm:$0xff]  ;;  %v17091_v29 = vld [vmem:[%s21020_s1 + $0x1c28] sm:$0xff] }
 0x362   :  { %10975 = vmatpush.bf16.msra.mxu2 %v17038_v30  ;;  %2495 = vst [vmem:[#allocation1] ss:$9 sm:$0xff] %v42_v16  ;;  %v17099_v30 = vld [vmem:[%s21020_s1 + $0x1c68] sm:$0xff] }
 0x363   :  { %10988 = vmatpush.bf16.msra.mxu3 %v17046_v31  ;;  %10950 = vmatmul.bf16.vlgmr.msra.gmra.mxu0 %v2486_v36  ;;  %v10757_v55 = vadd.f32 %v10756_v52, %v10744_v49  ;;  %v17107_v31 = vld [vmem:[%s21020_s1 + $0x1ca8] sm:$0xff]  ;;  %v17098_v36 = vld [vmem:[%s21020_s1 + $0x1c60] sm:$0xff] }
 0x364   :  { %10994 = vmatpush.bf16.msrb.mxu0 %v17061_v32  ;;  %10963 = vmatmul.bf16.vlgmr.msra.gmra.mxu1 %v2487_v38  ;;  %v17115_v32 = vld [vmem:[%s21020_s1 + $0x1ce8] sm:$0xff]  ;;  %v17106_v38 = vld [vmem:[%s21020_s1 + $0x1ca0] sm:$0xff] }
 0x365   :  { %11007 = vmatpush.bf16.msrb.mxu1 %v17069_v33  ;;  %10976 = vmatmul.bf16.vlgmr.msra.gmra.mxu2 %v2488_v37  ;;  %v17147_v16 = vld [vmem:[%s21020_s1 + $0x1de8] sm:$0xff] }
 0x366   :  { %11020 = vmatpush.bf16.msrb.mxu2 %v17077_v34  ;;  %10989 = vmatmul.bf16.vlgmr.msra.gmra.mxu3 %v2489_v39  ;;  %v17114_v39 = vld [vmem:[%s21020_s1 + $0x1ce0] sm:$0xff] }
 0x367   :  { %11033 = vmatpush.bf16.msrb.mxu3 %v17085_v35  ;;  %v17090_v35 = vld [vmem:[%s21020_s1 + $0x1c20] sm:$0xff] }
 0x368   :  { %10995 = vmatpush.bf16.msrb.mxu0 %v17060_v40  ;;  %v10769_v60 = vpop.f32.mrf.mxu2  ;;  %v10745_v63 = vpop.f32.mrf.mxu0 }
 0x369   :  { %11008 = vmatpush.bf16.msrb.mxu1 %v17068_v41  ;;  %v10770_v61 = vadd.f32 %v10769_v60, %v10757_v55  ;;  %v10782_v62 = vpop.f32.mrf.mxu3  ;;  %v10758_v3 = vpop.f32.mrf.mxu1  ;;  %v17089_v41 = vld [vmem:[%s21020_s1 + $0x1c18] sm:$0xff]  ;;  %v17087_v55 = vld [vmem:[%s21020_s1 + $0x1c08] sm:$0xff]  ;;  %v17102_v63 = vld [vmem:[%s21020_s1 + $0x1c80] sm:$0xff] }
 0x36a   :  { %11021 = vmatpush.bf16.msrb.mxu2 %v17076_v42  ;;  %v17097_v42 = vld [vmem:[%s21020_s1 + $0x1c58] sm:$0xff] }
 0x36b   :  { %11034 = vmatpush.bf16.msrb.mxu3 %v17084_v43  ;;  %v20149_v0 = vadd.f32 %v10782_v62, %v10770_v61  ;;  %v17105_v43 = vld [vmem:[%s21020_s1 + $0x1c98] sm:$0xff]  ;;  %v17086_v61 = vld [vmem:[%s21020_s1 + $0x1c00] sm:$0xff] }
 0x36c   :  { %10996 = vmatpush.bf16.msrb.mxu0 %v17059_v44  ;;  %v17113_v44 = vld [vmem:[%s21020_s1 + $0x1cd8] sm:$0xff]  ;;  %v17094_v62 = vld [vmem:[%s21020_s1 + $0x1c40] sm:$0xff] }
 0x36d   :  { %11009 = vmatpush.bf16.msrb.mxu1 %v17067_v45  ;;  %v17141_v3 = vld [vmem:[%s21020_s1 + $0x1db8] sm:$0xff] }
 0x36e   :  { %11022 = vmatpush.bf16.msrb.mxu2 %v17075_v46 }
 0x36f   :  { %11035 = vmatpush.bf16.msrb.mxu3 %v17083_v47 }
 0x370   :  { %10997 = vmatpush.bf16.msrb.mxu0 %v17058_v50  ;;  %v10771_v12 = vpop.f32.mrf.mxu2  ;;  %v17088_v50 = vld [vmem:[%s21020_s1 + $0x1c10] sm:$0xff] }
 0x371   :  { %11010 = vmatpush.bf16.msrb.mxu1 %v17066_v51  ;;  %v10784_v15 = vpop.f32.mrf.mxu3  ;;  %v17096_v51 = vld [vmem:[%s21020_s1 + $0x1c50] sm:$0xff] }
 0x372   :  { %11023 = vmatpush.bf16.msrb.mxu2 %v17074_v53  ;;  %v17104_v53 = vld [vmem:[%s21020_s1 + $0x1c90] sm:$0xff]  ;;  %v17139_v15 = vld [vmem:[%s21020_s1 + $0x1da8] sm:$0xff] }
 0x373   :  { %11036 = vmatpush.bf16.msrb.mxu3 %v17082_v54  ;;  %v17112_v54 = vld [vmem:[%s21020_s1 + $0x1cd0] sm:$0xff] }
 0x374   :  { %10998 = vmatpush.bf16.msrb.mxu0 %v17057_v56  ;;  %v17095_v56 = vld [vmem:[%s21020_s1 + $0x1c48] sm:$0xff]  ;;  %v17148_v12 = vld [vmem:[%s21020_s1 + $0x1df0] sm:$0xff] }
 0x375   :  { %11011 = vmatpush.bf16.msrb.mxu1 %v17065_v57  ;;  %v17103_v57 = vld [vmem:[%s21020_s1 + $0x1c88] sm:$0xff] }
 0x376   :  { %11024 = vmatpush.bf16.msrb.mxu2 %v17073_v58  ;;  %v17111_v58 = vld [vmem:[%s21020_s1 + $0x1cc8] sm:$0xff] }
 0x377   :  { %11037 = vmatpush.bf16.msrb.mxu3 %v17081_v59 }
 0x378   :  { %10999 = vmatpush.bf16.msrb.mxu0 %v17056_v1  ;;  %v17125_v1 = vld [vmem:[%s21020_s1 + $0x1d38] sm:$0xff] }
 0x379   :  { %11012 = vmatpush.bf16.msrb.mxu1 %v17064_v2  ;;  %v17133_v2 = vld [vmem:[%s21020_s1 + $0x1d78] sm:$0xff] }
 0x37a   :  { %11025 = vmatpush.bf16.msrb.mxu2 %v17072_v4  ;;  %v17149_v4 = vld [vmem:[%s21020_s1 + $0x1df8] sm:$0xff] }
 0x37b   :  { %11038 = vmatpush.bf16.msrb.mxu3 %v17080_v5  ;;  %v2496_v5 = vld [vmem:[#allocation1] sm:$0xff] }
 0x37c   :  { %11000 = vmatpush.bf16.msrb.mxu0 %v17055_v6  ;;  %v2498_v6 = vld [vmem:[#allocation1 + $0x12] sm:$0xff] }
 0x37d   :  { %11013 = vmatpush.bf16.msrb.mxu1 %v17063_v7  ;;  %v2497_v7 = vld [vmem:[#allocation1 + $0x9] sm:$0xff] }
 0x37e   :  { %11026 = vmatpush.bf16.msrb.mxu2 %v17071_v8  ;;  %v2499_v8 = vld [vmem:[#allocation1 + $0x1b] sm:$0xff] }
 0x37f   :  { %11039 = vmatpush.bf16.msrb.mxu3 %v17079_v9  ;;  %v17124_v9 = vld [vmem:[%s21020_s1 + $0x1d30] sm:$0xff] }
 0x380   :  { %11001 = vmatpush.bf16.msrb.mxu0 %v17054_v17  ;;  %v10795_v33 = vpop.f32.mrf.mxu0 }
 0x381   :  { %11014 = vmatpush.bf16.msrb.mxu1 %v17062_v18  ;;  %v10796_v34 = vadd.f32 %v10795_v33, %v20149_v0  ;;  %v10808_v37 = vpop.f32.mrf.mxu1  ;;  %v17110_v0 = vld [vmem:[%s21020_s1 + $0x1cc0] sm:$0xff] }
 0x382   :  { %11027 = vmatpush.bf16.msrb.mxu2 %v17070_v19  ;;  %v17122_v19 = vld [vmem:[%s21020_s1 + $0x1d20] sm:$0xff] }
 0x383   :  { %11040 = vmatpush.bf16.msrb.mxu3 %v17078_v20  ;;  %11002 = vmatmul.bf16.vlgmr.msrb.gmra.mxu0 %v2490_v10  ;;  %v10809_v40 = vadd.f32 %v10808_v37, %v10796_v34  ;;  %v17132_v10 = vld [vmem:[%s21020_s1 + $0x1d70] sm:$0xff]  ;;  %v17130_v20 = vld [vmem:[%s21020_s1 + $0x1d60] sm:$0xff] }
 0x384   :  { %11046 = vmatpush.bf16.msra.mxu0 %v17093_v21  ;;  %11015 = vmatmul.bf16.vlgmr.msrb.gmra.mxu1 %v2491_v13  ;;  %v17123_v13 = vld [vmem:[%s21020_s1 + $0x1d28] sm:$0xff]  ;;  %v17120_v34 = vld [vmem:[%s21020_s1 + $0x1d10] sm:$0xff] }
 0x385   :  { %11059 = vmatpush.bf16.msra.mxu1 %v17101_v22  ;;  %11028 = vmatmul.bf16.vlgmr.msrb.gmra.mxu2 %v2492_v11  ;;  %v17140_v11 = vld [vmem:[%s21020_s1 + $0x1db0] sm:$0xff]  ;;  %v17138_v22 = vld [vmem:[%s21020_s1 + $0x1da0] sm:$0xff] }
 0x386   :  { %11072 = vmatpush.bf16.msra.mxu2 %v17109_v23  ;;  %11041 = vmatmul.bf16.vlgmr.msrb.gmra.mxu3 %v2493_v14  ;;  %v17131_v14 = vld [vmem:[%s21020_s1 + $0x1d68] sm:$0xff]  ;;  %v17146_v23 = vld [vmem:[%s21020_s1 + $0x1de0] sm:$0xff]  ;;  %v17136_v37 = vld [vmem:[%s21020_s1 + $0x1d90] sm:$0xff] }
 0x387   :  { %11085 = vmatpush.bf16.msra.mxu3 %v17117_v24 }
 0x388   :  { %11047 = vmatpush.bf16.msra.mxu0 %v17092_v25  ;;  %v10821_v45 = vpop.f32.mrf.mxu2  ;;  %v10797_v48 = vpop.f32.mrf.mxu0  ;;  %v17121_v25 = vld [vmem:[%s21020_s1 + $0x1d18] sm:$0xff] }
 0x389   :  { %11060 = vmatpush.bf16.msra.mxu1 %v17100_v26  ;;  %v10822_v46 = vadd.f32 %v10821_v45, %v10809_v40  ;;  %v10834_v47 = vpop.f32.mrf.mxu3  ;;  %v10810_v52 = vpop.f32.mrf.mxu1  ;;  %v17129_v26 = vld [vmem:[%s21020_s1 + $0x1d58] sm:$0xff]  ;;  %v17127_v40 = vld [vmem:[%s21020_s1 + $0x1d48] sm:$0xff] }
 0x38a   :  { %11073 = vmatpush.bf16.msra.mxu2 %v17108_v27  ;;  %v17137_v27 = vld [vmem:[%s21020_s1 + $0x1d98] sm:$0xff]  ;;  %v17134_v52 = vld [vmem:[%s21020_s1 + $0x1d80] sm:$0xff] }
 0x38b   :  { %11086 = vmatpush.bf16.msra.mxu3 %v17116_v28  ;;  %v10835_v49 = vadd.f32 %v10834_v47, %v10822_v46  ;;  %v17145_v28 = vld [vmem:[%s21020_s1 + $0x1dd8] sm:$0xff]  ;;  %v2501_v46 = vld [vmem:[#allocation1 + $0x2d] sm:$0xff] }
 0x38c   :  { %11048 = vmatpush.bf16.msra.mxu0 %v17091_v29  ;;  %v2503_v47 = vld [vmem:[#allocation1 + $0x3f] sm:$0xff] }
 0x38d   :  { %11061 = vmatpush.bf16.msra.mxu1 %v17099_v30 }
 0x38e   :  { %11074 = vmatpush.bf16.msra.mxu2 %v17107_v31 }
 0x38f   :  { %11087 = vmatpush.bf16.msra.mxu3 %v17115_v32 }
 0x390   :  { %11049 = vmatpush.bf16.msra.mxu0 %v17090_v35  ;;  %v10823_v59 = vpop.f32.mrf.mxu2  ;;  %v17128_v35 = vld [vmem:[%s21020_s1 + $0x1d50] sm:$0xff] }
 0x391   :  { %11062 = vmatpush.bf16.msra.mxu1 %v17098_v36  ;;  %v10836_v60 = vpop.f32.mrf.mxu3  ;;  %v17164_v59 = vld [vmem:[%s21020_s1 + $0x1e70] sm:$0xff] }
 0x392   :  { %11075 = vmatpush.bf16.msra.mxu2 %v17106_v38  ;;  %v17144_v38 = vld [vmem:[%s21020_s1 + $0x1dd0] sm:$0xff] }
 0x393   :  { %11088 = vmatpush.bf16.msra.mxu3 %v17114_v39  ;;  %v17119_v39 = vld [vmem:[%s21020_s1 + $0x1d08] sm:$0xff]  ;;  %v17172_v60 = vld [vmem:[%s21020_s1 + $0x1eb0] sm:$0xff] }
 0x394   :  { %11050 = vmatpush.bf16.msra.mxu0 %v17089_v41  ;;  %v17135_v41 = vld [vmem:[%s21020_s1 + $0x1d88] sm:$0xff] }
 0x395   :  { %11063 = vmatpush.bf16.msra.mxu1 %v17097_v42  ;;  %v17143_v42 = vld [vmem:[%s21020_s1 + $0x1dc8] sm:$0xff] }
 0x396   :  { %11076 = vmatpush.bf16.msra.mxu2 %v17105_v43  ;;  %v2500_v43 = vld [vmem:[#allocation1 + $0x24] sm:$0xff] }
 0x397   :  { %11089 = vmatpush.bf16.msra.mxu3 %v17113_v44  ;;  %v2502_v44 = vld [vmem:[#allocation1 + $0x36] sm:$0xff] }
 0x398   :  { %11051 = vmatpush.bf16.msra.mxu0 %v17088_v50  ;;  %v17118_v50 = vld [vmem:[%s21020_s1 + $0x1d00] sm:$0xff] }
 0x399   :  { %11064 = vmatpush.bf16.msra.mxu1 %v17096_v51  ;;  %v17126_v51 = vld [vmem:[%s21020_s1 + $0x1d40] sm:$0xff] }
 0x39a   :  { %11077 = vmatpush.bf16.msra.mxu2 %v17104_v53  ;;  %v17142_v53 = vld [vmem:[%s21020_s1 + $0x1dc0] sm:$0xff] }
 0x39b   :  { %11090 = vmatpush.bf16.msra.mxu3 %v17112_v54  ;;  %v17157_v54 = vld [vmem:[%s21020_s1 + $0x1e38] sm:$0xff] }
 0x39c   :  { %11052 = vmatpush.bf16.msra.mxu0 %v17087_v55  ;;  %v17165_v55 = vld [vmem:[%s21020_s1 + $0x1e78] sm:$0xff] }
 0x39d   :  { %11065 = vmatpush.bf16.msra.mxu1 %v17095_v56  ;;  %v17173_v56 = vld [vmem:[%s21020_s1 + $0x1eb8] sm:$0xff] }
 0x39e   :  { %11078 = vmatpush.bf16.msra.mxu2 %v17103_v57  ;;  %v17181_v57 = vld [vmem:[%s21020_s1 + $0x1ef8] sm:$0xff] }
 0x39f   :  { %11091 = vmatpush.bf16.msra.mxu3 %v17111_v58  ;;  %v17156_v58 = vld [vmem:[%s21020_s1 + $0x1e30] sm:$0xff] }
 0x3a0   :  { %11053 = vmatpush.bf16.msra.mxu0 %v17086_v61  ;;  %v10847_v17 = vpop.f32.mrf.mxu0  ;;  %v17180_v61 = vld [vmem:[%s21020_s1 + $0x1ef0] sm:$0xff] }
 0x3a1   :  { %11066 = vmatpush.bf16.msra.mxu1 %v17094_v62  ;;  %v10848_v18 = vadd.f32 %v10847_v17, %v10835_v49  ;;  %v10860_v21 = vpop.f32.mrf.mxu1  ;;  %v43_v49 = vld [vmem:[%s21019_s0 + $0x78] sm:$0xff]  ;;  %v17155_v62 = vld [vmem:[%s21020_s1 + $0x1e28] sm:$0xff] }
 0x3a2   :  { %11079 = vmatpush.bf16.msra.mxu2 %v17102_v63  ;;  %2505 = vst [vmem:[#allocation1] ss:$9 sm:$0xff] %v43_v49  ;;  %v17163_v63 = vld [vmem:[%s21020_s1 + $0x1e68] sm:$0xff] }
 0x3a3   :  { %11092 = vmatpush.bf16.msra.mxu3 %v17110_v0  ;;  %11054 = vmatmul.bf16.vlgmr.msra.gmra.mxu0 %v2496_v5  ;;  %v10861_v24 = vadd.f32 %v10860_v21, %v10848_v18  ;;  %v17171_v0 = vld [vmem:[%s21020_s1 + $0x1ea8] sm:$0xff]  ;;  %v17162_v5 = vld [vmem:[%s21020_s1 + $0x1e60] sm:$0xff] }
 0x3a4   :  { %11098 = vmatpush.bf16.msrb.mxu0 %v17125_v1  ;;  %11067 = vmatmul.bf16.vlgmr.msra.gmra.mxu1 %v2497_v7  ;;  %v17179_v1 = vld [vmem:[%s21020_s1 + $0x1ee8] sm:$0xff]  ;;  %v17170_v7 = vld [vmem:[%s21020_s1 + $0x1ea0] sm:$0xff] }
 0x3a5   :  { %11111 = vmatpush.bf16.msrb.mxu1 %v17133_v2  ;;  %11080 = vmatmul.bf16.vlgmr.msra.gmra.mxu2 %v2498_v6  ;;  %v17211_v49 = vld [vmem:[%s21020_s1 + $0x1fe8] sm:$0xff] }
 0x3a6   :  { %11124 = vmatpush.bf16.msrb.mxu2 %v17141_v3  ;;  %11093 = vmatmul.bf16.vlgmr.msra.gmra.mxu3 %v2499_v8  ;;  %v17178_v8 = vld [vmem:[%s21020_s1 + $0x1ee0] sm:$0xff] }
 0x3a7   :  { %11137 = vmatpush.bf16.msrb.mxu3 %v17149_v4  ;;  %v17154_v4 = vld [vmem:[%s21020_s1 + $0x1e20] sm:$0xff] }
 0x3a8   :  { %11099 = vmatpush.bf16.msrb.mxu0 %v17124_v9  ;;  %v10873_v29 = vpop.f32.mrf.mxu2  ;;  %v10849_v32 = vpop.f32.mrf.mxu0 }
 0x3a9   :  { %11112 = vmatpush.bf16.msrb.mxu1 %v17132_v10  ;;  %v10874_v30 = vadd.f32 %v10873_v29, %v10861_v24  ;;  %v10886_v31 = vpop.f32.mrf.mxu3  ;;  %v10862_v36 = vpop.f32.mrf.mxu1  ;;  %v17153_v10 = vld [vmem:[%s21020_s1 + $0x1e18] sm:$0xff]  ;;  %v17151_v24 = vld [vmem:[%s21020_s1 + $0x1e08] sm:$0xff]  ;;  %v17166_v32 = vld [vmem:[%s21020_s1 + $0x1e80] sm:$0xff] }
 0x3aa   :  { %11125 = vmatpush.bf16.msrb.mxu2 %v17140_v11  ;;  %v17161_v11 = vld [vmem:[%s21020_s1 + $0x1e58] sm:$0xff] }
 0x3ab   :  { %11138 = vmatpush.bf16.msrb.mxu3 %v17148_v12  ;;  %v20347_v33 = vadd.f32 %v10886_v31, %v10874_v30  ;;  %v17169_v12 = vld [vmem:[%s21020_s1 + $0x1e98] sm:$0xff]  ;;  %v17150_v30 = vld [vmem:[%s21020_s1 + $0x1e00] sm:$0xff] }
 0x3ac   :  { %11100 = vmatpush.bf16.msrb.mxu0 %v17123_v13  ;;  %v17177_v13 = vld [vmem:[%s21020_s1 + $0x1ed8] sm:$0xff]  ;;  %v17158_v31 = vld [vmem:[%s21020_s1 + $0x1e40] sm:$0xff] }
 0x3ad   :  { %11113 = vmatpush.bf16.msrb.mxu1 %v17131_v14  ;;  %v17205_v36 = vld [vmem:[%s21020_s1 + $0x1fb8] sm:$0xff] }
 0x3ae   :  { %11126 = vmatpush.bf16.msrb.mxu2 %v17139_v15 }
 0x3af   :  { %11139 = vmatpush.bf16.msrb.mxu3 %v17147_v16 }
 0x3b0   :  { %11101 = vmatpush.bf16.msrb.mxu0 %v17122_v19  ;;  %v10875_v45 = vpop.f32.mrf.mxu2  ;;  %v17152_v19 = vld [vmem:[%s21020_s1 + $0x1e10] sm:$0xff] }
 0x3b1   :  { %11114 = vmatpush.bf16.msrb.mxu1 %v17130_v20  ;;  %v10888_v48 = vpop.f32.mrf.mxu3  ;;  %v17160_v20 = vld [vmem:[%s21020_s1 + $0x1e50] sm:$0xff] }
 0x3b2   :  { %11127 = vmatpush.bf16.msrb.mxu2 %v17138_v22  ;;  %v17168_v22 = vld [vmem:[%s21020_s1 + $0x1e90] sm:$0xff]  ;;  %v17203_v48 = vld [vmem:[%s21020_s1 + $0x1fa8] sm:$0xff] }
 0x3b3   :  { %11140 = vmatpush.bf16.msrb.mxu3 %v17146_v23  ;;  %v17176_v23 = vld [vmem:[%s21020_s1 + $0x1ed0] sm:$0xff] }
 0x3b4   :  { %11102 = vmatpush.bf16.msrb.mxu0 %v17121_v25  ;;  %v17159_v25 = vld [vmem:[%s21020_s1 + $0x1e48] sm:$0xff]  ;;  %v17212_v45 = vld [vmem:[%s21020_s1 + $0x1ff0] sm:$0xff] }
 0x3b5   :  { %11115 = vmatpush.bf16.msrb.mxu1 %v17129_v26  ;;  %v17167_v26 = vld [vmem:[%s21020_s1 + $0x1e88] sm:$0xff] }
 0x3b6   :  { %11128 = vmatpush.bf16.msrb.mxu2 %v17137_v27  ;;  %v17175_v27 = vld [vmem:[%s21020_s1 + $0x1ec8] sm:$0xff] }
 0x3b7   :  { %11141 = vmatpush.bf16.msrb.mxu3 %v17145_v28 }
 0x3b8   :  { %11103 = vmatpush.bf16.msrb.mxu0 %v17120_v34  ;;  %v17189_v34 = vld [vmem:[%s21020_s1 + $0x1f38] sm:$0xff] }
 0x3b9   :  { %11116 = vmatpush.bf16.msrb.mxu1 %v17128_v35  ;;  %v17197_v35 = vld [vmem:[%s21020_s1 + $0x1f78] sm:$0xff] }
 0x3ba   :  { %11129 = vmatpush.bf16.msrb.mxu2 %v17136_v37  ;;  %v17213_v37 = vld [vmem:[%s21020_s1 + $0x1ff8] sm:$0xff] }
 0x3bb   :  { %11142 = vmatpush.bf16.msrb.mxu3 %v17144_v38  ;;  %v2506_v38 = vld [vmem:[#allocation1] sm:$0xff] }
 0x3bc   :  { %11104 = vmatpush.bf16.msrb.mxu0 %v17119_v39  ;;  %v2508_v39 = vld [vmem:[#allocation1 + $0x12] sm:$0xff] }
 0x3bd   :  { %11117 = vmatpush.bf16.msrb.mxu1 %v17127_v40  ;;  %v2507_v40 = vld [vmem:[#allocation1 + $0x9] sm:$0xff] }
 0x3be   :  { %11130 = vmatpush.bf16.msrb.mxu2 %v17135_v41  ;;  %v2509_v41 = vld [vmem:[#allocation1 + $0x1b] sm:$0xff] }
 0x3bf   :  { %11143 = vmatpush.bf16.msrb.mxu3 %v17143_v42  ;;  %v17188_v42 = vld [vmem:[%s21020_s1 + $0x1f30] sm:$0xff] }
 0x3c0   :  { %11105 = vmatpush.bf16.msrb.mxu0 %v17118_v50  ;;  %v10899_v2 = vpop.f32.mrf.mxu0 }
 0x3c1   :  { %11118 = vmatpush.bf16.msrb.mxu1 %v17126_v51  ;;  %v10900_v3 = vadd.f32 %v10899_v2, %v20347_v33  ;;  %v10912_v6 = vpop.f32.mrf.mxu1  ;;  %v17174_v33 = vld [vmem:[%s21020_s1 + $0x1ec0] sm:$0xff] }
 0x3c2   :  { %11131 = vmatpush.bf16.msrb.mxu2 %v17134_v52  ;;  %v17186_v52 = vld [vmem:[%s21020_s1 + $0x1f20] sm:$0xff] }
 0x3c3   :  { %11144 = vmatpush.bf16.msrb.mxu3 %v17142_v53  ;;  %11106 = vmatmul.bf16.vlgmr.msrb.gmra.mxu0 %v2500_v43  ;;  %v10913_v9 = vadd.f32 %v10912_v6, %v10900_v3  ;;  %v17196_v43 = vld [vmem:[%s21020_s1 + $0x1f70] sm:$0xff]  ;;  %v17194_v53 = vld [vmem:[%s21020_s1 + $0x1f60] sm:$0xff] }
 0x3c4   :  { %11150 = vmatpush.bf16.msra.mxu0 %v17157_v54  ;;  %11119 = vmatmul.bf16.vlgmr.msrb.gmra.mxu1 %v2501_v46  ;;  %v17187_v46 = vld [vmem:[%s21020_s1 + $0x1f28] sm:$0xff]  ;;  %v17184_v3 = vld [vmem:[%s21020_s1 + $0x1f10] sm:$0xff] }
 0x3c5   :  { %11163 = vmatpush.bf16.msra.mxu1 %v17165_v55  ;;  %11132 = vmatmul.bf16.vlgmr.msrb.gmra.mxu2 %v2502_v44  ;;  %v17204_v44 = vld [vmem:[%s21020_s1 + $0x1fb0] sm:$0xff]  ;;  %v17202_v55 = vld [vmem:[%s21020_s1 + $0x1fa0] sm:$0xff] }
 0x3c6   :  { %11176 = vmatpush.bf16.msra.mxu2 %v17173_v56  ;;  %11145 = vmatmul.bf16.vlgmr.msrb.gmra.mxu3 %v2503_v47  ;;  %v17195_v47 = vld [vmem:[%s21020_s1 + $0x1f68] sm:$0xff]  ;;  %v17210_v56 = vld [vmem:[%s21020_s1 + $0x1fe0] sm:$0xff]  ;;  %v17200_v6 = vld [vmem:[%s21020_s1 + $0x1f90] sm:$0xff] }
 0x3c7   :  { %11189 = vmatpush.bf16.msra.mxu3 %v17181_v57 }
 0x3c8   :  { %11151 = vmatpush.bf16.msra.mxu0 %v17156_v58  ;;  %v10925_v14 = vpop.f32.mrf.mxu2  ;;  %v10901_v17 = vpop.f32.mrf.mxu0  ;;  %v17185_v58 = vld [vmem:[%s21020_s1 + $0x1f18] sm:$0xff] }
 0x3c9   :  { %11164 = vmatpush.bf16.msra.mxu1 %v17164_v59  ;;  %v10926_v15 = vadd.f32 %v10925_v14, %v10913_v9  ;;  %v10938_v16 = vpop.f32.mrf.mxu3  ;;  %v10914_v21 = vpop.f32.mrf.mxu1  ;;  %v17193_v59 = vld [vmem:[%s21020_s1 + $0x1f58] sm:$0xff]  ;;  %v17191_v9 = vld [vmem:[%s21020_s1 + $0x1f48] sm:$0xff] }
 0x3ca   :  { %11177 = vmatpush.bf16.msra.mxu2 %v17172_v60  ;;  %v17201_v60 = vld [vmem:[%s21020_s1 + $0x1f98] sm:$0xff]  ;;  %v17198_v21 = vld [vmem:[%s21020_s1 + $0x1f80] sm:$0xff] }
 0x3cb   :  { %11190 = vmatpush.bf16.msra.mxu3 %v17180_v61  ;;  %v10939_v18 = vadd.f32 %v10938_v16, %v10926_v15  ;;  %v17209_v61 = vld [vmem:[%s21020_s1 + $0x1fd8] sm:$0xff]  ;;  %v2511_v15 = vld [vmem:[#allocation1 + $0x2d] sm:$0xff] }
 0x3cc   :  { %11152 = vmatpush.bf16.msra.mxu0 %v17155_v62  ;;  %v2513_v16 = vld [vmem:[#allocation1 + $0x3f] sm:$0xff] }
 0x3cd   :  { %11165 = vmatpush.bf16.msra.mxu1 %v17163_v63 }
 0x3ce   :  { %11178 = vmatpush.bf16.msra.mxu2 %v17171_v0 }
 0x3cf   :  { %11191 = vmatpush.bf16.msra.mxu3 %v17179_v1 }
 0x3d0   :  { %11153 = vmatpush.bf16.msra.mxu0 %v17154_v4  ;;  %v10927_v28 = vpop.f32.mrf.mxu2  ;;  %v17192_v4 = vld [vmem:[%s21020_s1 + $0x1f50] sm:$0xff] }
 0x3d1   :  { %11166 = vmatpush.bf16.msra.mxu1 %v17162_v5  ;;  %v10940_v29 = vpop.f32.mrf.mxu3  ;;  %v17228_v28 = vld [vmem:[%s21020_s1 + $0x2070] sm:$0xff] }
 0x3d2   :  { %11179 = vmatpush.bf16.msra.mxu2 %v17170_v7  ;;  %v17208_v7 = vld [vmem:[%s21020_s1 + $0x1fd0] sm:$0xff] }
 0x3d3   :  { %11192 = vmatpush.bf16.msra.mxu3 %v17178_v8  ;;  %v17183_v8 = vld [vmem:[%s21020_s1 + $0x1f08] sm:$0xff]  ;;  %v17236_v29 = vld [vmem:[%s21020_s1 + $0x20b0] sm:$0xff] }
 0x3d4   :  { %11154 = vmatpush.bf16.msra.mxu0 %v17153_v10  ;;  %v17199_v10 = vld [vmem:[%s21020_s1 + $0x1f88] sm:$0xff] }
 0x3d5   :  { %11167 = vmatpush.bf16.msra.mxu1 %v17161_v11  ;;  %v17207_v11 = vld [vmem:[%s21020_s1 + $0x1fc8] sm:$0xff] }
 0x3d6   :  { %11180 = vmatpush.bf16.msra.mxu2 %v17169_v12  ;;  %v2510_v12 = vld [vmem:[#allocation1 + $0x24] sm:$0xff] }
 0x3d7   :  { %11193 = vmatpush.bf16.msra.mxu3 %v17177_v13  ;;  %v2512_v13 = vld [vmem:[#allocation1 + $0x36] sm:$0xff] }
 0x3d8   :  { %11155 = vmatpush.bf16.msra.mxu0 %v17152_v19  ;;  %v17182_v19 = vld [vmem:[%s21020_s1 + $0x1f00] sm:$0xff] }
 0x3d9   :  { %11168 = vmatpush.bf16.msra.mxu1 %v17160_v20  ;;  %v17190_v20 = vld [vmem:[%s21020_s1 + $0x1f40] sm:$0xff] }
 0x3da   :  { %11181 = vmatpush.bf16.msra.mxu2 %v17168_v22  ;;  %v17206_v22 = vld [vmem:[%s21020_s1 + $0x1fc0] sm:$0xff] }
 0x3db   :  { %11194 = vmatpush.bf16.msra.mxu3 %v17176_v23  ;;  %v17221_v23 = vld [vmem:[%s21020_s1 + $0x2038] sm:$0xff] }
 0x3dc   :  { %11156 = vmatpush.bf16.msra.mxu0 %v17151_v24  ;;  %v17229_v24 = vld [vmem:[%s21020_s1 + $0x2078] sm:$0xff] }
 0x3dd   :  { %11169 = vmatpush.bf16.msra.mxu1 %v17159_v25  ;;  %v17237_v25 = vld [vmem:[%s21020_s1 + $0x20b8] sm:$0xff] }
 0x3de   :  { %11182 = vmatpush.bf16.msra.mxu2 %v17167_v26  ;;  %v17245_v26 = vld [vmem:[%s21020_s1 + $0x20f8] sm:$0xff] }
 0x3df   :  { %11195 = vmatpush.bf16.msra.mxu3 %v17175_v27  ;;  %v17220_v27 = vld [vmem:[%s21020_s1 + $0x2030] sm:$0xff] }
 0x3e0   :  { %11157 = vmatpush.bf16.msra.mxu0 %v17150_v30  ;;  %v10951_v50 = vpop.f32.mrf.mxu0  ;;  %v17244_v30 = vld [vmem:[%s21020_s1 + $0x20f0] sm:$0xff] }
 0x3e1   :  { %11170 = vmatpush.bf16.msra.mxu1 %v17158_v31  ;;  %v10952_v51 = vadd.f32 %v10951_v50, %v10939_v18  ;;  %v10964_v54 = vpop.f32.mrf.mxu1  ;;  %v44_v18 = vld [vmem:[%s21019_s0 + $0x80] sm:$0xff]  ;;  %v17219_v31 = vld [vmem:[%s21020_s1 + $0x2028] sm:$0xff] }
 0x3e2   :  { %11183 = vmatpush.bf16.msra.mxu2 %v17166_v32  ;;  %2515 = vst [vmem:[#allocation1] ss:$9 sm:$0xff] %v44_v18  ;;  %v17227_v32 = vld [vmem:[%s21020_s1 + $0x2068] sm:$0xff] }
 0x3e3   :  { %11196 = vmatpush.bf16.msra.mxu3 %v17174_v33  ;;  %11158 = vmatmul.bf16.vlgmr.msra.gmra.mxu0 %v2506_v38  ;;  %v10965_v57 = vadd.f32 %v10964_v54, %v10952_v51  ;;  %v17235_v33 = vld [vmem:[%s21020_s1 + $0x20a8] sm:$0xff]  ;;  %v17226_v38 = vld [vmem:[%s21020_s1 + $0x2060] sm:$0xff] }
 0x3e4   :  { %11202 = vmatpush.bf16.msrb.mxu0 %v17189_v34  ;;  %11171 = vmatmul.bf16.vlgmr.msra.gmra.mxu1 %v2507_v40  ;;  %v17243_v34 = vld [vmem:[%s21020_s1 + $0x20e8] sm:$0xff]  ;;  %v17234_v40 = vld [vmem:[%s21020_s1 + $0x20a0] sm:$0xff] }
 0x3e5   :  { %11215 = vmatpush.bf16.msrb.mxu1 %v17197_v35  ;;  %11184 = vmatmul.bf16.vlgmr.msra.gmra.mxu2 %v2508_v39  ;;  %v17275_v18 = vld [vmem:[%s21020_s1 + $0x21e8] sm:$0xff] }
 0x3e6   :  { %11228 = vmatpush.bf16.msrb.mxu2 %v17205_v36  ;;  %11197 = vmatmul.bf16.vlgmr.msra.gmra.mxu3 %v2509_v41  ;;  %v17242_v41 = vld [vmem:[%s21020_s1 + $0x20e0] sm:$0xff] }
 0x3e7   :  { %11241 = vmatpush.bf16.msrb.mxu3 %v17213_v37  ;;  %v17218_v37 = vld [vmem:[%s21020_s1 + $0x2020] sm:$0xff] }
 0x3e8   :  { %11203 = vmatpush.bf16.msrb.mxu0 %v17188_v42  ;;  %v10977_v62 = vpop.f32.mrf.mxu2  ;;  %v10953_v1 = vpop.f32.mrf.mxu0 }
 0x3e9   :  { %11216 = vmatpush.bf16.msrb.mxu1 %v17196_v43  ;;  %v10978_v63 = vadd.f32 %v10977_v62, %v10965_v57  ;;  %v10990_v0 = vpop.f32.mrf.mxu3  ;;  %v10966_v5 = vpop.f32.mrf.mxu1  ;;  %v17217_v43 = vld [vmem:[%s21020_s1 + $0x2018] sm:$0xff]  ;;  %v17215_v57 = vld [vmem:[%s21020_s1 + $0x2008] sm:$0xff]  ;;  %v17230_v1 = vld [vmem:[%s21020_s1 + $0x2080] sm:$0xff] }
 0x3ea   :  { %11229 = vmatpush.bf16.msrb.mxu2 %v17204_v44  ;;  %v17225_v44 = vld [vmem:[%s21020_s1 + $0x2058] sm:$0xff] }
 0x3eb   :  { %11242 = vmatpush.bf16.msrb.mxu3 %v17212_v45  ;;  %v20545_v2 = vadd.f32 %v10990_v0, %v10978_v63  ;;  %v17233_v45 = vld [vmem:[%s21020_s1 + $0x2098] sm:$0xff]  ;;  %v17214_v63 = vld [vmem:[%s21020_s1 + $0x2000] sm:$0xff] }
 0x3ec   :  { %11204 = vmatpush.bf16.msrb.mxu0 %v17187_v46  ;;  %v17241_v46 = vld [vmem:[%s21020_s1 + $0x20d8] sm:$0xff]  ;;  %v17222_v0 = vld [vmem:[%s21020_s1 + $0x2040] sm:$0xff] }
 0x3ed   :  { %11217 = vmatpush.bf16.msrb.mxu1 %v17195_v47  ;;  %v17269_v5 = vld [vmem:[%s21020_s1 + $0x21b8] sm:$0xff] }
 0x3ee   :  { %11230 = vmatpush.bf16.msrb.mxu2 %v17203_v48 }
 0x3ef   :  { %11243 = vmatpush.bf16.msrb.mxu3 %v17211_v49 }
 0x3f0   :  { %11205 = vmatpush.bf16.msrb.mxu0 %v17186_v52  ;;  %v10979_v14 = vpop.f32.mrf.mxu2  ;;  %v17216_v52 = vld [vmem:[%s21020_s1 + $0x2010] sm:$0xff] }
 0x3f1   :  { %11218 = vmatpush.bf16.msrb.mxu1 %v17194_v53  ;;  %v10992_v17 = vpop.f32.mrf.mxu3  ;;  %v17224_v53 = vld [vmem:[%s21020_s1 + $0x2050] sm:$0xff] }
 0x3f2   :  { %11231 = vmatpush.bf16.msrb.mxu2 %v17202_v55  ;;  %v17232_v55 = vld [vmem:[%s21020_s1 + $0x2090] sm:$0xff]  ;;  %v17267_v17 = vld [vmem:[%s21020_s1 + $0x21a8] sm:$0xff] }
 0x3f3   :  { %11244 = vmatpush.bf16.msrb.mxu3 %v17210_v56  ;;  %v17240_v56 = vld [vmem:[%s21020_s1 + $0x20d0] sm:$0xff] }
 0x3f4   :  { %11206 = vmatpush.bf16.msrb.mxu0 %v17185_v58  ;;  %v17223_v58 = vld [vmem:[%s21020_s1 + $0x2048] sm:$0xff]  ;;  %v17276_v14 = vld [vmem:[%s21020_s1 + $0x21f0] sm:$0xff] }
 0x3f5   :  { %11219 = vmatpush.bf16.msrb.mxu1 %v17193_v59  ;;  %v17231_v59 = vld [vmem:[%s21020_s1 + $0x2088] sm:$0xff] }
 0x3f6   :  { %11232 = vmatpush.bf16.msrb.mxu2 %v17201_v60  ;;  %v17239_v60 = vld [vmem:[%s21020_s1 + $0x20c8] sm:$0xff] }
 0x3f7   :  { %11245 = vmatpush.bf16.msrb.mxu3 %v17209_v61 }
 0x3f8   :  { %11207 = vmatpush.bf16.msrb.mxu0 %v17184_v3  ;;  %v17253_v3 = vld [vmem:[%s21020_s1 + $0x2138] sm:$0xff] }
 0x3f9   :  { %11220 = vmatpush.bf16.msrb.mxu1 %v17192_v4  ;;  %v17261_v4 = vld [vmem:[%s21020_s1 + $0x2178] sm:$0xff] }
 0x3fa   :  { %11233 = vmatpush.bf16.msrb.mxu2 %v17200_v6  ;;  %v17277_v6 = vld [vmem:[%s21020_s1 + $0x21f8] sm:$0xff] }
 0x3fb   :  { %11246 = vmatpush.bf16.msrb.mxu3 %v17208_v7  ;;  %v2516_v7 = vld [vmem:[#allocation1] sm:$0xff] }
 0x3fc   :  { %11208 = vmatpush.bf16.msrb.mxu0 %v17183_v8  ;;  %v2518_v8 = vld [vmem:[#allocation1 + $0x12] sm:$0xff] }
 0x3fd   :  { %11221 = vmatpush.bf16.msrb.mxu1 %v17191_v9  ;;  %v2517_v9 = vld [vmem:[#allocation1 + $0x9] sm:$0xff] }
 0x3fe   :  { %11234 = vmatpush.bf16.msrb.mxu2 %v17199_v10  ;;  %v2519_v10 = vld [vmem:[#allocation1 + $0x1b] sm:$0xff] }
 0x3ff   :  { %11247 = vmatpush.bf16.msrb.mxu3 %v17207_v11  ;;  %v17252_v11 = vld [vmem:[%s21020_s1 + $0x2130] sm:$0xff] }
 0x400   :  { %11209 = vmatpush.bf16.msrb.mxu0 %v17182_v19  ;;  %v11003_v35 = vpop.f32.mrf.mxu0 }
 0x401   :  { %11222 = vmatpush.bf16.msrb.mxu1 %v17190_v20  ;;  %v11004_v36 = vadd.f32 %v11003_v35, %v20545_v2  ;;  %v11016_v39 = vpop.f32.mrf.mxu1  ;;  %v17238_v2 = vld [vmem:[%s21020_s1 + $0x20c0] sm:$0xff] }
 0x402   :  { %11235 = vmatpush.bf16.msrb.mxu2 %v17198_v21  ;;  %v17250_v21 = vld [vmem:[%s21020_s1 + $0x2120] sm:$0xff] }
 0x403   :  { %11248 = vmatpush.bf16.msrb.mxu3 %v17206_v22  ;;  %11210 = vmatmul.bf16.vlgmr.msrb.gmra.mxu0 %v2510_v12  ;;  %v11017_v42 = vadd.f32 %v11016_v39, %v11004_v36  ;;  %v17260_v12 = vld [vmem:[%s21020_s1 + $0x2170] sm:$0xff]  ;;  %v17258_v22 = vld [vmem:[%s21020_s1 + $0x2160] sm:$0xff] }
 0x404   :  { %11254 = vmatpush.bf16.msra.mxu0 %v17221_v23  ;;  %11223 = vmatmul.bf16.vlgmr.msrb.gmra.mxu1 %v2511_v15  ;;  %v17251_v15 = vld [vmem:[%s21020_s1 + $0x2128] sm:$0xff]  ;;  %v17248_v36 = vld [vmem:[%s21020_s1 + $0x2110] sm:$0xff] }
 0x405   :  { %11267 = vmatpush.bf16.msra.mxu1 %v17229_v24  ;;  %11236 = vmatmul.bf16.vlgmr.msrb.gmra.mxu2 %v2512_v13  ;;  %v17268_v13 = vld [vmem:[%s21020_s1 + $0x21b0] sm:$0xff]  ;;  %v17266_v24 = vld [vmem:[%s21020_s1 + $0x21a0] sm:$0xff] }
 0x406   :  { %11280 = vmatpush.bf16.msra.mxu2 %v17237_v25  ;;  %11249 = vmatmul.bf16.vlgmr.msrb.gmra.mxu3 %v2513_v16  ;;  %v17259_v16 = vld [vmem:[%s21020_s1 + $0x2168] sm:$0xff]  ;;  %v17274_v25 = vld [vmem:[%s21020_s1 + $0x21e0] sm:$0xff]  ;;  %v17264_v39 = vld [vmem:[%s21020_s1 + $0x2190] sm:$0xff] }
 0x407   :  { %11293 = vmatpush.bf16.msra.mxu3 %v17245_v26 }
 0x408   :  { %11255 = vmatpush.bf16.msra.mxu0 %v17220_v27  ;;  %v11029_v47 = vpop.f32.mrf.mxu2  ;;  %v11005_v50 = vpop.f32.mrf.mxu0  ;;  %v17249_v27 = vld [vmem:[%s21020_s1 + $0x2118] sm:$0xff] }
 0x409   :  { %11268 = vmatpush.bf16.msra.mxu1 %v17228_v28  ;;  %v11030_v48 = vadd.f32 %v11029_v47, %v11017_v42  ;;  %v11042_v49 = vpop.f32.mrf.mxu3  ;;  %v11018_v54 = vpop.f32.mrf.mxu1  ;;  %v17257_v28 = vld [vmem:[%s21020_s1 + $0x2158] sm:$0xff]  ;;  %v17255_v42 = vld [vmem:[%s21020_s1 + $0x2148] sm:$0xff] }
 0x40a   :  { %11281 = vmatpush.bf16.msra.mxu2 %v17236_v29  ;;  %v17265_v29 = vld [vmem:[%s21020_s1 + $0x2198] sm:$0xff]  ;;  %v17262_v54 = vld [vmem:[%s21020_s1 + $0x2180] sm:$0xff] }
 0x40b   :  { %11294 = vmatpush.bf16.msra.mxu3 %v17244_v30  ;;  %v11043_v51 = vadd.f32 %v11042_v49, %v11030_v48  ;;  %v17273_v30 = vld [vmem:[%s21020_s1 + $0x21d8] sm:$0xff]  ;;  %v2521_v48 = vld [vmem:[#allocation1 + $0x2d] sm:$0xff] }
 0x40c   :  { %11256 = vmatpush.bf16.msra.mxu0 %v17219_v31  ;;  %v2523_v49 = vld [vmem:[#allocation1 + $0x3f] sm:$0xff] }
 0x40d   :  { %11269 = vmatpush.bf16.msra.mxu1 %v17227_v32 }
 0x40e   :  { %11282 = vmatpush.bf16.msra.mxu2 %v17235_v33 }
 0x40f   :  { %11295 = vmatpush.bf16.msra.mxu3 %v17243_v34 }
 0x410   :  { %11257 = vmatpush.bf16.msra.mxu0 %v17218_v37  ;;  %v11031_v61 = vpop.f32.mrf.mxu2  ;;  %v17256_v37 = vld [vmem:[%s21020_s1 + $0x2150] sm:$0xff] }
 0x411   :  { %11270 = vmatpush.bf16.msra.mxu1 %v17226_v38  ;;  %v11044_v62 = vpop.f32.mrf.mxu3  ;;  %v17292_v61 = vld [vmem:[%s21020_s1 + $0x2270] sm:$0xff] }
 0x412   :  { %11283 = vmatpush.bf16.msra.mxu2 %v17234_v40  ;;  %v17272_v40 = vld [vmem:[%s21020_s1 + $0x21d0] sm:$0xff] }
 0x413   :  { %11296 = vmatpush.bf16.msra.mxu3 %v17242_v41  ;;  %v17247_v41 = vld [vmem:[%s21020_s1 + $0x2108] sm:$0xff]  ;;  %v17300_v62 = vld [vmem:[%s21020_s1 + $0x22b0] sm:$0xff] }
 0x414   :  { %11258 = vmatpush.bf16.msra.mxu0 %v17217_v43  ;;  %v17263_v43 = vld [vmem:[%s21020_s1 + $0x2188] sm:$0xff] }
 0x415   :  { %11271 = vmatpush.bf16.msra.mxu1 %v17225_v44  ;;  %v17271_v44 = vld [vmem:[%s21020_s1 + $0x21c8] sm:$0xff] }
 0x416   :  { %11284 = vmatpush.bf16.msra.mxu2 %v17233_v45  ;;  %v2520_v45 = vld [vmem:[#allocation1 + $0x24] sm:$0xff] }
 0x417   :  { %11297 = vmatpush.bf16.msra.mxu3 %v17241_v46  ;;  %v2522_v46 = vld [vmem:[#allocation1 + $0x36] sm:$0xff] }
 0x418   :  { %11259 = vmatpush.bf16.msra.mxu0 %v17216_v52  ;;  %v17246_v52 = vld [vmem:[%s21020_s1 + $0x2100] sm:$0xff] }
 0x419   :  { %11272 = vmatpush.bf16.msra.mxu1 %v17224_v53  ;;  %v17254_v53 = vld [vmem:[%s21020_s1 + $0x2140] sm:$0xff] }
 0x41a   :  { %11285 = vmatpush.bf16.msra.mxu2 %v17232_v55  ;;  %v17270_v55 = vld [vmem:[%s21020_s1 + $0x21c0] sm:$0xff] }
 0x41b   :  { %11298 = vmatpush.bf16.msra.mxu3 %v17240_v56  ;;  %v17285_v56 = vld [vmem:[%s21020_s1 + $0x2238] sm:$0xff] }
 0x41c   :  { %11260 = vmatpush.bf16.msra.mxu0 %v17215_v57  ;;  %v17293_v57 = vld [vmem:[%s21020_s1 + $0x2278] sm:$0xff] }
 0x41d   :  { %11273 = vmatpush.bf16.msra.mxu1 %v17223_v58  ;;  %v17301_v58 = vld [vmem:[%s21020_s1 + $0x22b8] sm:$0xff] }
 0x41e   :  { %11286 = vmatpush.bf16.msra.mxu2 %v17231_v59  ;;  %v17309_v59 = vld [vmem:[%s21020_s1 + $0x22f8] sm:$0xff] }
 0x41f   :  { %11299 = vmatpush.bf16.msra.mxu3 %v17239_v60  ;;  %v17284_v60 = vld [vmem:[%s21020_s1 + $0x2230] sm:$0xff] }
 0x420   :  { %11261 = vmatpush.bf16.msra.mxu0 %v17214_v63  ;;  %v11055_v19 = vpop.f32.mrf.mxu0  ;;  %v17308_v63 = vld [vmem:[%s21020_s1 + $0x22f0] sm:$0xff] }
 0x421   :  { %11274 = vmatpush.bf16.msra.mxu1 %v17222_v0  ;;  %v11056_v20 = vadd.f32 %v11055_v19, %v11043_v51  ;;  %v11068_v23 = vpop.f32.mrf.mxu1  ;;  %v45_v51 = vld [vmem:[%s21019_s0 + $0x88] sm:$0xff] }
 0x422   :  { %11287 = vmatpush.bf16.msra.mxu2 %v17230_v1  ;;  %2525 = vst [vmem:[#allocation1] ss:$9 sm:$0xff] %v45_v51  ;;  %v17283_v0 = vld [vmem:[%s21020_s1 + $0x2228] sm:$0xff] }
 0x423   :  { %11300 = vmatpush.bf16.msra.mxu3 %v17238_v2  ;;  %11262 = vmatmul.bf16.vlgmr.msra.gmra.mxu0 %v2516_v7  ;;  %v11069_v26 = vadd.f32 %v11068_v23, %v11056_v20  ;;  %v17291_v1 = vld [vmem:[%s21020_s1 + $0x2268] sm:$0xff]  ;;  %v17290_v7 = vld [vmem:[%s21020_s1 + $0x2260] sm:$0xff] }
 0x424   :  { %11306 = vmatpush.bf16.msrb.mxu0 %v17253_v3  ;;  %11275 = vmatmul.bf16.vlgmr.msra.gmra.mxu1 %v2517_v9  ;;  %v17299_v2 = vld [vmem:[%s21020_s1 + $0x22a8] sm:$0xff]  ;;  %v17298_v9 = vld [vmem:[%s21020_s1 + $0x22a0] sm:$0xff] }
 0x425   :  { %11319 = vmatpush.bf16.msrb.mxu1 %v17261_v4  ;;  %11288 = vmatmul.bf16.vlgmr.msra.gmra.mxu2 %v2518_v8  ;;  %v17307_v3 = vld [vmem:[%s21020_s1 + $0x22e8] sm:$0xff] }
 0x426   :  { %11332 = vmatpush.bf16.msrb.mxu2 %v17269_v5  ;;  %11301 = vmatmul.bf16.vlgmr.msra.gmra.mxu3 %v2519_v10  ;;  %v17306_v10 = vld [vmem:[%s21020_s1 + $0x22e0] sm:$0xff]  ;;  %v17339_v51 = vld [vmem:[%s21020_s1 + $0x23e8] sm:$0xff] }
 0x427   :  { %11345 = vmatpush.bf16.msrb.mxu3 %v17277_v6  ;;  %v17282_v6 = vld [vmem:[%s21020_s1 + $0x2220] sm:$0xff] }
 0x428   :  { %11307 = vmatpush.bf16.msrb.mxu0 %v17252_v11  ;;  %v11081_v31 = vpop.f32.mrf.mxu2  ;;  %v11057_v34 = vpop.f32.mrf.mxu0 }
 0x429   :  { %11320 = vmatpush.bf16.msrb.mxu1 %v17260_v12  ;;  %v11082_v32 = vadd.f32 %v11081_v31, %v11069_v26  ;;  %v11094_v33 = vpop.f32.mrf.mxu3  ;;  %v11070_v38 = vpop.f32.mrf.mxu1  ;;  %v17281_v12 = vld [vmem:[%s21020_s1 + $0x2218] sm:$0xff]  ;;  %v17279_v26 = vld [vmem:[%s21020_s1 + $0x2208] sm:$0xff]  ;;  %v17294_v34 = vld [vmem:[%s21020_s1 + $0x2280] sm:$0xff] }
 0x42a   :  { %11333 = vmatpush.bf16.msrb.mxu2 %v17268_v13  ;;  %v17289_v13 = vld [vmem:[%s21020_s1 + $0x2258] sm:$0xff] }
 0x42b   :  { %11346 = vmatpush.bf16.msrb.mxu3 %v17276_v14  ;;  %v20743_v35 = vadd.f32 %v11094_v33, %v11082_v32  ;;  %v17297_v14 = vld [vmem:[%s21020_s1 + $0x2298] sm:$0xff]  ;;  %v17278_v32 = vld [vmem:[%s21020_s1 + $0x2200] sm:$0xff] }
 0x42c   :  { %11308 = vmatpush.bf16.msrb.mxu0 %v17251_v15  ;;  %v17305_v15 = vld [vmem:[%s21020_s1 + $0x22d8] sm:$0xff]  ;;  %v17286_v33 = vld [vmem:[%s21020_s1 + $0x2240] sm:$0xff] }
 0x42d   :  { %11321 = vmatpush.bf16.msrb.mxu1 %v17259_v16  ;;  %v17333_v38 = vld [vmem:[%s21020_s1 + $0x23b8] sm:$0xff] }
 0x42e   :  { %11334 = vmatpush.bf16.msrb.mxu2 %v17267_v17 }
 0x42f   :  { %11347 = vmatpush.bf16.msrb.mxu3 %v17275_v18 }
 0x430   :  { %11309 = vmatpush.bf16.msrb.mxu0 %v17250_v21  ;;  %v11083_v47 = vpop.f32.mrf.mxu2  ;;  %v17280_v21 = vld [vmem:[%s21020_s1 + $0x2210] sm:$0xff] }
 0x431   :  { %11322 = vmatpush.bf16.msrb.mxu1 %v17258_v22  ;;  %v11096_v50 = vpop.f32.mrf.mxu3  ;;  %v17288_v22 = vld [vmem:[%s21020_s1 + $0x2250] sm:$0xff] }
 0x432   :  { %11335 = vmatpush.bf16.msrb.mxu2 %v17266_v24  ;;  %v17296_v24 = vld [vmem:[%s21020_s1 + $0x2290] sm:$0xff]  ;;  %v17331_v50 = vld [vmem:[%s21020_s1 + $0x23a8] sm:$0xff] }
 0x433   :  { %11348 = vmatpush.bf16.msrb.mxu3 %v17274_v25  ;;  %v17304_v25 = vld [vmem:[%s21020_s1 + $0x22d0] sm:$0xff] }
 0x434   :  { %11310 = vmatpush.bf16.msrb.mxu0 %v17249_v27  ;;  %v17287_v27 = vld [vmem:[%s21020_s1 + $0x2248] sm:$0xff]  ;;  %v17340_v47 = vld [vmem:[%s21020_s1 + $0x23f0] sm:$0xff] }
 0x435   :  { %11323 = vmatpush.bf16.msrb.mxu1 %v17257_v28  ;;  %v17295_v28 = vld [vmem:[%s21020_s1 + $0x2288] sm:$0xff] }
 0x436   :  { %11336 = vmatpush.bf16.msrb.mxu2 %v17265_v29  ;;  %v17303_v29 = vld [vmem:[%s21020_s1 + $0x22c8] sm:$0xff] }
 0x437   :  { %11349 = vmatpush.bf16.msrb.mxu3 %v17273_v30 }
 0x438   :  { %11311 = vmatpush.bf16.msrb.mxu0 %v17248_v36  ;;  %v17317_v36 = vld [vmem:[%s21020_s1 + $0x2338] sm:$0xff] }
 0x439   :  { %11324 = vmatpush.bf16.msrb.mxu1 %v17256_v37  ;;  %v17325_v37 = vld [vmem:[%s21020_s1 + $0x2378] sm:$0xff] }
 0x43a   :  { %11337 = vmatpush.bf16.msrb.mxu2 %v17264_v39  ;;  %v17341_v39 = vld [vmem:[%s21020_s1 + $0x23f8] sm:$0xff] }
 0x43b   :  { %11350 = vmatpush.bf16.msrb.mxu3 %v17272_v40  ;;  %v2526_v40 = vld [vmem:[#allocation1] sm:$0xff] }
 0x43c   :  { %11312 = vmatpush.bf16.msrb.mxu0 %v17247_v41  ;;  %v2528_v41 = vld [vmem:[#allocation1 + $0x12] sm:$0xff] }
 0x43d   :  { %11325 = vmatpush.bf16.msrb.mxu1 %v17255_v42  ;;  %v2527_v42 = vld [vmem:[#allocation1 + $0x9] sm:$0xff] }
 0x43e   :  { %11338 = vmatpush.bf16.msrb.mxu2 %v17263_v43  ;;  %v2529_v43 = vld [vmem:[#allocation1 + $0x1b] sm:$0xff] }
 0x43f   :  { %11351 = vmatpush.bf16.msrb.mxu3 %v17271_v44  ;;  %v17316_v44 = vld [vmem:[%s21020_s1 + $0x2330] sm:$0xff] }
 0x440   :  { %11313 = vmatpush.bf16.msrb.mxu0 %v17246_v52  ;;  %v11107_v4 = vpop.f32.mrf.mxu0 }
 0x441   :  { %11326 = vmatpush.bf16.msrb.mxu1 %v17254_v53  ;;  %v11108_v5 = vadd.f32 %v11107_v4, %v20743_v35  ;;  %v11120_v8 = vpop.f32.mrf.mxu1  ;;  %v17302_v35 = vld [vmem:[%s21020_s1 + $0x22c0] sm:$0xff] }
 0x442   :  { %11339 = vmatpush.bf16.msrb.mxu2 %v17262_v54  ;;  %v17314_v54 = vld [vmem:[%s21020_s1 + $0x2320] sm:$0xff] }
 0x443   :  { %11352 = vmatpush.bf16.msrb.mxu3 %v17270_v55  ;;  %11314 = vmatmul.bf16.vlgmr.msrb.gmra.mxu0 %v2520_v45  ;;  %v11121_v11 = vadd.f32 %v11120_v8, %v11108_v5  ;;  %v17324_v45 = vld [vmem:[%s21020_s1 + $0x2370] sm:$0xff]  ;;  %v17322_v55 = vld [vmem:[%s21020_s1 + $0x2360] sm:$0xff] }
 0x444   :  { %11358 = vmatpush.bf16.msra.mxu0 %v17285_v56  ;;  %11327 = vmatmul.bf16.vlgmr.msrb.gmra.mxu1 %v2521_v48  ;;  %v17315_v48 = vld [vmem:[%s21020_s1 + $0x2328] sm:$0xff]  ;;  %v17312_v5 = vld [vmem:[%s21020_s1 + $0x2310] sm:$0xff] }
 0x445   :  { %11371 = vmatpush.bf16.msra.mxu1 %v17293_v57  ;;  %11340 = vmatmul.bf16.vlgmr.msrb.gmra.mxu2 %v2522_v46  ;;  %v17332_v46 = vld [vmem:[%s21020_s1 + $0x23b0] sm:$0xff]  ;;  %v17330_v57 = vld [vmem:[%s21020_s1 + $0x23a0] sm:$0xff] }
 0x446   :  { %11384 = vmatpush.bf16.msra.mxu2 %v17301_v58  ;;  %11353 = vmatmul.bf16.vlgmr.msrb.gmra.mxu3 %v2523_v49  ;;  %v17323_v49 = vld [vmem:[%s21020_s1 + $0x2368] sm:$0xff]  ;;  %v17338_v58 = vld [vmem:[%s21020_s1 + $0x23e0] sm:$0xff]  ;;  %v17328_v8 = vld [vmem:[%s21020_s1 + $0x2390] sm:$0xff] }
 0x447   :  { %11397 = vmatpush.bf16.msra.mxu3 %v17309_v59 }
 0x448   :  { %11359 = vmatpush.bf16.msra.mxu0 %v17284_v60  ;;  %v11133_v16 = vpop.f32.mrf.mxu2  ;;  %v11109_v19 = vpop.f32.mrf.mxu0  ;;  %v17313_v60 = vld [vmem:[%s21020_s1 + $0x2318] sm:$0xff] }
 0x449   :  { %11372 = vmatpush.bf16.msra.mxu1 %v17292_v61  ;;  %v11134_v17 = vadd.f32 %v11133_v16, %v11121_v11  ;;  %v11146_v18 = vpop.f32.mrf.mxu3  ;;  %v11122_v23 = vpop.f32.mrf.mxu1  ;;  %v17321_v61 = vld [vmem:[%s21020_s1 + $0x2358] sm:$0xff]  ;;  %v17319_v11 = vld [vmem:[%s21020_s1 + $0x2348] sm:$0xff]  ;;  %v17310_v16 = vld [vmem:[%s21020_s1 + $0x2300] sm:$0xff] }
 0x44a   :  { %11385 = vmatpush.bf16.msra.mxu2 %v17300_v62  ;;  %v17329_v62 = vld [vmem:[%s21020_s1 + $0x2398] sm:$0xff]  ;;  %v17334_v19 = vld [vmem:[%s21020_s1 + $0x23c0] sm:$0xff] }
 0x44b   :  { %11398 = vmatpush.bf16.msra.mxu3 %v17308_v63  ;;  %v11147_v20 = vadd.f32 %v11146_v18, %v11134_v17  ;;  %v17337_v63 = vld [vmem:[%s21020_s1 + $0x23d8] sm:$0xff]  ;;  %v17318_v17 = vld [vmem:[%s21020_s1 + $0x2340] sm:$0xff] }
 0x44c   :  { %11360 = vmatpush.bf16.msra.mxu0 %v17283_v0  ;;  %v17326_v18 = vld [vmem:[%s21020_s1 + $0x2380] sm:$0xff] }
 0x44d   :  { %11373 = vmatpush.bf16.msra.mxu1 %v17291_v1  ;;  %v2533_v23 = vld [vmem:[#allocation1 + $0x3f] sm:$0xff] }
 0x44e   :  { %11386 = vmatpush.bf16.msra.mxu2 %v17299_v2 }
 0x44f   :  { %11399 = vmatpush.bf16.msra.mxu3 %v17307_v3 }
 0x450   :  { %11361 = vmatpush.bf16.msra.mxu0 %v17282_v6  ;;  %v11135_v30 = vpop.f32.mrf.mxu2  ;;  %v17320_v6 = vld [vmem:[%s21020_s1 + $0x2350] sm:$0xff] }
 0x451   :  { %11374 = vmatpush.bf16.msra.mxu1 %v17290_v7  ;;  %v11148_v31 = vpop.f32.mrf.mxu3 }
 0x452   :  { %11387 = vmatpush.bf16.msra.mxu2 %v17298_v9  ;;  %v17336_v9 = vld [vmem:[%s21020_s1 + $0x23d0] sm:$0xff] }
 0x453   :  { %11400 = vmatpush.bf16.msra.mxu3 %v17306_v10  ;;  %v17311_v10 = vld [vmem:[%s21020_s1 + $0x2308] sm:$0xff] }
 0x454   :  { %11362 = vmatpush.bf16.msra.mxu0 %v17281_v12  ;;  %v17327_v12 = vld [vmem:[%s21020_s1 + $0x2388] sm:$0xff] }
 0x455   :  { %11375 = vmatpush.bf16.msra.mxu1 %v17289_v13  ;;  %v17335_v13 = vld [vmem:[%s21020_s1 + $0x23c8] sm:$0xff]  ;;  %s11565_s1 = sshll.u32 %s21025_s6, 4  ;;  %s11566_s1 = int_to_ptr.hbm [resolvable:$true] %s11565_s1 }
 0x456   :  { %11388 = vmatpush.bf16.msra.mxu2 %v17297_v14 }
 0x457   :  { %11401 = vmatpush.bf16.msra.mxu3 %v17305_v15 }
 0x458   :  { %11363 = vmatpush.bf16.msra.mxu0 %v17280_v21  ;;  %v2531_v21 = vld [vmem:[#allocation1 + $0x2d] sm:$0xff] }
 0x459   :  { %11376 = vmatpush.bf16.msra.mxu1 %v17288_v22  ;;  %v2532_v22 = vld [vmem:[#allocation1 + $0x36] sm:$0xff] }
 0x45a   :  { %11389 = vmatpush.bf16.msra.mxu2 %v17296_v24 }
 0x45b   :  { %11402 = vmatpush.bf16.msra.mxu3 %v17304_v25 }
 0x45c   :  { %11364 = vmatpush.bf16.msra.mxu0 %v17279_v26 }
 0x45d   :  { %11377 = vmatpush.bf16.msra.mxu1 %v17287_v27 }
 0x45e   :  { %11390 = vmatpush.bf16.msra.mxu2 %v17295_v28 }
 0x45f   :  { %11403 = vmatpush.bf16.msra.mxu3 %v17303_v29 }
 0x460   :  { %11365 = vmatpush.bf16.msra.mxu0 %v17278_v32  ;;  %v11159_v52 = vpop.f32.mrf.mxu0 }
 0x461   :  { %11378 = vmatpush.bf16.msra.mxu1 %v17286_v33  ;;  %v11160_v53 = vadd.f32 %v11159_v52, %v11147_v20  ;;  %v11172_v56 = vpop.f32.mrf.mxu1  ;;  %v2530_v20 = vld [vmem:[#allocation1 + $0x24] sm:$0xff] }
 0x462   :  { %11391 = vmatpush.bf16.msra.mxu2 %v17294_v34 }
 0x463   :  { %11404 = vmatpush.bf16.msra.mxu3 %v17302_v35  ;;  %11366 = vmatmul.bf16.vlgmr.msra.gmra.mxu0 %v2526_v40  ;;  %v11173_v59 = vadd.f32 %v11172_v56, %v11160_v53 }
 0x464   :  { %11410 = vmatpush.bf16.msrb.mxu0 %v17317_v36  ;;  %11379 = vmatmul.bf16.vlgmr.msra.gmra.mxu1 %v2527_v42 }
 0x465   :  { %11423 = vmatpush.bf16.msrb.mxu1 %v17325_v37  ;;  %11392 = vmatmul.bf16.vlgmr.msra.gmra.mxu2 %v2528_v41 }
 0x466   :  { %11436 = vmatpush.bf16.msrb.mxu2 %v17333_v38  ;;  %11405 = vmatmul.bf16.vlgmr.msra.gmra.mxu3 %v2529_v43 }
 0x467   :  { %11449 = vmatpush.bf16.msrb.mxu3 %v17341_v39 }
 0x468   :  { %11411 = vmatpush.bf16.msrb.mxu0 %v17316_v44  ;;  %v11185_v0 = vpop.f32.mrf.mxu2  ;;  %v11161_v3 = vpop.f32.mrf.mxu0 }
 0x469   :  { %11424 = vmatpush.bf16.msrb.mxu1 %v17324_v45  ;;  %v11186_v1 = vadd.f32 %v11185_v0, %v11173_v59  ;;  %v11198_v2 = vpop.f32.mrf.mxu3  ;;  %v11174_v7 = vpop.f32.mrf.mxu1  ;;  %v11504_v0 = vld [vmem:[%s21023_s4 + $0x50] sm:$0xf] }
 0x46a   :  { %11437 = vmatpush.bf16.msrb.mxu2 %v17332_v46 }
 0x46b   :  { %11450 = vmatpush.bf16.msrb.mxu3 %v17340_v47  ;;  %v11199_v4 = vadd.f32 %v11198_v2, %v11186_v1  ;;  %v11503_v1 = vld [vmem:[%s21023_s4 + $0x48] sm:$0xff] }
 0x46c   :  { %11412 = vmatpush.bf16.msrb.mxu0 %v17315_v48 }
 0x46d   :  { %11425 = vmatpush.bf16.msrb.mxu1 %v17323_v49 }
 0x46e   :  { %11438 = vmatpush.bf16.msrb.mxu2 %v17331_v50 }
 0x46f   :  { %11451 = vmatpush.bf16.msrb.mxu3 %v17339_v51 }
 0x470   :  { %11413 = vmatpush.bf16.msrb.mxu0 %v17314_v54  ;;  %v11187_v14 = vpop.f32.mrf.mxu2 }
 0x471   :  { %11426 = vmatpush.bf16.msrb.mxu1 %v17322_v55  ;;  %v11200_v15 = vpop.f32.mrf.mxu3 }
 0x472   :  { %11439 = vmatpush.bf16.msrb.mxu2 %v17330_v57  ;;  %v11496_v15 = vld [vmem:[%s21023_s4 + $0x10] sm:$0xff] }
 0x473   :  { %11452 = vmatpush.bf16.msrb.mxu3 %v17338_v58 }
 0x474   :  { %11414 = vmatpush.bf16.msrb.mxu0 %v17313_v60 }
 0x475   :  { %11427 = vmatpush.bf16.msrb.mxu1 %v17321_v61 }
 0x476   :  { %11440 = vmatpush.bf16.msrb.mxu2 %v17329_v62 }
 0x477   :  { %11453 = vmatpush.bf16.msrb.mxu3 %v17337_v63 }
 0x478   :  { %11415 = vmatpush.bf16.msrb.mxu0 %v17312_v5 }
 0x479   :  { %11428 = vmatpush.bf16.msrb.mxu1 %v17320_v6  ;;  %v11501_v6 = vld [vmem:[%s21023_s4 + $0x38] sm:$0xff] }
 0x47a   :  { %11441 = vmatpush.bf16.msrb.mxu2 %v17328_v8  ;;  %v11500_v8 = vld [vmem:[%s21023_s4 + $0x30] sm:$0xff] }
 0x47b   :  { %11454 = vmatpush.bf16.msrb.mxu3 %v17336_v9 }
 0x47c   :  { %11416 = vmatpush.bf16.msrb.mxu0 %v17311_v10  ;;  %v11499_v10 = vld [vmem:[%s21023_s4 + $0x28] sm:$0xff] }
 0x47d   :  { %11429 = vmatpush.bf16.msrb.mxu1 %v17319_v11  ;;  %v11498_v11 = vld [vmem:[%s21023_s4 + $0x20] sm:$0xff] }
 0x47e   :  { %11442 = vmatpush.bf16.msrb.mxu2 %v17327_v12 }
 0x47f   :  { %11455 = vmatpush.bf16.msrb.mxu3 %v17335_v13  ;;  %v11497_v13 = vld [vmem:[%s21023_s4 + $0x18] sm:$0xff] }
 0x480   :  { %11417 = vmatpush.bf16.msrb.mxu0 %v17310_v16  ;;  %v11211_v24 = vpop.f32.mrf.mxu0 }
 0x481   :  { %11430 = vmatpush.bf16.msrb.mxu1 %v17318_v17  ;;  %v11212_v25 = vadd.f32 %v11211_v24, %v11199_v4  ;;  %v11224_v26 = vpop.f32.mrf.mxu1  ;;  %v11502_v4 = vld [vmem:[%s21023_s4 + $0x40] sm:$0xff] }
 0x482   :  { %11443 = vmatpush.bf16.msrb.mxu2 %v17326_v18 }
 0x483   :  { %11456 = vmatpush.bf16.msrb.mxu3 %v17334_v19  ;;  %11418 = vmatmul.bf16.vlgmr.msrb.gmra.mxu0 %v2530_v20  ;;  %v11225_v27 = vadd.f32 %v11224_v26, %v11212_v25 }
 0x484   :  { %11431 = vmatmul.bf16.vlgmr.msrb.gmra.mxu1 %v2531_v21 }
 0x485   :  { %11444 = vmatmul.bf16.vlgmr.msrb.gmra.mxu2 %v2532_v22  ;;  %16188 = vmatpush.msk.msra.mxu1 %vm11513_vm0, %v11504_v0 }
 0x486   :  { %11457 = vmatmul.bf16.vlgmr.msrb.gmra.mxu3 %v2533_v23 }
 0x487   :  { %11523 = vmatpush.msra.mxu1 %v11503_v1 }
 0x488   :  { %v11237_v28 = vpop.f32.mrf.mxu2  ;;  %v11213_v31 = vpop.f32.mrf.mxu0 }
 0x489   :  { %v11238_v29 = vadd.f32 %v11237_v28, %v11225_v27  ;;  %v11250_v30 = vpop.f32.mrf.mxu3  ;;  %v11226_v33 = vpop.f32.mrf.mxu1  ;;  %11524 = vmatpush.msra.mxu1 %v11502_v4  ;;  %v11462_v27 = vld [vmem:[%s21022_s3] sm:$0x3]  ;;  %s17375_s3 = smov [#allocation3]  }
 0x48a   :  { %v11494_v31 = vld [vmem:[%s21023_s4] sm:$0xff]  ;;  %s11563_s24 = sshll.u32 %s17375_s3, 4  ;;  %s11564_s24 = int_to_ptr.vmem [resolvable:$true] %s11563_s24 }
 0x48b   :  { %v11251_v32 = vadd.f32 %v11250_v30, %v11238_v29  ;;  %11525 = vmatpush.msra.mxu1 %v11501_v6  ;;  %v11495_v30 = vld [vmem:[%s21023_s4 + $0x8] sm:$0xff] }
 0x48d   :  { %11526 = vmatpush.msra.mxu1 %v11500_v8 }
 0x48f   :  { %11527 = vmatpush.msra.mxu1 %v11499_v10 }
 0x490   :  { %v11239_v34 = vpop.f32.mrf.mxu2 }
 0x491   :  { %v11252_v35 = vpop.f32.mrf.mxu3  ;;  %11528 = vmatpush.msra.mxu1 %v11498_v11  ;;  %v17344_v34 = vld [vmem:[#allocation2] ss:$0 sm:$0xff] }
 0x493   :  { %11529 = vmatpush.msra.mxu1 %v11497_v13 }
 0x495   :  { %11530 = vmatpush.msra.mxu1 %v11496_v15 }
 0x497   :  { %11531 = vmatpush.msra.mxu1 %v11495_v30 }
 0x499   :  { %11532 = vmatpush.msra.mxu1 %v11494_v31 }
 0x4a0   :  { %v11263_v36 = vpop.f32.mrf.mxu0 }
 0x4a1   :  { %v11264_v37 = vadd.f32 %v11263_v36, %v11251_v32  ;;  %v11276_v38 = vpop.f32.mrf.mxu1 }
 0x4a3   :  { %v11277_v39 = vadd.f32 %v11276_v38, %v11264_v37 }
 0x4a8   :  { %v11289_v40 = vpop.f32.mrf.mxu2  ;;  %v11265_v43 = vpop.f32.mrf.mxu0 }
 0x4a9   :  { %v11290_v41 = vadd.f32 %v11289_v40, %v11277_v39  ;;  %v11302_v42 = vpop.f32.mrf.mxu3  ;;  %v11278_v45 = vpop.f32.mrf.mxu1 }
 0x4ab   :  { %v11303_v44 = vadd.f32 %v11302_v42, %v11290_v41 }
 0x4b0   :  { %v11291_v46 = vpop.f32.mrf.mxu2 }
 0x4b1   :  { %v11304_v47 = vpop.f32.mrf.mxu3 }
 0x4c0   :  { %v11315_v48 = vpop.f32.mrf.mxu0 }
 0x4c1   :  { %v11328_v49 = vpop.f32.mrf.mxu1  ;;  %v11316_v59 = vadd.f32 %v11315_v48, %v11303_v44 }
 0x4c3   :  { %v11329_v63 = vadd.f32 %v11328_v49, %v11316_v59 }
 0x4c8   :  { %v11341_v50 = vpop.f32.mrf.mxu2  ;;  %v11317_v52 = vpop.f32.mrf.mxu0 }
 0x4c9   :  { %v11354_v51 = vpop.f32.mrf.mxu3  ;;  %v11330_v53 = vpop.f32.mrf.mxu1  ;;  %v11342_v2 = vadd.f32 %v11341_v50, %v11329_v63 }
 0x4cb   :  { %v11355_v7 = vadd.f32 %v11354_v51, %v11342_v2 }
 0x4d0   :  { %v11343_v54 = vpop.f32.mrf.mxu2 }
 0x4d1   :  { %v11356_v55 = vpop.f32.mrf.mxu3 }
 0x4e0   :  { %v11367_v56 = vpop.f32.mrf.mxu0 }
 0x4e1   :  { %v11380_v57 = vpop.f32.mrf.mxu1  ;;  %v11368_v9 = vadd.f32 %v11367_v56, %v11355_v7 }
 0x4e3   :  { %v11381_v12 = vadd.f32 %v11380_v57, %v11368_v9 }
 0x4e8   :  { %v11393_v58 = vpop.f32.mrf.mxu2  ;;  %v11369_v61 = vpop.f32.mrf.mxu0 }
 0x4e9   :  { %v11406_v60 = vpop.f32.mrf.mxu3  ;;  %v11382_v62 = vpop.f32.mrf.mxu1  ;;  %v11394_v14 = vadd.f32 %v11393_v58, %v11381_v12 }
 0x4eb   :  { %v11407_v16 = vadd.f32 %v11406_v60, %v11394_v14 }
 0x4f0   :  { %v11395_v3 = vpop.f32.mrf.mxu2 }
 0x4f1   :  { %v11408_v5 = vpop.f32.mrf.mxu3 }
 0x500   :  { %v11419_v17 = vpop.f32.mrf.mxu0 }
 0x501   :  { %v11432_v18 = vpop.f32.mrf.mxu1  ;;  %v11420_v19 = vadd.f32 %v11419_v17, %v11407_v16 }
 0x503   :  { %v11433_v20 = vadd.f32 %v11432_v18, %v11420_v19 }
 0x508   :  { %v11445_v21 = vpop.f32.mrf.mxu2  ;;  %v11421_v24 = vpop.f32.mrf.mxu0 }
 0x509   :  { %v11458_v22 = vpop.f32.mrf.mxu3  ;;  %v11446_v23 = vadd.f32 %v11445_v21, %v11433_v20  ;;  %v11434_v25 = vpop.f32.mrf.mxu1 }
 0x50b   :  { %v11459_v26 = vadd.f32 %v11458_v22, %v11446_v23 }
 0x50d   :  { %16186 = vmatpush.msk.msra.mxu0 %vm11467_vm1, %v11459_v26 }
 0x50e   :  { %16187 = vmatmul.msk.f32.vlgmr.msra.gmra.mxu0 %vm11463_vm2, %v11462_v27 }
 0x510   :  { %v11447_v28 = vpop.f32.mrf.mxu2 }
 0x511   :  { %v11460_v29 = vpop.f32.mrf.mxu3 }
 0x58b   :  { %v11488_v32 = vpop.f32.mrf.mxu0 }
 0x58c   :  { %11492 = vst.msk [vmem:[#allocation3] sm:$0x3] %vm11491_vm3, %v11488_v32  ;;  %v11493_v33 = vmax.f32 %v11488_v32, 0.0 }
 0x58d   :  { %11568 = dma.vmem_to_hbm [thread:$0]  %s11564_s24, 32, %s11566_s1, [#allocation4]  }
 0x58e   :  { %16189 = vmatmul.msk.f32.vlgmr.msra.gmra.mxu1 %vm11509_vm4, %v11493_v33 }
 0x60b   :  { %v11534_v35 = vpop.f32.mrf.mxu1 }
 0x60c   :  { %v11535_v36 = vadd.f32 %v17344_v34, %v11534_v35 }
 0x60e   :  { %v11537_v37 = vsub.f32 0.0, %v11535_v36 }
 0x610   :  { %v11538_v38 = vmul.f32 1.442695, %v11537_v37 }
 0x612   :  { %17345 = vpow2.f32 %v11538_v38 }
 0x618   :  { %v17346_v39 = vpop.eup %17345 }
 0x619   :  { %v11540_v40 = vadd.f32 1.0, %v17346_v39 }
 0x61b   :  { %17347 = vrcp.f32 %v11540_v40  ;;  %v11552_v44 = vand.u32 2147483648, %v11540_v40  ;;  %v11550_v46 = vand.u32 2147483647, %v11540_v40  ;;  %vm11546_vm6 = vweird.f32 %v11540_v40 }
 0x61d   :  { %v11553_v48 = vor.u32 1.1754944e-38, %v11552_v44  ;;  %vm11551_vm9 = vcmp.eq.f32.partialorder %v11550_v46, 8.507059e+37 }
 0x621   :  { %v17348_v41 = vpop.eup %17347 }
 0x622   :  { %v11542_v42 = vmul.f32 %v17348_v41, %v11540_v40  ;;  %vm11547_vm5 = vweird.f32 %v17348_v41 }
 0x623   :  { %vm11548_vm7 = vmor %vm11546_vm6, %vm11547_vm5 }
 0x624   :  { %v11543_v43 = vsub.f32 1.0, %v11542_v42 }
 0x626   :  { %v11544_v45 = vmul.f32 %v17348_v41, %v11543_v43 }
 0x628   :  { %v11545_v47 = vadd.f32 %v17348_v41, %v11544_v45 }
 0x62a   :  { %v11549_v49 = vsel %vm11548_vm7, %v17348_v41, %v11545_v47 }
 0x62b   :  { %v11554_v50 = vsel %vm11551_vm9, %v11553_v48, %v11549_v49 }
 0x62c   :  { %11557 = vst.msk [vmem:[%s21026_s7] sm:$0x3] %vm11556_vm8, %v11554_v50 }
 0x62d   :  { %17373 = dma.done.wait [#allocation4], 32  }
 0x62e   :  { %17374 = vsyncadd [#allocation4], 4294967264 }
 0x62f   :  { %11577 = vsyncpa [#allocation4], 1 }

</bundles_post_ra>
